<compile_context>
chip_gen: v7x
topology: tpu7x:2x2x1
jax: 0.10.0
libtpu: 0.0.40
codegen_flags: <defaults>
</compile_context>

<pallas_src>
import functools

import jax
import jax.numpy as jnp
from jax.experimental import pallas as pl
from jax.experimental.pallas import tpu as pltpu


# ---------------------------------------------------------------------------
# Pallas kernels
# ---------------------------------------------------------------------------

def _mm_bias_kernel(x_ref, w_ref, b_ref, o_ref, *, relu):
    """Single-block matmul + bias (+ optional ReLU). Everything fits in VMEM."""
    y = jnp.dot(x_ref[...], w_ref[...], preferred_element_type=jnp.float32)
    y = y + b_ref[...]                       # (1, N) broadcasts over rows
    if relu:
        y = jnp.maximum(y, 0.0)
    o_ref[...] = y.astype(o_ref.dtype)


def _conv2_pool_kernel(p_ref, w_ref, b_ref, o_ref):
    """Fused conv2(im2col matmul) + bias + ReLU + 2x2 max-pool.

    p_ref: (4, tm, 576) -- the 4 (h,w)-parity groups of im2col rows for the
           same tm pooled output positions.
    o_ref: (tm, 128)    -- pooled activations, rows in (n, ph, pw) order.
    """
    w = w_ref[...]
    b = b_ref[...]

    def branch(q):
        y = jnp.dot(p_ref[q], w, preferred_element_type=jnp.float32) + b
        return jnp.maximum(y, 0.0)

    o_ref[...] = jnp.maximum(jnp.maximum(branch(0), branch(1)),
                             jnp.maximum(branch(2), branch(3))).astype(o_ref.dtype)


def _fc1_kernel(x_ref, w_ref, b_ref, o_ref, acc_ref):
    """K-tiled, N-split matmul with VMEM accumulator (25088 -> 1024 layer).

    grid = (n_blocks, k_blocks); axis 0 is "parallel" (megacore on v7x),
    axis 1 is the reduction. bf16 inputs, f32 accumulation.
    """
    k = pl.program_id(1)

    @pl.when(k == 0)
    def _():
        acc_ref[...] = jnp.zeros_like(acc_ref)

    acc_ref[...] += jnp.dot(x_ref[...], w_ref[...],
                            preferred_element_type=jnp.float32)

    @pl.when(k == pl.num_programs(1) - 1)
    def _():
        o_ref[...] = jnp.maximum(acc_ref[...] + b_ref[...], 0.0).astype(o_ref.dtype)


# ---------------------------------------------------------------------------
# Pallas wrappers
# ---------------------------------------------------------------------------

def matmul_bias_act(x, w, b, *, relu):
    """y = x @ w + b (+ ReLU), single VMEM block (no grid). Used for conv1/fc2."""
    # NOTE: conv1's N=64 output is below the 128-lane width (masked stores);
    # it is a ~400 KB write so the absolute cost is negligible here.
    M = x.shape[0]
    N = w.shape[1]
    kernel = functools.partial(_mm_bias_kernel, relu=relu)
    return pl.pallas_call(
        kernel,
        out_shape=jax.ShapeDtypeStruct((M, N), jnp.float32),
    )(x, w, b)


def _pick_m_tile(m, cap=128):
    """Largest multiple-of-8 divisor of m that is <= cap (else the full dim)."""
    best = None
    for t in range(8, min(m, cap) + 1, 8):
        if m % t == 0:
            best = t
    return best if best is not None else m


def conv2_relu_pool(p2, w, b):
    """Fused conv2 + ReLU + 2x2 max-pool. p2: (4, N*196, 576) -> (N*196, 128)."""
    Q, M, K = p2.shape
    N_out = w.shape[1]
    tm = _pick_m_tile(M)
    grid = (M // tm,)
    return pl.pallas_call(
        _conv2_pool_kernel,
        out_shape=jax.ShapeDtypeStruct((M, N_out), jnp.float32),
        grid_spec=pltpu.PrefetchScalarGridSpec(
            num_scalar_prefetch=0,
            grid=grid,
            in_specs=[
                pl.BlockSpec((Q, tm, K), lambda i: (0, i, 0)),
                pl.BlockSpec((K, N_out), lambda i: (0, 0)),
                pl.BlockSpec((1, N_out), lambda i: (0, 0)),
            ],
            out_specs=pl.BlockSpec((tm, N_out), lambda i: (i, 0)),
        ),
        compiler_params=pltpu.CompilerParams(
            dimension_semantics=("parallel",)),
    )(p2, w, b)


def fc1_tiled(x, w, b, *, tk=3584, tn=512):
    """y = relu(x @ w + b) with K tiled (reduction) and N split ("parallel")."""
    M, K = x.shape
    Kw, N = w.shape
    assert K == Kw and K % tk == 0 and N % tn == 0
    nk, nn = K // tk, N // tn
    return pl.pallas_call(
        _fc1_kernel,
        out_shape=jax.ShapeDtypeStruct((M, N), jnp.float32),
        grid_spec=pltpu.PrefetchScalarGridSpec(
            num_scalar_prefetch=0,
            grid=(nn, nk),
            in_specs=[
                pl.BlockSpec((M, tk), lambda n, k: (0, k)),
                pl.BlockSpec((tk, tn), lambda n, k: (k, n)),
                pl.BlockSpec((1, tn), lambda n, k: (0, n)),
            ],
            out_specs=pl.BlockSpec((M, tn), lambda n, k: (0, n)),
            scratch_shapes=[pltpu.VMEM((M, tn), jnp.float32)],
        ),
        compiler_params=pltpu.CompilerParams(
            dimension_semantics=("parallel", "arbitrary")),
    )(x, w, b)


# ---------------------------------------------------------------------------
# Glue (im2col / parameter prep stays in plain JAX; weight prep is one-time,
# OUTSIDE the jitted forward)
# ---------------------------------------------------------------------------

def _patches_3x3(x_nhwc, pad=1):
    """3x3 patches; flattened feature order is (c, kh, kw) to match
    torch conv weight.reshape(out_c, in_c*kh*kw)."""
    N, H, W, C = x_nhwc.shape
    xp = jnp.pad(x_nhwc, ((0, 0), (pad, pad), (pad, pad), (0, 0)))
    cols = [xp[:, kh:kh + H, kw:kw + W, :] for kh in range(3) for kw in range(3)]
    return jnp.stack(cols, axis=-1)                   # (N, H, W, C, 9)


def im2col(x_nhwc):
    N, H, W, C = x_nhwc.shape
    return _patches_3x3(x_nhwc).reshape(N * H * W, C * 9)


def im2col_pool_parity(x_nhwc):
    """im2col for a stride-1 3x3 conv whose output feeds a 2x2/2 max-pool.
    Rows are split by output (h, w) parity so the pool becomes a max over the
    leading axis; within each parity, rows are (n, ph, pw) row-major."""
    N, H, W, C = x_nhwc.shape
    feat = _patches_3x3(x_nhwc).reshape(N, H, W, C * 9)
    groups = [feat[:, dh::2, dw::2, :].reshape(N * (H // 2) * (W // 2), C * 9)
              for dh in (0, 1) for dw in (0, 1)]
    return jnp.stack(groups, axis=0)                  # (4, N*H/2*W/2, C*9)


def init_params(key):
    """Parameters in PyTorch layout (as they would come from a checkpoint)."""
    ks = jax.random.split(key, 8)
    s = 0.02
    return {
        "conv1_w": s * jax.random.normal(ks[0], (64, 1, 3, 3), jnp.float32),
        "conv1_b": s * jax.random.normal(ks[1], (64,), jnp.float32),
        "conv2_w": s * jax.random.normal(ks[2], (128, 64, 3, 3), jnp.float32),
        "conv2_b": s * jax.random.normal(ks[3], (128,), jnp.float32),
        "fc1_w":  s * jax.random.normal(ks[4], (1024, 14 * 14 * 128), jnp.float32),
        "fc1_b":  s * jax.random.normal(ks[5], (1024,), jnp.float32),
        "fc2_w":  s * jax.random.normal(ks[6], (10, 1024), jnp.float32),
        "fc2_b":  s * jax.random.normal(ks[7], (10,), jnp.float32),
    }


def prepare_params(params):
    """One-time (NOT jitted) conversion of torch-layout params into kernel-ready
    arrays: conv weights as (K, out_c) matmul operands, fc weights pre-transposed,
    fc1 rows permuted from NCHW-flatten order (c, h, w) to NHWC-flatten order
    (h, w, c), and fc1 stored in bf16 to halve the dominant HBM stream."""
    fc1_wt = params["fc1_w"].T                                    # (25088, 1024), rows (c, h, w)
    fc1_wt = (fc1_wt.reshape(128, 14, 14, 1024)
              .transpose(1, 2, 0, 3)                              # rows -> (h, w, c)
              .reshape(14 * 14 * 128, 1024)
              .astype(jnp.bfloat16))
    return {
        "conv1_w": params["conv1_w"].reshape(64, 9).T,            # (9, 64)
        "conv1_b": params["conv1_b"].reshape(1, 64),
        "conv2_w": params["conv2_w"].reshape(128, 576).T,         # (576, 128)
        "conv2_b": params["conv2_b"].reshape(1, 128),
        "fc1_w": fc1_wt,                                          # (25088, 1024) bf16
        "fc1_b": params["fc1_b"].reshape(1, 1024),
        "fc2_w": params["fc2_w"].T,                               # (1024, 10)
        "fc2_b": params["fc2_b"].reshape(1, 10),
    }


@jax.jit
def net_forward(x_nchw, p):
    N = x_nchw.shape[0]
    x = jnp.transpose(x_nchw, (0, 2, 3, 1))           # NCHW -> NHWC, (N,28,28,1)

    # conv1 + ReLU (im2col matmul on MXU)
    # TODO(synk): conv1 (K=9) could be folded into the conv2 kernel preamble so
    # y1 / the im2col matrix never round-trip through HBM; kept separate here.
    p1 = im2col(x)                                    # (N*784, 9)
    y1 = matmul_bias_act(p1, p["conv1_w"], p["conv1_b"], relu=True)
    y1 = y1.reshape(N, 28, 28, 64)

    # conv2 + ReLU + MaxPool2d(2,2) fused into one Pallas kernel.
    p2 = im2col_pool_parity(y1)                       # (4, N*196, 576)
    pooled = conv2_relu_pool(p2, p["conv2_w"], p["conv2_b"])   # (N*196, 128)

    # NHWC flatten is a pure reshape; fc1 weight rows were pre-permuted to match
    # torch's NCHW x.view(-1, 14*14*128) semantics. bf16 activations feed the MXU.
    flat = pooled.reshape(N, 14 * 14 * 128).astype(jnp.bfloat16)

    # dense1 (25088 -> 1024) + ReLU; bf16 weight stream, f32 accumulation.
    h = fc1_tiled(flat, p["fc1_w"], p["fc1_b"], tk=3584, tn=512)

    # TODO(synk): nn.Dropout(p=0.5) is identity in eval mode; training-mode
    # stochastic masking is not reproduced here.

    # dense2 (1024 -> 10), no activation
    out = matmul_bias_act(h, p["fc2_w"], p["fc2_b"], relu=False)
    return out


if __name__ == "__main__":
    key = jax.random.PRNGKey(0)
    k_x, k_p = jax.random.split(key)
    # MNIST-shaped input (batch=2, 1 channel, 28x28) — 28x28 is forced by the
    # 14*14*128 flatten in the module.
    x = jax.random.normal(k_x, (2, 1, 28, 28), dtype=jnp.float32)
    params = init_params(k_p)
    kparams = prepare_params(params)   # one-time weight prep, outside the jit

    logits = net_forward(x, kparams)
    jax.block_until_ready(logits)
    assert logits.shape == (2, 10) and logits.dtype == jnp.float32
    print("KERNEL_OK")
</pallas_src>

<mosaic_0001>
module attributes {stable_mosaic.version = 11 : i64} {
  func.func @_mm_bias_kernel(%arg0: memref<1568x9xf32, #tpu.memory_space<vmem>>, %arg1: memref<9x64xf32, #tpu.memory_space<vmem>>, %arg2: memref<1x64xf32, #tpu.memory_space<vmem>>, %arg3: memref<1568x64xf32, #tpu.memory_space<vmem>>) attributes {dimension_semantics = [], scalar_prefetch = 0 : i64, scratch_operands = 0 : i64, tpu.core_type = #tpu.core_type<tc>} {
    %c0 = arith.constant 0 : index
    %c0_0 = arith.constant 0 : index
    %0 = vector.load %arg0[%c0, %c0_0] : memref<1568x9xf32, #tpu.memory_space<vmem>>, vector<1568x9xf32>
    %c0_1 = arith.constant 0 : index
    %c0_2 = arith.constant 0 : index
    %1 = vector.load %arg1[%c0_1, %c0_2] : memref<9x64xf32, #tpu.memory_space<vmem>>, vector<9x64xf32>
    %cst = arith.constant dense<0.000000e+00> : vector<1568x64xf32>
    %2 = tpu.matmul %0, %1, %cst {dimension_numbers = #tpu.dot_dimension_numbers<[1], [0], [0], [1], [0, 0, 1, 1], [], []>} : vector<1568x9xf32>, vector<9x64xf32>, vector<1568x64xf32> -> vector<1568x64xf32>
    %c0_3 = arith.constant 0 : index
    %c0_4 = arith.constant 0 : index
    %3 = vector.load %arg2[%c0_3, %c0_4] : memref<1x64xf32, #tpu.memory_space<vmem>>, vector<1x64xf32>
    %4 = vector.broadcast %3 : vector<1x64xf32> to vector<1568x64xf32>
    %5 = arith.addf %2, %4 : vector<1568x64xf32>
    %cst_5 = arith.constant 0.000000e+00 : f32
    %6 = vector.broadcast %cst_5 : f32 to vector<1568x64xf32>
    %7 = arith.maximumf %5, %6 : vector<1568x64xf32>
    %c0_6 = arith.constant 0 : index
    %c0_7 = arith.constant 0 : index
    %8 = vector.load %arg3[%c0_6, %c0_7] : memref<1568x64xf32, #tpu.memory_space<vmem>>, vector<1568x64xf32>
    tpu.vector_store %arg3[%c0_6, %c0_7], %7 {strides = array<i32>} : memref<1568x64xf32, #tpu.memory_space<vmem>>, vector<1568x64xf32>,
    return
  }
}

module attributes {stable_mosaic.version = 11 : i64} {
  func.func @_fc1_kernel(%arg0: i32, %arg1: i32, %arg2: memref<2x3584xbf16, #tpu.memory_space<vmem>>, %arg3: memref<3584x512xbf16, #tpu.memory_space<vmem>>, %arg4: memref<1x512xf32, #tpu.memory_space<vmem>>, %arg5: memref<2x512xf32, #tpu.memory_space<vmem>>, %arg6: memref<2x512xf32, #tpu.memory_space<vmem>>) attributes {dimension_semantics = [#tpu.dimension_semantics<parallel>, #tpu.dimension_semantics<arbitrary>], iteration_bounds = array<i64: 2, 7>, scalar_prefetch = 0 : i64, scratch_operands = 1 : i64, tpu.core_type = #tpu.core_type<tc>, window_params = [{transform_indices = @transform_0, window_bounds = array<i64: 2, 3584>}, {transform_indices = @transform_1, window_bounds = array<i64: 3584, 512>}, {transform_indices = @transform_2, window_bounds = array<i64: 1, 512>}, {transform_indices = @transform_3, window_bounds = array<i64: 2, 512>}]} {
    %c0_i32 = arith.constant 0 : i32
    %0 = arith.cmpi eq, %arg1, %c0_i32 : i32
    %1 = arith.extui %0 : i1 to i32
    %c0_i32_0 = arith.constant 0 : i32
    %2 = arith.cmpi ne, %1, %c0_i32_0 : i32
    scf.if %2 {
      %cst_9 = arith.constant 0.000000e+00 : f32
      %12 = vector.broadcast %cst_9 : f32 to vector<2x512xf32>
      %c0_10 = arith.constant 0 : index
      %c0_11 = arith.constant 0 : index
      %13 = vector.load %arg6[%c0_10, %c0_11] : memref<2x512xf32, #tpu.memory_space<vmem>>, vector<2x512xf32>
      tpu.vector_store %arg6[%c0_10, %c0_11], %12 {strides = array<i32>} : memref<2x512xf32, #tpu.memory_space<vmem>>, vector<2x512xf32>,
    } else {
    }
    %c0 = arith.constant 0 : index
    %c0_1 = arith.constant 0 : index
    %3 = vector.load %arg6[%c0, %c0_1] : memref<2x512xf32, #tpu.memory_space<vmem>>, vector<2x512xf32>
    %c0_2 = arith.constant 0 : index
    %c0_3 = arith.constant 0 : index
    %4 = vector.load %arg2[%c0_2, %c0_3] : memref<2x3584xbf16, #tpu.memory_space<vmem>>, vector<2x3584xbf16>
    %c0_4 = arith.constant 0 : index
    %c0_5 = arith.constant 0 : index
    %5 = vector.load %arg3[%c0_4, %c0_5] : memref<3584x512xbf16, #tpu.memory_space<vmem>>, vector<3584x512xbf16>
    %cst = arith.constant dense<0.000000e+00> : vector<2x512xf32>
    %6 = tpu.matmul %4, %5, %cst {dimension_numbers = #tpu.dot_dimension_numbers<[1], [0], [0], [1], [0, 0, 1, 1], [], []>} : vector<2x3584xbf16>, vector<3584x512xbf16>, vector<2x512xf32> -> vector<2x512xf32>
    %7 = arith.addf %3, %6 : vector<2x512xf32>
    %c0_6 = arith.constant 0 : index
    %c0_7 = arith.constant 0 : index
    %8 = vector.load %arg6[%c0_6, %c0_7] : memref<2x512xf32, #tpu.memory_space<vmem>>, vector<2x512xf32>
    tpu.vector_store %arg6[%c0_6, %c0_7], %7 {strides = array<i32>} : memref<2x512xf32, #tpu.memory_space<vmem>>, vector<2x512xf32>,
    %c6_i32 = arith.constant 6 : i32
    %9 = arith.cmpi eq, %arg1, %c6_i32 : i32
    %10 = arith.extui %9 : i1 to i32
    %c0_i32_8 = arith.constant 0 : i32
    %11 = arith.cmpi ne, %10, %c0_i32_8 : i32
    scf.if %11 {
      %c0_9 = arith.constant 0 : index
      %c0_10 = arith.constant 0 : index
      %12 = vector.load %arg6[%c0_9, %c0_10] : memref<2x512xf32, #tpu.memory_space<vmem>>, vector<2x512xf32>
      %c0_11 = arith.constant 0 : index
      %c0_12 = arith.constant 0 : index
      %13 = vector.load %arg4[%c0_11, %c0_12] : memref<1x512xf32, #tpu.memory_space<vmem>>, vector<1x512xf32>
      %14 = vector.broadcast %13 : vector<1x512xf32> to vector<2x512xf32>
      %15 = arith.addf %12, %14 : vector<2x512xf32>
      %cst_13 = arith.constant 0.000000e+00 : f32
      %16 = vector.broadcast %cst_13 : f32 to vector<2x512xf32>
      %17 = arith.maximumf %15, %16 : vector<2x512xf32>
      %c0_14 = arith.constant 0 : index
      %c0_15 = arith.constant 0 : index
      %18 = vector.load %arg5[%c0_14, %c0_15] : memref<2x512xf32, #tpu.memory_space<vmem>>, vector<2x512xf32>
      tpu.vector_store %arg5[%c0_14, %c0_15], %17 {strides = array<i32>} : memref<2x512xf32, #tpu.memory_space<vmem>>, vector<2x512xf32>,
    } else {
    }
    return
  }
  func.func @transform_0(%arg0: i32, %arg1: i32) -> (i32, i32) {
    %c0_i32 = arith.constant 0 : i32
    %c0_i32_0 = arith.constant 0 : i32
    return %c0_i32, %arg1 : i32, i32
  }
  func.func @transform_1(%arg0: i32, %arg1: i32) -> (i32, i32) {
    %c0_i32 = arith.constant 0 : i32
    return %arg1, %arg0 : i32, i32
  }
  func.func @transform_2(%arg0: i32, %arg1: i32) -> (i32, i32) {
    %c0_i32 = arith.constant 0 : i32
    %c0_i32_0 = arith.constant 0 : i32
    return %c0_i32, %arg0 : i32, i32
  }
  func.func @transform_3(%arg0: i32, %arg1: i32) -> (i32, i32) {
    %c0_i32 = arith.constant 0 : i32
    %c0_i32_0 = arith.constant 0 : i32
    return %c0_i32, %arg0 : i32, i32
  }
}

module attributes {stable_mosaic.version = 11 : i64} {
  func.func @_conv2_pool_kernel(%arg0: i32, %arg1: memref<4x56x576xf32, #tpu.memory_space<vmem>>, %arg2: memref<576x128xf32, #tpu.memory_space<vmem>>, %arg3: memref<1x128xf32, #tpu.memory_space<vmem>>, %arg4: memref<56x128xf32, #tpu.memory_space<vmem>>) attributes {dimension_semantics = [#tpu.dimension_semantics<parallel>], iteration_bounds = array<i64: 7>, scalar_prefetch = 0 : i64, scratch_operands = 0 : i64, tpu.core_type = #tpu.core_type<tc>, window_params = [{transform_indices = @transform_0, window_bounds = array<i64: 4, 56, 576>}, {pipeline_mode = #tpu.pipeline_mode<synchronous>, transform_indices = @transform_1, window_bounds = array<i64: 576, 128>}, {pipeline_mode = #tpu.pipeline_mode<synchronous>, transform_indices = @transform_2, window_bounds = array<i64: 1, 128>}, {transform_indices = @transform_3, window_bounds = array<i64: 56, 128>}]} {
    %c0 = arith.constant 0 : index
    %c0_0 = arith.constant 0 : index
    %0 = vector.load %arg2[%c0, %c0_0] : memref<576x128xf32, #tpu.memory_space<vmem>>, vector<576x128xf32>
    %c0_1 = arith.constant 0 : index
    %c0_2 = arith.constant 0 : index
    %1 = vector.load %arg3[%c0_1, %c0_2] : memref<1x128xf32, #tpu.memory_space<vmem>>, vector<1x128xf32>
    %c0_3 = arith.constant 0 : index
    %c0_4 = arith.constant 0 : index
    %c0_5 = arith.constant 0 : index
    %2 = vector.load %arg1[%c0_3, %c0_4, %c0_5] : memref<4x56x576xf32, #tpu.memory_space<vmem>>, vector<1x56x576xf32>
    %3 = vector.shape_cast %2 : vector<1x56x576xf32> to vector<56x576xf32>
    %cst = arith.constant dense<0.000000e+00> : vector<56x128xf32>
    %4 = tpu.matmul %3, %0, %cst {dimension_numbers = #tpu.dot_dimension_numbers<[1], [0], [0], [1], [0, 0, 1, 1], [], []>} : vector<56x576xf32>, vector<576x128xf32>, vector<56x128xf32> -> vector<56x128xf32>
    %5 = vector.broadcast %1 : vector<1x128xf32> to vector<56x128xf32>
    %6 = arith.addf %4, %5 : vector<56x128xf32>
    %cst_6 = arith.constant 0.000000e+00 : f32
    %7 = vector.broadcast %cst_6 : f32 to vector<56x128xf32>
    %8 = arith.maximumf %6, %7 : vector<56x128xf32>
    %c1 = arith.constant 1 : index
    %c0_7 = arith.constant 0 : index
    %c0_8 = arith.constant 0 : index
    %9 = vector.load %arg1[%c1, %c0_7, %c0_8] : memref<4x56x576xf32, #tpu.memory_space<vmem>>, vector<1x56x576xf32>
    %10 = vector.shape_cast %9 : vector<1x56x576xf32> to vector<56x576xf32>
    %cst_9 = arith.constant dense<0.000000e+00> : vector<56x128xf32>
    %11 = tpu.matmul %10, %0, %cst_9 {dimension_numbers = #tpu.dot_dimension_numbers<[1], [0], [0], [1], [0, 0, 1, 1], [], []>} : vector<56x576xf32>, vector<576x128xf32>, vector<56x128xf32> -> vector<56x128xf32>
    %12 = vector.broadcast %1 : vector<1x128xf32> to vector<56x128xf32>
    %13 = arith.addf %11, %12 : vector<56x128xf32>
    %cst_10 = arith.constant 0.000000e+00 : f32
    %14 = vector.broadcast %cst_10 : f32 to vector<56x128xf32>
    %15 = arith.maximumf %13, %14 : vector<56x128xf32>
    %16 = arith.maximumf %8, %15 : vector<56x128xf32>
    %c2 = arith.constant 2 : index
    %c0_11 = arith.constant 0 : index
    %c0_12 = arith.constant 0 : index
    %17 = vector.load %arg1[%c2, %c0_11, %c0_12] : memref<4x56x576xf32, #tpu.memory_space<vmem>>, vector<1x56x576xf32>
    %18 = vector.shape_cast %17 : vector<1x56x576xf32> to vector<56x576xf32>
    %cst_13 = arith.constant dense<0.000000e+00> : vector<56x128xf32>
    %19 = tpu.matmul %18, %0, %cst_13 {dimension_numbers = #tpu.dot_dimension_numbers<[1], [0], [0], [1], [0, 0, 1, 1], [], []>} : vector<56x576xf32>, vector<576x128xf32>, vector<56x128xf32> -> vector<56x128xf32>
    %20 = vector.broadcast %1 : vector<1x128xf32> to vector<56x128xf32>
    %21 = arith.addf %19, %20 : vector<56x128xf32>
    %cst_14 = arith.constant 0.000000e+00 : f32
    %22 = vector.broadcast %cst_14 : f32 to vector<56x128xf32>
    %23 = arith.maximumf %21, %22 : vector<56x128xf32>
    %c3 = arith.constant 3 : index
    %c0_15 = arith.constant 0 : index
    %c0_16 = arith.constant 0 : index
    %24 = vector.load %arg1[%c3, %c0_15, %c0_16] : memref<4x56x576xf32, #tpu.memory_space<vmem>>, vector<1x56x576xf32>
    %25 = vector.shape_cast %24 : vector<1x56x576xf32> to vector<56x576xf32>
    %cst_17 = arith.constant dense<0.000000e+00> : vector<56x128xf32>
    %26 = tpu.matmul %25, %0, %cst_17 {dimension_numbers = #tpu.dot_dimension_numbers<[1], [0], [0], [1], [0, 0, 1, 1], [], []>} : vector<56x576xf32>, vector<576x128xf32>, vector<56x128xf32> -> vector<56x128xf32>
    %27 = vector.broadcast %1 : vector<1x128xf32> to vector<56x128xf32>
    %28 = arith.addf %26, %27 : vector<56x128xf32>
    %cst_18 = arith.constant 0.000000e+00 : f32
    %29 = vector.broadcast %cst_18 : f32 to vector<56x128xf32>
    %30 = arith.maximumf %28, %29 : vector<56x128xf32>
    %31 = arith.maximumf %23, %30 : vector<56x128xf32>
    %32 = arith.maximumf %16, %31 : vector<56x128xf32>
    %c0_19 = arith.constant 0 : index
    %c0_20 = arith.constant 0 : index
    %33 = vector.load %arg4[%c0_19, %c0_20] : memref<56x128xf32, #tpu.memory_space<vmem>>, vector<56x128xf32>
    tpu.vector_store %arg4[%c0_19, %c0_20], %32 {strides = array<i32>} : memref<56x128xf32, #tpu.memory_space<vmem>>, vector<56x128xf32>,
    return
  }
  func.func @transform_0(%arg0: i32) -> (i32, i32, i32) {
    %c0_i32 = arith.constant 0 : i32
    %c0_i32_0 = arith.constant 0 : i32
    %c0_i32_1 = arith.constant 0 : i32
    return %c0_i32, %arg0, %c0_i32_0 : i32, i32, i32
  }
  func.func @transform_1(%arg0: i32) -> (i32, i32) {
    %c0_i32 = arith.constant 0 : i32
    %c0_i32_0 = arith.constant 0 : i32
    %c0_i32_1 = arith.constant 0 : i32
    return %c0_i32, %c0_i32_0 : i32, i32
  }
  func.func @transform_2(%arg0: i32) -> (i32, i32) {
    %c0_i32 = arith.constant 0 : i32
    %c0_i32_0 = arith.constant 0 : i32
    %c0_i32_1 = arith.constant 0 : i32
    return %c0_i32, %c0_i32_0 : i32, i32
  }
  func.func @transform_3(%arg0: i32) -> (i32, i32) {
    %c0_i32 = arith.constant 0 : i32
    %c0_i32_0 = arith.constant 0 : i32
    return %arg0, %c0_i32 : i32, i32
  }
}

module attributes {stable_mosaic.version = 11 : i64} {
  func.func @_mm_bias_kernel(%arg0: memref<2x1024xf32, #tpu.memory_space<vmem>>, %arg1: memref<1024x10xf32, #tpu.memory_space<vmem>>, %arg2: memref<1x10xf32, #tpu.memory_space<vmem>>, %arg3: memref<2x10xf32, #tpu.memory_space<vmem>>) attributes {dimension_semantics = [], scalar_prefetch = 0 : i64, scratch_operands = 0 : i64, tpu.core_type = #tpu.core_type<tc>} {
    %c0 = arith.constant 0 : index
    %c0_0 = arith.constant 0 : index
    %0 = vector.load %arg0[%c0, %c0_0] : memref<2x1024xf32, #tpu.memory_space<vmem>>, vector<2x1024xf32>
    %c0_1 = arith.constant 0 : index
    %c0_2 = arith.constant 0 : index
    %1 = vector.load %arg1[%c0_1, %c0_2] : memref<1024x10xf32, #tpu.memory_space<vmem>>, vector<1024x10xf32>
    %cst = arith.constant dense<0.000000e+00> : vector<2x10xf32>
    %2 = tpu.matmul %0, %1, %cst {dimension_numbers = #tpu.dot_dimension_numbers<[1], [0], [0], [1], [0, 0, 1, 1], [], []>} : vector<2x1024xf32>, vector<1024x10xf32>, vector<2x10xf32> -> vector<2x10xf32>
    %c0_3 = arith.constant 0 : index
    %c0_4 = arith.constant 0 : index
    %3 = vector.load %arg2[%c0_3, %c0_4] : memref<1x10xf32, #tpu.memory_space<vmem>>, vector<1x10xf32>
    %4 = vector.broadcast %3 : vector<1x10xf32> to vector<2x10xf32>
    %5 = arith.addf %2, %4 : vector<2x10xf32>
    %c0_5 = arith.constant 0 : index
    %c0_6 = arith.constant 0 : index
    %6 = vector.load %arg3[%c0_5, %c0_6] : memref<2x10xf32, #tpu.memory_space<vmem>>, vector<2x10xf32>
    tpu.vector_store %arg3[%c0_5, %c0_6], %5 {strides = array<i32>} : memref<2x10xf32, #tpu.memory_space<vmem>>, vector<2x10xf32>,
    return
  }
}

</mosaic_0001>

<bundles_post_ra>
// kernel: net_forward.4
= control target key start
LH: loop header
LB: loop body
LE: loop exit
PB: predicated region body
PF: predicated region fallthrough
CT: control target
= control target key end

     0   :  { %8 = vsyncpa [#allocation3], 0  ;;  %s4855_s0 = inlined_call_operand.vmem [shape: f32[1568,9], index: 0, kind: input, shape index: {}]   ;;  %s4856_s1 = inlined_call_operand.hbm [shape: f32[9,64], index: 1, kind: input, shape index: {}]   ;;  %s4857_s2 = inlined_call_operand.hbm [shape: f32[1,64], index: 2, kind: input, shape index: {}]   ;;  %s4858_s3 = inlined_call_operand.vmem [shape: f32[1568,64], index: 3, kind: output, shape index: {}]  }
   0x1   :  { %9 = vsyncpa [#allocation5], 0  ;;  %s3038_s12 = smov [#allocation2]   ;;  %s2990_s16 = scalar_lea.hbm %s4856_s1, 256 }
   0x2   :  { %s17_s13 = sshll.u32 %s3038_s12, 4  ;;  %p2991_p0 = scmp.ne.s32.totalorder %s4856_s1, %s2990_s16  ;;  %s18_s13 = int_to_ptr.vmem [resolvable:$true] %s17_s13 }
   0x3   :  { %p2994_p1 = scmp.lt.u32.totalorder %s2990_s16, %s4856_s1 }
   0x5   :  { %p2996_p2 = pnand %p2994_p1, %p2991_p0 }
   0x7   :  { %2999 = shalt.err (!%p2996_p2)
}
   0x8   :  { %s3000_s21 = scalar_lea.vmem %s18_s13, 256  ;;  %p3005_p4 = scmp.lt.s32.totalorder %s18_s13, %s18_s13 }
   0x9   :  { %p3001_p3 = scmp.ne.s32.totalorder %s18_s13, %s3000_s21  ;;  %p3006_p5 = scmp.lt.s32.totalorder %s3000_s21, %s3000_s21 }
   0xb   :  { %p3007_p6 = por %p3006_p5, %p3005_p4 }
   0xd   :  { %p3008_p7 = pnand %p3007_p6, %p3001_p3 }
   0xf   :  { %3011 = shalt.err (!%p3008_p7)
}
  0x10   :  { %s3039_s22 = smov 128   ;;  %s3040_s23 = smov 8  }
  0x11   :  { %23 = dma.hbm_to_vmem [thread:$0]  %s4856_s1, 256, %s18_s13, [#allocation3], %s3039_s22, %s3039_s22, %s3040_s23  }
  0x12   :  { %s3041_s26 = smov [#allocation4]   ;;  %s3012_s30 = scalar_lea.hbm %s4857_s2, 16 }
  0x13   :  { %s30_s27 = sshll.u32 %s3041_s26, 4  ;;  %p3013_p8 = scmp.ne.s32.totalorder %s4857_s2, %s3012_s30  ;;  %s31_s27 = int_to_ptr.vmem [resolvable:$true] %s30_s27 }
  0x14   :  { %p3016_p9 = scmp.lt.u32.totalorder %s3012_s30, %s4857_s2 }
  0x16   :  { %p3018_p10 = pnand %p3016_p9, %p3013_p8 }
  0x18   :  { %3021 = shalt.err (!%p3018_p10)
}
  0x19   :  { %s3022_s8 = scalar_lea.vmem %s31_s27, 16  ;;  %s3026_s1 = scalar_lea.vmem %s31_s27, 32 }
  0x1a   :  { %p3023_p11 = scmp.ne.s32.totalorder %s31_s27, %s3022_s8  ;;  %p3027_p12 = scmp.lt.s32.totalorder %s31_s27, %s31_s27 }
  0x1b   :  { %p3028_p13 = scmp.lt.s32.totalorder %s3026_s1, %s3022_s8 }
  0x1d   :  { %p3029_p0 = por %p3028_p13, %p3027_p12 }
  0x1f   :  { %p3030_p1 = pnand %p3029_p0, %p3023_p11 }
  0x21   :  { %3033 = shalt.err (!%p3030_p1)
}
  0x22   :  { %33 = dma.hbm_to_vmem [thread:$0]  %s4857_s2, 16, %s31_s27, [#allocation5]  }
  0x23   :  { %3034 = dma.done.wait [#allocation3], 256  }
  0x24   :  { %3035 = vsyncadd [#allocation3], 4294967040 }
  0x25   :  { %3036 = dma.done.wait [#allocation5], 16  }
  0x26   :  { %3037 = vsyncadd [#allocation5], 4294967280  ;;  %vm834_vm0 = vcmask 1040384   ;;  %vm245_vm1 = vcmask 72704   ;;  %vm3042_vm2 = vmmov 1   ;;  %v236_v0 = vld [vmem:[#allocation2] sm:$0xff] }
  0x27   :  { %vm2977_vm3 = vmpackc.low %vm834_vm0, %vm3042_vm2  ;;  %v237_v1 = vld [vmem:[#allocation2 + $0x8] sm:$0x1]  ;;  %v40_v2 = vld [vmem:[%s4855_s0] sm:$0xff]  ;;  %vm2079_vm4 = vcmask 523264  }
  0x28   :  { %v2976_v3 = vpack.c.bf16 %v237_v1, %v236_v0  ;;  %2682 = vmatprep.mubr.msk.f32.mxu0 %vm245_vm1, %v40_v2  ;;  %v138_v4 = vld [vmem:[%s4855_s0 + $0x310] sm:$0xff]  ;;  %v41_v5 = vld [vmem:[%s4855_s0 + $0x8] sm:$0xff]  ;;  %v139_v6 = vld [vmem:[%s4855_s0 + $0x318] sm:$0xff] }
  0x29   :  { %2829 = vmatprep.mubr.msk.f32.mxu1 %vm245_vm1, %v138_v4  ;;  %v42_v7 = vld [vmem:[%s4855_s0 + $0x10] sm:$0xff]  ;;  %v140_v8 = vld [vmem:[%s4855_s0 + $0x320] sm:$0xff]  ;;  %v43_v9 = vld [vmem:[%s4855_s0 + $0x18] sm:$0xff] }
  0x2a   :  { %2978 = vmatprep.subr.msk.bf16.mxu0 %vm2977_vm3, %v2976_v3  ;;  %2982 = vmatprep.subr.msk.bf16.mxu1 %vm2977_vm3, %v2976_v3  ;;  %v141_v10 = vld [vmem:[%s4855_s0 + $0x328] sm:$0xff]  ;;  %v44_v11 = vld [vmem:[%s4855_s0 + $0x20] sm:$0xff]  ;;  %v142_v12 = vld [vmem:[%s4855_s0 + $0x330] sm:$0xff] }
  0x2b   :  { %2981 = vmatpush3.bf16.msk.msra.mxu0 %vm2977_vm3, %v2976_v3  ;;  %2983 = vmatpush3.bf16.msk.msra.mxu1 %vm2977_vm3, %v2976_v3  ;;  %v45_v13 = vld [vmem:[%s4855_s0 + $0x28] sm:$0xff]  ;;  %v143_v14 = vld [vmem:[%s4855_s0 + $0x338] sm:$0xff]  ;;  %v46_v15 = vld [vmem:[%s4855_s0 + $0x30] sm:$0xff] }
  0x2c   :  { %v144_v16 = vld [vmem:[%s4855_s0 + $0x340] sm:$0xff]  ;;  %v47_v17 = vld [vmem:[%s4855_s0 + $0x38] sm:$0xff]  ;;  %v145_v18 = vld [vmem:[%s4855_s0 + $0x348] sm:$0xff] }
  0x2d   :  { %v48_v19 = vld [vmem:[%s4855_s0 + $0x40] sm:$0xff]  ;;  %v146_v20 = vld [vmem:[%s4855_s0 + $0x350] sm:$0xff]  ;;  %v49_v21 = vld [vmem:[%s4855_s0 + $0x48] sm:$0xff] }
  0x2e   :  { %2683 = vmatmul.mubr.msk.f32.vlgmr.msra.gmra.mrb[0].mxu0 %vm245_vm1, %v41_v5  ;;  %2830 = vmatmul.mubr.msk.f32.vlgmr.msra.gmra.mrb[0].mxu1 %vm245_vm1, %v139_v6  ;;  %v147_v22 = vld [vmem:[%s4855_s0 + $0x358] sm:$0xff]  ;;  %v50_v23 = vld [vmem:[%s4855_s0 + $0x50] sm:$0xff]  ;;  %v148_v24 = vld [vmem:[%s4855_s0 + $0x360] sm:$0xff] }
  0x2f   :  { %2685 = vmatprep.mubr.msk.f32.mxu0 %vm245_vm1, %v42_v7  ;;  %2832 = vmatprep.mubr.msk.f32.mxu1 %vm245_vm1, %v140_v8  ;;  %v51_v25 = vld [vmem:[%s4855_s0 + $0x58] sm:$0xff]  ;;  %v149_v26 = vld [vmem:[%s4855_s0 + $0x368] sm:$0xff]  ;;  %v52_v27 = vld [vmem:[%s4855_s0 + $0x60] sm:$0xff] }
  0x30   :  { %v150_v28 = vld [vmem:[%s4855_s0 + $0x370] sm:$0xff]  ;;  %v53_v29 = vld [vmem:[%s4855_s0 + $0x68] sm:$0xff]  ;;  %v151_v30 = vld [vmem:[%s4855_s0 + $0x378] sm:$0xff] }
  0x31   :  { %v54_v31 = vld [vmem:[%s4855_s0 + $0x70] sm:$0xff]  ;;  %v152_v32 = vld [vmem:[%s4855_s0 + $0x380] sm:$0xff]  ;;  %v55_v33 = vld [vmem:[%s4855_s0 + $0x78] sm:$0xff] }
  0x32   :  { %2686 = vmatmul.mubr.msk.f32.gmra.mrb[2].mxu0 %vm245_vm1, %v43_v9  ;;  %2833 = vmatmul.mubr.msk.f32.gmra.mrb[2].mxu1 %vm245_vm1, %v141_v10  ;;  %v153_v34 = vld [vmem:[%s4855_s0 + $0x388] sm:$0xff]  ;;  %v56_v35 = vld [vmem:[%s4855_s0 + $0x80] sm:$0xff]  ;;  %v154_v36 = vld [vmem:[%s4855_s0 + $0x390] sm:$0xff] }
  0x33   :  { %2688 = vmatprep.mubr.msk.f32.mxu0 %vm245_vm1, %v44_v11  ;;  %2835 = vmatprep.mubr.msk.f32.mxu1 %vm245_vm1, %v142_v12  ;;  %v57_v37 = vld [vmem:[%s4855_s0 + $0x88] sm:$0xff]  ;;  %v155_v38 = vld [vmem:[%s4855_s0 + $0x398] sm:$0xff]  ;;  %v58_v39 = vld [vmem:[%s4855_s0 + $0x90] sm:$0xff] }
  0x34   :  { %v156_v40 = vld [vmem:[%s4855_s0 + $0x3a0] sm:$0xff]  ;;  %v59_v41 = vld [vmem:[%s4855_s0 + $0x98] sm:$0xff]  ;;  %v157_v42 = vld [vmem:[%s4855_s0 + $0x3a8] sm:$0xff] }
  0x35   :  { %v60_v43 = vld [vmem:[%s4855_s0 + $0xa0] sm:$0xff]  ;;  %v158_v44 = vld [vmem:[%s4855_s0 + $0x3b0] sm:$0xff]  ;;  %v61_v45 = vld [vmem:[%s4855_s0 + $0xa8] sm:$0xff] }
  0x36   :  { %2689 = vmatmul.mubr.msk.f32.gmra.mrb[4].mxu0 %vm245_vm1, %v45_v13  ;;  %2836 = vmatmul.mubr.msk.f32.gmra.mrb[4].mxu1 %vm245_vm1, %v143_v14  ;;  %v159_v46 = vld [vmem:[%s4855_s0 + $0x3b8] sm:$0xff]  ;;  %v62_v47 = vld [vmem:[%s4855_s0 + $0xb0] sm:$0xff]  ;;  %v160_v48 = vld [vmem:[%s4855_s0 + $0x3c0] sm:$0xff] }
  0x37   :  { %2691 = vmatprep.mubr.msk.f32.mxu0 %vm245_vm1, %v46_v15  ;;  %2838 = vmatprep.mubr.msk.f32.mxu1 %vm245_vm1, %v144_v16  ;;  %v63_v49 = vld [vmem:[%s4855_s0 + $0xb8] sm:$0xff]  ;;  %v161_v50 = vld [vmem:[%s4855_s0 + $0x3c8] sm:$0xff]  ;;  %v64_v51 = vld [vmem:[%s4855_s0 + $0xc0] sm:$0xff] }
  0x38   :  { %v162_v52 = vld [vmem:[%s4855_s0 + $0x3d0] sm:$0xff]  ;;  %v65_v53 = vld [vmem:[%s4855_s0 + $0xc8] sm:$0xff]  ;;  %v163_v54 = vld [vmem:[%s4855_s0 + $0x3d8] sm:$0xff] }
  0x39   :  { %v66_v55 = vld [vmem:[%s4855_s0 + $0xd0] sm:$0xff]  ;;  %v164_v56 = vld [vmem:[%s4855_s0 + $0x3e0] sm:$0xff]  ;;  %v67_v57 = vld [vmem:[%s4855_s0 + $0xd8] sm:$0xff] }
  0x3a   :  { %2692 = vmatmul.mubr.msk.f32.gmra.mrb[6].mxu0 %vm245_vm1, %v47_v17  ;;  %2839 = vmatmul.mubr.msk.f32.gmra.mrb[6].mxu1 %vm245_vm1, %v145_v18  ;;  %v165_v58 = vld [vmem:[%s4855_s0 + $0x3e8] sm:$0xff]  ;;  %v68_v59 = vld [vmem:[%s4855_s0 + $0xe0] sm:$0xff]  ;;  %v166_v60 = vld [vmem:[%s4855_s0 + $0x3f0] sm:$0xff] }
  0x3b   :  { %2694 = vmatprep.mubr.msk.f32.mxu0 %vm245_vm1, %v48_v19  ;;  %2841 = vmatprep.mubr.msk.f32.mxu1 %vm245_vm1, %v146_v20  ;;  %v69_v61 = vld [vmem:[%s4855_s0 + $0xe8] sm:$0xff]  ;;  %v167_v62 = vld [vmem:[%s4855_s0 + $0x3f8] sm:$0xff]  ;;  %v70_v63 = vld [vmem:[%s4855_s0 + $0xf0] sm:$0xff] }
  0x3c   :  { %v168_v0 = vld [vmem:[%s4855_s0 + $0x400] sm:$0xff]  ;;  %v71_v1 = vld [vmem:[%s4855_s0 + $0xf8] sm:$0xff]  ;;  %v169_v2 = vld [vmem:[%s4855_s0 + $0x408] sm:$0xff] }
  0x3d   :  { %v72_v3 = vld [vmem:[%s4855_s0 + $0x100] sm:$0xff]  ;;  %v170_v4 = vld [vmem:[%s4855_s0 + $0x410] sm:$0xff]  ;;  %v73_v5 = vld [vmem:[%s4855_s0 + $0x108] sm:$0xff] }
  0x3e   :  { %2695 = vmatmul.mubr.msk.f32.gmra.mrb[8].mxu0 %vm245_vm1, %v49_v21  ;;  %2842 = vmatmul.mubr.msk.f32.gmra.mrb[8].mxu1 %vm245_vm1, %v147_v22  ;;  %v171_v6 = vld [vmem:[%s4855_s0 + $0x418] sm:$0xff]  ;;  %v74_v7 = vld [vmem:[%s4855_s0 + $0x110] sm:$0xff]  ;;  %v172_v8 = vld [vmem:[%s4855_s0 + $0x420] sm:$0xff] }
  0x3f   :  { %2697 = vmatprep.mubr.msk.f32.mxu0 %vm245_vm1, %v50_v23  ;;  %2844 = vmatprep.mubr.msk.f32.mxu1 %vm245_vm1, %v148_v24  ;;  %v75_v9 = vld [vmem:[%s4855_s0 + $0x118] sm:$0xff]  ;;  %v173_v10 = vld [vmem:[%s4855_s0 + $0x428] sm:$0xff]  ;;  %v76_v11 = vld [vmem:[%s4855_s0 + $0x120] sm:$0xff] }
  0x40   :  { %v174_v12 = vld [vmem:[%s4855_s0 + $0x430] sm:$0xff]  ;;  %v77_v13 = vld [vmem:[%s4855_s0 + $0x128] sm:$0xff]  ;;  %v175_v14 = vld [vmem:[%s4855_s0 + $0x438] sm:$0xff] }
  0x41   :  { %v78_v15 = vld [vmem:[%s4855_s0 + $0x130] sm:$0xff]  ;;  %v176_v16 = vld [vmem:[%s4855_s0 + $0x440] sm:$0xff]  ;;  %v79_v17 = vld [vmem:[%s4855_s0 + $0x138] sm:$0xff] }
  0x42   :  { %2698 = vmatmul.mubr.msk.f32.gmra.mrb[10].mxu0 %vm245_vm1, %v51_v25  ;;  %2845 = vmatmul.mubr.msk.f32.gmra.mrb[10].mxu1 %vm245_vm1, %v149_v26  ;;  %v177_v18 = vld [vmem:[%s4855_s0 + $0x448] sm:$0xff]  ;;  %v80_v19 = vld [vmem:[%s4855_s0 + $0x140] sm:$0xff]  ;;  %v178_v20 = vld [vmem:[%s4855_s0 + $0x450] sm:$0xff] }
  0x43   :  { %2700 = vmatprep.mubr.msk.f32.mxu0 %vm245_vm1, %v52_v27  ;;  %2847 = vmatprep.mubr.msk.f32.mxu1 %vm245_vm1, %v150_v28  ;;  %v81_v21 = vld [vmem:[%s4855_s0 + $0x148] sm:$0xff]  ;;  %v179_v22 = vld [vmem:[%s4855_s0 + $0x458] sm:$0xff]  ;;  %v82_v23 = vld [vmem:[%s4855_s0 + $0x150] sm:$0xff] }
  0x44   :  { %v180_v24 = vld [vmem:[%s4855_s0 + $0x460] sm:$0xff]  ;;  %v83_v25 = vld [vmem:[%s4855_s0 + $0x158] sm:$0xff]  ;;  %v181_v26 = vld [vmem:[%s4855_s0 + $0x468] sm:$0xff] }
  0x45   :  { %v84_v27 = vld [vmem:[%s4855_s0 + $0x160] sm:$0xff]  ;;  %v182_v28 = vld [vmem:[%s4855_s0 + $0x470] sm:$0xff] }
  0x46   :  { %2701 = vmatmul.mubr.msk.f32.gmra.mrb[12].mxu0 %vm245_vm1, %v53_v29  ;;  %2848 = vmatmul.mubr.msk.f32.gmra.mrb[12].mxu1 %vm245_vm1, %v151_v30  ;;  %v85_v29 = vld [vmem:[%s4855_s0 + $0x168] sm:$0xff]  ;;  %v183_v30 = vld [vmem:[%s4855_s0 + $0x478] sm:$0xff] }
  0x47   :  { %2703 = vmatprep.mubr.msk.f32.mxu0 %vm245_vm1, %v54_v31  ;;  %2850 = vmatprep.mubr.msk.f32.mxu1 %vm245_vm1, %v152_v32  ;;  %v86_v31 = vld [vmem:[%s4855_s0 + $0x170] sm:$0xff]  ;;  %v184_v32 = vld [vmem:[%s4855_s0 + $0x480] sm:$0xff] }
  0x4a   :  { %2704 = vmatmul.mubr.msk.f32.gmra.mrb[14].mxu0 %vm245_vm1, %v55_v33  ;;  %2851 = vmatmul.mubr.msk.f32.gmra.mrb[14].mxu1 %vm245_vm1, %v153_v34  ;;  %v87_v33 = vld [vmem:[%s4855_s0 + $0x178] sm:$0xff]  ;;  %v185_v34 = vld [vmem:[%s4855_s0 + $0x488] sm:$0xff] }
  0x4b   :  { %2706 = vmatprep.mubr.msk.f32.mxu0 %vm245_vm1, %v56_v35  ;;  %2853 = vmatprep.mubr.msk.f32.mxu1 %vm245_vm1, %v154_v36  ;;  %v88_v35 = vld [vmem:[%s4855_s0 + $0x180] sm:$0xff]  ;;  %v186_v36 = vld [vmem:[%s4855_s0 + $0x490] sm:$0xff] }
  0x4e   :  { %2707 = vmatmul.mubr.msk.f32.gmra.mrb[16].mxu0 %vm245_vm1, %v57_v37  ;;  %2854 = vmatmul.mubr.msk.f32.gmra.mrb[16].mxu1 %vm245_vm1, %v155_v38  ;;  %v89_v37 = vld [vmem:[%s4855_s0 + $0x188] sm:$0xff]  ;;  %v187_v38 = vld [vmem:[%s4855_s0 + $0x498] sm:$0xff] }
  0x4f   :  { %2709 = vmatprep.mubr.msk.f32.mxu0 %vm245_vm1, %v58_v39  ;;  %2856 = vmatprep.mubr.msk.f32.mxu1 %vm245_vm1, %v156_v40  ;;  %v90_v39 = vld [vmem:[%s4855_s0 + $0x190] sm:$0xff]  ;;  %v188_v40 = vld [vmem:[%s4855_s0 + $0x4a0] sm:$0xff] }
  0x52   :  { %2710 = vmatmul.mubr.msk.f32.gmra.mrb[18].mxu0 %vm245_vm1, %v59_v41  ;;  %2857 = vmatmul.mubr.msk.f32.gmra.mrb[18].mxu1 %vm245_vm1, %v157_v42  ;;  %v91_v41 = vld [vmem:[%s4855_s0 + $0x198] sm:$0xff]  ;;  %v189_v42 = vld [vmem:[%s4855_s0 + $0x4a8] sm:$0xff] }
  0x53   :  { %2712 = vmatprep.mubr.msk.f32.mxu0 %vm245_vm1, %v60_v43  ;;  %2859 = vmatprep.mubr.msk.f32.mxu1 %vm245_vm1, %v158_v44  ;;  %v92_v43 = vld [vmem:[%s4855_s0 + $0x1a0] sm:$0xff]  ;;  %v190_v44 = vld [vmem:[%s4855_s0 + $0x4b0] sm:$0xff] }
  0x56   :  { %2713 = vmatmul.mubr.msk.f32.gmra.mrb[20].mxu0 %vm245_vm1, %v61_v45  ;;  %2860 = vmatmul.mubr.msk.f32.gmra.mrb[20].mxu1 %vm245_vm1, %v159_v46  ;;  %v93_v45 = vld [vmem:[%s4855_s0 + $0x1a8] sm:$0xff]  ;;  %v191_v46 = vld [vmem:[%s4855_s0 + $0x4b8] sm:$0xff] }
  0x57   :  { %2715 = vmatprep.mubr.msk.f32.mxu0 %vm245_vm1, %v62_v47  ;;  %2862 = vmatprep.mubr.msk.f32.mxu1 %vm245_vm1, %v160_v48  ;;  %v94_v47 = vld [vmem:[%s4855_s0 + $0x1b0] sm:$0xff]  ;;  %v192_v48 = vld [vmem:[%s4855_s0 + $0x4c0] sm:$0xff] }
  0x5a   :  { %2716 = vmatmul.mubr.msk.f32.gmra.mrb[22].mxu0 %vm245_vm1, %v63_v49  ;;  %2863 = vmatmul.mubr.msk.f32.gmra.mrb[22].mxu1 %vm245_vm1, %v161_v50  ;;  %v95_v49 = vld [vmem:[%s4855_s0 + $0x1b8] sm:$0xff]  ;;  %v193_v50 = vld [vmem:[%s4855_s0 + $0x4c8] sm:$0xff] }
  0x5b   :  { %2718 = vmatprep.mubr.msk.f32.mxu0 %vm245_vm1, %v64_v51  ;;  %2865 = vmatprep.mubr.msk.f32.mxu1 %vm245_vm1, %v162_v52  ;;  %v96_v51 = vld [vmem:[%s4855_s0 + $0x1c0] sm:$0xff]  ;;  %v194_v52 = vld [vmem:[%s4855_s0 + $0x4d0] sm:$0xff] }
  0x5e   :  { %2719 = vmatmul.mubr.msk.f32.gmra.mrb[24].mxu0 %vm245_vm1, %v65_v53  ;;  %2866 = vmatmul.mubr.msk.f32.gmra.mrb[24].mxu1 %vm245_vm1, %v163_v54  ;;  %v97_v53 = vld [vmem:[%s4855_s0 + $0x1c8] sm:$0xff]  ;;  %v195_v54 = vld [vmem:[%s4855_s0 + $0x4d8] sm:$0xff] }
  0x5f   :  { %2721 = vmatprep.mubr.msk.f32.mxu0 %vm245_vm1, %v66_v55  ;;  %2868 = vmatprep.mubr.msk.f32.mxu1 %vm245_vm1, %v164_v56  ;;  %v98_v55 = vld [vmem:[%s4855_s0 + $0x1d0] sm:$0xff]  ;;  %v196_v56 = vld [vmem:[%s4855_s0 + $0x4e0] sm:$0xff] }
  0x62   :  { %2722 = vmatmul.mubr.msk.f32.gmra.mrb[26].mxu0 %vm245_vm1, %v67_v57  ;;  %2869 = vmatmul.mubr.msk.f32.gmra.mrb[26].mxu1 %vm245_vm1, %v165_v58  ;;  %v99_v57 = vld [vmem:[%s4855_s0 + $0x1d8] sm:$0xff]  ;;  %v197_v58 = vld [vmem:[%s4855_s0 + $0x4e8] sm:$0xff] }
  0x63   :  { %2724 = vmatprep.mubr.msk.f32.mxu0 %vm245_vm1, %v68_v59  ;;  %2871 = vmatprep.mubr.msk.f32.mxu1 %vm245_vm1, %v166_v60  ;;  %v100_v59 = vld [vmem:[%s4855_s0 + $0x1e0] sm:$0xff]  ;;  %v198_v60 = vld [vmem:[%s4855_s0 + $0x4f0] sm:$0xff] }
  0x66   :  { %2725 = vmatmul.mubr.msk.f32.gmra.mrb[28].mxu0 %vm245_vm1, %v69_v61  ;;  %2872 = vmatmul.mubr.msk.f32.gmra.mrb[28].mxu1 %vm245_vm1, %v167_v62  ;;  %v101_v61 = vld [vmem:[%s4855_s0 + $0x1e8] sm:$0xff]  ;;  %v199_v62 = vld [vmem:[%s4855_s0 + $0x4f8] sm:$0xff] }
  0x67   :  { %2727 = vmatprep.mubr.msk.f32.mxu0 %vm245_vm1, %v70_v63  ;;  %2874 = vmatprep.mubr.msk.f32.mxu1 %vm245_vm1, %v168_v0  ;;  %v102_v63 = vld [vmem:[%s4855_s0 + $0x1f0] sm:$0xff]  ;;  %v200_v0 = vld [vmem:[%s4855_s0 + $0x500] sm:$0xff] }
  0x6a   :  { %2728 = vmatmul.mubr.msk.f32.gmra.mrb[30].mxu0 %vm245_vm1, %v71_v1  ;;  %2875 = vmatmul.mubr.msk.f32.gmra.mrb[30].mxu1 %vm245_vm1, %v169_v2  ;;  %v103_v1 = vld [vmem:[%s4855_s0 + $0x1f8] sm:$0xff]  ;;  %v201_v2 = vld [vmem:[%s4855_s0 + $0x508] sm:$0xff] }
  0x6b   :  { %2730 = vmatprep.mubr.msk.f32.mxu0 %vm245_vm1, %v72_v3  ;;  %2877 = vmatprep.mubr.msk.f32.mxu1 %vm245_vm1, %v170_v4  ;;  %v104_v3 = vld [vmem:[%s4855_s0 + $0x200] sm:$0xff]  ;;  %v202_v4 = vld [vmem:[%s4855_s0 + $0x510] sm:$0xff] }
  0x6e   :  { %2731 = vmatmul.mubr.msk.f32.gmra.mrb[32].mxu0 %vm245_vm1, %v73_v5  ;;  %2878 = vmatmul.mubr.msk.f32.gmra.mrb[32].mxu1 %vm245_vm1, %v171_v6  ;;  %v105_v5 = vld [vmem:[%s4855_s0 + $0x208] sm:$0xff]  ;;  %v203_v6 = vld [vmem:[%s4855_s0 + $0x518] sm:$0xff] }
  0x6f   :  { %2733 = vmatprep.mubr.msk.f32.mxu0 %vm245_vm1, %v74_v7  ;;  %2880 = vmatprep.mubr.msk.f32.mxu1 %vm245_vm1, %v172_v8  ;;  %v106_v7 = vld [vmem:[%s4855_s0 + $0x210] sm:$0xff]  ;;  %v204_v8 = vld [vmem:[%s4855_s0 + $0x520] sm:$0xff] }
  0x72   :  { %2734 = vmatmul.mubr.msk.f32.gmra.mrb[34].mxu0 %vm245_vm1, %v75_v9  ;;  %2881 = vmatmul.mubr.msk.f32.gmra.mrb[34].mxu1 %vm245_vm1, %v173_v10  ;;  %v107_v9 = vld [vmem:[%s4855_s0 + $0x218] sm:$0xff]  ;;  %v205_v10 = vld [vmem:[%s4855_s0 + $0x528] sm:$0xff] }
  0x73   :  { %2736 = vmatprep.mubr.msk.f32.mxu0 %vm245_vm1, %v76_v11  ;;  %2883 = vmatprep.mubr.msk.f32.mxu1 %vm245_vm1, %v174_v12  ;;  %v108_v11 = vld [vmem:[%s4855_s0 + $0x220] sm:$0xff]  ;;  %v206_v12 = vld [vmem:[%s4855_s0 + $0x530] sm:$0xff] }
  0x76   :  { %2737 = vmatmul.mubr.msk.f32.gmra.mrb[36].mxu0 %vm245_vm1, %v77_v13  ;;  %2884 = vmatmul.mubr.msk.f32.gmra.mrb[36].mxu1 %vm245_vm1, %v175_v14  ;;  %v109_v13 = vld [vmem:[%s4855_s0 + $0x228] sm:$0xff]  ;;  %v207_v14 = vld [vmem:[%s4855_s0 + $0x538] sm:$0xff] }
  0x77   :  { %2739 = vmatprep.mubr.msk.f32.mxu0 %vm245_vm1, %v78_v15  ;;  %2886 = vmatprep.mubr.msk.f32.mxu1 %vm245_vm1, %v176_v16  ;;  %v110_v15 = vld [vmem:[%s4855_s0 + $0x230] sm:$0xff]  ;;  %v208_v16 = vld [vmem:[%s4855_s0 + $0x540] sm:$0xff] }
  0x7a   :  { %2740 = vmatmul.mubr.msk.f32.gmra.mrb[38].mxu0 %vm245_vm1, %v79_v17  ;;  %2887 = vmatmul.mubr.msk.f32.gmra.mrb[38].mxu1 %vm245_vm1, %v177_v18  ;;  %v111_v17 = vld [vmem:[%s4855_s0 + $0x238] sm:$0xff]  ;;  %v209_v18 = vld [vmem:[%s4855_s0 + $0x548] sm:$0xff] }
  0x7b   :  { %2742 = vmatprep.mubr.msk.f32.mxu0 %vm245_vm1, %v80_v19  ;;  %2889 = vmatprep.mubr.msk.f32.mxu1 %vm245_vm1, %v178_v20  ;;  %v112_v19 = vld [vmem:[%s4855_s0 + $0x240] sm:$0xff]  ;;  %v210_v20 = vld [vmem:[%s4855_s0 + $0x550] sm:$0xff] }
  0x7e   :  { %2743 = vmatmul.mubr.msk.f32.gmra.mrb[40].mxu0 %vm245_vm1, %v81_v21  ;;  %2890 = vmatmul.mubr.msk.f32.gmra.mrb[40].mxu1 %vm245_vm1, %v179_v22  ;;  %v113_v21 = vld [vmem:[%s4855_s0 + $0x248] sm:$0xff]  ;;  %v211_v22 = vld [vmem:[%s4855_s0 + $0x558] sm:$0xff] }
  0x7f   :  { %2745 = vmatprep.mubr.msk.f32.mxu0 %vm245_vm1, %v82_v23  ;;  %2892 = vmatprep.mubr.msk.f32.mxu1 %vm245_vm1, %v180_v24  ;;  %v114_v23 = vld [vmem:[%s4855_s0 + $0x250] sm:$0xff]  ;;  %v212_v24 = vld [vmem:[%s4855_s0 + $0x560] sm:$0xff] }
  0x82   :  { %2746 = vmatmul.mubr.msk.f32.gmra.mrb[42].mxu0 %vm245_vm1, %v83_v25  ;;  %2893 = vmatmul.mubr.msk.f32.gmra.mrb[42].mxu1 %vm245_vm1, %v181_v26  ;;  %v115_v25 = vld [vmem:[%s4855_s0 + $0x258] sm:$0xff]  ;;  %v213_v26 = vld [vmem:[%s4855_s0 + $0x568] sm:$0xff] }
  0x83   :  { %2748 = vmatprep.mubr.msk.f32.mxu0 %vm245_vm1, %v84_v27  ;;  %2895 = vmatprep.mubr.msk.f32.mxu1 %vm245_vm1, %v182_v28  ;;  %v116_v27 = vld [vmem:[%s4855_s0 + $0x260] sm:$0xff]  ;;  %v214_v28 = vld [vmem:[%s4855_s0 + $0x570] sm:$0xff] }
  0x86   :  { %2749 = vmatmul.mubr.msk.f32.gmra.mrb[44].mxu0 %vm245_vm1, %v85_v29  ;;  %2896 = vmatmul.mubr.msk.f32.gmra.mrb[44].mxu1 %vm245_vm1, %v183_v30  ;;  %v117_v29 = vld [vmem:[%s4855_s0 + $0x268] sm:$0xff]  ;;  %v215_v30 = vld [vmem:[%s4855_s0 + $0x578] sm:$0xff] }
  0x87   :  { %2751 = vmatprep.mubr.msk.f32.mxu0 %vm245_vm1, %v86_v31  ;;  %2898 = vmatprep.mubr.msk.f32.mxu1 %vm245_vm1, %v184_v32  ;;  %v118_v31 = vld [vmem:[%s4855_s0 + $0x270] sm:$0xff]  ;;  %v216_v32 = vld [vmem:[%s4855_s0 + $0x580] sm:$0xff] }
  0x8a   :  { %2752 = vmatmul.mubr.msk.f32.gmra.mrb[46].mxu0 %vm245_vm1, %v87_v33  ;;  %2899 = vmatmul.mubr.msk.f32.gmra.mrb[46].mxu1 %vm245_vm1, %v185_v34  ;;  %v119_v33 = vld [vmem:[%s4855_s0 + $0x278] sm:$0xff]  ;;  %v217_v34 = vld [vmem:[%s4855_s0 + $0x588] sm:$0xff] }
  0x8b   :  { %2754 = vmatprep.mubr.msk.f32.mxu0 %vm245_vm1, %v88_v35  ;;  %2901 = vmatprep.mubr.msk.f32.mxu1 %vm245_vm1, %v186_v36  ;;  %v120_v35 = vld [vmem:[%s4855_s0 + $0x280] sm:$0xff]  ;;  %v218_v36 = vld [vmem:[%s4855_s0 + $0x590] sm:$0xff] }
  0x8e   :  { %2755 = vmatmul.mubr.msk.f32.gmra.mrb[48].mxu0 %vm245_vm1, %v89_v37  ;;  %2902 = vmatmul.mubr.msk.f32.gmra.mrb[48].mxu1 %vm245_vm1, %v187_v38  ;;  %v121_v37 = vld [vmem:[%s4855_s0 + $0x288] sm:$0xff]  ;;  %v219_v38 = vld [vmem:[%s4855_s0 + $0x598] sm:$0xff] }
  0x8f   :  { %2757 = vmatprep.mubr.msk.f32.mxu0 %vm245_vm1, %v90_v39  ;;  %2904 = vmatprep.mubr.msk.f32.mxu1 %vm245_vm1, %v188_v40  ;;  %v122_v39 = vld [vmem:[%s4855_s0 + $0x290] sm:$0xff]  ;;  %v220_v40 = vld [vmem:[%s4855_s0 + $0x5a0] sm:$0xff] }
  0x92   :  { %2758 = vmatmul.mubr.msk.f32.gmra.mrb[50].mxu0 %vm245_vm1, %v91_v41  ;;  %2905 = vmatmul.mubr.msk.f32.gmra.mrb[50].mxu1 %vm245_vm1, %v189_v42  ;;  %v123_v41 = vld [vmem:[%s4855_s0 + $0x298] sm:$0xff]  ;;  %v221_v42 = vld [vmem:[%s4855_s0 + $0x5a8] sm:$0xff] }
  0x93   :  { %2760 = vmatprep.mubr.msk.f32.mxu0 %vm245_vm1, %v92_v43  ;;  %2907 = vmatprep.mubr.msk.f32.mxu1 %vm245_vm1, %v190_v44  ;;  %v124_v43 = vld [vmem:[%s4855_s0 + $0x2a0] sm:$0xff]  ;;  %v222_v44 = vld [vmem:[%s4855_s0 + $0x5b0] sm:$0xff] }
  0x96   :  { %2761 = vmatmul.mubr.msk.f32.gmra.mrb[52].mxu0 %vm245_vm1, %v93_v45  ;;  %2908 = vmatmul.mubr.msk.f32.gmra.mrb[52].mxu1 %vm245_vm1, %v191_v46  ;;  %v125_v45 = vld [vmem:[%s4855_s0 + $0x2a8] sm:$0xff]  ;;  %v223_v46 = vld [vmem:[%s4855_s0 + $0x5b8] sm:$0xff] }
  0x97   :  { %2763 = vmatprep.mubr.msk.f32.mxu0 %vm245_vm1, %v94_v47  ;;  %2910 = vmatprep.mubr.msk.f32.mxu1 %vm245_vm1, %v192_v48  ;;  %v126_v47 = vld [vmem:[%s4855_s0 + $0x2b0] sm:$0xff]  ;;  %v224_v48 = vld [vmem:[%s4855_s0 + $0x5c0] sm:$0xff] }
  0x9a   :  { %2764 = vmatmul.mubr.msk.f32.gmra.mrb[54].mxu0 %vm245_vm1, %v95_v49  ;;  %2911 = vmatmul.mubr.msk.f32.gmra.mrb[54].mxu1 %vm245_vm1, %v193_v50  ;;  %v127_v49 = vld [vmem:[%s4855_s0 + $0x2b8] sm:$0xff]  ;;  %v225_v50 = vld [vmem:[%s4855_s0 + $0x5c8] sm:$0xff] }
  0x9b   :  { %2766 = vmatprep.mubr.msk.f32.mxu0 %vm245_vm1, %v96_v51  ;;  %2913 = vmatprep.mubr.msk.f32.mxu1 %vm245_vm1, %v194_v52  ;;  %v128_v51 = vld [vmem:[%s4855_s0 + $0x2c0] sm:$0xff]  ;;  %v226_v52 = vld [vmem:[%s4855_s0 + $0x5d0] sm:$0xff] }
  0x9e   :  { %2767 = vmatmul.mubr.msk.f32.gmra.mrb[56].mxu0 %vm245_vm1, %v97_v53  ;;  %2914 = vmatmul.mubr.msk.f32.gmra.mrb[56].mxu1 %vm245_vm1, %v195_v54  ;;  %v129_v53 = vld [vmem:[%s4855_s0 + $0x2c8] sm:$0xff]  ;;  %v227_v54 = vld [vmem:[%s4855_s0 + $0x5d8] sm:$0xff] }
  0x9f   :  { %2769 = vmatprep.mubr.msk.f32.mxu0 %vm245_vm1, %v98_v55  ;;  %2916 = vmatprep.mubr.msk.f32.mxu1 %vm245_vm1, %v196_v56  ;;  %v130_v55 = vld [vmem:[%s4855_s0 + $0x2d0] sm:$0xff]  ;;  %v228_v56 = vld [vmem:[%s4855_s0 + $0x5e0] sm:$0xff] }
  0xa2   :  { %2770 = vmatmul.mubr.msk.f32.gmra.mrb[58].mxu0 %vm245_vm1, %v99_v57  ;;  %2917 = vmatmul.mubr.msk.f32.gmra.mrb[58].mxu1 %vm245_vm1, %v197_v58  ;;  %v131_v57 = vld [vmem:[%s4855_s0 + $0x2d8] sm:$0xff]  ;;  %v229_v58 = vld [vmem:[%s4855_s0 + $0x5e8] sm:$0xff] }
  0xa3   :  { %2772 = vmatprep.mubr.msk.f32.mxu0 %vm245_vm1, %v100_v59  ;;  %2919 = vmatprep.mubr.msk.f32.mxu1 %vm245_vm1, %v198_v60  ;;  %v132_v59 = vld [vmem:[%s4855_s0 + $0x2e0] sm:$0xff]  ;;  %v230_v60 = vld [vmem:[%s4855_s0 + $0x5f0] sm:$0xff] }
  0xa6   :  { %2773 = vmatmul.mubr.msk.f32.gmra.mrb[60].mxu0 %vm245_vm1, %v101_v61  ;;  %2920 = vmatmul.mubr.msk.f32.gmra.mrb[60].mxu1 %vm245_vm1, %v199_v62  ;;  %v133_v61 = vld [vmem:[%s4855_s0 + $0x2e8] sm:$0xff]  ;;  %v231_v62 = vld [vmem:[%s4855_s0 + $0x5f8] sm:$0xff] }
  0xa7   :  { %2775 = vmatprep.mubr.msk.f32.mxu0 %vm245_vm1, %v102_v63  ;;  %2922 = vmatprep.mubr.msk.f32.mxu1 %vm245_vm1, %v200_v0  ;;  %v134_v63 = vld [vmem:[%s4855_s0 + $0x2f0] sm:$0xff]  ;;  %v232_v0 = vld [vmem:[%s4855_s0 + $0x600] sm:$0xff] }
  0xaa   :  { %2776 = vmatmul.mubr.msk.f32.gmra.mrb[62].mxu0 %vm245_vm1, %v103_v1  ;;  %2923 = vmatmul.mubr.msk.f32.gmra.mrb[62].mxu1 %vm245_vm1, %v201_v2  ;;  %v135_v1 = vld [vmem:[%s4855_s0 + $0x2f8] sm:$0xff]  ;;  %v233_v2 = vld [vmem:[%s4855_s0 + $0x608] sm:$0xff] }
  0xab   :  { %2778 = vmatprep.mubr.msk.f32.mxu0 %vm245_vm1, %v104_v3  ;;  %2925 = vmatprep.mubr.msk.f32.mxu1 %vm245_vm1, %v202_v4  ;;  %v136_v3 = vld [vmem:[%s4855_s0 + $0x300] sm:$0xff]  ;;  %v234_v4 = vld [vmem:[%s4855_s0 + $0x610] sm:$0xff] }
  0xae   :  { %2779 = vmatmul.mubr.msk.f32.gmra.mrb[64].mxu0 %vm245_vm1, %v105_v5  ;;  %2926 = vmatmul.mubr.msk.f32.gmra.mrb[64].mxu1 %vm245_vm1, %v203_v6  ;;  %v137_v5 = vld [vmem:[%s4855_s0 + $0x308] sm:$0xff]  ;;  %v235_v6 = vld [vmem:[%s4855_s0 + $0x618] sm:$0xff] }
  0xaf   :  { %2781 = vmatprep.mubr.msk.f32.mxu0 %vm245_vm1, %v106_v7  ;;  %2928 = vmatprep.mubr.msk.f32.mxu1 %vm245_vm1, %v204_v8  ;;  %v3871_v7 = vld [vmem:[#allocation4] ss:$0 sm:$0xff] }
  0xb2   :  { %2782 = vmatmul.mubr.msk.f32.gmra.mrb[66].mxu0 %vm245_vm1, %v107_v9  ;;  %2929 = vmatmul.mubr.msk.f32.gmra.mrb[66].mxu1 %vm245_vm1, %v205_v10 }
  0xb3   :  { %2784 = vmatprep.mubr.msk.f32.mxu0 %vm245_vm1, %v108_v11  ;;  %2931 = vmatprep.mubr.msk.f32.mxu1 %vm245_vm1, %v206_v12 }
  0xb6   :  { %2785 = vmatmul.mubr.msk.f32.gmra.mrb[68].mxu0 %vm245_vm1, %v109_v13  ;;  %2932 = vmatmul.mubr.msk.f32.gmra.mrb[68].mxu1 %vm245_vm1, %v207_v14 }
  0xb7   :  { %2787 = vmatprep.mubr.msk.f32.mxu0 %vm245_vm1, %v110_v15  ;;  %2934 = vmatprep.mubr.msk.f32.mxu1 %vm245_vm1, %v208_v16 }
  0xba   :  { %2788 = vmatmul.mubr.msk.f32.gmra.mrb[70].mxu0 %vm245_vm1, %v111_v17  ;;  %2935 = vmatmul.mubr.msk.f32.gmra.mrb[70].mxu1 %vm245_vm1, %v209_v18 }
  0xbb   :  { %2790 = vmatprep.mubr.msk.f32.mxu0 %vm245_vm1, %v112_v19  ;;  %2937 = vmatprep.mubr.msk.f32.mxu1 %vm245_vm1, %v210_v20 }
  0xbe   :  { %2791 = vmatmul.mubr.msk.f32.gmra.mrb[72].mxu0 %vm245_vm1, %v113_v21  ;;  %2938 = vmatmul.mubr.msk.f32.gmra.mrb[72].mxu1 %vm245_vm1, %v211_v22 }
  0xbf   :  { %2793 = vmatprep.mubr.msk.f32.mxu0 %vm245_vm1, %v114_v23  ;;  %2940 = vmatprep.mubr.msk.f32.mxu1 %vm245_vm1, %v212_v24 }
  0xc2   :  { %2794 = vmatmul.mubr.msk.f32.gmra.mrb[74].mxu0 %vm245_vm1, %v115_v25  ;;  %2941 = vmatmul.mubr.msk.f32.gmra.mrb[74].mxu1 %vm245_vm1, %v213_v26 }
  0xc3   :  { %2796 = vmatprep.mubr.msk.f32.mxu0 %vm245_vm1, %v116_v27  ;;  %2943 = vmatprep.mubr.msk.f32.mxu1 %vm245_vm1, %v214_v28 }
  0xc6   :  { %2797 = vmatmul.mubr.msk.f32.gmra.mrb[76].mxu0 %vm245_vm1, %v117_v29  ;;  %2944 = vmatmul.mubr.msk.f32.gmra.mrb[76].mxu1 %vm245_vm1, %v215_v30 }
  0xc7   :  { %2799 = vmatprep.mubr.msk.f32.mxu0 %vm245_vm1, %v118_v31  ;;  %2946 = vmatprep.mubr.msk.f32.mxu1 %vm245_vm1, %v216_v32 }
  0xca   :  { %2800 = vmatmul.mubr.msk.f32.gmra.mrb[78].mxu0 %vm245_vm1, %v119_v33  ;;  %2947 = vmatmul.mubr.msk.f32.gmra.mrb[78].mxu1 %vm245_vm1, %v217_v34 }
  0xcb   :  { %2802 = vmatprep.mubr.msk.f32.mxu0 %vm245_vm1, %v120_v35  ;;  %2949 = vmatprep.mubr.msk.f32.mxu1 %vm245_vm1, %v218_v36 }
  0xce   :  { %2803 = vmatmul.mubr.msk.f32.gmra.mrb[80].mxu0 %vm245_vm1, %v121_v37  ;;  %2950 = vmatmul.mubr.msk.f32.gmra.mrb[80].mxu1 %vm245_vm1, %v219_v38 }
  0xcf   :  { %2805 = vmatprep.mubr.msk.f32.mxu0 %vm245_vm1, %v122_v39  ;;  %2952 = vmatprep.mubr.msk.f32.mxu1 %vm245_vm1, %v220_v40 }
  0xd2   :  { %2806 = vmatmul.mubr.msk.f32.gmra.mrb[82].mxu0 %vm245_vm1, %v123_v41  ;;  %2953 = vmatmul.mubr.msk.f32.gmra.mrb[82].mxu1 %vm245_vm1, %v221_v42 }
  0xd3   :  { %2808 = vmatprep.mubr.msk.f32.mxu0 %vm245_vm1, %v124_v43  ;;  %2955 = vmatprep.mubr.msk.f32.mxu1 %vm245_vm1, %v222_v44 }
  0xd6   :  { %2809 = vmatmul.mubr.msk.f32.gmra.mrb[84].mxu0 %vm245_vm1, %v125_v45  ;;  %2956 = vmatmul.mubr.msk.f32.gmra.mrb[84].mxu1 %vm245_vm1, %v223_v46 }
  0xd7   :  { %2811 = vmatprep.mubr.msk.f32.mxu0 %vm245_vm1, %v126_v47  ;;  %2958 = vmatprep.mubr.msk.f32.mxu1 %vm245_vm1, %v224_v48 }
  0xda   :  { %2812 = vmatmul.mubr.msk.f32.gmra.mrb[86].mxu0 %vm245_vm1, %v127_v49  ;;  %2959 = vmatmul.mubr.msk.f32.gmra.mrb[86].mxu1 %vm245_vm1, %v225_v50 }
  0xdb   :  { %2814 = vmatprep.mubr.msk.f32.mxu0 %vm245_vm1, %v128_v51  ;;  %2961 = vmatprep.mubr.msk.f32.mxu1 %vm245_vm1, %v226_v52 }
  0xde   :  { %2815 = vmatmul.mubr.msk.f32.gmra.mrb[88].mxu0 %vm245_vm1, %v129_v53  ;;  %2962 = vmatmul.mubr.msk.f32.gmra.mrb[88].mxu1 %vm245_vm1, %v227_v54 }
  0xdf   :  { %2817 = vmatprep.mubr.msk.f32.mxu0 %vm245_vm1, %v130_v55  ;;  %2964 = vmatprep.mubr.msk.f32.mxu1 %vm245_vm1, %v228_v56 }
  0xe2   :  { %2818 = vmatmul.mubr.msk.f32.gmra.mrb[90].mxu0 %vm245_vm1, %v131_v57  ;;  %2965 = vmatmul.mubr.msk.f32.gmra.mrb[90].mxu1 %vm245_vm1, %v229_v58 }
  0xe3   :  { %2820 = vmatprep.mubr.msk.f32.mxu0 %vm245_vm1, %v132_v59  ;;  %2967 = vmatprep.mubr.msk.f32.mxu1 %vm245_vm1, %v230_v60 }
  0xe6   :  { %2821 = vmatmul.mubr.msk.f32.gmra.mrb[92].mxu0 %vm245_vm1, %v133_v61  ;;  %2968 = vmatmul.mubr.msk.f32.gmra.mrb[92].mxu1 %vm245_vm1, %v231_v62 }
  0xe7   :  { %2823 = vmatprep.mubr.msk.f32.mxu0 %vm245_vm1, %v134_v63  ;;  %2970 = vmatprep.mubr.msk.f32.mxu1 %vm245_vm1, %v232_v0 }
  0xea   :  { %2824 = vmatmul.mubr.msk.f32.gmra.mrb[94].mxu0 %vm245_vm1, %v135_v1  ;;  %2971 = vmatmul.mubr.msk.f32.gmra.mrb[94].mxu1 %vm245_vm1, %v233_v2 }
  0xeb   :  { %2826 = vmatprep.mubr.msk.f32.mxu0 %vm245_vm1, %v136_v3  ;;  %2973 = vmatprep.mubr.msk.f32.mxu1 %vm245_vm1, %v234_v4 }
  0xee   :  { %2827 = vmatmul.mubr.msk.f32.gmra.mrb[96].mxu0 %vm245_vm1, %v137_v5  ;;  %2974 = vmatmul.mubr.msk.f32.gmra.mrb[96].mxu1 %vm245_vm1, %v235_v6 }
 0x101   :  { %v2684_v8 = vpop.f32.mrb[0].mxu0  ;;  %v2831_v9 = vpop.f32.mrb[0].mxu1 }
 0x102   :  { %v910_v10 = vadd.f32 %v2684_v8, %v3871_v7  ;;  %v1400_v11 = vadd.f32 %v2831_v9, %v3871_v7  ;;  %v904_v12 = vpop.f32.mrb[1].mxu0  ;;  %v1394_v13 = vpop.f32.mrb[1].mxu1 }
 0x103   :  { %v905_v14 = vadd.f32 %v3871_v7, %v904_v12  ;;  %v1395_v15 = vadd.f32 %v3871_v7, %v1394_v13 }
 0x104   :  { %v1884_v16 = vmax.f32 %v910_v10, 0.0  ;;  %v1982_v17 = vmax.f32 %v1400_v11, 0.0 }
 0x105   :  { %v1883_v18 = vmax.f32 %v905_v14, 0.0  ;;  %v1981_v19 = vmax.f32 %v1395_v15, 0.0  ;;  %v2687_v20 = vpop.f32.mrb[2].mxu0  ;;  %v2834_v21 = vpop.f32.mrb[2].mxu1 }
 0x106   :  { %2081 = vst.msk [vmem:[%s4858_s3 + $0x8] sm:$0xff] %vm2079_vm4, %v1884_v16  ;;  %2179 = vst.msk [vmem:[%s4858_s3 + $0x318] sm:$0xff] %vm2079_vm4, %v1982_v17  ;;  %v920_v22 = vadd.f32 %v2687_v20, %v3871_v7  ;;  %v1410_v23 = vadd.f32 %v2834_v21, %v3871_v7  ;;  %v914_v24 = vpop.f32.mrb[3].mxu0  ;;  %v1404_v25 = vpop.f32.mrb[3].mxu1 }
 0x107   :  { %2080 = vst.msk [vmem:[%s4858_s3] sm:$0xff] %vm2079_vm4, %v1883_v18  ;;  %2178 = vst.msk [vmem:[%s4858_s3 + $0x310] sm:$0xff] %vm2079_vm4, %v1981_v19  ;;  %v915_v26 = vadd.f32 %v3871_v7, %v914_v24  ;;  %v1405_v27 = vadd.f32 %v3871_v7, %v1404_v25 }
 0x108   :  { %v1886_v28 = vmax.f32 %v920_v22, 0.0  ;;  %v1984_v29 = vmax.f32 %v1410_v23, 0.0 }
 0x109   :  { %v1885_v30 = vmax.f32 %v915_v26, 0.0  ;;  %v1983_v31 = vmax.f32 %v1405_v27, 0.0  ;;  %v2690_v32 = vpop.f32.mrb[4].mxu0  ;;  %v2837_v33 = vpop.f32.mrb[4].mxu1 }
 0x10a   :  { %2083 = vst.msk [vmem:[%s4858_s3 + $0x18] sm:$0xff] %vm2079_vm4, %v1886_v28  ;;  %2181 = vst.msk [vmem:[%s4858_s3 + $0x328] sm:$0xff] %vm2079_vm4, %v1984_v29  ;;  %v930_v34 = vadd.f32 %v2690_v32, %v3871_v7  ;;  %v1420_v35 = vadd.f32 %v2837_v33, %v3871_v7  ;;  %v924_v36 = vpop.f32.mrb[5].mxu0  ;;  %v1414_v37 = vpop.f32.mrb[5].mxu1 }
 0x10b   :  { %2082 = vst.msk [vmem:[%s4858_s3 + $0x10] sm:$0xff] %vm2079_vm4, %v1885_v30  ;;  %2180 = vst.msk [vmem:[%s4858_s3 + $0x320] sm:$0xff] %vm2079_vm4, %v1983_v31  ;;  %v925_v38 = vadd.f32 %v3871_v7, %v924_v36  ;;  %v1415_v39 = vadd.f32 %v3871_v7, %v1414_v37 }
 0x10c   :  { %v1888_v40 = vmax.f32 %v930_v34, 0.0  ;;  %v1986_v41 = vmax.f32 %v1420_v35, 0.0 }
 0x10d   :  { %v1887_v42 = vmax.f32 %v925_v38, 0.0  ;;  %v1985_v43 = vmax.f32 %v1415_v39, 0.0  ;;  %v2693_v44 = vpop.f32.mrb[6].mxu0  ;;  %v2840_v45 = vpop.f32.mrb[6].mxu1 }
 0x10e   :  { %2085 = vst.msk [vmem:[%s4858_s3 + $0x28] sm:$0xff] %vm2079_vm4, %v1888_v40  ;;  %2183 = vst.msk [vmem:[%s4858_s3 + $0x338] sm:$0xff] %vm2079_vm4, %v1986_v41  ;;  %v940_v46 = vadd.f32 %v2693_v44, %v3871_v7  ;;  %v1430_v47 = vadd.f32 %v2840_v45, %v3871_v7  ;;  %v934_v48 = vpop.f32.mrb[7].mxu0  ;;  %v1424_v49 = vpop.f32.mrb[7].mxu1 }
 0x10f   :  { %2084 = vst.msk [vmem:[%s4858_s3 + $0x20] sm:$0xff] %vm2079_vm4, %v1887_v42  ;;  %2182 = vst.msk [vmem:[%s4858_s3 + $0x330] sm:$0xff] %vm2079_vm4, %v1985_v43  ;;  %v935_v50 = vadd.f32 %v3871_v7, %v934_v48  ;;  %v1425_v51 = vadd.f32 %v3871_v7, %v1424_v49 }
 0x110   :  { %v1890_v52 = vmax.f32 %v940_v46, 0.0  ;;  %v1988_v53 = vmax.f32 %v1430_v47, 0.0 }
 0x111   :  { %v1889_v54 = vmax.f32 %v935_v50, 0.0  ;;  %v1987_v55 = vmax.f32 %v1425_v51, 0.0  ;;  %v2696_v56 = vpop.f32.mrb[8].mxu0  ;;  %v2843_v57 = vpop.f32.mrb[8].mxu1 }
 0x112   :  { %2087 = vst.msk [vmem:[%s4858_s3 + $0x38] sm:$0xff] %vm2079_vm4, %v1890_v52  ;;  %2185 = vst.msk [vmem:[%s4858_s3 + $0x348] sm:$0xff] %vm2079_vm4, %v1988_v53  ;;  %v950_v58 = vadd.f32 %v2696_v56, %v3871_v7  ;;  %v1440_v59 = vadd.f32 %v2843_v57, %v3871_v7  ;;  %v944_v60 = vpop.f32.mrb[9].mxu0  ;;  %v1434_v61 = vpop.f32.mrb[9].mxu1 }
 0x113   :  { %2086 = vst.msk [vmem:[%s4858_s3 + $0x30] sm:$0xff] %vm2079_vm4, %v1889_v54  ;;  %2184 = vst.msk [vmem:[%s4858_s3 + $0x340] sm:$0xff] %vm2079_vm4, %v1987_v55  ;;  %v945_v62 = vadd.f32 %v3871_v7, %v944_v60  ;;  %v1435_v63 = vadd.f32 %v3871_v7, %v1434_v61 }
 0x114   :  { %v1892_v0 = vmax.f32 %v950_v58, 0.0  ;;  %v1990_v1 = vmax.f32 %v1440_v59, 0.0 }
 0x115   :  { %v1891_v2 = vmax.f32 %v945_v62, 0.0  ;;  %v1989_v3 = vmax.f32 %v1435_v63, 0.0  ;;  %v2699_v4 = vpop.f32.mrb[10].mxu0  ;;  %v2846_v5 = vpop.f32.mrb[10].mxu1 }
 0x116   :  { %2089 = vst.msk [vmem:[%s4858_s3 + $0x48] sm:$0xff] %vm2079_vm4, %v1892_v0  ;;  %2187 = vst.msk [vmem:[%s4858_s3 + $0x358] sm:$0xff] %vm2079_vm4, %v1990_v1  ;;  %v960_v6 = vadd.f32 %v2699_v4, %v3871_v7  ;;  %v1450_v8 = vadd.f32 %v2846_v5, %v3871_v7  ;;  %v954_v9 = vpop.f32.mrb[11].mxu0  ;;  %v1444_v10 = vpop.f32.mrb[11].mxu1 }
 0x117   :  { %2088 = vst.msk [vmem:[%s4858_s3 + $0x40] sm:$0xff] %vm2079_vm4, %v1891_v2  ;;  %2186 = vst.msk [vmem:[%s4858_s3 + $0x350] sm:$0xff] %vm2079_vm4, %v1989_v3  ;;  %v955_v11 = vadd.f32 %v3871_v7, %v954_v9  ;;  %v1445_v12 = vadd.f32 %v3871_v7, %v1444_v10 }
 0x118   :  { %v1894_v13 = vmax.f32 %v960_v6, 0.0  ;;  %v1992_v14 = vmax.f32 %v1450_v8, 0.0 }
 0x119   :  { %v1893_v15 = vmax.f32 %v955_v11, 0.0  ;;  %v1991_v16 = vmax.f32 %v1445_v12, 0.0  ;;  %v2702_v17 = vpop.f32.mrb[12].mxu0  ;;  %v2849_v18 = vpop.f32.mrb[12].mxu1 }
 0x11a   :  { %2091 = vst.msk [vmem:[%s4858_s3 + $0x58] sm:$0xff] %vm2079_vm4, %v1894_v13  ;;  %2189 = vst.msk [vmem:[%s4858_s3 + $0x368] sm:$0xff] %vm2079_vm4, %v1992_v14  ;;  %v970_v19 = vadd.f32 %v2702_v17, %v3871_v7  ;;  %v1460_v20 = vadd.f32 %v2849_v18, %v3871_v7  ;;  %v964_v21 = vpop.f32.mrb[13].mxu0  ;;  %v1454_v22 = vpop.f32.mrb[13].mxu1 }
 0x11b   :  { %2090 = vst.msk [vmem:[%s4858_s3 + $0x50] sm:$0xff] %vm2079_vm4, %v1893_v15  ;;  %2188 = vst.msk [vmem:[%s4858_s3 + $0x360] sm:$0xff] %vm2079_vm4, %v1991_v16  ;;  %v965_v23 = vadd.f32 %v3871_v7, %v964_v21  ;;  %v1455_v24 = vadd.f32 %v3871_v7, %v1454_v22 }
 0x11c   :  { %v1896_v25 = vmax.f32 %v970_v19, 0.0  ;;  %v1994_v26 = vmax.f32 %v1460_v20, 0.0 }
 0x11d   :  { %v1895_v27 = vmax.f32 %v965_v23, 0.0  ;;  %v1993_v28 = vmax.f32 %v1455_v24, 0.0  ;;  %v2705_v29 = vpop.f32.mrb[14].mxu0  ;;  %v2852_v30 = vpop.f32.mrb[14].mxu1 }
 0x11e   :  { %2093 = vst.msk [vmem:[%s4858_s3 + $0x68] sm:$0xff] %vm2079_vm4, %v1896_v25  ;;  %2191 = vst.msk [vmem:[%s4858_s3 + $0x378] sm:$0xff] %vm2079_vm4, %v1994_v26  ;;  %v980_v31 = vadd.f32 %v2705_v29, %v3871_v7  ;;  %v1470_v32 = vadd.f32 %v2852_v30, %v3871_v7  ;;  %v974_v33 = vpop.f32.mrb[15].mxu0  ;;  %v1464_v34 = vpop.f32.mrb[15].mxu1 }
 0x11f   :  { %2092 = vst.msk [vmem:[%s4858_s3 + $0x60] sm:$0xff] %vm2079_vm4, %v1895_v27  ;;  %2190 = vst.msk [vmem:[%s4858_s3 + $0x370] sm:$0xff] %vm2079_vm4, %v1993_v28  ;;  %v975_v35 = vadd.f32 %v3871_v7, %v974_v33  ;;  %v1465_v36 = vadd.f32 %v3871_v7, %v1464_v34 }
 0x120   :  { %v1898_v37 = vmax.f32 %v980_v31, 0.0  ;;  %v1996_v38 = vmax.f32 %v1470_v32, 0.0 }
 0x121   :  { %v1897_v39 = vmax.f32 %v975_v35, 0.0  ;;  %v1995_v40 = vmax.f32 %v1465_v36, 0.0  ;;  %v2708_v41 = vpop.f32.mrb[16].mxu0  ;;  %v2855_v42 = vpop.f32.mrb[16].mxu1 }
 0x122   :  { %2095 = vst.msk [vmem:[%s4858_s3 + $0x78] sm:$0xff] %vm2079_vm4, %v1898_v37  ;;  %2193 = vst.msk [vmem:[%s4858_s3 + $0x388] sm:$0xff] %vm2079_vm4, %v1996_v38  ;;  %v990_v43 = vadd.f32 %v2708_v41, %v3871_v7  ;;  %v1480_v44 = vadd.f32 %v2855_v42, %v3871_v7  ;;  %v984_v45 = vpop.f32.mrb[17].mxu0  ;;  %v1474_v46 = vpop.f32.mrb[17].mxu1 }
 0x123   :  { %2094 = vst.msk [vmem:[%s4858_s3 + $0x70] sm:$0xff] %vm2079_vm4, %v1897_v39  ;;  %2192 = vst.msk [vmem:[%s4858_s3 + $0x380] sm:$0xff] %vm2079_vm4, %v1995_v40  ;;  %v985_v47 = vadd.f32 %v3871_v7, %v984_v45  ;;  %v1475_v48 = vadd.f32 %v3871_v7, %v1474_v46 }
 0x124   :  { %v1900_v49 = vmax.f32 %v990_v43, 0.0  ;;  %v1998_v50 = vmax.f32 %v1480_v44, 0.0 }
 0x125   :  { %v1899_v51 = vmax.f32 %v985_v47, 0.0  ;;  %v1997_v52 = vmax.f32 %v1475_v48, 0.0  ;;  %v2711_v53 = vpop.f32.mrb[18].mxu0  ;;  %v2858_v54 = vpop.f32.mrb[18].mxu1 }
 0x126   :  { %2097 = vst.msk [vmem:[%s4858_s3 + $0x88] sm:$0xff] %vm2079_vm4, %v1900_v49  ;;  %2195 = vst.msk [vmem:[%s4858_s3 + $0x398] sm:$0xff] %vm2079_vm4, %v1998_v50  ;;  %v1000_v55 = vadd.f32 %v2711_v53, %v3871_v7  ;;  %v1490_v56 = vadd.f32 %v2858_v54, %v3871_v7  ;;  %v994_v57 = vpop.f32.mrb[19].mxu0  ;;  %v1484_v58 = vpop.f32.mrb[19].mxu1 }
 0x127   :  { %2096 = vst.msk [vmem:[%s4858_s3 + $0x80] sm:$0xff] %vm2079_vm4, %v1899_v51  ;;  %2194 = vst.msk [vmem:[%s4858_s3 + $0x390] sm:$0xff] %vm2079_vm4, %v1997_v52  ;;  %v995_v59 = vadd.f32 %v3871_v7, %v994_v57  ;;  %v1485_v60 = vadd.f32 %v3871_v7, %v1484_v58 }
 0x128   :  { %v1902_v61 = vmax.f32 %v1000_v55, 0.0  ;;  %v2000_v62 = vmax.f32 %v1490_v56, 0.0 }
 0x129   :  { %v1901_v63 = vmax.f32 %v995_v59, 0.0  ;;  %v1999_v0 = vmax.f32 %v1485_v60, 0.0  ;;  %v2714_v1 = vpop.f32.mrb[20].mxu0  ;;  %v2861_v2 = vpop.f32.mrb[20].mxu1 }
 0x12a   :  { %2099 = vst.msk [vmem:[%s4858_s3 + $0x98] sm:$0xff] %vm2079_vm4, %v1902_v61  ;;  %2197 = vst.msk [vmem:[%s4858_s3 + $0x3a8] sm:$0xff] %vm2079_vm4, %v2000_v62  ;;  %v1010_v3 = vadd.f32 %v2714_v1, %v3871_v7  ;;  %v1500_v4 = vadd.f32 %v2861_v2, %v3871_v7  ;;  %v1004_v5 = vpop.f32.mrb[21].mxu0  ;;  %v1494_v6 = vpop.f32.mrb[21].mxu1 }
 0x12b   :  { %2098 = vst.msk [vmem:[%s4858_s3 + $0x90] sm:$0xff] %vm2079_vm4, %v1901_v63  ;;  %2196 = vst.msk [vmem:[%s4858_s3 + $0x3a0] sm:$0xff] %vm2079_vm4, %v1999_v0  ;;  %v1005_v8 = vadd.f32 %v3871_v7, %v1004_v5  ;;  %v1495_v9 = vadd.f32 %v3871_v7, %v1494_v6 }
 0x12c   :  { %v1904_v10 = vmax.f32 %v1010_v3, 0.0  ;;  %v2002_v11 = vmax.f32 %v1500_v4, 0.0 }
 0x12d   :  { %v1903_v12 = vmax.f32 %v1005_v8, 0.0  ;;  %v2001_v13 = vmax.f32 %v1495_v9, 0.0  ;;  %v2717_v14 = vpop.f32.mrb[22].mxu0  ;;  %v2864_v15 = vpop.f32.mrb[22].mxu1 }
 0x12e   :  { %2101 = vst.msk [vmem:[%s4858_s3 + $0xa8] sm:$0xff] %vm2079_vm4, %v1904_v10  ;;  %2199 = vst.msk [vmem:[%s4858_s3 + $0x3b8] sm:$0xff] %vm2079_vm4, %v2002_v11  ;;  %v1020_v16 = vadd.f32 %v2717_v14, %v3871_v7  ;;  %v1510_v17 = vadd.f32 %v2864_v15, %v3871_v7  ;;  %v1014_v18 = vpop.f32.mrb[23].mxu0  ;;  %v1504_v19 = vpop.f32.mrb[23].mxu1 }
 0x12f   :  { %2100 = vst.msk [vmem:[%s4858_s3 + $0xa0] sm:$0xff] %vm2079_vm4, %v1903_v12  ;;  %2198 = vst.msk [vmem:[%s4858_s3 + $0x3b0] sm:$0xff] %vm2079_vm4, %v2001_v13  ;;  %v1015_v20 = vadd.f32 %v3871_v7, %v1014_v18  ;;  %v1505_v21 = vadd.f32 %v3871_v7, %v1504_v19 }
 0x130   :  { %v1906_v22 = vmax.f32 %v1020_v16, 0.0  ;;  %v2004_v23 = vmax.f32 %v1510_v17, 0.0 }
 0x131   :  { %v1905_v24 = vmax.f32 %v1015_v20, 0.0  ;;  %v2003_v25 = vmax.f32 %v1505_v21, 0.0  ;;  %v2720_v26 = vpop.f32.mrb[24].mxu0  ;;  %v2867_v27 = vpop.f32.mrb[24].mxu1 }
 0x132   :  { %2103 = vst.msk [vmem:[%s4858_s3 + $0xb8] sm:$0xff] %vm2079_vm4, %v1906_v22  ;;  %2201 = vst.msk [vmem:[%s4858_s3 + $0x3c8] sm:$0xff] %vm2079_vm4, %v2004_v23  ;;  %v1030_v28 = vadd.f32 %v2720_v26, %v3871_v7  ;;  %v1520_v29 = vadd.f32 %v2867_v27, %v3871_v7  ;;  %v1024_v30 = vpop.f32.mrb[25].mxu0  ;;  %v1514_v31 = vpop.f32.mrb[25].mxu1 }
 0x133   :  { %2102 = vst.msk [vmem:[%s4858_s3 + $0xb0] sm:$0xff] %vm2079_vm4, %v1905_v24  ;;  %2200 = vst.msk [vmem:[%s4858_s3 + $0x3c0] sm:$0xff] %vm2079_vm4, %v2003_v25  ;;  %v1025_v32 = vadd.f32 %v3871_v7, %v1024_v30  ;;  %v1515_v33 = vadd.f32 %v3871_v7, %v1514_v31 }
 0x134   :  { %v1908_v34 = vmax.f32 %v1030_v28, 0.0  ;;  %v2006_v35 = vmax.f32 %v1520_v29, 0.0 }
 0x135   :  { %v1907_v36 = vmax.f32 %v1025_v32, 0.0  ;;  %v2005_v37 = vmax.f32 %v1515_v33, 0.0  ;;  %v2723_v38 = vpop.f32.mrb[26].mxu0  ;;  %v2870_v39 = vpop.f32.mrb[26].mxu1 }
 0x136   :  { %2105 = vst.msk [vmem:[%s4858_s3 + $0xc8] sm:$0xff] %vm2079_vm4, %v1908_v34  ;;  %2203 = vst.msk [vmem:[%s4858_s3 + $0x3d8] sm:$0xff] %vm2079_vm4, %v2006_v35  ;;  %v1040_v40 = vadd.f32 %v2723_v38, %v3871_v7  ;;  %v1530_v41 = vadd.f32 %v2870_v39, %v3871_v7  ;;  %v1034_v42 = vpop.f32.mrb[27].mxu0  ;;  %v1524_v43 = vpop.f32.mrb[27].mxu1 }
 0x137   :  { %2104 = vst.msk [vmem:[%s4858_s3 + $0xc0] sm:$0xff] %vm2079_vm4, %v1907_v36  ;;  %2202 = vst.msk [vmem:[%s4858_s3 + $0x3d0] sm:$0xff] %vm2079_vm4, %v2005_v37  ;;  %v1035_v44 = vadd.f32 %v3871_v7, %v1034_v42  ;;  %v1525_v45 = vadd.f32 %v3871_v7, %v1524_v43 }
 0x138   :  { %v1910_v46 = vmax.f32 %v1040_v40, 0.0  ;;  %v2008_v47 = vmax.f32 %v1530_v41, 0.0 }
 0x139   :  { %v1909_v48 = vmax.f32 %v1035_v44, 0.0  ;;  %v2007_v49 = vmax.f32 %v1525_v45, 0.0  ;;  %v2726_v50 = vpop.f32.mrb[28].mxu0  ;;  %v2873_v51 = vpop.f32.mrb[28].mxu1 }
 0x13a   :  { %2107 = vst.msk [vmem:[%s4858_s3 + $0xd8] sm:$0xff] %vm2079_vm4, %v1910_v46  ;;  %2205 = vst.msk [vmem:[%s4858_s3 + $0x3e8] sm:$0xff] %vm2079_vm4, %v2008_v47  ;;  %v1050_v52 = vadd.f32 %v2726_v50, %v3871_v7  ;;  %v1540_v53 = vadd.f32 %v2873_v51, %v3871_v7  ;;  %v1044_v54 = vpop.f32.mrb[29].mxu0  ;;  %v1534_v55 = vpop.f32.mrb[29].mxu1 }
 0x13b   :  { %2106 = vst.msk [vmem:[%s4858_s3 + $0xd0] sm:$0xff] %vm2079_vm4, %v1909_v48  ;;  %2204 = vst.msk [vmem:[%s4858_s3 + $0x3e0] sm:$0xff] %vm2079_vm4, %v2007_v49  ;;  %v1045_v56 = vadd.f32 %v3871_v7, %v1044_v54  ;;  %v1535_v57 = vadd.f32 %v3871_v7, %v1534_v55 }
 0x13c   :  { %v1912_v58 = vmax.f32 %v1050_v52, 0.0  ;;  %v2010_v59 = vmax.f32 %v1540_v53, 0.0 }
 0x13d   :  { %v1911_v60 = vmax.f32 %v1045_v56, 0.0  ;;  %v2009_v61 = vmax.f32 %v1535_v57, 0.0  ;;  %v2729_v62 = vpop.f32.mrb[30].mxu0  ;;  %v2876_v63 = vpop.f32.mrb[30].mxu1 }
 0x13e   :  { %2109 = vst.msk [vmem:[%s4858_s3 + $0xe8] sm:$0xff] %vm2079_vm4, %v1912_v58  ;;  %2207 = vst.msk [vmem:[%s4858_s3 + $0x3f8] sm:$0xff] %vm2079_vm4, %v2010_v59  ;;  %v1060_v0 = vadd.f32 %v2729_v62, %v3871_v7  ;;  %v1550_v1 = vadd.f32 %v2876_v63, %v3871_v7  ;;  %v1054_v2 = vpop.f32.mrb[31].mxu0  ;;  %v1544_v3 = vpop.f32.mrb[31].mxu1 }
 0x13f   :  { %2108 = vst.msk [vmem:[%s4858_s3 + $0xe0] sm:$0xff] %vm2079_vm4, %v1911_v60  ;;  %2206 = vst.msk [vmem:[%s4858_s3 + $0x3f0] sm:$0xff] %vm2079_vm4, %v2009_v61  ;;  %v1055_v4 = vadd.f32 %v3871_v7, %v1054_v2  ;;  %v1545_v5 = vadd.f32 %v3871_v7, %v1544_v3 }
 0x140   :  { %v1914_v6 = vmax.f32 %v1060_v0, 0.0  ;;  %v2012_v8 = vmax.f32 %v1550_v1, 0.0 }
 0x141   :  { %v1913_v9 = vmax.f32 %v1055_v4, 0.0  ;;  %v2011_v10 = vmax.f32 %v1545_v5, 0.0  ;;  %v2732_v11 = vpop.f32.mrb[32].mxu0  ;;  %v2879_v12 = vpop.f32.mrb[32].mxu1 }
 0x142   :  { %2111 = vst.msk [vmem:[%s4858_s3 + $0xf8] sm:$0xff] %vm2079_vm4, %v1914_v6  ;;  %2209 = vst.msk [vmem:[%s4858_s3 + $0x408] sm:$0xff] %vm2079_vm4, %v2012_v8  ;;  %v1070_v13 = vadd.f32 %v2732_v11, %v3871_v7  ;;  %v1560_v14 = vadd.f32 %v2879_v12, %v3871_v7  ;;  %v1064_v15 = vpop.f32.mrb[33].mxu0  ;;  %v1554_v16 = vpop.f32.mrb[33].mxu1 }
 0x143   :  { %2110 = vst.msk [vmem:[%s4858_s3 + $0xf0] sm:$0xff] %vm2079_vm4, %v1913_v9  ;;  %2208 = vst.msk [vmem:[%s4858_s3 + $0x400] sm:$0xff] %vm2079_vm4, %v2011_v10  ;;  %v1065_v17 = vadd.f32 %v3871_v7, %v1064_v15  ;;  %v1555_v18 = vadd.f32 %v3871_v7, %v1554_v16 }
 0x144   :  { %v1916_v19 = vmax.f32 %v1070_v13, 0.0  ;;  %v2014_v20 = vmax.f32 %v1560_v14, 0.0 }
 0x145   :  { %v1915_v21 = vmax.f32 %v1065_v17, 0.0  ;;  %v2013_v22 = vmax.f32 %v1555_v18, 0.0  ;;  %v2735_v23 = vpop.f32.mrb[34].mxu0  ;;  %v2882_v24 = vpop.f32.mrb[34].mxu1 }
 0x146   :  { %2113 = vst.msk [vmem:[%s4858_s3 + $0x108] sm:$0xff] %vm2079_vm4, %v1916_v19  ;;  %2211 = vst.msk [vmem:[%s4858_s3 + $0x418] sm:$0xff] %vm2079_vm4, %v2014_v20  ;;  %v1080_v25 = vadd.f32 %v2735_v23, %v3871_v7  ;;  %v1570_v26 = vadd.f32 %v2882_v24, %v3871_v7  ;;  %v1074_v27 = vpop.f32.mrb[35].mxu0  ;;  %v1564_v28 = vpop.f32.mrb[35].mxu1 }
 0x147   :  { %2112 = vst.msk [vmem:[%s4858_s3 + $0x100] sm:$0xff] %vm2079_vm4, %v1915_v21  ;;  %2210 = vst.msk [vmem:[%s4858_s3 + $0x410] sm:$0xff] %vm2079_vm4, %v2013_v22  ;;  %v1075_v29 = vadd.f32 %v3871_v7, %v1074_v27  ;;  %v1565_v30 = vadd.f32 %v3871_v7, %v1564_v28 }
 0x148   :  { %v1918_v31 = vmax.f32 %v1080_v25, 0.0  ;;  %v2016_v32 = vmax.f32 %v1570_v26, 0.0 }
 0x149   :  { %v1917_v33 = vmax.f32 %v1075_v29, 0.0  ;;  %v2015_v34 = vmax.f32 %v1565_v30, 0.0  ;;  %v2738_v35 = vpop.f32.mrb[36].mxu0  ;;  %v2885_v36 = vpop.f32.mrb[36].mxu1 }
 0x14a   :  { %2115 = vst.msk [vmem:[%s4858_s3 + $0x118] sm:$0xff] %vm2079_vm4, %v1918_v31  ;;  %2213 = vst.msk [vmem:[%s4858_s3 + $0x428] sm:$0xff] %vm2079_vm4, %v2016_v32  ;;  %v1090_v37 = vadd.f32 %v2738_v35, %v3871_v7  ;;  %v1580_v38 = vadd.f32 %v2885_v36, %v3871_v7  ;;  %v1084_v39 = vpop.f32.mrb[37].mxu0  ;;  %v1574_v40 = vpop.f32.mrb[37].mxu1 }
 0x14b   :  { %2114 = vst.msk [vmem:[%s4858_s3 + $0x110] sm:$0xff] %vm2079_vm4, %v1917_v33  ;;  %2212 = vst.msk [vmem:[%s4858_s3 + $0x420] sm:$0xff] %vm2079_vm4, %v2015_v34  ;;  %v1085_v41 = vadd.f32 %v3871_v7, %v1084_v39  ;;  %v1575_v42 = vadd.f32 %v3871_v7, %v1574_v40 }
 0x14c   :  { %v1920_v43 = vmax.f32 %v1090_v37, 0.0  ;;  %v2018_v44 = vmax.f32 %v1580_v38, 0.0 }
 0x14d   :  { %v1919_v45 = vmax.f32 %v1085_v41, 0.0  ;;  %v2017_v46 = vmax.f32 %v1575_v42, 0.0  ;;  %v2741_v47 = vpop.f32.mrb[38].mxu0  ;;  %v2888_v48 = vpop.f32.mrb[38].mxu1 }
 0x14e   :  { %2117 = vst.msk [vmem:[%s4858_s3 + $0x128] sm:$0xff] %vm2079_vm4, %v1920_v43  ;;  %2215 = vst.msk [vmem:[%s4858_s3 + $0x438] sm:$0xff] %vm2079_vm4, %v2018_v44  ;;  %v1100_v49 = vadd.f32 %v2741_v47, %v3871_v7  ;;  %v1590_v50 = vadd.f32 %v2888_v48, %v3871_v7  ;;  %v1094_v51 = vpop.f32.mrb[39].mxu0  ;;  %v1584_v52 = vpop.f32.mrb[39].mxu1 }
 0x14f   :  { %2116 = vst.msk [vmem:[%s4858_s3 + $0x120] sm:$0xff] %vm2079_vm4, %v1919_v45  ;;  %2214 = vst.msk [vmem:[%s4858_s3 + $0x430] sm:$0xff] %vm2079_vm4, %v2017_v46  ;;  %v1095_v53 = vadd.f32 %v3871_v7, %v1094_v51  ;;  %v1585_v54 = vadd.f32 %v3871_v7, %v1584_v52 }
 0x150   :  { %v1922_v55 = vmax.f32 %v1100_v49, 0.0  ;;  %v2020_v56 = vmax.f32 %v1590_v50, 0.0 }
 0x151   :  { %v1921_v57 = vmax.f32 %v1095_v53, 0.0  ;;  %v2019_v58 = vmax.f32 %v1585_v54, 0.0  ;;  %v2744_v59 = vpop.f32.mrb[40].mxu0  ;;  %v2891_v60 = vpop.f32.mrb[40].mxu1 }
 0x152   :  { %2119 = vst.msk [vmem:[%s4858_s3 + $0x138] sm:$0xff] %vm2079_vm4, %v1922_v55  ;;  %2217 = vst.msk [vmem:[%s4858_s3 + $0x448] sm:$0xff] %vm2079_vm4, %v2020_v56  ;;  %v1110_v61 = vadd.f32 %v2744_v59, %v3871_v7  ;;  %v1600_v62 = vadd.f32 %v2891_v60, %v3871_v7  ;;  %v1104_v63 = vpop.f32.mrb[41].mxu0  ;;  %v1594_v0 = vpop.f32.mrb[41].mxu1 }
 0x153   :  { %2118 = vst.msk [vmem:[%s4858_s3 + $0x130] sm:$0xff] %vm2079_vm4, %v1921_v57  ;;  %2216 = vst.msk [vmem:[%s4858_s3 + $0x440] sm:$0xff] %vm2079_vm4, %v2019_v58  ;;  %v1105_v1 = vadd.f32 %v3871_v7, %v1104_v63  ;;  %v1595_v2 = vadd.f32 %v3871_v7, %v1594_v0 }
 0x154   :  { %v1924_v3 = vmax.f32 %v1110_v61, 0.0  ;;  %v2022_v4 = vmax.f32 %v1600_v62, 0.0 }
 0x155   :  { %v1923_v5 = vmax.f32 %v1105_v1, 0.0  ;;  %v2021_v6 = vmax.f32 %v1595_v2, 0.0  ;;  %v2747_v8 = vpop.f32.mrb[42].mxu0  ;;  %v2894_v9 = vpop.f32.mrb[42].mxu1 }
 0x156   :  { %2121 = vst.msk [vmem:[%s4858_s3 + $0x148] sm:$0xff] %vm2079_vm4, %v1924_v3  ;;  %2219 = vst.msk [vmem:[%s4858_s3 + $0x458] sm:$0xff] %vm2079_vm4, %v2022_v4  ;;  %v1120_v10 = vadd.f32 %v2747_v8, %v3871_v7  ;;  %v1610_v11 = vadd.f32 %v2894_v9, %v3871_v7  ;;  %v1114_v12 = vpop.f32.mrb[43].mxu0  ;;  %v1604_v13 = vpop.f32.mrb[43].mxu1 }
 0x157   :  { %2120 = vst.msk [vmem:[%s4858_s3 + $0x140] sm:$0xff] %vm2079_vm4, %v1923_v5  ;;  %2218 = vst.msk [vmem:[%s4858_s3 + $0x450] sm:$0xff] %vm2079_vm4, %v2021_v6  ;;  %v1115_v14 = vadd.f32 %v3871_v7, %v1114_v12  ;;  %v1605_v15 = vadd.f32 %v3871_v7, %v1604_v13 }
 0x158   :  { %v1926_v16 = vmax.f32 %v1120_v10, 0.0  ;;  %v2024_v17 = vmax.f32 %v1610_v11, 0.0 }
 0x159   :  { %v1925_v18 = vmax.f32 %v1115_v14, 0.0  ;;  %v2023_v19 = vmax.f32 %v1605_v15, 0.0  ;;  %v2750_v20 = vpop.f32.mrb[44].mxu0  ;;  %v2897_v21 = vpop.f32.mrb[44].mxu1 }
 0x15a   :  { %2123 = vst.msk [vmem:[%s4858_s3 + $0x158] sm:$0xff] %vm2079_vm4, %v1926_v16  ;;  %2221 = vst.msk [vmem:[%s4858_s3 + $0x468] sm:$0xff] %vm2079_vm4, %v2024_v17  ;;  %v1130_v22 = vadd.f32 %v2750_v20, %v3871_v7  ;;  %v1620_v23 = vadd.f32 %v2897_v21, %v3871_v7  ;;  %v1124_v24 = vpop.f32.mrb[45].mxu0  ;;  %v1614_v25 = vpop.f32.mrb[45].mxu1 }
 0x15b   :  { %2122 = vst.msk [vmem:[%s4858_s3 + $0x150] sm:$0xff] %vm2079_vm4, %v1925_v18  ;;  %2220 = vst.msk [vmem:[%s4858_s3 + $0x460] sm:$0xff] %vm2079_vm4, %v2023_v19  ;;  %v1125_v26 = vadd.f32 %v3871_v7, %v1124_v24  ;;  %v1615_v27 = vadd.f32 %v3871_v7, %v1614_v25 }
 0x15c   :  { %v1928_v28 = vmax.f32 %v1130_v22, 0.0  ;;  %v2026_v29 = vmax.f32 %v1620_v23, 0.0 }
 0x15d   :  { %v1927_v30 = vmax.f32 %v1125_v26, 0.0  ;;  %v2025_v31 = vmax.f32 %v1615_v27, 0.0  ;;  %v2753_v32 = vpop.f32.mrb[46].mxu0  ;;  %v2900_v33 = vpop.f32.mrb[46].mxu1 }
 0x15e   :  { %2125 = vst.msk [vmem:[%s4858_s3 + $0x168] sm:$0xff] %vm2079_vm4, %v1928_v28  ;;  %2223 = vst.msk [vmem:[%s4858_s3 + $0x478] sm:$0xff] %vm2079_vm4, %v2026_v29  ;;  %v1140_v34 = vadd.f32 %v2753_v32, %v3871_v7  ;;  %v1630_v35 = vadd.f32 %v2900_v33, %v3871_v7  ;;  %v1134_v36 = vpop.f32.mrb[47].mxu0  ;;  %v1624_v37 = vpop.f32.mrb[47].mxu1 }
 0x15f   :  { %2124 = vst.msk [vmem:[%s4858_s3 + $0x160] sm:$0xff] %vm2079_vm4, %v1927_v30  ;;  %2222 = vst.msk [vmem:[%s4858_s3 + $0x470] sm:$0xff] %vm2079_vm4, %v2025_v31  ;;  %v1135_v38 = vadd.f32 %v3871_v7, %v1134_v36  ;;  %v1625_v39 = vadd.f32 %v3871_v7, %v1624_v37 }
 0x160   :  { %v1930_v40 = vmax.f32 %v1140_v34, 0.0  ;;  %v2028_v41 = vmax.f32 %v1630_v35, 0.0 }
 0x161   :  { %v1929_v42 = vmax.f32 %v1135_v38, 0.0  ;;  %v2027_v43 = vmax.f32 %v1625_v39, 0.0  ;;  %v2756_v44 = vpop.f32.mrb[48].mxu0  ;;  %v2903_v45 = vpop.f32.mrb[48].mxu1 }
 0x162   :  { %2127 = vst.msk [vmem:[%s4858_s3 + $0x178] sm:$0xff] %vm2079_vm4, %v1930_v40  ;;  %2225 = vst.msk [vmem:[%s4858_s3 + $0x488] sm:$0xff] %vm2079_vm4, %v2028_v41  ;;  %v1150_v46 = vadd.f32 %v2756_v44, %v3871_v7  ;;  %v1640_v47 = vadd.f32 %v2903_v45, %v3871_v7  ;;  %v1144_v48 = vpop.f32.mrb[49].mxu0  ;;  %v1634_v49 = vpop.f32.mrb[49].mxu1 }
 0x163   :  { %2126 = vst.msk [vmem:[%s4858_s3 + $0x170] sm:$0xff] %vm2079_vm4, %v1929_v42  ;;  %2224 = vst.msk [vmem:[%s4858_s3 + $0x480] sm:$0xff] %vm2079_vm4, %v2027_v43  ;;  %v1145_v50 = vadd.f32 %v3871_v7, %v1144_v48  ;;  %v1635_v51 = vadd.f32 %v3871_v7, %v1634_v49 }
 0x164   :  { %v1932_v52 = vmax.f32 %v1150_v46, 0.0  ;;  %v2030_v53 = vmax.f32 %v1640_v47, 0.0 }
 0x165   :  { %v1931_v54 = vmax.f32 %v1145_v50, 0.0  ;;  %v2029_v55 = vmax.f32 %v1635_v51, 0.0  ;;  %v2759_v56 = vpop.f32.mrb[50].mxu0  ;;  %v2906_v57 = vpop.f32.mrb[50].mxu1 }
 0x166   :  { %2129 = vst.msk [vmem:[%s4858_s3 + $0x188] sm:$0xff] %vm2079_vm4, %v1932_v52  ;;  %2227 = vst.msk [vmem:[%s4858_s3 + $0x498] sm:$0xff] %vm2079_vm4, %v2030_v53  ;;  %v1160_v58 = vadd.f32 %v2759_v56, %v3871_v7  ;;  %v1650_v59 = vadd.f32 %v2906_v57, %v3871_v7  ;;  %v1154_v60 = vpop.f32.mrb[51].mxu0  ;;  %v1644_v61 = vpop.f32.mrb[51].mxu1 }
 0x167   :  { %2128 = vst.msk [vmem:[%s4858_s3 + $0x180] sm:$0xff] %vm2079_vm4, %v1931_v54  ;;  %2226 = vst.msk [vmem:[%s4858_s3 + $0x490] sm:$0xff] %vm2079_vm4, %v2029_v55  ;;  %v1155_v62 = vadd.f32 %v3871_v7, %v1154_v60  ;;  %v1645_v63 = vadd.f32 %v3871_v7, %v1644_v61 }
 0x168   :  { %v1934_v0 = vmax.f32 %v1160_v58, 0.0  ;;  %v2032_v1 = vmax.f32 %v1650_v59, 0.0 }
 0x169   :  { %v1933_v2 = vmax.f32 %v1155_v62, 0.0  ;;  %v2031_v3 = vmax.f32 %v1645_v63, 0.0  ;;  %v2762_v4 = vpop.f32.mrb[52].mxu0  ;;  %v2909_v5 = vpop.f32.mrb[52].mxu1 }
 0x16a   :  { %2131 = vst.msk [vmem:[%s4858_s3 + $0x198] sm:$0xff] %vm2079_vm4, %v1934_v0  ;;  %2229 = vst.msk [vmem:[%s4858_s3 + $0x4a8] sm:$0xff] %vm2079_vm4, %v2032_v1  ;;  %v1170_v6 = vadd.f32 %v2762_v4, %v3871_v7  ;;  %v1660_v8 = vadd.f32 %v2909_v5, %v3871_v7  ;;  %v1164_v9 = vpop.f32.mrb[53].mxu0  ;;  %v1654_v10 = vpop.f32.mrb[53].mxu1 }
 0x16b   :  { %2130 = vst.msk [vmem:[%s4858_s3 + $0x190] sm:$0xff] %vm2079_vm4, %v1933_v2  ;;  %2228 = vst.msk [vmem:[%s4858_s3 + $0x4a0] sm:$0xff] %vm2079_vm4, %v2031_v3  ;;  %v1165_v11 = vadd.f32 %v3871_v7, %v1164_v9  ;;  %v1655_v12 = vadd.f32 %v3871_v7, %v1654_v10 }
 0x16c   :  { %v1936_v13 = vmax.f32 %v1170_v6, 0.0  ;;  %v2034_v14 = vmax.f32 %v1660_v8, 0.0 }
 0x16d   :  { %v1935_v15 = vmax.f32 %v1165_v11, 0.0  ;;  %v2033_v16 = vmax.f32 %v1655_v12, 0.0  ;;  %v2765_v17 = vpop.f32.mrb[54].mxu0  ;;  %v2912_v18 = vpop.f32.mrb[54].mxu1 }
 0x16e   :  { %2133 = vst.msk [vmem:[%s4858_s3 + $0x1a8] sm:$0xff] %vm2079_vm4, %v1936_v13  ;;  %2231 = vst.msk [vmem:[%s4858_s3 + $0x4b8] sm:$0xff] %vm2079_vm4, %v2034_v14  ;;  %v1180_v19 = vadd.f32 %v2765_v17, %v3871_v7  ;;  %v1670_v20 = vadd.f32 %v2912_v18, %v3871_v7  ;;  %v1174_v21 = vpop.f32.mrb[55].mxu0  ;;  %v1664_v22 = vpop.f32.mrb[55].mxu1 }
 0x16f   :  { %2132 = vst.msk [vmem:[%s4858_s3 + $0x1a0] sm:$0xff] %vm2079_vm4, %v1935_v15  ;;  %2230 = vst.msk [vmem:[%s4858_s3 + $0x4b0] sm:$0xff] %vm2079_vm4, %v2033_v16  ;;  %v1175_v23 = vadd.f32 %v3871_v7, %v1174_v21  ;;  %v1665_v24 = vadd.f32 %v3871_v7, %v1664_v22  ;;  %v4505_v16 = vld [vmem:[#allocation4] ss:$0 sm:$0xff] }
 0x170   :  { %v1938_v25 = vmax.f32 %v1180_v19, 0.0  ;;  %v2036_v26 = vmax.f32 %v1670_v20, 0.0 }
 0x171   :  { %v1937_v27 = vmax.f32 %v1175_v23, 0.0  ;;  %v2035_v28 = vmax.f32 %v1665_v24, 0.0  ;;  %v2768_v29 = vpop.f32.mrb[56].mxu0  ;;  %v2915_v30 = vpop.f32.mrb[56].mxu1 }
 0x172   :  { %2135 = vst.msk [vmem:[%s4858_s3 + $0x1b8] sm:$0xff] %vm2079_vm4, %v1938_v25  ;;  %2233 = vst.msk [vmem:[%s4858_s3 + $0x4c8] sm:$0xff] %vm2079_vm4, %v2036_v26  ;;  %v1190_v31 = vadd.f32 %v2768_v29, %v3871_v7  ;;  %v1680_v32 = vadd.f32 %v2915_v30, %v3871_v7  ;;  %v1184_v33 = vpop.f32.mrb[57].mxu0  ;;  %v1674_v34 = vpop.f32.mrb[57].mxu1 }
 0x173   :  { %2134 = vst.msk [vmem:[%s4858_s3 + $0x1b0] sm:$0xff] %vm2079_vm4, %v1937_v27  ;;  %2232 = vst.msk [vmem:[%s4858_s3 + $0x4c0] sm:$0xff] %vm2079_vm4, %v2035_v28  ;;  %v1185_v35 = vadd.f32 %v3871_v7, %v1184_v33  ;;  %v1675_v36 = vadd.f32 %v3871_v7, %v1674_v34 }
 0x174   :  { %v1940_v37 = vmax.f32 %v1190_v31, 0.0  ;;  %v2038_v38 = vmax.f32 %v1680_v32, 0.0 }
 0x175   :  { %v1939_v39 = vmax.f32 %v1185_v35, 0.0  ;;  %v2037_v40 = vmax.f32 %v1675_v36, 0.0  ;;  %v2771_v41 = vpop.f32.mrb[58].mxu0  ;;  %v2918_v42 = vpop.f32.mrb[58].mxu1 }
 0x176   :  { %2137 = vst.msk [vmem:[%s4858_s3 + $0x1c8] sm:$0xff] %vm2079_vm4, %v1940_v37  ;;  %2235 = vst.msk [vmem:[%s4858_s3 + $0x4d8] sm:$0xff] %vm2079_vm4, %v2038_v38  ;;  %v1200_v43 = vadd.f32 %v2771_v41, %v3871_v7  ;;  %v1690_v44 = vadd.f32 %v2918_v42, %v3871_v7  ;;  %v1194_v45 = vpop.f32.mrb[59].mxu0  ;;  %v1684_v46 = vpop.f32.mrb[59].mxu1 }
 0x177   :  { %2136 = vst.msk [vmem:[%s4858_s3 + $0x1c0] sm:$0xff] %vm2079_vm4, %v1939_v39  ;;  %2234 = vst.msk [vmem:[%s4858_s3 + $0x4d0] sm:$0xff] %vm2079_vm4, %v2037_v40  ;;  %v1195_v47 = vadd.f32 %v3871_v7, %v1194_v45  ;;  %v1685_v48 = vadd.f32 %v3871_v7, %v1684_v46 }
 0x178   :  { %v1942_v49 = vmax.f32 %v1200_v43, 0.0  ;;  %v2040_v50 = vmax.f32 %v1690_v44, 0.0 }
 0x179   :  { %v1941_v51 = vmax.f32 %v1195_v47, 0.0  ;;  %v2039_v52 = vmax.f32 %v1685_v48, 0.0  ;;  %v2774_v53 = vpop.f32.mrb[60].mxu0  ;;  %v2921_v54 = vpop.f32.mrb[60].mxu1 }
 0x17a   :  { %2139 = vst.msk [vmem:[%s4858_s3 + $0x1d8] sm:$0xff] %vm2079_vm4, %v1942_v49  ;;  %2237 = vst.msk [vmem:[%s4858_s3 + $0x4e8] sm:$0xff] %vm2079_vm4, %v2040_v50  ;;  %v1210_v55 = vadd.f32 %v2774_v53, %v3871_v7  ;;  %v1700_v56 = vadd.f32 %v2921_v54, %v3871_v7  ;;  %v1204_v57 = vpop.f32.mrb[61].mxu0  ;;  %v1694_v58 = vpop.f32.mrb[61].mxu1 }
 0x17b   :  { %2138 = vst.msk [vmem:[%s4858_s3 + $0x1d0] sm:$0xff] %vm2079_vm4, %v1941_v51  ;;  %2236 = vst.msk [vmem:[%s4858_s3 + $0x4e0] sm:$0xff] %vm2079_vm4, %v2039_v52  ;;  %v1205_v59 = vadd.f32 %v3871_v7, %v1204_v57  ;;  %v1695_v60 = vadd.f32 %v3871_v7, %v1694_v58 }
 0x17c   :  { %v1944_v61 = vmax.f32 %v1210_v55, 0.0  ;;  %v2042_v62 = vmax.f32 %v1700_v56, 0.0 }
 0x17d   :  { %v1943_v63 = vmax.f32 %v1205_v59, 0.0  ;;  %v2041_v0 = vmax.f32 %v1695_v60, 0.0  ;;  %v2777_v1 = vpop.f32.mrb[62].mxu0  ;;  %v2924_v2 = vpop.f32.mrb[62].mxu1 }
 0x17e   :  { %2141 = vst.msk [vmem:[%s4858_s3 + $0x1e8] sm:$0xff] %vm2079_vm4, %v1944_v61  ;;  %2239 = vst.msk [vmem:[%s4858_s3 + $0x4f8] sm:$0xff] %vm2079_vm4, %v2042_v62  ;;  %v1220_v3 = vadd.f32 %v2777_v1, %v3871_v7  ;;  %v1710_v4 = vadd.f32 %v2924_v2, %v3871_v7  ;;  %v1214_v5 = vpop.f32.mrb[63].mxu0  ;;  %v1704_v6 = vpop.f32.mrb[63].mxu1 }
 0x17f   :  { %2140 = vst.msk [vmem:[%s4858_s3 + $0x1e0] sm:$0xff] %vm2079_vm4, %v1943_v63  ;;  %2238 = vst.msk [vmem:[%s4858_s3 + $0x4f0] sm:$0xff] %vm2079_vm4, %v2041_v0  ;;  %v1215_v8 = vadd.f32 %v3871_v7, %v1214_v5  ;;  %v1705_v9 = vadd.f32 %v3871_v7, %v1704_v6 }
 0x180   :  { %v1946_v10 = vmax.f32 %v1220_v3, 0.0  ;;  %v2044_v11 = vmax.f32 %v1710_v4, 0.0 }
 0x181   :  { %v1945_v12 = vmax.f32 %v1215_v8, 0.0  ;;  %v2043_v13 = vmax.f32 %v1705_v9, 0.0  ;;  %v2780_v14 = vpop.f32.mrb[64].mxu0  ;;  %v2927_v15 = vpop.f32.mrb[64].mxu1 }
 0x182   :  { %2143 = vst.msk [vmem:[%s4858_s3 + $0x1f8] sm:$0xff] %vm2079_vm4, %v1946_v10  ;;  %2241 = vst.msk [vmem:[%s4858_s3 + $0x508] sm:$0xff] %vm2079_vm4, %v2044_v11  ;;  %v1230_v7 = vadd.f32 %v4505_v16, %v2780_v14  ;;  %v1720_v17 = vadd.f32 %v4505_v16, %v2927_v15  ;;  %v1224_v18 = vpop.f32.mrb[65].mxu0  ;;  %v1714_v19 = vpop.f32.mrb[65].mxu1 }
 0x183   :  { %2142 = vst.msk [vmem:[%s4858_s3 + $0x1f0] sm:$0xff] %vm2079_vm4, %v1945_v12  ;;  %2240 = vst.msk [vmem:[%s4858_s3 + $0x500] sm:$0xff] %vm2079_vm4, %v2043_v13  ;;  %v1225_v20 = vadd.f32 %v4505_v16, %v1224_v18  ;;  %v1715_v21 = vadd.f32 %v4505_v16, %v1714_v19 }
 0x184   :  { %v1948_v22 = vmax.f32 %v1230_v7, 0.0  ;;  %v2046_v23 = vmax.f32 %v1720_v17, 0.0 }
 0x185   :  { %v1947_v24 = vmax.f32 %v1225_v20, 0.0  ;;  %v2045_v25 = vmax.f32 %v1715_v21, 0.0  ;;  %v2783_v26 = vpop.f32.mrb[66].mxu0  ;;  %v2930_v27 = vpop.f32.mrb[66].mxu1 }
 0x186   :  { %2145 = vst.msk [vmem:[%s4858_s3 + $0x208] sm:$0xff] %vm2079_vm4, %v1948_v22  ;;  %2243 = vst.msk [vmem:[%s4858_s3 + $0x518] sm:$0xff] %vm2079_vm4, %v2046_v23  ;;  %v1240_v28 = vadd.f32 %v4505_v16, %v2783_v26  ;;  %v1730_v29 = vadd.f32 %v4505_v16, %v2930_v27  ;;  %v1234_v30 = vpop.f32.mrb[67].mxu0  ;;  %v1724_v31 = vpop.f32.mrb[67].mxu1 }
 0x187   :  { %2144 = vst.msk [vmem:[%s4858_s3 + $0x200] sm:$0xff] %vm2079_vm4, %v1947_v24  ;;  %2242 = vst.msk [vmem:[%s4858_s3 + $0x510] sm:$0xff] %vm2079_vm4, %v2045_v25  ;;  %v1235_v32 = vadd.f32 %v4505_v16, %v1234_v30  ;;  %v1725_v33 = vadd.f32 %v4505_v16, %v1724_v31 }
 0x188   :  { %v1950_v34 = vmax.f32 %v1240_v28, 0.0  ;;  %v2048_v35 = vmax.f32 %v1730_v29, 0.0 }
 0x189   :  { %v1949_v36 = vmax.f32 %v1235_v32, 0.0  ;;  %v2047_v37 = vmax.f32 %v1725_v33, 0.0  ;;  %v2786_v38 = vpop.f32.mrb[68].mxu0  ;;  %v2933_v39 = vpop.f32.mrb[68].mxu1 }
 0x18a   :  { %2147 = vst.msk [vmem:[%s4858_s3 + $0x218] sm:$0xff] %vm2079_vm4, %v1950_v34  ;;  %2245 = vst.msk [vmem:[%s4858_s3 + $0x528] sm:$0xff] %vm2079_vm4, %v2048_v35  ;;  %v1250_v40 = vadd.f32 %v4505_v16, %v2786_v38  ;;  %v1740_v41 = vadd.f32 %v4505_v16, %v2933_v39  ;;  %v1244_v42 = vpop.f32.mrb[69].mxu0  ;;  %v1734_v43 = vpop.f32.mrb[69].mxu1 }
 0x18b   :  { %2146 = vst.msk [vmem:[%s4858_s3 + $0x210] sm:$0xff] %vm2079_vm4, %v1949_v36  ;;  %2244 = vst.msk [vmem:[%s4858_s3 + $0x520] sm:$0xff] %vm2079_vm4, %v2047_v37  ;;  %v1245_v44 = vadd.f32 %v4505_v16, %v1244_v42  ;;  %v1735_v45 = vadd.f32 %v4505_v16, %v1734_v43 }
 0x18c   :  { %v1952_v46 = vmax.f32 %v1250_v40, 0.0  ;;  %v2050_v47 = vmax.f32 %v1740_v41, 0.0 }
 0x18d   :  { %v1951_v48 = vmax.f32 %v1245_v44, 0.0  ;;  %v2049_v49 = vmax.f32 %v1735_v45, 0.0  ;;  %v2789_v50 = vpop.f32.mrb[70].mxu0  ;;  %v2936_v51 = vpop.f32.mrb[70].mxu1 }
 0x18e   :  { %2149 = vst.msk [vmem:[%s4858_s3 + $0x228] sm:$0xff] %vm2079_vm4, %v1952_v46  ;;  %2247 = vst.msk [vmem:[%s4858_s3 + $0x538] sm:$0xff] %vm2079_vm4, %v2050_v47  ;;  %v1260_v52 = vadd.f32 %v4505_v16, %v2789_v50  ;;  %v1750_v53 = vadd.f32 %v4505_v16, %v2936_v51  ;;  %v1254_v54 = vpop.f32.mrb[71].mxu0  ;;  %v1744_v55 = vpop.f32.mrb[71].mxu1 }
 0x18f   :  { %2148 = vst.msk [vmem:[%s4858_s3 + $0x220] sm:$0xff] %vm2079_vm4, %v1951_v48  ;;  %2246 = vst.msk [vmem:[%s4858_s3 + $0x530] sm:$0xff] %vm2079_vm4, %v2049_v49  ;;  %v1255_v56 = vadd.f32 %v4505_v16, %v1254_v54  ;;  %v1745_v57 = vadd.f32 %v4505_v16, %v1744_v55 }
 0x190   :  { %v1954_v58 = vmax.f32 %v1260_v52, 0.0  ;;  %v2052_v59 = vmax.f32 %v1750_v53, 0.0 }
 0x191   :  { %v1953_v60 = vmax.f32 %v1255_v56, 0.0  ;;  %v2051_v61 = vmax.f32 %v1745_v57, 0.0  ;;  %v2792_v62 = vpop.f32.mrb[72].mxu0  ;;  %v2939_v63 = vpop.f32.mrb[72].mxu1 }
 0x192   :  { %2151 = vst.msk [vmem:[%s4858_s3 + $0x238] sm:$0xff] %vm2079_vm4, %v1954_v58  ;;  %2249 = vst.msk [vmem:[%s4858_s3 + $0x548] sm:$0xff] %vm2079_vm4, %v2052_v59  ;;  %v1270_v0 = vadd.f32 %v4505_v16, %v2792_v62  ;;  %v1760_v1 = vadd.f32 %v4505_v16, %v2939_v63  ;;  %v1264_v2 = vpop.f32.mrb[73].mxu0  ;;  %v1754_v3 = vpop.f32.mrb[73].mxu1 }
 0x193   :  { %2150 = vst.msk [vmem:[%s4858_s3 + $0x230] sm:$0xff] %vm2079_vm4, %v1953_v60  ;;  %2248 = vst.msk [vmem:[%s4858_s3 + $0x540] sm:$0xff] %vm2079_vm4, %v2051_v61  ;;  %v1265_v4 = vadd.f32 %v4505_v16, %v1264_v2  ;;  %v1755_v5 = vadd.f32 %v4505_v16, %v1754_v3 }
 0x194   :  { %v1956_v6 = vmax.f32 %v1270_v0, 0.0  ;;  %v2054_v8 = vmax.f32 %v1760_v1, 0.0 }
 0x195   :  { %v1955_v9 = vmax.f32 %v1265_v4, 0.0  ;;  %v2053_v10 = vmax.f32 %v1755_v5, 0.0  ;;  %v2795_v11 = vpop.f32.mrb[74].mxu0  ;;  %v2942_v12 = vpop.f32.mrb[74].mxu1 }
 0x196   :  { %2153 = vst.msk [vmem:[%s4858_s3 + $0x248] sm:$0xff] %vm2079_vm4, %v1956_v6  ;;  %2251 = vst.msk [vmem:[%s4858_s3 + $0x558] sm:$0xff] %vm2079_vm4, %v2054_v8  ;;  %v1280_v13 = vadd.f32 %v4505_v16, %v2795_v11  ;;  %v1770_v14 = vadd.f32 %v4505_v16, %v2942_v12  ;;  %v1274_v15 = vpop.f32.mrb[75].mxu0  ;;  %v1764_v7 = vpop.f32.mrb[75].mxu1 }
 0x197   :  { %2152 = vst.msk [vmem:[%s4858_s3 + $0x240] sm:$0xff] %vm2079_vm4, %v1955_v9  ;;  %2250 = vst.msk [vmem:[%s4858_s3 + $0x550] sm:$0xff] %vm2079_vm4, %v2053_v10  ;;  %v1275_v17 = vadd.f32 %v4505_v16, %v1274_v15  ;;  %v1765_v18 = vadd.f32 %v4505_v16, %v1764_v7 }
 0x198   :  { %v1958_v19 = vmax.f32 %v1280_v13, 0.0  ;;  %v2056_v20 = vmax.f32 %v1770_v14, 0.0 }
 0x199   :  { %v1957_v21 = vmax.f32 %v1275_v17, 0.0  ;;  %v2055_v22 = vmax.f32 %v1765_v18, 0.0  ;;  %v2798_v23 = vpop.f32.mrb[76].mxu0  ;;  %v2945_v24 = vpop.f32.mrb[76].mxu1 }
 0x19a   :  { %2155 = vst.msk [vmem:[%s4858_s3 + $0x258] sm:$0xff] %vm2079_vm4, %v1958_v19  ;;  %2253 = vst.msk [vmem:[%s4858_s3 + $0x568] sm:$0xff] %vm2079_vm4, %v2056_v20  ;;  %v1290_v25 = vadd.f32 %v4505_v16, %v2798_v23  ;;  %v1780_v26 = vadd.f32 %v4505_v16, %v2945_v24  ;;  %v1284_v27 = vpop.f32.mrb[77].mxu0  ;;  %v1774_v28 = vpop.f32.mrb[77].mxu1 }
 0x19b   :  { %2154 = vst.msk [vmem:[%s4858_s3 + $0x250] sm:$0xff] %vm2079_vm4, %v1957_v21  ;;  %2252 = vst.msk [vmem:[%s4858_s3 + $0x560] sm:$0xff] %vm2079_vm4, %v2055_v22  ;;  %v1285_v29 = vadd.f32 %v4505_v16, %v1284_v27  ;;  %v1775_v30 = vadd.f32 %v4505_v16, %v1774_v28 }
 0x19c   :  { %v1960_v31 = vmax.f32 %v1290_v25, 0.0  ;;  %v2058_v32 = vmax.f32 %v1780_v26, 0.0 }
 0x19d   :  { %v1959_v33 = vmax.f32 %v1285_v29, 0.0  ;;  %v2057_v34 = vmax.f32 %v1775_v30, 0.0  ;;  %v2801_v35 = vpop.f32.mrb[78].mxu0  ;;  %v2948_v36 = vpop.f32.mrb[78].mxu1 }
 0x19e   :  { %2157 = vst.msk [vmem:[%s4858_s3 + $0x268] sm:$0xff] %vm2079_vm4, %v1960_v31  ;;  %2255 = vst.msk [vmem:[%s4858_s3 + $0x578] sm:$0xff] %vm2079_vm4, %v2058_v32  ;;  %v1300_v37 = vadd.f32 %v4505_v16, %v2801_v35  ;;  %v1790_v38 = vadd.f32 %v4505_v16, %v2948_v36  ;;  %v1294_v39 = vpop.f32.mrb[79].mxu0  ;;  %v1784_v40 = vpop.f32.mrb[79].mxu1 }
 0x19f   :  { %2156 = vst.msk [vmem:[%s4858_s3 + $0x260] sm:$0xff] %vm2079_vm4, %v1959_v33  ;;  %2254 = vst.msk [vmem:[%s4858_s3 + $0x570] sm:$0xff] %vm2079_vm4, %v2057_v34  ;;  %v1295_v41 = vadd.f32 %v4505_v16, %v1294_v39  ;;  %v1785_v42 = vadd.f32 %v4505_v16, %v1784_v40 }
 0x1a0   :  { %v1962_v43 = vmax.f32 %v1300_v37, 0.0  ;;  %v2060_v44 = vmax.f32 %v1790_v38, 0.0 }
 0x1a1   :  { %v1961_v45 = vmax.f32 %v1295_v41, 0.0  ;;  %v2059_v46 = vmax.f32 %v1785_v42, 0.0  ;;  %v2804_v47 = vpop.f32.mrb[80].mxu0  ;;  %v2951_v48 = vpop.f32.mrb[80].mxu1 }
 0x1a2   :  { %2159 = vst.msk [vmem:[%s4858_s3 + $0x278] sm:$0xff] %vm2079_vm4, %v1962_v43  ;;  %2257 = vst.msk [vmem:[%s4858_s3 + $0x588] sm:$0xff] %vm2079_vm4, %v2060_v44  ;;  %v1310_v49 = vadd.f32 %v4505_v16, %v2804_v47  ;;  %v1800_v50 = vadd.f32 %v4505_v16, %v2951_v48  ;;  %v1304_v51 = vpop.f32.mrb[81].mxu0  ;;  %v1794_v52 = vpop.f32.mrb[81].mxu1 }
 0x1a3   :  { %2158 = vst.msk [vmem:[%s4858_s3 + $0x270] sm:$0xff] %vm2079_vm4, %v1961_v45  ;;  %2256 = vst.msk [vmem:[%s4858_s3 + $0x580] sm:$0xff] %vm2079_vm4, %v2059_v46  ;;  %v1305_v53 = vadd.f32 %v4505_v16, %v1304_v51  ;;  %v1795_v54 = vadd.f32 %v4505_v16, %v1794_v52 }
 0x1a4   :  { %v1964_v55 = vmax.f32 %v1310_v49, 0.0  ;;  %v2062_v56 = vmax.f32 %v1800_v50, 0.0 }
 0x1a5   :  { %v1963_v57 = vmax.f32 %v1305_v53, 0.0  ;;  %v2061_v58 = vmax.f32 %v1795_v54, 0.0  ;;  %v2807_v59 = vpop.f32.mrb[82].mxu0  ;;  %v2954_v60 = vpop.f32.mrb[82].mxu1 }
 0x1a6   :  { %2161 = vst.msk [vmem:[%s4858_s3 + $0x288] sm:$0xff] %vm2079_vm4, %v1964_v55  ;;  %2259 = vst.msk [vmem:[%s4858_s3 + $0x598] sm:$0xff] %vm2079_vm4, %v2062_v56  ;;  %v1320_v61 = vadd.f32 %v4505_v16, %v2807_v59  ;;  %v1810_v62 = vadd.f32 %v4505_v16, %v2954_v60  ;;  %v1314_v63 = vpop.f32.mrb[83].mxu0  ;;  %v1804_v0 = vpop.f32.mrb[83].mxu1 }
 0x1a7   :  { %2160 = vst.msk [vmem:[%s4858_s3 + $0x280] sm:$0xff] %vm2079_vm4, %v1963_v57  ;;  %2258 = vst.msk [vmem:[%s4858_s3 + $0x590] sm:$0xff] %vm2079_vm4, %v2061_v58  ;;  %v1315_v1 = vadd.f32 %v4505_v16, %v1314_v63  ;;  %v1805_v2 = vadd.f32 %v4505_v16, %v1804_v0 }
 0x1a8   :  { %v1966_v3 = vmax.f32 %v1320_v61, 0.0  ;;  %v2064_v4 = vmax.f32 %v1810_v62, 0.0 }
 0x1a9   :  { %v1965_v5 = vmax.f32 %v1315_v1, 0.0  ;;  %v2063_v6 = vmax.f32 %v1805_v2, 0.0  ;;  %v2810_v8 = vpop.f32.mrb[84].mxu0  ;;  %v2957_v9 = vpop.f32.mrb[84].mxu1 }
 0x1aa   :  { %2163 = vst.msk [vmem:[%s4858_s3 + $0x298] sm:$0xff] %vm2079_vm4, %v1966_v3  ;;  %2261 = vst.msk [vmem:[%s4858_s3 + $0x5a8] sm:$0xff] %vm2079_vm4, %v2064_v4  ;;  %v1330_v10 = vadd.f32 %v4505_v16, %v2810_v8  ;;  %v1820_v11 = vadd.f32 %v4505_v16, %v2957_v9  ;;  %v1324_v12 = vpop.f32.mrb[85].mxu0  ;;  %v1814_v13 = vpop.f32.mrb[85].mxu1 }
 0x1ab   :  { %2162 = vst.msk [vmem:[%s4858_s3 + $0x290] sm:$0xff] %vm2079_vm4, %v1965_v5  ;;  %2260 = vst.msk [vmem:[%s4858_s3 + $0x5a0] sm:$0xff] %vm2079_vm4, %v2063_v6  ;;  %v1325_v14 = vadd.f32 %v4505_v16, %v1324_v12  ;;  %v1815_v15 = vadd.f32 %v4505_v16, %v1814_v13 }
 0x1ac   :  { %v1968_v7 = vmax.f32 %v1330_v10, 0.0  ;;  %v2066_v17 = vmax.f32 %v1820_v11, 0.0 }
 0x1ad   :  { %v1967_v18 = vmax.f32 %v1325_v14, 0.0  ;;  %v2065_v19 = vmax.f32 %v1815_v15, 0.0  ;;  %v2813_v20 = vpop.f32.mrb[86].mxu0  ;;  %v2960_v21 = vpop.f32.mrb[86].mxu1 }
 0x1ae   :  { %2165 = vst.msk [vmem:[%s4858_s3 + $0x2a8] sm:$0xff] %vm2079_vm4, %v1968_v7  ;;  %2263 = vst.msk [vmem:[%s4858_s3 + $0x5b8] sm:$0xff] %vm2079_vm4, %v2066_v17  ;;  %v1340_v22 = vadd.f32 %v4505_v16, %v2813_v20  ;;  %v1830_v23 = vadd.f32 %v4505_v16, %v2960_v21  ;;  %v1334_v24 = vpop.f32.mrb[87].mxu0  ;;  %v1824_v25 = vpop.f32.mrb[87].mxu1 }
 0x1af   :  { %2164 = vst.msk [vmem:[%s4858_s3 + $0x2a0] sm:$0xff] %vm2079_vm4, %v1967_v18  ;;  %2262 = vst.msk [vmem:[%s4858_s3 + $0x5b0] sm:$0xff] %vm2079_vm4, %v2065_v19  ;;  %v1335_v26 = vadd.f32 %v4505_v16, %v1334_v24  ;;  %v1825_v27 = vadd.f32 %v4505_v16, %v1824_v25 }
 0x1b0   :  { %v1970_v28 = vmax.f32 %v1340_v22, 0.0  ;;  %v2068_v29 = vmax.f32 %v1830_v23, 0.0 }
 0x1b1   :  { %v1969_v30 = vmax.f32 %v1335_v26, 0.0  ;;  %v2067_v31 = vmax.f32 %v1825_v27, 0.0  ;;  %v2816_v32 = vpop.f32.mrb[88].mxu0  ;;  %v2963_v33 = vpop.f32.mrb[88].mxu1 }
 0x1b2   :  { %2167 = vst.msk [vmem:[%s4858_s3 + $0x2b8] sm:$0xff] %vm2079_vm4, %v1970_v28  ;;  %2265 = vst.msk [vmem:[%s4858_s3 + $0x5c8] sm:$0xff] %vm2079_vm4, %v2068_v29  ;;  %v1350_v34 = vadd.f32 %v4505_v16, %v2816_v32  ;;  %v1840_v35 = vadd.f32 %v4505_v16, %v2963_v33  ;;  %v1344_v36 = vpop.f32.mrb[89].mxu0  ;;  %v1834_v37 = vpop.f32.mrb[89].mxu1 }
 0x1b3   :  { %2166 = vst.msk [vmem:[%s4858_s3 + $0x2b0] sm:$0xff] %vm2079_vm4, %v1969_v30  ;;  %2264 = vst.msk [vmem:[%s4858_s3 + $0x5c0] sm:$0xff] %vm2079_vm4, %v2067_v31  ;;  %v1345_v38 = vadd.f32 %v4505_v16, %v1344_v36  ;;  %v1835_v39 = vadd.f32 %v4505_v16, %v1834_v37 }
 0x1b4   :  { %v1972_v40 = vmax.f32 %v1350_v34, 0.0  ;;  %v2070_v41 = vmax.f32 %v1840_v35, 0.0 }
 0x1b5   :  { %v1971_v42 = vmax.f32 %v1345_v38, 0.0  ;;  %v2069_v43 = vmax.f32 %v1835_v39, 0.0  ;;  %v2819_v44 = vpop.f32.mrb[90].mxu0  ;;  %v2966_v45 = vpop.f32.mrb[90].mxu1 }
 0x1b6   :  { %2169 = vst.msk [vmem:[%s4858_s3 + $0x2c8] sm:$0xff] %vm2079_vm4, %v1972_v40  ;;  %2267 = vst.msk [vmem:[%s4858_s3 + $0x5d8] sm:$0xff] %vm2079_vm4, %v2070_v41  ;;  %v1360_v46 = vadd.f32 %v4505_v16, %v2819_v44  ;;  %v1850_v47 = vadd.f32 %v4505_v16, %v2966_v45  ;;  %v1354_v48 = vpop.f32.mrb[91].mxu0  ;;  %v1844_v49 = vpop.f32.mrb[91].mxu1 }
 0x1b7   :  { %2168 = vst.msk [vmem:[%s4858_s3 + $0x2c0] sm:$0xff] %vm2079_vm4, %v1971_v42  ;;  %2266 = vst.msk [vmem:[%s4858_s3 + $0x5d0] sm:$0xff] %vm2079_vm4, %v2069_v43  ;;  %v1355_v50 = vadd.f32 %v4505_v16, %v1354_v48  ;;  %v1845_v51 = vadd.f32 %v4505_v16, %v1844_v49 }
 0x1b8   :  { %v1974_v52 = vmax.f32 %v1360_v46, 0.0  ;;  %v2072_v53 = vmax.f32 %v1850_v47, 0.0 }
 0x1b9   :  { %v1973_v54 = vmax.f32 %v1355_v50, 0.0  ;;  %v2071_v55 = vmax.f32 %v1845_v51, 0.0  ;;  %v2822_v56 = vpop.f32.mrb[92].mxu0  ;;  %v2969_v57 = vpop.f32.mrb[92].mxu1 }
 0x1ba   :  { %2171 = vst.msk [vmem:[%s4858_s3 + $0x2d8] sm:$0xff] %vm2079_vm4, %v1974_v52  ;;  %2269 = vst.msk [vmem:[%s4858_s3 + $0x5e8] sm:$0xff] %vm2079_vm4, %v2072_v53  ;;  %v1370_v58 = vadd.f32 %v4505_v16, %v2822_v56  ;;  %v1860_v59 = vadd.f32 %v4505_v16, %v2969_v57  ;;  %v1364_v60 = vpop.f32.mrb[93].mxu0  ;;  %v1854_v61 = vpop.f32.mrb[93].mxu1 }
 0x1bb   :  { %2170 = vst.msk [vmem:[%s4858_s3 + $0x2d0] sm:$0xff] %vm2079_vm4, %v1973_v54  ;;  %2268 = vst.msk [vmem:[%s4858_s3 + $0x5e0] sm:$0xff] %vm2079_vm4, %v2071_v55  ;;  %v1365_v62 = vadd.f32 %v4505_v16, %v1364_v60  ;;  %v1855_v63 = vadd.f32 %v4505_v16, %v1854_v61 }
 0x1bc   :  { %v1976_v0 = vmax.f32 %v1370_v58, 0.0  ;;  %v2074_v1 = vmax.f32 %v1860_v59, 0.0 }
 0x1bd   :  { %v1975_v2 = vmax.f32 %v1365_v62, 0.0  ;;  %v2073_v3 = vmax.f32 %v1855_v63, 0.0  ;;  %v2825_v4 = vpop.f32.mrb[94].mxu0  ;;  %v2972_v5 = vpop.f32.mrb[94].mxu1 }
 0x1be   :  { %2173 = vst.msk [vmem:[%s4858_s3 + $0x2e8] sm:$0xff] %vm2079_vm4, %v1976_v0  ;;  %2271 = vst.msk [vmem:[%s4858_s3 + $0x5f8] sm:$0xff] %vm2079_vm4, %v2074_v1  ;;  %v1380_v6 = vadd.f32 %v4505_v16, %v2825_v4  ;;  %v1870_v8 = vadd.f32 %v4505_v16, %v2972_v5  ;;  %v1374_v9 = vpop.f32.mrb[95].mxu0  ;;  %v1864_v10 = vpop.f32.mrb[95].mxu1 }
 0x1bf   :  { %2172 = vst.msk [vmem:[%s4858_s3 + $0x2e0] sm:$0xff] %vm2079_vm4, %v1975_v2  ;;  %2270 = vst.msk [vmem:[%s4858_s3 + $0x5f0] sm:$0xff] %vm2079_vm4, %v2073_v3  ;;  %v1375_v11 = vadd.f32 %v4505_v16, %v1374_v9  ;;  %v1865_v12 = vadd.f32 %v4505_v16, %v1864_v10 }
 0x1c0   :  { %v1978_v13 = vmax.f32 %v1380_v6, 0.0  ;;  %v2076_v14 = vmax.f32 %v1870_v8, 0.0 }
 0x1c1   :  { %v1977_v15 = vmax.f32 %v1375_v11, 0.0  ;;  %v2075_v7 = vmax.f32 %v1865_v12, 0.0  ;;  %v2828_v17 = vpop.f32.mrb[96].mxu0  ;;  %v2975_v18 = vpop.f32.mrb[96].mxu1 }
 0x1c2   :  { %2175 = vst.msk [vmem:[%s4858_s3 + $0x2f8] sm:$0xff] %vm2079_vm4, %v1978_v13  ;;  %2273 = vst.msk [vmem:[%s4858_s3 + $0x608] sm:$0xff] %vm2079_vm4, %v2076_v14  ;;  %v1390_v19 = vadd.f32 %v4505_v16, %v2828_v17  ;;  %v1880_v20 = vadd.f32 %v4505_v16, %v2975_v18  ;;  %v1384_v21 = vpop.f32.mrb[97].mxu0  ;;  %v1874_v22 = vpop.f32.mrb[97].mxu1 }
 0x1c3   :  { %2174 = vst.msk [vmem:[%s4858_s3 + $0x2f0] sm:$0xff] %vm2079_vm4, %v1977_v15  ;;  %2272 = vst.msk [vmem:[%s4858_s3 + $0x600] sm:$0xff] %vm2079_vm4, %v2075_v7  ;;  %v1385_v23 = vadd.f32 %v4505_v16, %v1384_v21  ;;  %v1875_v24 = vadd.f32 %v4505_v16, %v1874_v22 }
 0x1c4   :  { %v1980_v25 = vmax.f32 %v1390_v19, 0.0  ;;  %v2078_v26 = vmax.f32 %v1880_v20, 0.0 }
 0x1c5   :  { %v1979_v27 = vmax.f32 %v1385_v23, 0.0  ;;  %v2077_v28 = vmax.f32 %v1875_v24, 0.0 }
 0x1c6   :  { %2177 = vst.msk [vmem:[%s4858_s3 + $0x308] sm:$0xff] %vm2079_vm4, %v1980_v25  ;;  %2275 = vst.msk [vmem:[%s4858_s3 + $0x618] sm:$0xff] %vm2079_vm4, %v2078_v26 }
 0x1c7   :  { %2176 = vst.msk [vmem:[%s4858_s3 + $0x300] sm:$0xff] %vm2079_vm4, %v1979_v27  ;;  %2274 = vst.msk [vmem:[%s4858_s3 + $0x610] sm:$0xff] %vm2079_vm4, %v2077_v28 }
 0x1c8   :  { %2280 = vsyncpa [#allocation3], 1 }
 0x1c9   :  { %2281 = vsyncpa [#allocation5], 1 }

// kernel: net_forward.5
= control target key start
LH: loop header
LB: loop body
LE: loop exit
PB: predicated region body
PF: predicated region fallthrough
CT: control target
= control target key end

     0   :  { %s3254_s12 = smov 0   ;;  %s3256_s13 = smov 0   ;;  %s4378_s0 = inlined_call_operand.vmem [shape: f32[4,392,576], index: 0, kind: input, shape index: {}]   ;;  %s4379_s1 = inlined_call_operand.vmem [shape: f32[576,128], index: 1, kind: input, shape index: {}]   ;;  %s4380_s2 = inlined_call_operand.vmem [shape: f32[1,128], index: 2, kind: input, shape index: {}]   ;;  %s4381_s3 = inlined_call_operand.vmem [shape: f32[392,128], index: 3, kind: output, shape index: {}]  }
   0x1   :  { %s3258_s14 = smov 0  }
   0x2 LB: > { %s2097_s15 = sadd.s32 4294967295, %s3229_s14   ;;  %s3271_s16 = sadd.s32 1, %s3229_s14   ;;  %s3229_s14 = sphi %s3258_s14, %s4384_s14   ;;  %s3225_s13 = sphi %s3256_s13, %s4383_s13   ;;  %s3221_s12 = sphi %s3254_s12, %s4382_s12  }
   0x3   : > { %s17_s17 = ssub.s32 %s3229_s14, %s3271_s16  ;;  %s20_s18 = sadd.s32 1, %s3225_s13 }
   0x4   : > { %p18_p0 = scmp.eq.s32.totalorder %s17_s17, 0  ;;  %p27_p1 = scmp.ne.s32.totalorder %s3225_s13, %s3221_s12 }
   0x5   : > { %p28_p2 = scmp.eq.s32.totalorder %s3229_s14, 0  ;;  %p2100_p4 = scmp.ge.s32.totalorder %s3229_s14, 7 }
   0x6   : > { %s3280_s19 = scalar_select %p18_p0, %s3225_s13, %s20_s18  }
   0x7   : > { %p29_p3 = por %p28_p2, %p27_p1  ;;  %127 = sbr.rel (%p2100_p4) target bundleno = 90 (0x5a), region = 24 }
   0xe   : > { %130 = sbr.rel (!%p29_p3) target bundleno = 90 (0x5a), region = 28  ;;  %s132_s20 = sand.u32 (%p29_p3), 1, %s3225_s13  }
   0xf   : > { %s3176_s21 = smul.u32 (%p29_p3), 1120, %s132_s20 }
  0x10   : > { %s3179_s22 = smul.u32 (%p29_p3), 280, %s3229_s14 }
  0x11   : > { %s3293_s26 = scalar_lea.vmem (%p29_p3), [#allocation2], %s3176_s21 }
  0x12   : > { %s3288_s25 = scalar_lea.vmem (%p29_p3), %s4378_s0, %s3179_s22 }
  0x13   : > { %v151_v0 = vld [vmem:[%s3288_s25] sm:$0xff] (%p29_p3)  ;;  %v153_v1 = vld [vmem:[%s3288_s25 + $0x8] sm:$0xff] (%p29_p3)  ;;  %v155_v2 = vld [vmem:[%s3288_s25 + $0x10] sm:$0xff] (%p29_p3) }
  0x14   : > { %152 = vst [vmem:[%s3293_s26] sm:$0xff] (%p29_p3), %v151_v0  ;;  %154 = vst [vmem:[%s3293_s26 + $0x8] sm:$0xff] (%p29_p3), %v153_v1  ;;  %v157_v3 = vld [vmem:[%s3288_s25 + $0x18] sm:$0xff] (%p29_p3)  ;;  %v159_v4 = vld [vmem:[%s3288_s25 + $0x20] sm:$0xff] (%p29_p3) }
  0x15   : > { %156 = vst [vmem:[%s3293_s26 + $0x10] sm:$0xff] %v155_v2  ;;  %v161_v5 = vld [vmem:[%s3288_s25 + $0x28] sm:$0xff]  ;;  %158 = vst [vmem:[%s3293_s26 + $0x18] sm:$0xff] %v157_v3  ;;  %v163_v6 = vld [vmem:[%s3288_s25 + $0x30] sm:$0xff] }
  0x16   : > { %160 = vst [vmem:[%s3293_s26 + $0x20] sm:$0xff] %v159_v4  ;;  %162 = vst [vmem:[%s3293_s26 + $0x28] sm:$0xff] %v161_v5  ;;  %v165_v7 = vld [vmem:[%s3288_s25 + $0x38] sm:$0xff]  ;;  %v167_v8 = vld [vmem:[%s3288_s25 + $0x40] sm:$0xff] }
  0x17   : > { %164 = vst [vmem:[%s3293_s26 + $0x30] sm:$0xff] %v163_v6  ;;  %166 = vst [vmem:[%s3293_s26 + $0x38] sm:$0xff] %v165_v7  ;;  %v169_v9 = vld [vmem:[%s3288_s25 + $0x48] sm:$0xff]  ;;  %v171_v10 = vld [vmem:[%s3288_s25 + $0x50] sm:$0xff] }
  0x18   : > { %168 = vst [vmem:[%s3293_s26 + $0x40] sm:$0xff] %v167_v8  ;;  %v173_v11 = vld [vmem:[%s3288_s25 + $0x58] sm:$0xff]  ;;  %170 = vst [vmem:[%s3293_s26 + $0x48] sm:$0xff] %v169_v9  ;;  %v175_v12 = vld [vmem:[%s3288_s25 + $0x60] sm:$0xff] }
  0x19   : > { %172 = vst [vmem:[%s3293_s26 + $0x50] sm:$0xff] %v171_v10  ;;  %174 = vst [vmem:[%s3293_s26 + $0x58] sm:$0xff] %v173_v11  ;;  %v177_v13 = vld [vmem:[%s3288_s25 + $0x68] sm:$0xff]  ;;  %v179_v14 = vld [vmem:[%s3288_s25 + $0x70] sm:$0xff] }
  0x1a   : > { %176 = vst [vmem:[%s3293_s26 + $0x60] sm:$0xff] %v175_v12  ;;  %178 = vst [vmem:[%s3293_s26 + $0x68] sm:$0xff] %v177_v13  ;;  %v181_v15 = vld [vmem:[%s3288_s25 + $0x78] sm:$0xff]  ;;  %v183_v16 = vld [vmem:[%s3288_s25 + $0x80] sm:$0xff] }
  0x1b   : > { %180 = vst [vmem:[%s3293_s26 + $0x70] sm:$0xff] %v179_v14  ;;  %v185_v17 = vld [vmem:[%s3288_s25 + $0x88] sm:$0xff]  ;;  %182 = vst [vmem:[%s3293_s26 + $0x78] sm:$0xff] %v181_v15  ;;  %v187_v18 = vld [vmem:[%s3288_s25 + $0x90] sm:$0xff] }
  0x1c   : > { %184 = vst [vmem:[%s3293_s26 + $0x80] sm:$0xff] %v183_v16  ;;  %186 = vst [vmem:[%s3293_s26 + $0x88] sm:$0xff] %v185_v17  ;;  %v189_v19 = vld [vmem:[%s3288_s25 + $0x98] sm:$0xff]  ;;  %v191_v20 = vld [vmem:[%s3288_s25 + $0xa0] sm:$0xff] }
  0x1d   : > { %188 = vst [vmem:[%s3293_s26 + $0x90] sm:$0xff] %v187_v18  ;;  %190 = vst [vmem:[%s3293_s26 + $0x98] sm:$0xff] %v189_v19  ;;  %v193_v21 = vld [vmem:[%s3288_s25 + $0xa8] sm:$0xff]  ;;  %v195_v22 = vld [vmem:[%s3288_s25 + $0xb0] sm:$0xff] }
  0x1e   : > { %192 = vst [vmem:[%s3293_s26 + $0xa0] sm:$0xff] %v191_v20  ;;  %v197_v23 = vld [vmem:[%s3288_s25 + $0xb8] sm:$0xff]  ;;  %194 = vst [vmem:[%s3293_s26 + $0xa8] sm:$0xff] %v193_v21  ;;  %v199_v24 = vld [vmem:[%s3288_s25 + $0xc0] sm:$0xff] }
  0x1f   : > { %196 = vst [vmem:[%s3293_s26 + $0xb0] sm:$0xff] %v195_v22  ;;  %198 = vst [vmem:[%s3293_s26 + $0xb8] sm:$0xff] %v197_v23  ;;  %v201_v25 = vld [vmem:[%s3288_s25 + $0xc8] sm:$0xff]  ;;  %v203_v26 = vld [vmem:[%s3288_s25 + $0xd0] sm:$0xff] }
  0x20   : > { %200 = vst [vmem:[%s3293_s26 + $0xc0] sm:$0xff] %v199_v24  ;;  %202 = vst [vmem:[%s3293_s26 + $0xc8] sm:$0xff] %v201_v25  ;;  %v205_v27 = vld [vmem:[%s3288_s25 + $0xd8] sm:$0xff]  ;;  %v207_v28 = vld [vmem:[%s3288_s25 + $0xe0] sm:$0xff] }
  0x21   : > { %204 = vst [vmem:[%s3293_s26 + $0xd0] sm:$0xff] %v203_v26  ;;  %v209_v29 = vld [vmem:[%s3288_s25 + $0xe8] sm:$0xff]  ;;  %206 = vst [vmem:[%s3293_s26 + $0xd8] sm:$0xff] %v205_v27  ;;  %v211_v30 = vld [vmem:[%s3288_s25 + $0xf0] sm:$0xff] }
  0x22   : > { %208 = vst [vmem:[%s3293_s26 + $0xe0] sm:$0xff] %v207_v28  ;;  %210 = vst [vmem:[%s3293_s26 + $0xe8] sm:$0xff] %v209_v29  ;;  %v213_v31 = vld [vmem:[%s3288_s25 + $0xf8] sm:$0xff]  ;;  %v215_v32 = vld [vmem:[%s3288_s25 + $0x100] sm:$0xff] }
  0x23   : > { %212 = vst [vmem:[%s3293_s26 + $0xf0] sm:$0xff] %v211_v30  ;;  %214 = vst [vmem:[%s3293_s26 + $0xf8] sm:$0xff] %v213_v31  ;;  %v217_v33 = vld [vmem:[%s3288_s25 + $0x108] sm:$0xff]  ;;  %v219_v34 = vld [vmem:[%s3288_s25 + $0x110] sm:$0xff] }
  0x24   : > { %216 = vst [vmem:[%s3293_s26 + $0x100] sm:$0xff] %v215_v32  ;;  %v221_v35 = vld [vmem:[%s3288_s25 + $0x7a8] sm:$0xff]  ;;  %218 = vst [vmem:[%s3293_s26 + $0x108] sm:$0xff] %v217_v33  ;;  %v223_v36 = vld [vmem:[%s3288_s25 + $0x7b0] sm:$0xff] }
  0x25   : > { %220 = vst [vmem:[%s3293_s26 + $0x110] sm:$0xff] %v219_v34  ;;  %222 = vst [vmem:[%s3293_s26 + $0x118] sm:$0xff] %v221_v35  ;;  %v225_v37 = vld [vmem:[%s3288_s25 + $0x7b8] sm:$0xff]  ;;  %v227_v38 = vld [vmem:[%s3288_s25 + $0x7c0] sm:$0xff] }
  0x26   : > { %224 = vst [vmem:[%s3293_s26 + $0x120] sm:$0xff] %v223_v36  ;;  %226 = vst [vmem:[%s3293_s26 + $0x128] sm:$0xff] %v225_v37  ;;  %v229_v39 = vld [vmem:[%s3288_s25 + $0x7c8] sm:$0xff]  ;;  %v231_v40 = vld [vmem:[%s3288_s25 + $0x7d0] sm:$0xff] }
  0x27   : > { %228 = vst [vmem:[%s3293_s26 + $0x130] sm:$0xff] %v227_v38  ;;  %v233_v41 = vld [vmem:[%s3288_s25 + $0x7d8] sm:$0xff]  ;;  %230 = vst [vmem:[%s3293_s26 + $0x138] sm:$0xff] %v229_v39  ;;  %v235_v42 = vld [vmem:[%s3288_s25 + $0x7e0] sm:$0xff] }
  0x28   : > { %232 = vst [vmem:[%s3293_s26 + $0x140] sm:$0xff] %v231_v40  ;;  %234 = vst [vmem:[%s3293_s26 + $0x148] sm:$0xff] %v233_v41  ;;  %v237_v43 = vld [vmem:[%s3288_s25 + $0x7e8] sm:$0xff]  ;;  %v239_v44 = vld [vmem:[%s3288_s25 + $0x7f0] sm:$0xff] }
  0x29   : > { %236 = vst [vmem:[%s3293_s26 + $0x150] sm:$0xff] %v235_v42  ;;  %238 = vst [vmem:[%s3293_s26 + $0x158] sm:$0xff] %v237_v43  ;;  %v241_v45 = vld [vmem:[%s3288_s25 + $0x7f8] sm:$0xff]  ;;  %v243_v46 = vld [vmem:[%s3288_s25 + $0x800] sm:$0xff] }
  0x2a   : > { %240 = vst [vmem:[%s3293_s26 + $0x160] sm:$0xff] %v239_v44  ;;  %v245_v47 = vld [vmem:[%s3288_s25 + $0x808] sm:$0xff]  ;;  %242 = vst [vmem:[%s3293_s26 + $0x168] sm:$0xff] %v241_v45  ;;  %v247_v48 = vld [vmem:[%s3288_s25 + $0x810] sm:$0xff] }
  0x2b   : > { %244 = vst [vmem:[%s3293_s26 + $0x170] sm:$0xff] %v243_v46  ;;  %246 = vst [vmem:[%s3293_s26 + $0x178] sm:$0xff] %v245_v47  ;;  %v249_v49 = vld [vmem:[%s3288_s25 + $0x818] sm:$0xff]  ;;  %v251_v50 = vld [vmem:[%s3288_s25 + $0x820] sm:$0xff] }
  0x2c   : > { %248 = vst [vmem:[%s3293_s26 + $0x180] sm:$0xff] %v247_v48  ;;  %250 = vst [vmem:[%s3293_s26 + $0x188] sm:$0xff] %v249_v49  ;;  %v253_v51 = vld [vmem:[%s3288_s25 + $0x828] sm:$0xff]  ;;  %v255_v52 = vld [vmem:[%s3288_s25 + $0x830] sm:$0xff] }
  0x2d   : > { %252 = vst [vmem:[%s3293_s26 + $0x190] sm:$0xff] %v251_v50  ;;  %v257_v53 = vld [vmem:[%s3288_s25 + $0x838] sm:$0xff]  ;;  %254 = vst [vmem:[%s3293_s26 + $0x198] sm:$0xff] %v253_v51  ;;  %v259_v54 = vld [vmem:[%s3288_s25 + $0x840] sm:$0xff] }
  0x2e   : > { %256 = vst [vmem:[%s3293_s26 + $0x1a0] sm:$0xff] %v255_v52  ;;  %258 = vst [vmem:[%s3293_s26 + $0x1a8] sm:$0xff] %v257_v53  ;;  %v261_v55 = vld [vmem:[%s3288_s25 + $0x848] sm:$0xff]  ;;  %v263_v56 = vld [vmem:[%s3288_s25 + $0x850] sm:$0xff] }
  0x2f   : > { %260 = vst [vmem:[%s3293_s26 + $0x1b0] sm:$0xff] %v259_v54  ;;  %262 = vst [vmem:[%s3293_s26 + $0x1b8] sm:$0xff] %v261_v55  ;;  %v265_v57 = vld [vmem:[%s3288_s25 + $0x858] sm:$0xff]  ;;  %v267_v58 = vld [vmem:[%s3288_s25 + $0x860] sm:$0xff] }
  0x30   : > { %264 = vst [vmem:[%s3293_s26 + $0x1c0] sm:$0xff] %v263_v56  ;;  %v269_v59 = vld [vmem:[%s3288_s25 + $0x868] sm:$0xff]  ;;  %266 = vst [vmem:[%s3293_s26 + $0x1c8] sm:$0xff] %v265_v57  ;;  %v271_v60 = vld [vmem:[%s3288_s25 + $0x870] sm:$0xff] }
  0x31   : > { %268 = vst [vmem:[%s3293_s26 + $0x1d0] sm:$0xff] %v267_v58  ;;  %270 = vst [vmem:[%s3293_s26 + $0x1d8] sm:$0xff] %v269_v59  ;;  %v273_v61 = vld [vmem:[%s3288_s25 + $0x878] sm:$0xff]  ;;  %v275_v62 = vld [vmem:[%s3288_s25 + $0x880] sm:$0xff] }
  0x32   : > { %272 = vst [vmem:[%s3293_s26 + $0x1e0] sm:$0xff] %v271_v60  ;;  %274 = vst [vmem:[%s3293_s26 + $0x1e8] sm:$0xff] %v273_v61  ;;  %v277_v63 = vld [vmem:[%s3288_s25 + $0x888] sm:$0xff]  ;;  %v279_v0 = vld [vmem:[%s3288_s25 + $0x890] sm:$0xff] }
  0x33   : > { %276 = vst [vmem:[%s3293_s26 + $0x1f0] sm:$0xff] %v275_v62  ;;  %v281_v1 = vld [vmem:[%s3288_s25 + $0x898] sm:$0xff]  ;;  %278 = vst [vmem:[%s3293_s26 + $0x1f8] sm:$0xff] %v277_v63  ;;  %v283_v2 = vld [vmem:[%s3288_s25 + $0x8a0] sm:$0xff] }
  0x34   : > { %280 = vst [vmem:[%s3293_s26 + $0x200] sm:$0xff] %v279_v0  ;;  %282 = vst [vmem:[%s3293_s26 + $0x208] sm:$0xff] %v281_v1  ;;  %v285_v3 = vld [vmem:[%s3288_s25 + $0x8a8] sm:$0xff]  ;;  %v287_v4 = vld [vmem:[%s3288_s25 + $0x8b0] sm:$0xff] }
  0x35   : > { %284 = vst [vmem:[%s3293_s26 + $0x210] sm:$0xff] %v283_v2  ;;  %286 = vst [vmem:[%s3293_s26 + $0x218] sm:$0xff] %v285_v3  ;;  %v289_v5 = vld [vmem:[%s3288_s25 + $0x8b8] sm:$0xff]  ;;  %v291_v6 = vld [vmem:[%s3288_s25 + $0xf50] sm:$0xff] }
  0x36   : > { %288 = vst [vmem:[%s3293_s26 + $0x220] sm:$0xff] %v287_v4  ;;  %v293_v7 = vld [vmem:[%s3288_s25 + $0xf58] sm:$0xff]  ;;  %290 = vst [vmem:[%s3293_s26 + $0x228] sm:$0xff] %v289_v5  ;;  %v295_v8 = vld [vmem:[%s3288_s25 + $0xf60] sm:$0xff] }
  0x37   : > { %292 = vst [vmem:[%s3293_s26 + $0x230] sm:$0xff] %v291_v6  ;;  %294 = vst [vmem:[%s3293_s26 + $0x238] sm:$0xff] %v293_v7  ;;  %v297_v9 = vld [vmem:[%s3288_s25 + $0xf68] sm:$0xff]  ;;  %v299_v10 = vld [vmem:[%s3288_s25 + $0xf70] sm:$0xff] }
  0x38   : > { %296 = vst [vmem:[%s3293_s26 + $0x240] sm:$0xff] %v295_v8  ;;  %298 = vst [vmem:[%s3293_s26 + $0x248] sm:$0xff] %v297_v9  ;;  %v301_v11 = vld [vmem:[%s3288_s25 + $0xf78] sm:$0xff]  ;;  %v303_v12 = vld [vmem:[%s3288_s25 + $0xf80] sm:$0xff] }
  0x39   : > { %300 = vst [vmem:[%s3293_s26 + $0x250] sm:$0xff] %v299_v10  ;;  %v305_v13 = vld [vmem:[%s3288_s25 + $0xf88] sm:$0xff]  ;;  %302 = vst [vmem:[%s3293_s26 + $0x258] sm:$0xff] %v301_v11  ;;  %v307_v14 = vld [vmem:[%s3288_s25 + $0xf90] sm:$0xff] }
  0x3a   : > { %304 = vst [vmem:[%s3293_s26 + $0x260] sm:$0xff] %v303_v12  ;;  %306 = vst [vmem:[%s3293_s26 + $0x268] sm:$0xff] %v305_v13  ;;  %v309_v15 = vld [vmem:[%s3288_s25 + $0xf98] sm:$0xff]  ;;  %v311_v16 = vld [vmem:[%s3288_s25 + $0xfa0] sm:$0xff] }
  0x3b   : > { %308 = vst [vmem:[%s3293_s26 + $0x270] sm:$0xff] %v307_v14  ;;  %310 = vst [vmem:[%s3293_s26 + $0x278] sm:$0xff] %v309_v15  ;;  %v313_v17 = vld [vmem:[%s3288_s25 + $0xfa8] sm:$0xff]  ;;  %v315_v18 = vld [vmem:[%s3288_s25 + $0xfb0] sm:$0xff] }
  0x3c   : > { %312 = vst [vmem:[%s3293_s26 + $0x280] sm:$0xff] %v311_v16  ;;  %v317_v19 = vld [vmem:[%s3288_s25 + $0xfb8] sm:$0xff]  ;;  %314 = vst [vmem:[%s3293_s26 + $0x288] sm:$0xff] %v313_v17  ;;  %v319_v20 = vld [vmem:[%s3288_s25 + $0xfc0] sm:$0xff] }
  0x3d   : > { %316 = vst [vmem:[%s3293_s26 + $0x290] sm:$0xff] %v315_v18  ;;  %318 = vst [vmem:[%s3293_s26 + $0x298] sm:$0xff] %v317_v19  ;;  %v321_v21 = vld [vmem:[%s3288_s25 + $0xfc8] sm:$0xff]  ;;  %v323_v22 = vld [vmem:[%s3288_s25 + $0xfd0] sm:$0xff] }
  0x3e   : > { %320 = vst [vmem:[%s3293_s26 + $0x2a0] sm:$0xff] %v319_v20  ;;  %322 = vst [vmem:[%s3293_s26 + $0x2a8] sm:$0xff] %v321_v21  ;;  %v325_v23 = vld [vmem:[%s3288_s25 + $0xfd8] sm:$0xff]  ;;  %v327_v24 = vld [vmem:[%s3288_s25 + $0xfe0] sm:$0xff] }
  0x3f   : > { %324 = vst [vmem:[%s3293_s26 + $0x2b0] sm:$0xff] %v323_v22  ;;  %v329_v25 = vld [vmem:[%s3288_s25 + $0xfe8] sm:$0xff]  ;;  %326 = vst [vmem:[%s3293_s26 + $0x2b8] sm:$0xff] %v325_v23  ;;  %v331_v26 = vld [vmem:[%s3288_s25 + $0xff0] sm:$0xff] }
  0x40   : > { %328 = vst [vmem:[%s3293_s26 + $0x2c0] sm:$0xff] %v327_v24  ;;  %330 = vst [vmem:[%s3293_s26 + $0x2c8] sm:$0xff] %v329_v25  ;;  %v333_v27 = vld [vmem:[%s3288_s25 + $0xff8] sm:$0xff]  ;;  %v335_v28 = vld [vmem:[%s3288_s25 + $0x1000] sm:$0xff] }
  0x41   : > { %332 = vst [vmem:[%s3293_s26 + $0x2d0] sm:$0xff] %v331_v26  ;;  %334 = vst [vmem:[%s3293_s26 + $0x2d8] sm:$0xff] %v333_v27  ;;  %v337_v29 = vld [vmem:[%s3288_s25 + $0x1008] sm:$0xff]  ;;  %v339_v30 = vld [vmem:[%s3288_s25 + $0x1010] sm:$0xff] }
  0x42   : > { %336 = vst [vmem:[%s3293_s26 + $0x2e0] sm:$0xff] %v335_v28  ;;  %v341_v31 = vld [vmem:[%s3288_s25 + $0x1018] sm:$0xff]  ;;  %338 = vst [vmem:[%s3293_s26 + $0x2e8] sm:$0xff] %v337_v29  ;;  %v343_v32 = vld [vmem:[%s3288_s25 + $0x1020] sm:$0xff] }
  0x43   : > { %340 = vst [vmem:[%s3293_s26 + $0x2f0] sm:$0xff] %v339_v30  ;;  %342 = vst [vmem:[%s3293_s26 + $0x2f8] sm:$0xff] %v341_v31  ;;  %v345_v33 = vld [vmem:[%s3288_s25 + $0x1028] sm:$0xff]  ;;  %v347_v34 = vld [vmem:[%s3288_s25 + $0x1030] sm:$0xff] }
  0x44   : > { %344 = vst [vmem:[%s3293_s26 + $0x300] sm:$0xff] %v343_v32  ;;  %346 = vst [vmem:[%s3293_s26 + $0x308] sm:$0xff] %v345_v33  ;;  %v349_v35 = vld [vmem:[%s3288_s25 + $0x1038] sm:$0xff]  ;;  %v351_v36 = vld [vmem:[%s3288_s25 + $0x1040] sm:$0xff] }
  0x45   : > { %348 = vst [vmem:[%s3293_s26 + $0x310] sm:$0xff] %v347_v34  ;;  %v353_v37 = vld [vmem:[%s3288_s25 + $0x1048] sm:$0xff]  ;;  %350 = vst [vmem:[%s3293_s26 + $0x318] sm:$0xff] %v349_v35  ;;  %v355_v38 = vld [vmem:[%s3288_s25 + $0x1050] sm:$0xff] }
  0x46   : > { %352 = vst [vmem:[%s3293_s26 + $0x320] sm:$0xff] %v351_v36  ;;  %354 = vst [vmem:[%s3293_s26 + $0x328] sm:$0xff] %v353_v37  ;;  %v357_v39 = vld [vmem:[%s3288_s25 + $0x1058] sm:$0xff]  ;;  %v359_v40 = vld [vmem:[%s3288_s25 + $0x1060] sm:$0xff] }
  0x47   : > { %356 = vst [vmem:[%s3293_s26 + $0x330] sm:$0xff] %v355_v38  ;;  %358 = vst [vmem:[%s3293_s26 + $0x338] sm:$0xff] %v357_v39  ;;  %v361_v41 = vld [vmem:[%s3288_s25 + $0x16f8] sm:$0xff]  ;;  %v363_v42 = vld [vmem:[%s3288_s25 + $0x1700] sm:$0xff] }
  0x48   : > { %360 = vst [vmem:[%s3293_s26 + $0x340] sm:$0xff] %v359_v40  ;;  %v365_v43 = vld [vmem:[%s3288_s25 + $0x1708] sm:$0xff]  ;;  %362 = vst [vmem:[%s3293_s26 + $0x348] sm:$0xff] %v361_v41  ;;  %v367_v44 = vld [vmem:[%s3288_s25 + $0x1710] sm:$0xff] }
  0x49   : > { %364 = vst [vmem:[%s3293_s26 + $0x350] sm:$0xff] %v363_v42  ;;  %366 = vst [vmem:[%s3293_s26 + $0x358] sm:$0xff] %v365_v43  ;;  %v369_v45 = vld [vmem:[%s3288_s25 + $0x1718] sm:$0xff]  ;;  %v371_v46 = vld [vmem:[%s3288_s25 + $0x1720] sm:$0xff] }
  0x4a   : > { %368 = vst [vmem:[%s3293_s26 + $0x360] sm:$0xff] %v367_v44  ;;  %370 = vst [vmem:[%s3293_s26 + $0x368] sm:$0xff] %v369_v45  ;;  %v373_v47 = vld [vmem:[%s3288_s25 + $0x1728] sm:$0xff]  ;;  %v375_v48 = vld [vmem:[%s3288_s25 + $0x1730] sm:$0xff] }
  0x4b   : > { %372 = vst [vmem:[%s3293_s26 + $0x370] sm:$0xff] %v371_v46  ;;  %v377_v49 = vld [vmem:[%s3288_s25 + $0x1738] sm:$0xff]  ;;  %374 = vst [vmem:[%s3293_s26 + $0x378] sm:$0xff] %v373_v47  ;;  %v379_v50 = vld [vmem:[%s3288_s25 + $0x1740] sm:$0xff] }
  0x4c   : > { %376 = vst [vmem:[%s3293_s26 + $0x380] sm:$0xff] %v375_v48  ;;  %378 = vst [vmem:[%s3293_s26 + $0x388] sm:$0xff] %v377_v49  ;;  %v381_v51 = vld [vmem:[%s3288_s25 + $0x1748] sm:$0xff]  ;;  %v383_v52 = vld [vmem:[%s3288_s25 + $0x1750] sm:$0xff] }
  0x4d   : > { %380 = vst [vmem:[%s3293_s26 + $0x390] sm:$0xff] %v379_v50  ;;  %382 = vst [vmem:[%s3293_s26 + $0x398] sm:$0xff] %v381_v51  ;;  %v385_v53 = vld [vmem:[%s3288_s25 + $0x1758] sm:$0xff]  ;;  %v387_v54 = vld [vmem:[%s3288_s25 + $0x1760] sm:$0xff] }
  0x4e   : > { %384 = vst [vmem:[%s3293_s26 + $0x3a0] sm:$0xff] %v383_v52  ;;  %v389_v55 = vld [vmem:[%s3288_s25 + $0x1768] sm:$0xff]  ;;  %386 = vst [vmem:[%s3293_s26 + $0x3a8] sm:$0xff] %v385_v53  ;;  %v391_v56 = vld [vmem:[%s3288_s25 + $0x1770] sm:$0xff] }
  0x4f   : > { %388 = vst [vmem:[%s3293_s26 + $0x3b0] sm:$0xff] %v387_v54  ;;  %390 = vst [vmem:[%s3293_s26 + $0x3b8] sm:$0xff] %v389_v55  ;;  %v393_v57 = vld [vmem:[%s3288_s25 + $0x1778] sm:$0xff]  ;;  %v395_v58 = vld [vmem:[%s3288_s25 + $0x1780] sm:$0xff] }
  0x50   : > { %392 = vst [vmem:[%s3293_s26 + $0x3c0] sm:$0xff] %v391_v56  ;;  %394 = vst [vmem:[%s3293_s26 + $0x3c8] sm:$0xff] %v393_v57  ;;  %v397_v59 = vld [vmem:[%s3288_s25 + $0x1788] sm:$0xff]  ;;  %v399_v60 = vld [vmem:[%s3288_s25 + $0x1790] sm:$0xff] }
  0x51   : > { %396 = vst [vmem:[%s3293_s26 + $0x3d0] sm:$0xff] %v395_v58  ;;  %v401_v61 = vld [vmem:[%s3288_s25 + $0x1798] sm:$0xff]  ;;  %398 = vst [vmem:[%s3293_s26 + $0x3d8] sm:$0xff] %v397_v59  ;;  %v403_v62 = vld [vmem:[%s3288_s25 + $0x17a0] sm:$0xff] }
  0x52   : > { %400 = vst [vmem:[%s3293_s26 + $0x3e0] sm:$0xff] %v399_v60  ;;  %402 = vst [vmem:[%s3293_s26 + $0x3e8] sm:$0xff] %v401_v61  ;;  %v405_v63 = vld [vmem:[%s3288_s25 + $0x17a8] sm:$0xff]  ;;  %v407_v0 = vld [vmem:[%s3288_s25 + $0x17b0] sm:$0xff] }
  0x53   : > { %404 = vst [vmem:[%s3293_s26 + $0x3f0] sm:$0xff] %v403_v62  ;;  %406 = vst [vmem:[%s3293_s26 + $0x3f8] sm:$0xff] %v405_v63  ;;  %v409_v1 = vld [vmem:[%s3288_s25 + $0x17b8] sm:$0xff]  ;;  %v411_v2 = vld [vmem:[%s3288_s25 + $0x17c0] sm:$0xff] }
  0x54   : > { %408 = vst [vmem:[%s3293_s26 + $0x400] sm:$0xff] %v407_v0  ;;  %v413_v3 = vld [vmem:[%s3288_s25 + $0x17c8] sm:$0xff]  ;;  %410 = vst [vmem:[%s3293_s26 + $0x408] sm:$0xff] %v409_v1  ;;  %v415_v4 = vld [vmem:[%s3288_s25 + $0x17d0] sm:$0xff] }
  0x55   : > { %412 = vst [vmem:[%s3293_s26 + $0x410] sm:$0xff] %v411_v2  ;;  %414 = vst [vmem:[%s3293_s26 + $0x418] sm:$0xff] %v413_v3  ;;  %v417_v5 = vld [vmem:[%s3288_s25 + $0x17d8] sm:$0xff]  ;;  %v419_v6 = vld [vmem:[%s3288_s25 + $0x17e0] sm:$0xff] }
  0x56   : > { %416 = vst [vmem:[%s3293_s26 + $0x420] sm:$0xff] %v415_v4  ;;  %418 = vst [vmem:[%s3293_s26 + $0x428] sm:$0xff] %v417_v5  ;;  %v421_v7 = vld [vmem:[%s3288_s25 + $0x17e8] sm:$0xff]  ;;  %v423_v8 = vld [vmem:[%s3288_s25 + $0x17f0] sm:$0xff] }
  0x57   : > { %420 = vst [vmem:[%s3293_s26 + $0x430] sm:$0xff] %v419_v6  ;;  %v425_v9 = vld [vmem:[%s3288_s25 + $0x17f8] sm:$0xff]  ;;  %422 = vst [vmem:[%s3293_s26 + $0x438] sm:$0xff] %v421_v7  ;;  %v427_v10 = vld [vmem:[%s3288_s25 + $0x1800] sm:$0xff] }
  0x58   : > { %424 = vst [vmem:[%s3293_s26 + $0x440] sm:$0xff] %v423_v8  ;;  %426 = vst [vmem:[%s3293_s26 + $0x448] sm:$0xff] %v425_v9  ;;  %v429_v11 = vld [vmem:[%s3288_s25 + $0x1808] sm:$0xff] }
  0x59   : > { %428 = vst [vmem:[%s3293_s26 + $0x450] sm:$0xff] %v427_v10  ;;  %430 = vst [vmem:[%s3293_s26 + $0x458] sm:$0xff] %v429_v11 }
  0x5a PF: > { %p2102_p5 = scmp.ge.s32.totalorder %s3229_s14, 1  ;;  %p435_p6 = scmp.lt.s32.totalorder %s3229_s14, 8 }
  0x5c   : > { %p436_p7 = pnand %p2102_p5, %p435_p6 }
  0x5d   : > { %v488_v12 = vld [vmem:[%s4379_s1 + $0x80] sm:$0xff] (!%p436_p7)  ;;  %v489_v13 = vld [vmem:[%s4379_s1 + $0x88] sm:$0xff] (!%p436_p7)  ;;  %v490_v23 = vld [vmem:[%s4379_s1 + $0x90] sm:$0xff] (!%p436_p7)  ;;  %s442_s30 = sand.u32 (!%p436_p7), 1, %s3221_s12   ;;  %vm3232_vm0 = vmmov (!%p436_p7), 0   ;;  %vm586_vm1 = vcmask (!%p436_p7), 523264  }
  0x5e   : > { %439 = sbr.rel (%p436_p7) target bundleno = 530 (0x212), region = 51  ;;  %v472_v14 = vld [vmem:[%s4379_s1] sm:$0xff] (!%p436_p7)  ;;  %v3583_v15 = vpack.c.bf16 (!%p436_p7), %v489_v13, %v488_v12  ;;  %v473_v16 = vld [vmem:[%s4379_s1 + $0x8] sm:$0xff] (!%p436_p7)  ;;  %v491_v25 = vld [vmem:[%s4379_s1 + $0x98] sm:$0xff] (!%p436_p7) }
  0x5f   : > { %v520_v17 = vld [vmem:[%s4379_s1 + $0x180] sm:$0xff] (!%p436_p7)  ;;  %v521_v18 = vld [vmem:[%s4379_s1 + $0x188] sm:$0xff] (!%p436_p7)  ;;  %v3594_v19 = vpack.c.bf16 (!%p436_p7), %v473_v16, %v472_v14  ;;  %v474_v26 = vld [vmem:[%s4379_s1 + $0x10] sm:$0xff] (!%p436_p7)  ;;  %v3621_v28 = vpack.c.bf16 (!%p436_p7), %v491_v25, %v490_v23  ;;  %s3178_s21 = smul.u32 (!%p436_p7), 1120, %s442_s30 }
  0x60   : > { %v3596_v20 = vpack.c.bf16 (!%p436_p7), %v521_v18, %v520_v17  ;;  %v504_v21 = vld [vmem:[%s4379_s1 + $0x100] sm:$0xff] (!%p436_p7)  ;;  %v505_v22 = vld [vmem:[%s4379_s1 + $0x108] sm:$0xff] (!%p436_p7)  ;;  %2873 = vmatprep.subr.bf16.mxu0 (!%p436_p7), %v3583_v15  ;;  %v475_v27 = vld [vmem:[%s4379_s1 + $0x18] sm:$0xff] (!%p436_p7) }
  0x61   : > { %v3608_v24 = vpack.c.bf16 (!%p436_p7), %v505_v22, %v504_v21  ;;  %2875 = vmatpush3.bf16.msra.mxu0 (!%p436_p7), %v3594_v19  ;;  %v3623_v29 = vpack.c.bf16 (!%p436_p7), %v475_v27, %v474_v26  ;;  %v522_v30 = vld [vmem:[%s4379_s1 + $0x190] sm:$0xff] (!%p436_p7)  ;;  %v523_v31 = vld [vmem:[%s4379_s1 + $0x198] sm:$0xff] (!%p436_p7)  ;;  %v492_v35 = vld [vmem:[%s4379_s1 + $0xa0] sm:$0xff] (!%p436_p7)  ;;  %s3799_s29 = scalar_lea.vmem (!%p436_p7), [#allocation2], %s3178_s21 }
  0x62   : > { %2905 = vmatprep.subr.bf16.mxu1 (!%p436_p7), %v3596_v20  ;;  %v506_v32 = vld [vmem:[%s4379_s1 + $0x110] sm:$0xff] (!%p436_p7)  ;;  %v3635_v33 = vpack.c.bf16 (!%p436_p7), %v523_v31, %v522_v30  ;;  %v507_v34 = vld [vmem:[%s4379_s1 + $0x118] sm:$0xff] (!%p436_p7)  ;;  %v493_v36 = vld [vmem:[%s4379_s1 + $0xa8] sm:$0xff] (!%p436_p7)  ;;  %2877 = vmatprep.subr.bf16.mxu0 (!%p436_p7), %v3621_v28 }
  0x63   : > { %2907 = vmatpush3.bf16.msra.mxu1 (!%p436_p7), %v3608_v24  ;;  %v3647_v37 = vpack.c.bf16 (!%p436_p7), %v507_v34, %v506_v32  ;;  %v3649_v38 = vpack.c.bf16 (!%p436_p7), %v493_v36, %v492_v35  ;;  %v476_v39 = vld [vmem:[%s4379_s1 + $0x20] sm:$0xff] (!%p436_p7)  ;;  %v477_v40 = vld [vmem:[%s4379_s1 + $0x28] sm:$0xff] (!%p436_p7)  ;;  %v494_v47 = vld [vmem:[%s4379_s1 + $0xb0] sm:$0xff] (!%p436_p7) }
  0x64   : > { %v524_v41 = vld [vmem:[%s4379_s1 + $0x1a0] sm:$0xff] (!%p436_p7)  ;;  %2909 = vmatprep.subr.bf16.mxu1 (!%p436_p7), %v3635_v33  ;;  %v525_v42 = vld [vmem:[%s4379_s1 + $0x1a8] sm:$0xff] (!%p436_p7)  ;;  %v3671_v45 = vpack.c.bf16 (!%p436_p7), %v477_v40, %v476_v39  ;;  %v495_v48 = vld [vmem:[%s4379_s1 + $0xb8] sm:$0xff] (!%p436_p7) }
  0x65   : > { %v508_v43 = vld [vmem:[%s4379_s1 + $0x120] sm:$0xff]  ;;  %v509_v44 = vld [vmem:[%s4379_s1 + $0x128] sm:$0xff]  ;;  %2879 = vmatpush3.bf16.msra.mxu0 %v3623_v29  ;;  %v3673_v46 = vpack.c.bf16 %v525_v42, %v524_v41  ;;  %v478_v49 = vld [vmem:[%s4379_s1 + $0x30] sm:$0xff]  ;;  %v3688_v51 = vpack.c.bf16 %v495_v48, %v494_v47 }
  0x66   : > { %2881 = vmatprep.subr.bf16.mxu0 %v3649_v38  ;;  %v3686_v50 = vpack.c.bf16 %v509_v44, %v508_v43  ;;  %v479_v52 = vld [vmem:[%s4379_s1 + $0x38] sm:$0xff]  ;;  %v526_v53 = vld [vmem:[%s4379_s1 + $0x1b0] sm:$0xff]  ;;  %v496_v58 = vld [vmem:[%s4379_s1 + $0xc0] sm:$0xff] }
  0x67   : > { %2911 = vmatpush3.bf16.msra.mxu1 %v3647_v37  ;;  %v527_v54 = vld [vmem:[%s4379_s1 + $0x1b8] sm:$0xff]  ;;  %v510_v56 = vld [vmem:[%s4379_s1 + $0x130] sm:$0xff]  ;;  %v497_v59 = vld [vmem:[%s4379_s1 + $0xc8] sm:$0xff]  ;;  %v3716_v60 = vpack.c.bf16 %v479_v52, %v478_v49 }
  0x68   : > { %2913 = vmatprep.subr.bf16.mxu1 %v3673_v46  ;;  %v3700_v55 = vpack.c.bf16 %v527_v54, %v526_v53  ;;  %v511_v57 = vld [vmem:[%s4379_s1 + $0x138] sm:$0xff]  ;;  %v528_v61 = vld [vmem:[%s4379_s1 + $0x1c0] sm:$0xff]  ;;  %v529_v62 = vld [vmem:[%s4379_s1 + $0x1c8] sm:$0xff]  ;;  %v3728_v0 = vpack.c.bf16 %v497_v59, %v496_v58 }
  0x69   : > { %2883 = vmatpush3.bf16.msra.mxu0 %v3671_v45  ;;  %v3726_v63 = vpack.c.bf16 %v511_v57, %v510_v56  ;;  %v480_v1 = vld [vmem:[%s4379_s1 + $0x40] sm:$0xff]  ;;  %v481_v2 = vld [vmem:[%s4379_s1 + $0x48] sm:$0xff]  ;;  %v3740_v4 = vpack.c.bf16 %v529_v62, %v528_v61  ;;  %v498_v6 = vld [vmem:[%s4379_s1 + $0xd0] sm:$0xff] }
  0x6a   : > { %2885 = vmatprep.subr.bf16.mxu0 %v3688_v51  ;;  %v512_v3 = vld [vmem:[%s4379_s1 + $0x140] sm:$0xff]  ;;  %v513_v5 = vld [vmem:[%s4379_s1 + $0x148] sm:$0xff]  ;;  %v499_v7 = vld [vmem:[%s4379_s1 + $0xd8] sm:$0xff]  ;;  %v3758_v10 = vpack.c.bf16 %v481_v2, %v480_v1 }
  0x6b   : > { %2915 = vmatpush3.bf16.msra.mxu1 %v3686_v50  ;;  %v530_v8 = vld [vmem:[%s4379_s1 + $0x1d0] sm:$0xff]  ;;  %v531_v9 = vld [vmem:[%s4379_s1 + $0x1d8] sm:$0xff]  ;;  %v3762_v11 = vpack.c.bf16 %v513_v5, %v512_v3  ;;  %v3764_v12 = vpack.c.bf16 %v499_v7, %v498_v6  ;;  %v500_v21 = vld [vmem:[%s4379_s1 + $0xe0] sm:$0xff]  ;;  %v3231_v3 = vmov 0.0|0.0  }
  0x6c   : > { %2917 = vmatprep.subr.bf16.mxu1 %v3700_v55  ;;  %v482_v13 = vld [vmem:[%s4379_s1 + $0x50] sm:$0xff]  ;;  %v483_v14 = vld [vmem:[%s4379_s1 + $0x58] sm:$0xff]  ;;  %v3776_v17 = vpack.c.bf16 %v531_v9, %v530_v8  ;;  %v501_v22 = vld [vmem:[%s4379_s1 + $0xe8] sm:$0xff] }
  0x6d   : > { %2887 = vmatpush3.bf16.msra.mxu0 %v3716_v60  ;;  %v514_v16 = vld [vmem:[%s4379_s1 + $0x150] sm:$0xff]  ;;  %v515_v18 = vld [vmem:[%s4379_s1 + $0x158] sm:$0xff]  ;;  %v532_v23 = vld [vmem:[%s4379_s1 + $0x1e0] sm:$0xff]  ;;  %v3794_v26 = vpack.c.bf16 %v483_v14, %v482_v13  ;;  %v3806_v32 = vpack.c.bf16 %v501_v22, %v500_v21 }
  0x6e   : > { %2889 = vmatprep.subr.bf16.mxu0 %v3728_v0  ;;  %v533_v25 = vld [vmem:[%s4379_s1 + $0x1e8] sm:$0xff]  ;;  %v484_v27 = vld [vmem:[%s4379_s1 + $0x60] sm:$0xff]  ;;  %v3804_v31 = vpack.c.bf16 %v515_v18, %v514_v16  ;;  %v502_v40 = vld [vmem:[%s4379_s1 + $0xf0] sm:$0xff] }
  0x6f   : > { %2919 = vmatpush3.bf16.msra.mxu1 %v3726_v63  ;;  %v546_v30 = vld [vmem:[%s3799_s29 + $0x8] sm:$0xff]  ;;  %v516_v35 = vld [vmem:[%s4379_s1 + $0x160] sm:$0xff]  ;;  %v3818_v39 = vpack.c.bf16 %v533_v25, %v532_v23  ;;  %v503_v41 = vld [vmem:[%s4379_s1 + $0xf8] sm:$0xff] }
  0x70   : > { %2921 = vmatprep.subr.bf16.mxu1 %v3740_v4  ;;  %v485_v34 = vld [vmem:[%s4379_s1 + $0x68] sm:$0xff]  ;;  %672 = vmatprep.mubr.f32.mxu0 %v546_v30  ;;  %v548_v42 = vld [vmem:[%s3799_s29 + $0x18] sm:$0xff]  ;;  %v534_v43 = vld [vmem:[%s4379_s1 + $0x1f0] sm:$0xff]  ;;  %v3840_v49 = vpack.c.bf16 %v503_v41, %v502_v40 }
  0x71   : > { %2891 = vmatpush3.bf16.msra.mxu0 %v3758_v10  ;;  %v517_v36 = vld [vmem:[%s4379_s1 + $0x168] sm:$0xff]  ;;  %v535_v44 = vld [vmem:[%s4379_s1 + $0x1f8] sm:$0xff]  ;;  %772 = vmatprep.mubr.f32.mxu1 %v548_v42  ;;  %v3834_v47 = vpack.c.bf16 %v485_v34, %v484_v27  ;;  %v486_v52 = vld [vmem:[%s4379_s1 + $0x70] sm:$0xff] }
  0x72   : > { %2893 = vmatprep.subr.bf16.mxu0 %v3764_v12  ;;  %v3838_v48 = vpack.c.bf16 %v517_v36, %v516_v35  ;;  %v487_v53 = vld [vmem:[%s4379_s1 + $0x78] sm:$0xff]  ;;  %v3849_v54 = vpack.c.bf16 %v535_v44, %v534_v43  ;;  %v518_v56 = vld [vmem:[%s4379_s1 + $0x170] sm:$0xff]  ;;  %v536_v61 = vld [vmem:[%s4379_s1 + $0x200] sm:$0xff] }
  0x73   : > { %2923 = vmatpush3.bf16.msra.mxu1 %v3762_v11  ;;  %v519_v57 = vld [vmem:[%s4379_s1 + $0x178] sm:$0xff]  ;;  %v3858_v58 = vpack.c.bf16 %v487_v53, %v486_v52  ;;  %v537_v62 = vld [vmem:[%s4379_s1 + $0x208] sm:$0xff]  ;;  %v545_v1 = vld [vmem:[%s3799_s29] sm:$0xff] }
  0x74   : > { %2925 = vmatprep.subr.bf16.mxu1 %v3776_v17  ;;  %v3862_v59 = vpack.c.bf16 %v519_v57, %v518_v56  ;;  %v3873_v2 = vpack.c.bf16 %v537_v62, %v536_v61  ;;  %v547_v5 = vld [vmem:[%s3799_s29 + $0x10] sm:$0xff]  ;;  %v539_v8 = vld [vmem:[%s4379_s1 + $0x218] sm:$0xff]  ;;  %v553_v9 = vld [vmem:[%s3799_s29 + $0x40] sm:$0xff] }
  0x75   : > { %2895 = vmatpush3.bf16.msra.mxu0 %v3794_v26  ;;  %v551_v6 = vld [vmem:[%s3799_s29 + $0x30] sm:$0xff]  ;;  %v550_v13 = vld [vmem:[%s3799_s29 + $0x28] sm:$0xff]  ;;  %v552_v14 = vld [vmem:[%s3799_s29 + $0x38] sm:$0xff] }
  0x76   : > { %2897 = vmatprep.subr.bf16.mxu0 %v3806_v32  ;;  %v538_v7 = vld [vmem:[%s4379_s1 + $0x210] sm:$0xff]  ;;  %v556_v16 = vld [vmem:[%s3799_s29 + $0x58] sm:$0xff]  ;;  %v558_v21 = vld [vmem:[%s3799_s29 + $0x68] sm:$0xff] }
  0x77   : > { %2927 = vmatpush3.bf16.msra.mxu1 %v3804_v31  ;;  %v3892_v18 = vpack.c.bf16 %v539_v8, %v538_v7  ;;  %v540_v22 = vld [vmem:[%s4379_s1 + $0x220] sm:$0xff]  ;;  %v541_v23 = vld [vmem:[%s4379_s1 + $0x228] sm:$0xff]  ;;  %v555_v25 = vld [vmem:[%s3799_s29 + $0x50] sm:$0xff] }
  0x78   : > { %2929 = vmatprep.subr.bf16.mxu1 %v3818_v39  ;;  %v557_v27 = vld [vmem:[%s3799_s29 + $0x60] sm:$0xff]  ;;  %v563_v34 = vld [vmem:[%s3799_s29 + $0x90] sm:$0xff]  ;;  %v3910_v35 = vpack.c.bf16 %v541_v23, %v540_v22  ;;  %v543_v40 = vld [vmem:[%s4379_s1 + $0x238] sm:$0xff] }
  0x79   : > { %2899 = vmatpush3.bf16.msra.mxu0 %v3834_v47  ;;  %v561_v30 = vld [vmem:[%s3799_s29 + $0x80] sm:$0xff]  ;;  %v542_v36 = vld [vmem:[%s4379_s1 + $0x230] sm:$0xff]  ;;  %v560_v41 = vld [vmem:[%s3799_s29 + $0x78] sm:$0xff] }
  0x7a   : > { %2901 = vmatprep.subr.bf16.mxu0 %v3840_v49  ;;  %v562_v42 = vld [vmem:[%s3799_s29 + $0x88] sm:$0xff]  ;;  %v568_v44 = vld [vmem:[%s3799_s29 + $0xb8] sm:$0xff]  ;;  %v3926_v52 = vpack.c.bf16 %v543_v40, %v542_v36  ;;  %v565_v53 = vld [vmem:[%s3799_s29 + $0xa0] sm:$0xff] }
  0x7b   : > { %2931 = vmatpush3.bf16.msra.mxu1 %v3838_v48  ;;  %v566_v43 = vld [vmem:[%s3799_s29 + $0xa8] sm:$0xff]  ;;  %v567_v56 = vld [vmem:[%s3799_s29 + $0xb0] sm:$0xff]  ;;  %v573_v61 = vld [vmem:[%s3799_s29 + $0xe0] sm:$0xff] }
  0x7c   : > { %2933 = vmatprep.subr.bf16.mxu1 %v3849_v54  ;;  %v571_v57 = vld [vmem:[%s3799_s29 + $0xd0] sm:$0xff]  ;;  %v570_v62 = vld [vmem:[%s3799_s29 + $0xc8] sm:$0xff]  ;;  %v577_v8 = vld [vmem:[%s3799_s29 + $0x100] sm:$0xff] }
  0x7d   : > { %2903 = vmatpush3.bf16.msra.mxu0 %v3858_v58  ;;  %v575_v7 = vld [vmem:[%s3799_s29 + $0xf0] sm:$0xff]  ;;  %v2118_v22 = vld [vmem:[%s3799_s29 + $0x148] sm:$0xff]  ;;  %v2128_v36 = vld [vmem:[%s3799_s29 + $0x198] sm:$0xff] }
  0x7e   : > { %2936 = vmatprep.subr.bf16.mxu0 %v3231_v3  ;;  %v559_v23 = vld [vmem:[%s3799_s29 + $0x70] sm:$0xff]  ;;  %v569_v40 = vld [vmem:[%s3799_s29 + $0xc0] sm:$0xff] }
  0x7f   : > { %2935 = vmatpush3.bf16.msra.mxu1 %v3862_v59 }
  0x80   : > { %2949 = vmatprep.subr.bf16.mxu1 %v3583_v15  ;;  %673 = vmatmul.mubr.f32.vlgmr.msra.gmra.mrb[0].mxu0 %v545_v1  ;;  %v572_v1 = vld [vmem:[%s3799_s29 + $0xd8] sm:$0xff] }
  0x81   : > { %2938 = vmatpush3.bf16.msra.mxu0 %v3873_v2  ;;  %677 = vmatprep.mubr.f32.mxu0 %v551_v6  ;;  %v578_v6 = vld [vmem:[%s3799_s29 + $0x108] sm:$0xff] }
  0x82   : > { %773 = vmatmul.mubr.f32.vlgmr.msra.gmra.mrb[0].mxu1 %v547_v5  ;;  %2939 = vmatprep.subr.bf16.mxu0 %v3231_v3  ;;  %v576_v5 = vld [vmem:[%s3799_s29 + $0xf8] sm:$0xff] }
  0x83   : > { %2951 = vmatpush3.bf16.msra.mxu1 %v3594_v19  ;;  %777 = vmatprep.mubr.f32.mxu1 %v553_v9  ;;  %v2113_v9 = vld [vmem:[%s3799_s29 + $0x120] sm:$0xff] }
  0x84   : > { %2953 = vmatprep.subr.bf16.mxu1 %v3621_v28  ;;  %678 = vmatmul.mubr.f32.gmra.mrb[2].mxu0 %v550_v13  ;;  %v3233_v13 = vmov 0.0  }
  0x85   : > { %682 = vmatprep.mubr.f32.mxu0 %v556_v16  ;;  %2941 = vmatpush3.bf16.msra.mxu0 %v3892_v18  ;;  %v554_v16 = vld [vmem:[%s3799_s29 + $0x48] sm:$0xff] }
  0x86   : > { %778 = vmatmul.mubr.f32.gmra.mrb[2].mxu1 %v552_v14  ;;  %2942 = vmatprep.subr.bf16.mxu0 %v3231_v3  ;;  %v549_v14 = vld [vmem:[%s3799_s29 + $0x20] sm:$0xff] }
  0x87   : > { %2955 = vmatpush3.bf16.msra.mxu1 %v3623_v29  ;;  %782 = vmatprep.mubr.f32.mxu1 %v558_v21  ;;  %v2112_v21 = vld [vmem:[%s3799_s29 + $0x118] sm:$0xff] }
  0x88   : > { %2957 = vmatprep.subr.bf16.mxu1 %v3649_v38  ;;  %683 = vmatmul.mubr.f32.gmra.mrb[4].mxu0 %v555_v25  ;;  %v2117_v25 = vld [vmem:[%s3799_s29 + $0x140] sm:$0xff] }
  0x89   : > { %687 = vmatprep.mubr.f32.mxu0 %v561_v30  ;;  %2944 = vmatpush3.bf16.msra.mxu0 %v3910_v35  ;;  %v564_v30 = vld [vmem:[%s3799_s29 + $0x98] sm:$0xff] }
  0x8a   : > { %783 = vmatmul.mubr.f32.gmra.mrb[4].mxu1 %v557_v27  ;;  %2945 = vmatprep.subr.bf16.mxu0 %v3231_v3  ;;  %v2123_v27 = vld [vmem:[%s3799_s29 + $0x170] sm:$0xff] }
  0x8b   : > { %2959 = vmatpush3.bf16.msra.mxu1 %v3671_v45  ;;  %787 = vmatprep.mubr.f32.mxu1 %v563_v34  ;;  %v2122_v34 = vld [vmem:[%s3799_s29 + $0x168] sm:$0xff] }
  0x8c   : > { %2961 = vmatprep.subr.bf16.mxu1 %v3688_v51  ;;  %688 = vmatmul.mubr.f32.gmra.mrb[6].mxu0 %v560_v41  ;;  %v2127_v41 = vld [vmem:[%s3799_s29 + $0x190] sm:$0xff] }
  0x8d   : > { %692 = vmatprep.mubr.f32.mxu0 %v566_v43  ;;  %2947 = vmatpush3.bf16.msra.mxu0 %v3926_v52  ;;  %v574_v43 = vld [vmem:[%s3799_s29 + $0xe8] sm:$0xff] }
  0x8e   : > { %788 = vmatmul.mubr.f32.gmra.mrb[6].mxu1 %v562_v42  ;;  %2981 = vmatprep.subr.bf16.mxu0 %v3596_v20  ;;  %v2133_v42 = vld [vmem:[%s3799_s29 + $0x1c0] sm:$0xff] }
  0x8f   : > { %2963 = vmatpush3.bf16.msra.mxu1 %v3716_v60  ;;  %792 = vmatprep.mubr.f32.mxu1 %v568_v44  ;;  %v2132_v44 = vld [vmem:[%s3799_s29 + $0x1b8] sm:$0xff] }
  0x90   : > { %2965 = vmatprep.subr.bf16.mxu1 %v3728_v0  ;;  %693 = vmatmul.mubr.f32.gmra.mrb[8].mxu0 %v565_v53  ;;  %v2138_v53 = vld [vmem:[%s3799_s29 + $0x1e8] sm:$0xff] }
  0x91   : > { %697 = vmatprep.mubr.f32.mxu0 %v571_v57  ;;  %v2137_v57 = vld [vmem:[%s3799_s29 + $0x1e0] sm:$0xff] }
  0x92   : > { %793 = vmatmul.mubr.f32.gmra.mrb[8].mxu1 %v567_v56  ;;  %v579_v56 = vld [vmem:[%s3799_s29 + $0x110] sm:$0xff] }
  0x93   : > { %2967 = vmatpush3.bf16.msra.mxu1 %v3758_v10  ;;  %797 = vmatprep.mubr.f32.mxu1 %v573_v61  ;;  %v2143_v61 = vld [vmem:[%s3799_s29 + $0x210] sm:$0xff] }
  0x94   : > { %2969 = vmatprep.subr.bf16.mxu1 %v3764_v12  ;;  %698 = vmatmul.mubr.f32.gmra.mrb[10].mxu0 %v570_v62  ;;  %v2115_v62 = vld [vmem:[%s3799_s29 + $0x130] sm:$0xff] }
  0x95   : > { %702 = vmatprep.mubr.f32.mxu0 %v576_v5  ;;  %v2114_v5 = vld [vmem:[%s3799_s29 + $0x128] sm:$0xff] }
  0x96   : > { %798 = vmatmul.mubr.f32.gmra.mrb[10].mxu1 %v572_v1  ;;  %v2142_v1 = vld [vmem:[%s3799_s29 + $0x208] sm:$0xff] }
  0x97   : > { %2971 = vmatpush3.bf16.msra.mxu1 %v3794_v26  ;;  %802 = vmatprep.mubr.f32.mxu1 %v578_v6  ;;  %v2120_v6 = vld [vmem:[%s3799_s29 + $0x158] sm:$0xff] }
  0x98   : > { %2973 = vmatprep.subr.bf16.mxu1 %v3806_v32  ;;  %703 = vmatmul.mubr.f32.gmra.mrb[12].mxu0 %v575_v7  ;;  %v2116_v7 = vld [vmem:[%s3799_s29 + $0x138] sm:$0xff] }
  0x99   : > { %2740 = vmatprep.mubr.msk.f32.mxu0 %vm3232_vm0, %v3233_v13 }
  0x9a   : > { %803 = vmatmul.mubr.f32.gmra.mrb[12].mxu1 %v577_v8  ;;  %v2119_v8 = vld [vmem:[%s3799_s29 + $0x150] sm:$0xff] }
  0x9b   : > { %2975 = vmatpush3.bf16.msra.mxu1 %v3834_v47  ;;  %1036 = vmatprep.mubr.f32.mxu1 %v2113_v9  ;;  %v2125_v9 = vld [vmem:[%s3799_s29 + $0x180] sm:$0xff] }
  0x9c   : > { %2977 = vmatprep.subr.bf16.mxu1 %v3840_v49  ;;  %2741 = vmatmul.mubr.msk.f32.vlgmr.msra.gmra.mrb[14].mxu0 %vm586_vm1, %v549_v14  ;;  %v2121_v14 = vld [vmem:[%s3799_s29 + $0x160] sm:$0xff] }
  0x9d   : > { %2983 = vmatpush3.bf16.msra.mxu0 %v3608_v24  ;;  %2743 = vmatprep.mubr.msk.f32.mxu0 %vm3232_vm0, %v3233_v13 }
  0x9e   : > { %2985 = vmatprep.subr.bf16.mxu0 %v3635_v33 }
  0x9f   : > { %2979 = vmatpush3.bf16.msra.mxu1 %v3858_v58 }
  0xa0   : > { %3012 = vmatprep.subr.bf16.mxu1 %v3231_v3  ;;  %2744 = vmatmul.mubr.msk.f32.gmra.mrb[16].mxu0 %vm586_vm1, %v554_v16  ;;  %v2124_v16 = vld [vmem:[%s3799_s29 + $0x178] sm:$0xff] }
  0xa1   : > { %2987 = vmatpush3.bf16.msra.mxu0 %v3647_v37  ;;  %2746 = vmatprep.mubr.msk.f32.mxu0 %vm3232_vm0, %v3233_v13 }
  0xa2   : > { %1037 = vmatmul.mubr.f32.vlgmr.msra.gmra.mrb[14].mxu1 %v2112_v21  ;;  %2989 = vmatprep.subr.bf16.mxu0 %v3673_v46  ;;  %v2130_v21 = vld [vmem:[%s3799_s29 + $0x1a8] sm:$0xff] }
  0xa3   : > { %1041 = vmatprep.mubr.f32.mxu1 %v2118_v22  ;;  %3014 = vmatpush3.bf16.msra.mxu1 %v3873_v2  ;;  %v2126_v22 = vld [vmem:[%s3799_s29 + $0x188] sm:$0xff] }
  0xa4   : > { %2747 = vmatmul.mubr.msk.f32.gmra.mrb[18].mxu0 %vm586_vm1, %v559_v23  ;;  %3015 = vmatprep.subr.bf16.mxu1 %v3231_v3  ;;  %v2129_v23 = vld [vmem:[%s3799_s29 + $0x1a0] sm:$0xff] }
  0xa5   : > { %2991 = vmatpush3.bf16.msra.mxu0 %v3686_v50  ;;  %2749 = vmatprep.mubr.msk.f32.mxu0 %vm3232_vm0, %v3233_v13 }
  0xa6   : > { %1042 = vmatmul.mubr.f32.gmra.mrb[16].mxu1 %v2117_v25  ;;  %2993 = vmatprep.subr.bf16.mxu0 %v3700_v55  ;;  %v2135_v25 = vld [vmem:[%s3799_s29 + $0x1d0] sm:$0xff] }
  0xa7   : > { %1046 = vmatprep.mubr.f32.mxu1 %v2123_v27  ;;  %3017 = vmatpush3.bf16.msra.mxu1 %v3892_v18  ;;  %v2131_v27 = vld [vmem:[%s3799_s29 + $0x1b0] sm:$0xff] }
  0xa8   : > { %2750 = vmatmul.mubr.msk.f32.gmra.mrb[20].mxu0 %vm586_vm1, %v564_v30  ;;  %3018 = vmatprep.subr.bf16.mxu1 %v3231_v3  ;;  %v2134_v30 = vld [vmem:[%s3799_s29 + $0x1c8] sm:$0xff] }
  0xa9   : > { %2995 = vmatpush3.bf16.msra.mxu0 %v3726_v63  ;;  %2752 = vmatprep.mubr.msk.f32.mxu0 %vm3232_vm0, %v3233_v13 }
  0xaa   : > { %1047 = vmatmul.mubr.f32.gmra.mrb[18].mxu1 %v2122_v34  ;;  %2997 = vmatprep.subr.bf16.mxu0 %v3740_v4  ;;  %v2140_v34 = vld [vmem:[%s3799_s29 + $0x1f8] sm:$0xff] }
  0xab   : > { %1051 = vmatprep.mubr.f32.mxu1 %v2128_v36  ;;  %3020 = vmatpush3.bf16.msra.mxu1 %v3910_v35  ;;  %v2136_v36 = vld [vmem:[%s3799_s29 + $0x1d8] sm:$0xff] }
  0xac   : > { %2753 = vmatmul.mubr.msk.f32.gmra.mrb[22].mxu0 %vm586_vm1, %v569_v40  ;;  %3021 = vmatprep.subr.bf16.mxu1 %v3231_v3  ;;  %v2139_v40 = vld [vmem:[%s3799_s29 + $0x1f0] sm:$0xff] }
  0xad   : > { %2999 = vmatpush3.bf16.msra.mxu0 %v3762_v11  ;;  %2755 = vmatprep.mubr.msk.f32.mxu0 %vm3232_vm0, %v3233_v13 }
  0xae   : > { %1052 = vmatmul.mubr.f32.gmra.mrb[20].mxu1 %v2127_v41  ;;  %3001 = vmatprep.subr.bf16.mxu0 %v3776_v17  ;;  %v2145_v41 = vld [vmem:[%s3799_s29 + $0x220] sm:$0xff] }
  0xaf   : > { %1056 = vmatprep.mubr.f32.mxu1 %v2133_v42  ;;  %3023 = vmatpush3.bf16.msra.mxu1 %v3926_v52  ;;  %v2141_v42 = vld [vmem:[%s3799_s29 + $0x200] sm:$0xff] }
  0xb0   : > { %2756 = vmatmul.mubr.msk.f32.gmra.mrb[24].mxu0 %vm586_vm1, %v574_v43  ;;  %3057 = vmatprep.subr.bf16.mxu1 %v3596_v20  ;;  %v2144_v43 = vld [vmem:[%s3799_s29 + $0x218] sm:$0xff] }
  0xb1   : > { %3003 = vmatpush3.bf16.msra.mxu0 %v3804_v31  ;;  %2758 = vmatprep.mubr.msk.f32.mxu0 %vm3232_vm0, %v3233_v13 }
  0xb2   : > { %1057 = vmatmul.mubr.f32.gmra.mrb[22].mxu1 %v2132_v44  ;;  %3005 = vmatprep.subr.bf16.mxu0 %v3818_v39  ;;  %v2155_v44 = vld [vmem:[%s3799_s29 + $0x238] sm:$0xff] }
  0xb3   : > { %1061 = vmatprep.mubr.f32.mxu1 %v2138_v53  ;;  %v2146_v53 = vld [vmem:[%s3799_s29 + $0x228] sm:$0xff] }
  0xb4   : > { %2759 = vmatmul.mubr.msk.f32.gmra.mrb[26].mxu0 %vm586_vm1, %v579_v56  ;;  %v2157_v56 = vld [vmem:[%s3799_s29 + $0x248] sm:$0xff] }
  0xb5   : > { %3007 = vmatpush3.bf16.msra.mxu0 %v3838_v48  ;;  %1136 = vmatprep.mubr.f32.mxu0 %v2115_v62  ;;  %v2156_v62 = vld [vmem:[%s3799_s29 + $0x240] sm:$0xff] }
  0xb6   : > { %1062 = vmatmul.mubr.f32.gmra.mrb[24].mxu1 %v2137_v57  ;;  %3009 = vmatprep.subr.bf16.mxu0 %v3849_v54  ;;  %v2154_v57 = vld [vmem:[%s3799_s29 + $0x230] sm:$0xff] }
  0xb7   : > { %1066 = vmatprep.mubr.f32.mxu1 %v2143_v61  ;;  %v2160_v61 = vld [vmem:[%s3799_s29 + $0x260] sm:$0xff] }
  0xb9   : > { %3011 = vmatpush3.bf16.msra.mxu0 %v3862_v59 }
  0xba   : > { %1067 = vmatmul.mubr.f32.gmra.mrb[26].mxu1 %v2142_v1  ;;  %3025 = vmatprep.subr.bf16.mxu0 %v3583_v15  ;;  %v2162_v1 = vld [vmem:[%s3799_s29 + $0x270] sm:$0xff] }
  0xbb   : > { %2777 = vmatprep.mubr.msk.f32.mxu1 %vm3232_vm0, %v3233_v13 }
  0xbc   : > { %1137 = vmatmul.mubr.f32.vlgmr.msra.gmra.mrb[28].mxu0 %v2114_v5  ;;  %v2159_v5 = vld [vmem:[%s3799_s29 + $0x258] sm:$0xff] }
  0xbd   : > { %3027 = vmatpush3.bf16.msra.mxu0 %v3594_v19  ;;  %1141 = vmatprep.mubr.f32.mxu0 %v2120_v6  ;;  %v2165_v6 = vld [vmem:[%s3799_s29 + $0x288] sm:$0xff] }
  0xbe   : > { %2778 = vmatmul.mubr.msk.f32.vlgmr.msra.gmra.mrb[28].mxu1 %vm586_vm1, %v2116_v7  ;;  %3029 = vmatprep.subr.bf16.mxu0 %v3621_v28  ;;  %v2161_v7 = vld [vmem:[%s3799_s29 + $0x268] sm:$0xff] }
  0xbf   : > { %3059 = vmatpush3.bf16.msra.mxu1 %v3608_v24  ;;  %2780 = vmatprep.mubr.msk.f32.mxu1 %vm3232_vm0, %v3233_v13 }
  0xc0   : > { %1142 = vmatmul.mubr.f32.gmra.mrb[30].mxu0 %v2119_v8  ;;  %3061 = vmatprep.subr.bf16.mxu1 %v3635_v33  ;;  %v2164_v8 = vld [vmem:[%s3799_s29 + $0x280] sm:$0xff] }
  0xc1   : > { %3031 = vmatpush3.bf16.msra.mxu0 %v3623_v29  ;;  %1146 = vmatprep.mubr.f32.mxu0 %v2125_v9  ;;  %v2170_v9 = vld [vmem:[%s3799_s29 + $0x2b0] sm:$0xff] }
  0xc2   : > { %3033 = vmatprep.subr.bf16.mxu0 %v3649_v38  ;;  %2781 = vmatmul.mubr.msk.f32.gmra.mrb[30].mxu1 %vm586_vm1, %v2121_v14  ;;  %v2169_v14 = vld [vmem:[%s3799_s29 + $0x2a8] sm:$0xff] }
  0xc3   : > { %3063 = vmatpush3.bf16.msra.mxu1 %v3647_v37  ;;  %2783 = vmatprep.mubr.msk.f32.mxu1 %vm3232_vm0, %v3233_v13 }
  0xc4   : > { %1147 = vmatmul.mubr.f32.gmra.mrb[32].mxu0 %v2124_v16  ;;  %3065 = vmatprep.subr.bf16.mxu1 %v3673_v46  ;;  %v2175_v16 = vld [vmem:[%s3799_s29 + $0x2d8] sm:$0xff] }
  0xc5   : > { %3035 = vmatpush3.bf16.msra.mxu0 %v3671_v45  ;;  %1151 = vmatprep.mubr.f32.mxu0 %v2130_v21  ;;  %v2174_v21 = vld [vmem:[%s3799_s29 + $0x2d0] sm:$0xff] }
  0xc6   : > { %3037 = vmatprep.subr.bf16.mxu0 %v3688_v51  ;;  %2784 = vmatmul.mubr.msk.f32.gmra.mrb[32].mxu1 %vm586_vm1, %v2126_v22  ;;  %v2180_v22 = vld [vmem:[%s3799_s29 + $0x300] sm:$0xff] }
  0xc7   : > { %3067 = vmatpush3.bf16.msra.mxu1 %v3686_v50  ;;  %2786 = vmatprep.mubr.msk.f32.mxu1 %vm3232_vm0, %v3233_v13 }
  0xc8   : > { %1152 = vmatmul.mubr.f32.gmra.mrb[34].mxu0 %v2129_v23  ;;  %3069 = vmatprep.subr.bf16.mxu1 %v3700_v55  ;;  %v2179_v23 = vld [vmem:[%s3799_s29 + $0x2f8] sm:$0xff] }
  0xc9   : > { %3039 = vmatpush3.bf16.msra.mxu0 %v3716_v60  ;;  %1156 = vmatprep.mubr.f32.mxu0 %v2135_v25  ;;  %v2185_v25 = vld [vmem:[%s3799_s29 + $0x328] sm:$0xff] }
  0xca   : > { %3041 = vmatprep.subr.bf16.mxu0 %v3728_v0  ;;  %2787 = vmatmul.mubr.msk.f32.gmra.mrb[34].mxu1 %vm586_vm1, %v2131_v27  ;;  %v2184_v27 = vld [vmem:[%s3799_s29 + $0x320] sm:$0xff] }
  0xcb   : > { %3071 = vmatpush3.bf16.msra.mxu1 %v3726_v63  ;;  %2789 = vmatprep.mubr.msk.f32.mxu1 %vm3232_vm0, %v3233_v13 }
  0xcc   : > { %1157 = vmatmul.mubr.f32.gmra.mrb[36].mxu0 %v2134_v30  ;;  %3073 = vmatprep.subr.bf16.mxu1 %v3740_v4  ;;  %v2197_v30 = vld [vmem:[%s3799_s29 + $0x350] sm:$0xff] }
  0xcd   : > { %3043 = vmatpush3.bf16.msra.mxu0 %v3758_v10  ;;  %1161 = vmatprep.mubr.f32.mxu0 %v2140_v34  ;;  %v2208_v34 = vld [vmem:[%s3799_s29 + $0x3a8] sm:$0xff] }
  0xce   : > { %3045 = vmatprep.subr.bf16.mxu0 %v3764_v12  ;;  %2790 = vmatmul.mubr.msk.f32.gmra.mrb[36].mxu1 %vm586_vm1, %v2136_v36  ;;  %v2214_v36 = vld [vmem:[%s3799_s29 + $0x3d8] sm:$0xff] }
  0xcf   : > { %3075 = vmatpush3.bf16.msra.mxu1 %v3762_v11  ;;  %2792 = vmatprep.mubr.msk.f32.mxu1 %vm3232_vm0, %v3233_v13 }
  0xd0   : > { %1162 = vmatmul.mubr.f32.gmra.mrb[38].mxu0 %v2139_v40  ;;  %3077 = vmatprep.subr.bf16.mxu1 %v3776_v17  ;;  %v2210_v40 = vld [vmem:[%s3799_s29 + $0x3b8] sm:$0xff] }
  0xd1   : > { %3047 = vmatpush3.bf16.msra.mxu0 %v3794_v26  ;;  %1166 = vmatprep.mubr.f32.mxu0 %v2145_v41  ;;  %v2213_v41 = vld [vmem:[%s3799_s29 + $0x3d0] sm:$0xff] }
  0xd2   : > { %3049 = vmatprep.subr.bf16.mxu0 %v3806_v32  ;;  %2793 = vmatmul.mubr.msk.f32.gmra.mrb[38].mxu1 %vm586_vm1, %v2141_v42  ;;  %v2219_v42 = vld [vmem:[%s3799_s29 + $0x400] sm:$0xff] }
  0xd3   : > { %3079 = vmatpush3.bf16.msra.mxu1 %v3804_v31  ;;  %2795 = vmatprep.mubr.msk.f32.mxu1 %vm3232_vm0, %v3233_v13 }
  0xd4   : > { %1167 = vmatmul.mubr.f32.gmra.mrb[40].mxu0 %v2144_v43  ;;  %3081 = vmatprep.subr.bf16.mxu1 %v3818_v39  ;;  %v2215_v43 = vld [vmem:[%s3799_s29 + $0x3e0] sm:$0xff] }
  0xd5   : > { %3051 = vmatpush3.bf16.msra.mxu0 %v3834_v47  ;;  %1407 = vmatprep.mubr.f32.mxu0 %v2155_v44  ;;  %v2218_v44 = vld [vmem:[%s3799_s29 + $0x3f8] sm:$0xff] }
  0xd6   : > { %3053 = vmatprep.subr.bf16.mxu0 %v3840_v49  ;;  %2796 = vmatmul.mubr.msk.f32.gmra.mrb[40].mxu1 %vm586_vm1, %v2146_v53  ;;  %v2224_v53 = vld [vmem:[%s3799_s29 + $0x428] sm:$0xff] }
  0xd7   : > { %3083 = vmatpush3.bf16.msra.mxu1 %v3838_v48  ;;  %1507 = vmatprep.mubr.f32.mxu1 %v2157_v56  ;;  %v2220_v56 = vld [vmem:[%s3799_s29 + $0x408] sm:$0xff] }
  0xd8   : > { %3085 = vmatprep.subr.bf16.mxu1 %v3849_v54 }
  0xd9   : > { %3055 = vmatpush3.bf16.msra.mxu0 %v3858_v58 }
  0xda   : > { %3088 = vmatprep.subr.bf16.mxu0 %v3231_v3 }
  0xdb   : > { %3087 = vmatpush3.bf16.msra.mxu1 %v3862_v59 }
  0xdc   : > { %1408 = vmatmul.mubr.f32.vlgmr.msra.gmra.mrb[42].mxu0 %v2154_v57  ;;  %3101 = vmatprep.subr.bf16.mxu1 %v3583_v15  ;;  %v2167_v15 = vld [vmem:[%s3799_s29 + $0x298] sm:$0xff]  ;;  %v2223_v57 = vld [vmem:[%s3799_s29 + $0x420] sm:$0xff] }
  0xdd   : > { %3090 = vmatpush3.bf16.msra.mxu0 %v3873_v2  ;;  %1412 = vmatprep.mubr.f32.mxu0 %v2160_v61  ;;  %v2229_v61 = vld [vmem:[%s3799_s29 + $0x450] sm:$0xff] }
  0xde   : > { %1508 = vmatmul.mubr.f32.vlgmr.msra.gmra.mrb[42].mxu1 %v2156_v62  ;;  %3091 = vmatprep.subr.bf16.mxu0 %v3231_v3  ;;  %v2225_v62 = vld [vmem:[%s3799_s29 + $0x430] sm:$0xff] }
  0xdf   : > { %1512 = vmatprep.mubr.f32.mxu1 %v2162_v1  ;;  %3103 = vmatpush3.bf16.msra.mxu1 %v3594_v19  ;;  %v2166_v19 = vld [vmem:[%s3799_s29 + $0x290] sm:$0xff]  ;;  %v2228_v1 = vld [vmem:[%s3799_s29 + $0x448] sm:$0xff] }
  0xe0   : > { %1413 = vmatmul.mubr.f32.gmra.mrb[44].mxu0 %v2159_v5  ;;  %3105 = vmatprep.subr.bf16.mxu1 %v3621_v28  ;;  %v2172_v28 = vld [vmem:[%s3799_s29 + $0x2c0] sm:$0xff]  ;;  %v2230_v5 = vld [vmem:[%s3799_s29 + $0x458] sm:$0xff] }
  0xe1   : > { %1417 = vmatprep.mubr.f32.mxu0 %v2165_v6  ;;  %3093 = vmatpush3.bf16.msra.mxu0 %v3892_v18 }
  0xe2   : > { %1513 = vmatmul.mubr.f32.gmra.mrb[44].mxu1 %v2161_v7  ;;  %3094 = vmatprep.subr.bf16.mxu0 %v3231_v3  ;;  %v4252_v7 = vld [vmem:[%s4380_s2] ss:$0 sm:$0xff] }
  0xe3   : > { %1517 = vmatprep.mubr.f32.mxu1 %v2167_v15  ;;  %3107 = vmatpush3.bf16.msra.mxu1 %v3623_v29  ;;  %v2171_v29 = vld [vmem:[%s3799_s29 + $0x2b8] sm:$0xff] }
  0xe4   : > { %1418 = vmatmul.mubr.f32.gmra.mrb[46].mxu0 %v2164_v8  ;;  %3109 = vmatprep.subr.bf16.mxu1 %v3649_v38  ;;  %v2177_v38 = vld [vmem:[%s3799_s29 + $0x2e8] sm:$0xff] }
  0xe5   : > { %1422 = vmatprep.mubr.f32.mxu0 %v2170_v9  ;;  %3096 = vmatpush3.bf16.msra.mxu0 %v3910_v35 }
  0xe6   : > { %1518 = vmatmul.mubr.f32.gmra.mrb[46].mxu1 %v2166_v19  ;;  %3097 = vmatprep.subr.bf16.mxu0 %v3231_v3 }
  0xe7   : > { %1522 = vmatprep.mubr.f32.mxu1 %v2172_v28  ;;  %3111 = vmatpush3.bf16.msra.mxu1 %v3671_v45  ;;  %v2176_v45 = vld [vmem:[%s3799_s29 + $0x2e0] sm:$0xff] }
  0xe8   : > { %1423 = vmatmul.mubr.f32.gmra.mrb[48].mxu0 %v2169_v14  ;;  %3113 = vmatprep.subr.bf16.mxu1 %v3688_v51  ;;  %v2182_v51 = vld [vmem:[%s3799_s29 + $0x310] sm:$0xff] }
  0xe9   : > { %1427 = vmatprep.mubr.f32.mxu0 %v2175_v16  ;;  %3099 = vmatpush3.bf16.msra.mxu0 %v3926_v52 }
  0xea   : > { %1523 = vmatmul.mubr.f32.gmra.mrb[48].mxu1 %v2171_v29  ;;  %3133 = vmatprep.subr.bf16.mxu0 %v3596_v20  ;;  %v2181_v20 = vld [vmem:[%s3799_s29 + $0x308] sm:$0xff] }
  0xeb   : > { %1527 = vmatprep.mubr.f32.mxu1 %v2177_v38  ;;  %3115 = vmatpush3.bf16.msra.mxu1 %v3716_v60  ;;  %v2187_v60 = vld [vmem:[%s3799_s29 + $0x338] sm:$0xff] }
  0xec   : > { %1428 = vmatmul.mubr.f32.gmra.mrb[50].mxu0 %v2174_v21  ;;  %3117 = vmatprep.subr.bf16.mxu1 %v3728_v0  ;;  %v2186_v0 = vld [vmem:[%s3799_s29 + $0x330] sm:$0xff] }
  0xed   : > { %1432 = vmatprep.mubr.f32.mxu0 %v2180_v22 }
  0xee   : > { %1528 = vmatmul.mubr.f32.gmra.mrb[50].mxu1 %v2176_v45 }
  0xef   : > { %1532 = vmatprep.mubr.f32.mxu1 %v2182_v51  ;;  %3119 = vmatpush3.bf16.msra.mxu1 %v3758_v10  ;;  %v2158_v10 = vld [vmem:[%s3799_s29 + $0x250] sm:$0xff] }
  0xf0   : > { %1433 = vmatmul.mubr.f32.gmra.mrb[52].mxu0 %v2179_v23  ;;  %3121 = vmatprep.subr.bf16.mxu1 %v3764_v12  ;;  %v2163_v12 = vld [vmem:[%s3799_s29 + $0x278] sm:$0xff] }
  0xf1   : > { %1437 = vmatprep.mubr.f32.mxu0 %v2185_v25 }
  0xf2   : > { %1533 = vmatmul.mubr.f32.gmra.mrb[52].mxu1 %v2181_v20 }
  0xf3   : > { %1537 = vmatprep.mubr.f32.mxu1 %v2187_v60  ;;  %3123 = vmatpush3.bf16.msra.mxu1 %v3794_v26  ;;  %v2196_v26 = vld [vmem:[%s3799_s29 + $0x348] sm:$0xff] }
  0xf4   : > { %1438 = vmatmul.mubr.f32.gmra.mrb[54].mxu0 %v2184_v27  ;;  %3125 = vmatprep.subr.bf16.mxu1 %v3806_v32  ;;  %v2202_v32 = vld [vmem:[%s3799_s29 + $0x378] sm:$0xff] }
  0xf5   : > { %2814 = vmatprep.mubr.msk.f32.mxu0 %vm3232_vm0, %v3233_v13 }
  0xf6   : > { %1538 = vmatmul.mubr.f32.gmra.mrb[54].mxu1 %v2186_v0 }
  0xf7   : > { %3127 = vmatpush3.bf16.msra.mxu1 %v3834_v47  ;;  %1771 = vmatprep.mubr.f32.mxu1 %v2197_v30  ;;  %v2207_v47 = vld [vmem:[%s3799_s29 + $0x3a0] sm:$0xff] }
  0xf8   : > { %2815 = vmatmul.mubr.msk.f32.vlgmr.msra.gmra.mrb[56].mxu0 %vm586_vm1, %v2158_v10  ;;  %3129 = vmatprep.subr.bf16.mxu1 %v3840_v49  ;;  %v2212_v49 = vld [vmem:[%s3799_s29 + $0x3c8] sm:$0xff] }
  0xf9   : > { %3135 = vmatpush3.bf16.msra.mxu0 %v3608_v24  ;;  %2817 = vmatprep.mubr.msk.f32.mxu0 %vm3232_vm0, %v3233_v13  ;;  %v2168_v24 = vld [vmem:[%s3799_s29 + $0x2a0] sm:$0xff] }
  0xfa   : > { %3137 = vmatprep.subr.bf16.mxu0 %v3635_v33  ;;  %v2201_v33 = vld [vmem:[%s3799_s29 + $0x370] sm:$0xff] }
  0xfb   : > { %3131 = vmatpush3.bf16.msra.mxu1 %v3858_v58  ;;  %v2217_v58 = vld [vmem:[%s3799_s29 + $0x3f0] sm:$0xff] }
  0xfc   : > { %2818 = vmatmul.mubr.msk.f32.gmra.mrb[58].mxu0 %vm586_vm1, %v2163_v12  ;;  %3164 = vmatprep.subr.bf16.mxu1 %v3231_v3 }
  0xfd   : > { %3139 = vmatpush3.bf16.msra.mxu0 %v3647_v37  ;;  %2820 = vmatprep.mubr.msk.f32.mxu0 %vm3232_vm0, %v3233_v13  ;;  %v2173_v37 = vld [vmem:[%s3799_s29 + $0x2c8] sm:$0xff] }
  0xfe   : > { %3141 = vmatprep.subr.bf16.mxu0 %v3673_v46  ;;  %1772 = vmatmul.mubr.f32.vlgmr.msra.gmra.mrb[56].mxu1 %v2196_v26  ;;  %v2206_v46 = vld [vmem:[%s3799_s29 + $0x398] sm:$0xff] }
  0xff   : > { %3166 = vmatpush3.bf16.msra.mxu1 %v3873_v2  ;;  %1776 = vmatprep.mubr.f32.mxu1 %v2202_v32  ;;  %v2222_v2 = vld [vmem:[%s3799_s29 + $0x418] sm:$0xff] }
 0x100   : > { %2821 = vmatmul.mubr.msk.f32.gmra.mrb[60].mxu0 %vm586_vm1, %v2168_v24  ;;  %3167 = vmatprep.subr.bf16.mxu1 %v3231_v3 }
 0x101   : > { %3143 = vmatpush3.bf16.msra.mxu0 %v3686_v50  ;;  %2823 = vmatprep.mubr.msk.f32.mxu0 %vm3232_vm0, %v3233_v13  ;;  %v2178_v50 = vld [vmem:[%s3799_s29 + $0x2f0] sm:$0xff] }
 0x102   : > { %3145 = vmatprep.subr.bf16.mxu0 %v3700_v55  ;;  %1777 = vmatmul.mubr.f32.gmra.mrb[58].mxu1 %v2201_v33  ;;  %v2211_v55 = vld [vmem:[%s3799_s29 + $0x3c0] sm:$0xff] }
 0x103   : > { %1781 = vmatprep.mubr.f32.mxu1 %v2207_v47  ;;  %3169 = vmatpush3.bf16.msra.mxu1 %v3892_v18  ;;  %v2227_v18 = vld [vmem:[%s3799_s29 + $0x440] sm:$0xff] }
 0x104   : > { %2824 = vmatmul.mubr.msk.f32.gmra.mrb[62].mxu0 %vm586_vm1, %v2173_v37  ;;  %3170 = vmatprep.subr.bf16.mxu1 %v3231_v3 }
 0x105   : > { %3147 = vmatpush3.bf16.msra.mxu0 %v3726_v63  ;;  %2826 = vmatprep.mubr.msk.f32.mxu0 %vm3232_vm0, %v3233_v13  ;;  %v2183_v63 = vld [vmem:[%s3799_s29 + $0x318] sm:$0xff] }
 0x106   : > { %3149 = vmatprep.subr.bf16.mxu0 %v3740_v4  ;;  %1782 = vmatmul.mubr.f32.gmra.mrb[60].mxu1 %v2206_v46  ;;  %v2216_v4 = vld [vmem:[%s3799_s29 + $0x3e8] sm:$0xff] }
 0x107   : > { %1786 = vmatprep.mubr.f32.mxu1 %v2212_v49  ;;  %3172 = vmatpush3.bf16.msra.mxu1 %v3910_v35  ;;  %v2204_v35 = vld [vmem:[%s3799_s29 + $0x388] sm:$0xff] }
 0x108   : > { %2827 = vmatmul.mubr.msk.f32.gmra.mrb[64].mxu0 %vm586_vm1, %v2178_v50  ;;  %3173 = vmatprep.subr.bf16.mxu1 %v3231_v3  ;;  %v2221_v3 = vld [vmem:[%s3799_s29 + $0x410] sm:$0xff] }
 0x109   : > { %3151 = vmatpush3.bf16.msra.mxu0 %v3762_v11  ;;  %2829 = vmatprep.mubr.msk.f32.mxu0 %vm3232_vm0, %v3233_v13  ;;  %v2188_v11 = vld [vmem:[%s3799_s29 + $0x340] sm:$0xff] }
 0x10a   : > { %3153 = vmatprep.subr.bf16.mxu0 %v3776_v17  ;;  %1787 = vmatmul.mubr.f32.gmra.mrb[62].mxu1 %v2211_v55  ;;  %v2199_v17 = vld [vmem:[%s3799_s29 + $0x360] sm:$0xff] }
 0x10b   : > { %1791 = vmatprep.mubr.f32.mxu1 %v2217_v58  ;;  %3175 = vmatpush3.bf16.msra.mxu1 %v3926_v52  ;;  %v2209_v52 = vld [vmem:[%s3799_s29 + $0x3b0] sm:$0xff] }
 0x10c   : > { %2830 = vmatmul.mubr.msk.f32.gmra.mrb[66].mxu0 %vm586_vm1, %v2183_v63 }
 0x10d   : > { %3155 = vmatpush3.bf16.msra.mxu0 %v3804_v31  ;;  %2832 = vmatprep.mubr.msk.f32.mxu0 %vm3232_vm0, %v3233_v13  ;;  %v2226_v31 = vld [vmem:[%s3799_s29 + $0x438] sm:$0xff] }
 0x10e   : > { %3157 = vmatprep.subr.bf16.mxu0 %v3818_v39  ;;  %1792 = vmatmul.mubr.f32.gmra.mrb[64].mxu1 %v2216_v4  ;;  %v2198_v39 = vld [vmem:[%s3799_s29 + $0x358] sm:$0xff] }
 0x10f   : > { %1796 = vmatprep.mubr.f32.mxu1 %v2222_v2 }
 0x110   : > { %2833 = vmatmul.mubr.msk.f32.gmra.mrb[68].mxu0 %vm586_vm1, %v2188_v11 }
 0x111   : > { %3159 = vmatpush3.bf16.msra.mxu0 %v3838_v48  ;;  %1871 = vmatprep.mubr.f32.mxu0 %v2199_v17  ;;  %v2200_v48 = vld [vmem:[%s3799_s29 + $0x368] sm:$0xff] }
 0x112   : > { %3161 = vmatprep.subr.bf16.mxu0 %v3849_v54  ;;  %1797 = vmatmul.mubr.f32.gmra.mrb[66].mxu1 %v2221_v3  ;;  %v2203_v54 = vld [vmem:[%s3799_s29 + $0x380] sm:$0xff] }
 0x113   : > { %1801 = vmatprep.mubr.f32.mxu1 %v2227_v18 }
 0x115   : > { %3163 = vmatpush3.bf16.msra.mxu0 %v3862_v59  ;;  %v2205_v59 = vld [vmem:[%s3799_s29 + $0x390] sm:$0xff]  ;;  %s466_s29 = smul.u32 7, %s2097_s15 }
 0x116   : > { %1802 = vmatmul.mubr.f32.gmra.mrb[68].mxu1 %v2226_v31 }
 0x117   : > { %2851 = vmatprep.mubr.msk.f32.mxu1 %vm3232_vm0, %v3233_v13  ;;  %p467_p8 = scmp.lt.s32.totalorder %s466_s29, 48 }
 0x118   : > { %1872 = vmatmul.mubr.f32.vlgmr.msra.gmra.mrb[70].mxu0 %v2198_v39 }
 0x119   : > { %1876 = vmatprep.mubr.f32.mxu0 %v2204_v35  ;;  %s4386_s29 = smov (!%p467_p8, %s466_s29), 48 }
 0x11a   : > { %2852 = vmatmul.mubr.msk.f32.vlgmr.msra.gmra.mrb[70].mxu1 %vm586_vm1, %v2200_v48  ;;  %s2103_s14 = sshll.u32 %s4386_s29, 3 }
 0x11b   : > { %2854 = vmatprep.mubr.msk.f32.mxu1 %vm3232_vm0, %v3233_v13  ;;  %s4340_s28 = scalar_lea.vmem %s4381_s3, %s2103_s14 }
 0x11c   : > { %1877 = vmatmul.mubr.f32.gmra.mrb[72].mxu0 %v2203_v54 }
 0x11d   : > { %1881 = vmatprep.mubr.f32.mxu0 %v2209_v52 }
 0x11e   : > { %2855 = vmatmul.mubr.msk.f32.gmra.mrb[72].mxu1 %vm586_vm1, %v2205_v59 }
 0x11f   : > { %2857 = vmatprep.mubr.msk.f32.mxu1 %vm3232_vm0, %v3233_v13 }
 0x120   : > { %1882 = vmatmul.mubr.f32.gmra.mrb[74].mxu0 %v2208_v34 }
 0x121   : > { %1886 = vmatprep.mubr.f32.mxu0 %v2214_v36 }
 0x122   : > { %2858 = vmatmul.mubr.msk.f32.gmra.mrb[74].mxu1 %vm586_vm1, %v2210_v40 }
 0x123   : > { %2860 = vmatprep.mubr.msk.f32.mxu1 %vm3232_vm0, %v3233_v13 }
 0x124   : > { %1887 = vmatmul.mubr.f32.gmra.mrb[76].mxu0 %v2213_v41 }
 0x125   : > { %1891 = vmatprep.mubr.f32.mxu0 %v2219_v42 }
 0x126   : > { %2861 = vmatmul.mubr.msk.f32.gmra.mrb[76].mxu1 %vm586_vm1, %v2215_v43 }
 0x127   : > { %2863 = vmatprep.mubr.msk.f32.mxu1 %vm3232_vm0, %v3233_v13 }
 0x128   : > { %1892 = vmatmul.mubr.f32.gmra.mrb[78].mxu0 %v2218_v44 }
 0x129   : > { %1896 = vmatprep.mubr.f32.mxu0 %v2224_v53 }
 0x12a   : > { %2864 = vmatmul.mubr.msk.f32.gmra.mrb[78].mxu1 %vm586_vm1, %v2220_v56 }
 0x12b   : > { %2866 = vmatprep.mubr.msk.f32.mxu1 %vm3232_vm0, %v3233_v13 }
 0x12c   : > { %1897 = vmatmul.mubr.f32.gmra.mrb[80].mxu0 %v2223_v57 }
 0x12d   : > { %1901 = vmatprep.mubr.f32.mxu0 %v2229_v61 }
 0x12e   : > { %2867 = vmatmul.mubr.msk.f32.gmra.mrb[80].mxu1 %vm586_vm1, %v2225_v62 }
 0x12f   : > { %2869 = vmatprep.mubr.msk.f32.mxu1 %vm3232_vm0, %v3233_v13 }
 0x130   : > { %1902 = vmatmul.mubr.f32.gmra.mrb[82].mxu0 %v2228_v1 }
 0x132   : > { %2870 = vmatmul.mubr.msk.f32.gmra.mrb[82].mxu1 %vm586_vm1, %v2230_v5 }
 0x153   : > { %v2272_v6 = vpop.f32.mrb[0].mxu0 }
 0x154   : > { %v2273_v15 = vpop.f32.mrb[1].mxu0 }
 0x155   : > { %v2325_v8 = vpop.f32.mrb[0].mxu1  ;;  %v2274_v9 = vadd.f32 %v2273_v15, %v2272_v6 }
 0x156   : > { %v2326_v19 = vpop.f32.mrb[1].mxu1 }
 0x157   : > { %v2327_v28 = vadd.f32 %v2326_v19, %v2325_v8  ;;  %v675_v14 = vadd.f32 %v2274_v9, %v4252_v7  ;;  %v2275_v16 = vpop.f32.mrb[2].mxu0 }
 0x158   : > { %v2276_v29 = vpop.f32.mrb[3].mxu0 }
 0x159   : > { %v2328_v13 = vpop.f32.mrb[2].mxu1  ;;  %v2277_v38 = vadd.f32 %v2276_v29, %v2275_v16  ;;  %v775_v22 = vadd.f32 %v2327_v28, %v675_v14 }
 0x15a   : > { %v2329_v21 = vpop.f32.mrb[3].mxu1 }
 0x15b   : > { %v2330_v45 = vadd.f32 %v2329_v21, %v2328_v13  ;;  %v680_v51 = vadd.f32 %v2277_v38, %v4252_v7  ;;  %v2278_v23 = vpop.f32.mrb[4].mxu0 }
 0x15c   : > { %v2279_v25 = vpop.f32.mrb[5].mxu0 }
 0x15d   : > { %v2331_v20 = vpop.f32.mrb[4].mxu1  ;;  %v2280_v60 = vadd.f32 %v2279_v25, %v2278_v23  ;;  %v780_v0 = vadd.f32 %v2330_v45, %v680_v51 }
 0x15e   : > { %v2332_v27 = vpop.f32.mrb[5].mxu1 }
 0x15f   : > { %v2333_v30 = vadd.f32 %v2332_v27, %v2331_v20  ;;  %v685_v10 = vadd.f32 %v2280_v60, %v4252_v7  ;;  %v2281_v12 = vpop.f32.mrb[6].mxu0 }
 0x160   : > { %v2282_v26 = vpop.f32.mrb[7].mxu0 }
 0x161   : > { %v2334_v32 = vpop.f32.mrb[6].mxu1  ;;  %v2283_v24 = vadd.f32 %v2282_v26, %v2281_v12  ;;  %v785_v47 = vadd.f32 %v2333_v30, %v685_v10 }
 0x162   : > { %v2335_v33 = vpop.f32.mrb[7].mxu1 }
 0x163   : > { %v2336_v37 = vadd.f32 %v2335_v33, %v2334_v32  ;;  %v690_v46 = vadd.f32 %v2283_v24, %v4252_v7  ;;  %v2284_v49 = vpop.f32.mrb[8].mxu0 }
 0x164   : > { %v2285_v50 = vpop.f32.mrb[9].mxu0 }
 0x165   : > { %v2337_v55 = vpop.f32.mrb[8].mxu1  ;;  %v2286_v58 = vadd.f32 %v2285_v50, %v2284_v49  ;;  %v790_v4 = vadd.f32 %v2336_v37, %v690_v46 }
 0x166   : > { %v2338_v63 = vpop.f32.mrb[9].mxu1 }
 0x167   : > { %v2339_v2 = vadd.f32 %v2338_v63, %v2337_v55  ;;  %v695_v11 = vadd.f32 %v2286_v58, %v4252_v7  ;;  %v2287_v17 = vpop.f32.mrb[10].mxu0 }
 0x168   : > { %v2288_v3 = vpop.f32.mrb[11].mxu0 }
 0x169   : > { %v2340_v18 = vpop.f32.mrb[10].mxu1  ;;  %v2289_v31 = vadd.f32 %v2288_v3, %v2287_v17  ;;  %v795_v35 = vadd.f32 %v2339_v2, %v695_v11 }
 0x16a   : > { %v2341_v39 = vpop.f32.mrb[11].mxu1 }
 0x16b   : > { %v2342_v48 = vadd.f32 %v2341_v39, %v2340_v18  ;;  %v700_v54 = vadd.f32 %v2289_v31, %v4252_v7  ;;  %v2290_v52 = vpop.f32.mrb[12].mxu0 }
 0x16c   : > { %v2291_v59 = vpop.f32.mrb[13].mxu0 }
 0x16d   : > { %v2343_v34 = vpop.f32.mrb[12].mxu1  ;;  %v2292_v36 = vadd.f32 %v2291_v59, %v2290_v52  ;;  %v800_v41 = vadd.f32 %v2342_v48, %v700_v54 }
 0x16e   : > { %v2344_v40 = vpop.f32.mrb[13].mxu1 }
 0x16f   : > { %v2345_v42 = vadd.f32 %v2344_v40, %v2343_v34  ;;  %v705_v43 = vadd.f32 %v2292_v36, %v4252_v7  ;;  %v874_v44 = vpop.f32.mrb[14].mxu0 }
 0x170   : > { %v4261_v53 = vadd.f32 %v874_v44, %v775_v22  ;;  %v2742_v56 = vpop.f32.mrb[15].mxu0 }
 0x171   : > { %v805_v57 = vadd.f32 %v2345_v42, %v705_v43 }
 0x172   : > { %v908_v34 = vmax.f32 %v4261_v53, 0.0 }
 0x173   : > { %v879_v61 = vpop.f32.mrb[16].mxu0 }
 0x174   : > { %v4263_v62 = vadd.f32 %v879_v61, %v780_v0  ;;  %v2745_v1 = vpop.f32.mrb[17].mxu0 }
 0x175   : > { %v2393_v5 = vpop.f32.mrb[14].mxu1 }
 0x176   : > { %v2394_v6 = vpop.f32.mrb[15].mxu1 }
 0x177   : > { %v2395_v15 = vadd.f32 %v2394_v6, %v2393_v5  ;;  %v884_v8 = vpop.f32.mrb[18].mxu0  ;;  %v909_v5 = vmax.f32 %v4263_v62, 0.0 }
 0x178   : > { %v4265_v9 = vadd.f32 %v884_v8, %v785_v47  ;;  %v2748_v19 = vpop.f32.mrb[19].mxu0 }
 0x179   : > { %v2396_v28 = vpop.f32.mrb[16].mxu1  ;;  %v1039_v2 = vadd.f32 %v2395_v15, %v4252_v7 }
 0x17a   : > { %v2397_v14 = vpop.f32.mrb[17].mxu1 }
 0x17b   : > { %v2398_v16 = vadd.f32 %v2397_v14, %v2396_v28  ;;  %v889_v29 = vpop.f32.mrb[20].mxu0 }
 0x17c   : > { %v4267_v13 = vadd.f32 %v889_v29, %v790_v4  ;;  %v2751_v38 = vpop.f32.mrb[21].mxu0 }
 0x17d   : > { %v2399_v21 = vpop.f32.mrb[18].mxu1 }
 0x17e   : > { %v2400_v22 = vpop.f32.mrb[19].mxu1 }
 0x17f   : > { %v2401_v45 = vadd.f32 %v2400_v22, %v2399_v21  ;;  %v894_v51 = vpop.f32.mrb[22].mxu0  ;;  %v910_v21 = vmax.f32 %v4265_v9, 0.0 }
 0x180   : > { %v4269_v23 = vadd.f32 %v894_v51, %v795_v35  ;;  %v2754_v25 = vpop.f32.mrb[23].mxu0  ;;  %v1044_v35 = vadd.f32 %v2398_v16, %v4252_v7 }
 0x181   : > { %v2402_v20 = vpop.f32.mrb[20].mxu1  ;;  %v1049_v43 = vadd.f32 %v2401_v45, %v4252_v7 }
 0x182   : > { %v2403_v60 = vpop.f32.mrb[21].mxu1 }
 0x183   : > { %v2404_v27 = vadd.f32 %v2403_v60, %v2402_v20  ;;  %v899_v0 = vpop.f32.mrb[24].mxu0 }
 0x184   : > { %v4271_v30 = vadd.f32 %v899_v0, %v800_v41  ;;  %v2757_v10 = vpop.f32.mrb[25].mxu0 }
 0x185   : > { %v2405_v12 = vpop.f32.mrb[22].mxu1  ;;  %v1054_v53 = vadd.f32 %v2404_v27, %v4252_v7 }
 0x186   : > { %v2406_v26 = vpop.f32.mrb[23].mxu1 }
 0x187   : > { %v2407_v32 = vadd.f32 %v2406_v26, %v2405_v12  ;;  %v904_v24 = vpop.f32.mrb[26].mxu0  ;;  %v911_v12 = vmax.f32 %v4267_v13, 0.0 }
 0x188   : > { %v4273_v33 = vadd.f32 %v904_v24, %v805_v57  ;;  %v2760_v37 = vpop.f32.mrb[27].mxu0 }
 0x189   : > { %v2408_v47 = vpop.f32.mrb[24].mxu1  ;;  %v1059_v62 = vadd.f32 %v2407_v32, %v4252_v7 }
 0x18a   : > { %v2409_v46 = vpop.f32.mrb[25].mxu1 }
 0x18b   : > { %v2410_v49 = vadd.f32 %v2409_v46, %v2408_v47 }
 0x18d   : > { %v2411_v50 = vpop.f32.mrb[26].mxu1  ;;  %v1064_v9 = vadd.f32 %v2410_v49, %v4252_v7 }
 0x18e   : > { %v2412_v55 = vpop.f32.mrb[27].mxu1 }
 0x18f   : > { %v4275_v58 = vadd.f32 %v2412_v55, %v2411_v50  ;;  %v2446_v63 = vpop.f32.mrb[28].mxu0 }
 0x190   : > { %v2447_v4 = vpop.f32.mrb[29].mxu0 }
 0x191   : > { %v2448_v11 = vadd.f32 %v2447_v4, %v2446_v63  ;;  %v1238_v17 = vpop.f32.mrb[28].mxu1  ;;  %v912_v4 = vmax.f32 %v4269_v23, 0.0  ;;  %v1069_v13 = vadd.f32 %v4275_v58, %v4252_v7 }
 0x192   : > { %v2779_v3 = vpop.f32.mrb[29].mxu1 }
 0x193   : > { %v2449_v18 = vpop.f32.mrb[30].mxu0  ;;  %v1139_v31 = vadd.f32 %v2448_v11, %v1039_v2 }
 0x194   : > { %v2450_v39 = vpop.f32.mrb[31].mxu0 }
 0x195   : > { %v1239_v48 = vadd.f32 %v1238_v17, %v1139_v31  ;;  %v2451_v54 = vadd.f32 %v2450_v39, %v2449_v18  ;;  %v1243_v52 = vpop.f32.mrb[30].mxu1 }
 0x196   : > { %v2782_v59 = vpop.f32.mrb[31].mxu1 }
 0x197   : > { %v1272_v36 = vmax.f32 %v1239_v48, 0.0  ;;  %v2452_v40 = vpop.f32.mrb[32].mxu0  ;;  %v1144_v41 = vadd.f32 %v2451_v54, %v1044_v35  ;;  %v913_v48 = vmax.f32 %v4271_v30, 0.0 }
 0x198   : > { %v2453_v42 = vpop.f32.mrb[33].mxu0 }
 0x199   : > { %v4281_v44 = vmax.f32 %v908_v34, %v1272_v36  ;;  %v2454_v56 = vadd.f32 %v2453_v42, %v2452_v40  ;;  %v1244_v57 = vadd.f32 %v1243_v52, %v1144_v41  ;;  %v1248_v61 = vpop.f32.mrb[32].mxu1  ;;  %v914_v34 = vmax.f32 %v4273_v33, 0.0 }
 0x19a   : > { %v2785_v1 = vpop.f32.mrb[33].mxu1 }
 0x19b   : > { %v1273_v6 = vmax.f32 %v1244_v57, 0.0  ;;  %v2455_v15 = vpop.f32.mrb[34].mxu0  ;;  %v1149_v8 = vadd.f32 %v2454_v56, %v1049_v43 }
 0x19c   : > { %v2456_v19 = vpop.f32.mrb[35].mxu0 }
 0x19d   : > { %v4285_v28 = vmax.f32 %v909_v5, %v1273_v6  ;;  %v2457_v14 = vadd.f32 %v2456_v19, %v2455_v15  ;;  %v1249_v16 = vadd.f32 %v1248_v61, %v1149_v8  ;;  %v1253_v29 = vpop.f32.mrb[34].mxu1 }
 0x19e   : > { %v2788_v38 = vpop.f32.mrb[35].mxu1 }
 0x19f   : > { %v1274_v22 = vmax.f32 %v1249_v16, 0.0  ;;  %v2458_v45 = vpop.f32.mrb[36].mxu0  ;;  %v1154_v51 = vadd.f32 %v2457_v14, %v1054_v53 }
 0x1a0   : > { %v2459_v25 = vpop.f32.mrb[37].mxu0 }
 0x1a1   : > { %v4289_v20 = vmax.f32 %v910_v21, %v1274_v22  ;;  %v2460_v60 = vadd.f32 %v2459_v25, %v2458_v45  ;;  %v1254_v0 = vadd.f32 %v1253_v29, %v1154_v51  ;;  %v1258_v10 = vpop.f32.mrb[36].mxu1 }
 0x1a2   : > { %v2791_v27 = vpop.f32.mrb[37].mxu1 }
 0x1a3   : > { %v1275_v26 = vmax.f32 %v1254_v0, 0.0  ;;  %v2461_v24 = vpop.f32.mrb[38].mxu0  ;;  %v1159_v47 = vadd.f32 %v2460_v60, %v1059_v62 }
 0x1a4   : > { %v2462_v37 = vpop.f32.mrb[39].mxu0 }
 0x1a5   : > { %v4293_v46 = vmax.f32 %v911_v12, %v1275_v26  ;;  %v2463_v50 = vadd.f32 %v2462_v37, %v2461_v24  ;;  %v1259_v55 = vadd.f32 %v1258_v10, %v1159_v47  ;;  %v1263_v63 = vpop.f32.mrb[38].mxu1 }
 0x1a6   : > { %v2794_v32 = vpop.f32.mrb[39].mxu1 }
 0x1a7   : > { %v1276_v2 = vmax.f32 %v1259_v55, 0.0  ;;  %v2464_v11 = vpop.f32.mrb[40].mxu0  ;;  %v1164_v17 = vadd.f32 %v2463_v50, %v1064_v9 }
 0x1a8   : > { %v2465_v3 = vpop.f32.mrb[41].mxu0 }
 0x1a9   : > { %v4298_v18 = vmax.f32 %v912_v4, %v1276_v2  ;;  %v2466_v31 = vadd.f32 %v2465_v3, %v2464_v11  ;;  %v1264_v39 = vadd.f32 %v1263_v63, %v1164_v17  ;;  %v1268_v49 = vpop.f32.mrb[40].mxu1 }
 0x1aa   : > { %v2797_v35 = vpop.f32.mrb[41].mxu1 }
 0x1ab   : > { %v1277_v54 = vmax.f32 %v1264_v39, 0.0  ;;  %v1169_v52 = vadd.f32 %v2466_v31, %v1069_v13 }
 0x1ad   : > { %v4301_v59 = vmax.f32 %v913_v48, %v1277_v54  ;;  %v1269_v23 = vadd.f32 %v1268_v49, %v1169_v52 }
 0x1af   : > { %v1278_v36 = vmax.f32 %v1269_v23, 0.0  ;;  %v2514_v40 = vpop.f32.mrb[42].mxu0 }
 0x1b0   : > { %v2515_v41 = vpop.f32.mrb[43].mxu0 }
 0x1b1   : > { %v4304_v42 = vmax.f32 %v914_v34, %v1278_v36  ;;  %v2516_v58 = vadd.f32 %v2515_v41, %v2514_v40  ;;  %v2567_v43 = vpop.f32.mrb[42].mxu1 }
 0x1b2   : > { %v2568_v56 = vpop.f32.mrb[43].mxu1 }
 0x1b3   : > { %v1410_v57 = vadd.f32 %v2516_v58, %v4252_v7  ;;  %v2569_v61 = vadd.f32 %v2568_v56, %v2567_v43  ;;  %v2517_v1 = vpop.f32.mrb[44].mxu0 }
 0x1b4   : > { %v2518_v30 = vpop.f32.mrb[45].mxu0 }
 0x1b5   : > { %v2519_v5 = vadd.f32 %v2518_v30, %v2517_v1  ;;  %v2570_v6 = vpop.f32.mrb[44].mxu1  ;;  %v1510_v15 = vadd.f32 %v2569_v61, %v1410_v57 }
 0x1b6   : > { %v2571_v8 = vpop.f32.mrb[45].mxu1 }
 0x1b7   : > { %v1415_v19 = vadd.f32 %v2519_v5, %v4252_v7  ;;  %v2572_v33 = vadd.f32 %v2571_v8, %v2570_v6  ;;  %v2520_v53 = vpop.f32.mrb[46].mxu0 }
 0x1b8   : > { %v2521_v14 = vpop.f32.mrb[47].mxu0 }
 0x1b9   : > { %v2522_v16 = vadd.f32 %v2521_v14, %v2520_v53  ;;  %v2573_v29 = vpop.f32.mrb[46].mxu1  ;;  %v1515_v38 = vadd.f32 %v2572_v33, %v1415_v19 }
 0x1ba   : > { %v2574_v21 = vpop.f32.mrb[47].mxu1 }
 0x1bb   : > { %v1420_v22 = vadd.f32 %v2522_v16, %v4252_v7  ;;  %v2575_v45 = vadd.f32 %v2574_v21, %v2573_v29  ;;  %v2523_v51 = vpop.f32.mrb[48].mxu0 }
 0x1bc   : > { %v2524_v25 = vpop.f32.mrb[49].mxu0 }
 0x1bd   : > { %v2525_v62 = vadd.f32 %v2524_v25, %v2523_v51  ;;  %v2576_v60 = vpop.f32.mrb[48].mxu1  ;;  %v1520_v0 = vadd.f32 %v2575_v45, %v1420_v22 }
 0x1be   : > { %v2577_v10 = vpop.f32.mrb[49].mxu1 }
 0x1bf   : > { %v1425_v27 = vadd.f32 %v2525_v62, %v4252_v7  ;;  %v2578_v12 = vadd.f32 %v2577_v10, %v2576_v60  ;;  %v2526_v26 = vpop.f32.mrb[50].mxu0 }
 0x1c0   : > { %v2527_v24 = vpop.f32.mrb[51].mxu0 }
 0x1c1   : > { %v2528_v47 = vadd.f32 %v2527_v24, %v2526_v26  ;;  %v2579_v37 = vpop.f32.mrb[50].mxu1  ;;  %v1525_v9 = vadd.f32 %v2578_v12, %v1425_v27 }
 0x1c2   : > { %v2580_v50 = vpop.f32.mrb[51].mxu1 }
 0x1c3   : > { %v1430_v55 = vadd.f32 %v2528_v47, %v4252_v7  ;;  %v2581_v63 = vadd.f32 %v2580_v50, %v2579_v37  ;;  %v2529_v32 = vpop.f32.mrb[52].mxu0 }
 0x1c4   : > { %v2530_v4 = vpop.f32.mrb[53].mxu0 }
 0x1c5   : > { %v2531_v2 = vadd.f32 %v2530_v4, %v2529_v32  ;;  %v2582_v11 = vpop.f32.mrb[52].mxu1  ;;  %v1530_v17 = vadd.f32 %v2581_v63, %v1430_v55 }
 0x1c6   : > { %v2583_v3 = vpop.f32.mrb[53].mxu1 }
 0x1c7   : > { %v1435_v13 = vadd.f32 %v2531_v2, %v4252_v7  ;;  %v2584_v31 = vadd.f32 %v2583_v3, %v2582_v11  ;;  %v2532_v39 = vpop.f32.mrb[54].mxu0 }
 0x1c8   : > { %v2533_v49 = vpop.f32.mrb[55].mxu0 }
 0x1c9   : > { %v2534_v35 = vadd.f32 %v2533_v49, %v2532_v39  ;;  %v2585_v48 = vpop.f32.mrb[54].mxu1  ;;  %v1535_v54 = vadd.f32 %v2584_v31, %v1435_v13 }
 0x1ca   : > { %v2586_v52 = vpop.f32.mrb[55].mxu1 }
 0x1cb   : > { %v1440_v23 = vadd.f32 %v2534_v35, %v4252_v7  ;;  %v2587_v34 = vadd.f32 %v2586_v52, %v2585_v48  ;;  %v1609_v36 = vpop.f32.mrb[56].mxu0 }
 0x1cc   : > { %v4313_v40 = vadd.f32 %v1609_v36, %v1510_v15  ;;  %v2816_v41 = vpop.f32.mrb[57].mxu0 }
 0x1cd   : > { %v1540_v58 = vadd.f32 %v2587_v34, %v1440_v23 }
 0x1ce   : > { %v1643_v41 = vmax.f32 %v4313_v40, 0.0 }
 0x1cf   : > { %v1614_v43 = vpop.f32.mrb[58].mxu0 }
 0x1d0   : > { %v4315_v56 = vadd.f32 %v1614_v43, %v1515_v38  ;;  %v2819_v57 = vpop.f32.mrb[59].mxu0 }
 0x1d1   : > { %v2635_v61 = vpop.f32.mrb[56].mxu1 }
 0x1d2   : > { %v2636_v1 = vpop.f32.mrb[57].mxu1  ;;  %v1644_v40 = vmax.f32 %v4315_v56, 0.0 }
 0x1d3   : > { %v1619_v30 = vpop.f32.mrb[60].mxu0  ;;  %v2637_v5 = vadd.f32 %v2636_v1, %v2635_v61 }
 0x1d4   : > { %v4317_v6 = vadd.f32 %v1619_v30, %v1520_v0  ;;  %v2822_v8 = vpop.f32.mrb[61].mxu0 }
 0x1d5   : > { %v2638_v19 = vpop.f32.mrb[58].mxu1  ;;  %v1774_v3 = vadd.f32 %v2637_v5, %v4252_v7 }
 0x1d6   : > { %v2639_v33 = vpop.f32.mrb[59].mxu1 }
 0x1d7   : > { %v1624_v53 = vpop.f32.mrb[62].mxu0  ;;  %v2640_v14 = vadd.f32 %v2639_v33, %v2638_v19 }
 0x1d8   : > { %v4319_v16 = vadd.f32 %v1624_v53, %v1525_v9  ;;  %v2825_v15 = vpop.f32.mrb[63].mxu0 }
 0x1d9   : > { %v2641_v29 = vpop.f32.mrb[60].mxu1 }
 0x1da   : > { %v2642_v21 = vpop.f32.mrb[61].mxu1 }
 0x1db   : > { %v1629_v22 = vpop.f32.mrb[64].mxu0  ;;  %v2643_v38 = vadd.f32 %v2642_v21, %v2641_v29 }
 0x1dc   : > { %v4321_v45 = vadd.f32 %v1629_v22, %v1530_v17  ;;  %v2828_v51 = vpop.f32.mrb[65].mxu0 }
 0x1dd   : > { %v2644_v25 = vpop.f32.mrb[62].mxu1  ;;  %v1784_v1 = vadd.f32 %v2643_v38, %v4252_v7 }
 0x1de   : > { %v2645_v62 = vpop.f32.mrb[63].mxu1 }
 0x1df   : > { %v1634_v60 = vpop.f32.mrb[66].mxu0  ;;  %v2646_v0 = vadd.f32 %v2645_v62, %v2644_v25 }
 0x1e0   : > { %v4323_v10 = vadd.f32 %v1634_v60, %v1535_v54  ;;  %v2831_v27 = vpop.f32.mrb[67].mxu0  ;;  %v1779_v54 = vadd.f32 %v2640_v14, %v4252_v7 }
 0x1e1   : > { %v2647_v12 = vpop.f32.mrb[64].mxu1  ;;  %v1789_v22 = vadd.f32 %v2646_v0, %v4252_v7  ;;  %v1645_v27 = vmax.f32 %v4317_v6, 0.0 }
 0x1e2   : > { %v2648_v26 = vpop.f32.mrb[65].mxu1 }
 0x1e3   : > { %v1639_v24 = vpop.f32.mrb[68].mxu0  ;;  %v2649_v47 = vadd.f32 %v2648_v26, %v2647_v12 }
 0x1e4   : > { %v4325_v37 = vadd.f32 %v1639_v24, %v1540_v58  ;;  %v2834_v9 = vpop.f32.mrb[69].mxu0 }
 0x1e5   : > { %v2650_v50 = vpop.f32.mrb[66].mxu1  ;;  %v1794_v9 = vadd.f32 %v2649_v47, %v4252_v7 }
 0x1e6   : > { %v2651_v55 = vpop.f32.mrb[67].mxu1 }
 0x1e7   : > { %v4327_v63 = vadd.f32 %v2651_v55, %v2650_v50 }
 0x1e9   : > { %v2653_v32 = vpop.f32.mrb[68].mxu1 }
 0x1ea   : > { %v2654_v4 = vpop.f32.mrb[69].mxu1 }
 0x1eb   : > { %v2688_v2 = vpop.f32.mrb[70].mxu0  ;;  %v4331_v11 = vadd.f32 %v2654_v4, %v2653_v32 }
 0x1ec   : > { %v2689_v17 = vpop.f32.mrb[71].mxu0 }
 0x1ed   : > { %v2690_v13 = vadd.f32 %v2689_v17, %v2688_v2  ;;  %v1973_v31 = vpop.f32.mrb[70].mxu1  ;;  %v1646_v2 = vmax.f32 %v4319_v16, 0.0 }
 0x1ee   : > { %v2853_v39 = vpop.f32.mrb[71].mxu1 }
 0x1ef   : > { %v2691_v49 = vpop.f32.mrb[72].mxu0  ;;  %v1874_v35 = vadd.f32 %v2690_v13, %v1774_v3 }
 0x1f0   : > { %v2692_v48 = vpop.f32.mrb[73].mxu0 }
 0x1f1   : > { %v2693_v52 = vadd.f32 %v2692_v48, %v2691_v49  ;;  %v1974_v23 = vadd.f32 %v1973_v31, %v1874_v35  ;;  %v1978_v34 = vpop.f32.mrb[72].mxu1  ;;  %v1799_v31 = vadd.f32 %v4327_v63, %v4252_v7 }
 0x1f2   : > { %v2856_v36 = vpop.f32.mrb[73].mxu1 }
 0x1f3   : > { %v2007_v58 = vmax.f32 %v1974_v23, 0.0  ;;  %v2694_v43 = vpop.f32.mrb[74].mxu0  ;;  %v1879_v57 = vadd.f32 %v2693_v52, %v1779_v54  ;;  %v1647_v54 = vmax.f32 %v4321_v45, 0.0  ;;  %v1804_v36 = vadd.f32 %v4331_v11, %v4252_v7 }
 0x1f4   : > { %v2695_v61 = vpop.f32.mrb[75].mxu0  ;;  %v1648_v45 = vmax.f32 %v4323_v10, 0.0 }
 0x1f5   : > { %v2014_v30 = vmax.f32 %v1643_v41, %v2007_v58  ;;  %v2696_v5 = vadd.f32 %v2695_v61, %v2694_v43  ;;  %v1979_v8 = vadd.f32 %v1978_v34, %v1879_v57  ;;  %v1983_v19 = vpop.f32.mrb[74].mxu1 }
 0x1f6   : > { %v2859_v33 = vpop.f32.mrb[75].mxu1 }
 0x1f7   : > { %v2021_v53 = vmax.f32 %v4281_v44, %v2014_v30  ;;  %v2008_v14 = vmax.f32 %v1979_v8, 0.0  ;;  %v2697_v15 = vpop.f32.mrb[76].mxu0  ;;  %v1884_v29 = vadd.f32 %v2696_v5, %v1784_v1  ;;  %v1649_v8 = vmax.f32 %v4325_v37, 0.0 }
 0x1f8   : > { %v2698_v21 = vpop.f32.mrb[77].mxu0 }
 0x1f9   : > { %2028 = vst [vmem:[%s4340_s28] sm:$0xff] %v2021_v53  ;;  %v2015_v38 = vmax.f32 %v1644_v40, %v2008_v14  ;;  %v2699_v51 = vadd.f32 %v2698_v21, %v2697_v15  ;;  %v1984_v25 = vadd.f32 %v1983_v19, %v1884_v29  ;;  %v1988_v62 = vpop.f32.mrb[76].mxu1 }
 0x1fa   : > { %v2862_v60 = vpop.f32.mrb[77].mxu1 }
 0x1fb   : > { %v2022_v12 = vmax.f32 %v4285_v28, %v2015_v38  ;;  %v2009_v56 = vmax.f32 %v1984_v25, 0.0  ;;  %v2700_v26 = vpop.f32.mrb[78].mxu0  ;;  %v1889_v44 = vadd.f32 %v2699_v51, %v1789_v22 }
 0x1fc   : > { %v2701_v24 = vpop.f32.mrb[79].mxu0 }
 0x1fd   : > { %2029 = vst [vmem:[%s4340_s28 + $0x8] sm:$0xff] %v2022_v12  ;;  %v2016_v50 = vmax.f32 %v1645_v27, %v2009_v56  ;;  %v2702_v0 = vadd.f32 %v2701_v24, %v2700_v26  ;;  %v1989_v55 = vadd.f32 %v1988_v62, %v1889_v44  ;;  %v1993_v32 = vpop.f32.mrb[78].mxu1 }
 0x1fe   : > { %v2865_v4 = vpop.f32.mrb[79].mxu1 }
 0x1ff   : > { %v2023_v17 = vmax.f32 %v4289_v20, %v2016_v50  ;;  %v2010_v6 = vmax.f32 %v1989_v55, 0.0  ;;  %v2703_v3 = vpop.f32.mrb[80].mxu0  ;;  %v1894_v28 = vadd.f32 %v2702_v0, %v1794_v9 }
 0x200   : > { %v2704_v13 = vpop.f32.mrb[81].mxu0 }
 0x201   : > { %2030 = vst [vmem:[%s4340_s28 + $0x10] sm:$0xff] %v2023_v17  ;;  %v2017_v47 = vmax.f32 %v1646_v2, %v2010_v6  ;;  %v2705_v39 = vadd.f32 %v2704_v13, %v2703_v3  ;;  %v1994_v49 = vadd.f32 %v1993_v32, %v1894_v28  ;;  %v1998_v35 = vpop.f32.mrb[80].mxu1 }
 0x202   : > { %v2868_v48 = vpop.f32.mrb[81].mxu1 }
 0x203   : > { %v2024_v16 = vmax.f32 %v4293_v46, %v2017_v47  ;;  %v2011_v20 = vmax.f32 %v1994_v49, 0.0  ;;  %v2706_v52 = vpop.f32.mrb[82].mxu0  ;;  %v1899_v23 = vadd.f32 %v2705_v39, %v1799_v31 }
 0x204   : > { %v2707_v34 = vpop.f32.mrb[83].mxu0 }
 0x205   : > { %2031 = vst [vmem:[%s4340_s28 + $0x18] sm:$0xff] %v2024_v16  ;;  %v2018_v63 = vmax.f32 %v1647_v54, %v2011_v20  ;;  %v2708_v41 = vadd.f32 %v2707_v34, %v2706_v52  ;;  %v1999_v58 = vadd.f32 %v1998_v35, %v1899_v23  ;;  %v2003_v43 = vpop.f32.mrb[82].mxu1 }
 0x206   : > { %v2871_v57 = vpop.f32.mrb[83].mxu1 }
 0x207   : > { %v2025_v46 = vmax.f32 %v4298_v18, %v2018_v63  ;;  %v2012_v61 = vmax.f32 %v1999_v58, 0.0  ;;  %v1904_v1 = vadd.f32 %v2708_v41, %v1804_v36 }
 0x209   : > { %2032 = vst [vmem:[%s4340_s28 + $0x20] sm:$0xff] %v2025_v46  ;;  %v2019_v30 = vmax.f32 %v1648_v45, %v2012_v61  ;;  %v2004_v5 = vadd.f32 %v2003_v43, %v1904_v1 }
 0x20b   : > { %v2026_v7 = vmax.f32 %v4301_v59, %v2019_v30  ;;  %v2013_v11 = vmax.f32 %v2004_v5, 0.0 }
 0x20d   : > { %2033 = vst [vmem:[%s4340_s28 + $0x28] sm:$0xff] %v2026_v7  ;;  %v2020_v19 = vmax.f32 %v1649_v8, %v2013_v11 }
 0x20f   : > { %v2027_v33 = vmax.f32 %v4304_v42, %v2020_v19 }
 0x211   : > { %2034 = vst [vmem:[%s4340_s28 + $0x30] sm:$0xff] %v2027_v33 }
 0x212 PF: > { %p10_p9 = scmp.ge.s32.totalorder %s3271_s16, 9   ;;  %s4382_s12 = smov %s3225_s13 }
 0x213   : > { %s4383_s13 = smov %s3280_s19  ;;  %s4384_s14 = smov %s3271_s16 }
 0x214   :  { %12 = sbr.rel (!%p10_p9) target bundleno = 2 (0x2), region = 93 }

// kernel: net_forward.7
= control target key start
LH: loop header
LB: loop body
LE: loop exit
PB: predicated region body
PF: predicated region fallthrough
CT: control target
= control target key end

     0   :  { %v789_v47 = vmov 1983009808   ;;  %v158_v49 = vlaneseq  ;;  %s1227_s0 = inlined_call_operand.vmem [shape: f32[2,1024], index: 0, kind: input, shape index: {}]   ;;  %s1228_s1 = inlined_call_operand.vmem [shape: f32[1024,10], index: 1, kind: input, shape index: {}]   ;;  %s1229_s2 = inlined_call_operand.vmem [shape: f32[1,10], index: 2, kind: input, shape index: {}]   ;;  %s1230_s3 = inlined_call_operand.hbm [shape: f32[2,10], index: 3, kind: output, shape index: {}]  }
   0x1   :  { %v33_v0 = vld [vmem:[%s1228_s1 + $0x80] sm:$0xff]  ;;  %v34_v1 = vld [vmem:[%s1228_s1 + $0x88] sm:$0xff]  ;;  %v35_v11 = vld [vmem:[%s1228_s1 + $0x90] sm:$0xff]  ;;  %v156_v48 = vunpack.c.l.s4 %v789_v47 }
   0x2   :  { %v17_v2 = vld [vmem:[%s1228_s1] sm:$0xff]  ;;  %v633_v3 = vpack.c.bf16 %v34_v1, %v33_v0  ;;  %v18_v4 = vld [vmem:[%s1228_s1 + $0x8] sm:$0xff]  ;;  %v36_v13 = vld [vmem:[%s1228_s1 + $0x98] sm:$0xff]  ;;  %v159_v0 = vshrl.u32 %v158_v49, 7 }
   0x3   :  { %v65_v5 = vld [vmem:[%s1228_s1 + $0x180] sm:$0xff]  ;;  %v66_v6 = vld [vmem:[%s1228_s1 + $0x188] sm:$0xff]  ;;  %v635_v7 = vpack.c.bf16 %v18_v4, %v17_v2  ;;  %v19_v14 = vld [vmem:[%s1228_s1 + $0x10] sm:$0xff]  ;;  %v637_v16 = vpack.c.bf16 %v36_v13, %v35_v11  ;;  %v157_v63 = vunpack.c.0.s8 %v156_v48 }
   0x4   :  { %v665_v8 = vpack.c.bf16 %v66_v6, %v65_v5  ;;  %v49_v9 = vld [vmem:[%s1228_s1 + $0x100] sm:$0xff]  ;;  %v50_v10 = vld [vmem:[%s1228_s1 + $0x108] sm:$0xff]  ;;  %634 = vmatprep.subr.bf16.mxu0 %v633_v3  ;;  %v20_v15 = vld [vmem:[%s1228_s1 + $0x18] sm:$0xff] }
   0x5   :  { %v667_v12 = vpack.c.bf16 %v50_v10, %v49_v9  ;;  %636 = vmatpush3.bf16.msra.mxu0 %v635_v7  ;;  %v639_v17 = vpack.c.bf16 %v20_v15, %v19_v14  ;;  %v67_v18 = vld [vmem:[%s1228_s1 + $0x190] sm:$0xff]  ;;  %v68_v19 = vld [vmem:[%s1228_s1 + $0x198] sm:$0xff]  ;;  %v37_v23 = vld [vmem:[%s1228_s1 + $0xa0] sm:$0xff]  ;;  %v961_v13 = vsub.s32 %v157_v63, %v159_v0 }
   0x6   :  { %666 = vmatprep.subr.bf16.mxu1 %v665_v8  ;;  %v51_v20 = vld [vmem:[%s1228_s1 + $0x110] sm:$0xff]  ;;  %v669_v21 = vpack.c.bf16 %v68_v19, %v67_v18  ;;  %v52_v22 = vld [vmem:[%s1228_s1 + $0x118] sm:$0xff]  ;;  %v38_v24 = vld [vmem:[%s1228_s1 + $0xa8] sm:$0xff]  ;;  %638 = vmatprep.subr.bf16.mxu0 %v637_v16 }
   0x7   :  { %668 = vmatpush3.bf16.msra.mxu1 %v667_v12  ;;  %v671_v25 = vpack.c.bf16 %v52_v22, %v51_v20  ;;  %v641_v26 = vpack.c.bf16 %v38_v24, %v37_v23  ;;  %v21_v27 = vld [vmem:[%s1228_s1 + $0x20] sm:$0xff]  ;;  %v22_v28 = vld [vmem:[%s1228_s1 + $0x28] sm:$0xff]  ;;  %v39_v35 = vld [vmem:[%s1228_s1 + $0xb0] sm:$0xff] }
   0x8   :  { %v69_v29 = vld [vmem:[%s1228_s1 + $0x1a0] sm:$0xff]  ;;  %670 = vmatprep.subr.bf16.mxu1 %v669_v21  ;;  %v70_v30 = vld [vmem:[%s1228_s1 + $0x1a8] sm:$0xff]  ;;  %v643_v33 = vpack.c.bf16 %v22_v28, %v21_v27  ;;  %v40_v36 = vld [vmem:[%s1228_s1 + $0xb8] sm:$0xff] }
   0x9   :  { %v53_v31 = vld [vmem:[%s1228_s1 + $0x120] sm:$0xff]  ;;  %v54_v32 = vld [vmem:[%s1228_s1 + $0x128] sm:$0xff]  ;;  %640 = vmatpush3.bf16.msra.mxu0 %v639_v17  ;;  %v673_v34 = vpack.c.bf16 %v70_v30, %v69_v29  ;;  %v23_v37 = vld [vmem:[%s1228_s1 + $0x30] sm:$0xff]  ;;  %v645_v39 = vpack.c.bf16 %v40_v36, %v39_v35 }
   0xa   :  { %642 = vmatprep.subr.bf16.mxu0 %v641_v26  ;;  %v675_v38 = vpack.c.bf16 %v54_v32, %v53_v31  ;;  %v24_v40 = vld [vmem:[%s1228_s1 + $0x38] sm:$0xff]  ;;  %v71_v41 = vld [vmem:[%s1228_s1 + $0x1b0] sm:$0xff]  ;;  %v41_v46 = vld [vmem:[%s1228_s1 + $0xc0] sm:$0xff] }
   0xb   :  { %672 = vmatpush3.bf16.msra.mxu1 %v671_v25  ;;  %v72_v42 = vld [vmem:[%s1228_s1 + $0x1b8] sm:$0xff]  ;;  %v55_v44 = vld [vmem:[%s1228_s1 + $0x130] sm:$0xff]  ;;  %v42_v50 = vld [vmem:[%s1228_s1 + $0xc8] sm:$0xff]  ;;  %v647_v51 = vpack.c.bf16 %v24_v40, %v23_v37 }
   0xc   :  { %674 = vmatprep.subr.bf16.mxu1 %v673_v34  ;;  %v677_v43 = vpack.c.bf16 %v72_v42, %v71_v41  ;;  %v56_v45 = vld [vmem:[%s1228_s1 + $0x138] sm:$0xff]  ;;  %v73_v52 = vld [vmem:[%s1228_s1 + $0x1c0] sm:$0xff]  ;;  %v74_v53 = vld [vmem:[%s1228_s1 + $0x1c8] sm:$0xff]  ;;  %v649_v55 = vpack.c.bf16 %v42_v50, %v41_v46 }
   0xd   :  { %644 = vmatpush3.bf16.msra.mxu0 %v643_v33  ;;  %v679_v54 = vpack.c.bf16 %v56_v45, %v55_v44  ;;  %v25_v56 = vld [vmem:[%s1228_s1 + $0x40] sm:$0xff]  ;;  %v26_v57 = vld [vmem:[%s1228_s1 + $0x48] sm:$0xff]  ;;  %v681_v59 = vpack.c.bf16 %v74_v53, %v73_v52  ;;  %v43_v61 = vld [vmem:[%s1228_s1 + $0xd0] sm:$0xff] }
   0xe   :  { %646 = vmatprep.subr.bf16.mxu0 %v645_v39  ;;  %v57_v58 = vld [vmem:[%s1228_s1 + $0x140] sm:$0xff]  ;;  %v58_v60 = vld [vmem:[%s1228_s1 + $0x148] sm:$0xff]  ;;  %v44_v62 = vld [vmem:[%s1228_s1 + $0xd8] sm:$0xff]  ;;  %v651_v3 = vpack.c.bf16 %v26_v57, %v25_v56 }
   0xf   :  { %676 = vmatpush3.bf16.msra.mxu1 %v675_v38  ;;  %v75_v1 = vld [vmem:[%s1228_s1 + $0x1d0] sm:$0xff]  ;;  %v76_v2 = vld [vmem:[%s1228_s1 + $0x1d8] sm:$0xff]  ;;  %v683_v4 = vpack.c.bf16 %v58_v60, %v57_v58  ;;  %v653_v5 = vpack.c.bf16 %v44_v62, %v43_v61  ;;  %v45_v11 = vld [vmem:[%s1228_s1 + $0xe0] sm:$0xff] }
  0x10   :  { %678 = vmatprep.subr.bf16.mxu1 %v677_v43  ;;  %v27_v6 = vld [vmem:[%s1228_s1 + $0x50] sm:$0xff]  ;;  %v28_v7 = vld [vmem:[%s1228_s1 + $0x58] sm:$0xff]  ;;  %v685_v9 = vpack.c.bf16 %v76_v2, %v75_v1  ;;  %v46_v12 = vld [vmem:[%s1228_s1 + $0xe8] sm:$0xff] }
  0x11   :  { %648 = vmatpush3.bf16.msra.mxu0 %v647_v51  ;;  %v59_v8 = vld [vmem:[%s1228_s1 + $0x150] sm:$0xff]  ;;  %v60_v10 = vld [vmem:[%s1228_s1 + $0x158] sm:$0xff]  ;;  %v77_v14 = vld [vmem:[%s1228_s1 + $0x1e0] sm:$0xff]  ;;  %v655_v16 = vpack.c.bf16 %v28_v7, %v27_v6  ;;  %v657_v19 = vpack.c.bf16 %v46_v12, %v45_v11 }
  0x12   :  { %650 = vmatprep.subr.bf16.mxu0 %v649_v55  ;;  %v78_v15 = vld [vmem:[%s1228_s1 + $0x1e8] sm:$0xff]  ;;  %v29_v17 = vld [vmem:[%s1228_s1 + $0x60] sm:$0xff]  ;;  %v687_v18 = vpack.c.bf16 %v60_v10, %v59_v8  ;;  %v47_v25 = vld [vmem:[%s1228_s1 + $0xf0] sm:$0xff] }
  0x13   :  { %680 = vmatpush3.bf16.msra.mxu1 %v679_v54  ;;  %v30_v20 = vld [vmem:[%s1228_s1 + $0x68] sm:$0xff]  ;;  %v61_v21 = vld [vmem:[%s1228_s1 + $0x160] sm:$0xff]  ;;  %v689_v23 = vpack.c.bf16 %v78_v15, %v77_v14  ;;  %v48_v26 = vld [vmem:[%s1228_s1 + $0xf8] sm:$0xff] }
  0x14   :  { %682 = vmatprep.subr.bf16.mxu1 %v681_v59  ;;  %v15_v22 = vld [vmem:[%s1227_s0] sm:$0xff]  ;;  %v62_v24 = vld [vmem:[%s1228_s1 + $0x168] sm:$0xff]  ;;  %v79_v29 = vld [vmem:[%s1228_s1 + $0x1f0] sm:$0xff]  ;;  %v659_v31 = vpack.c.bf16 %v30_v20, %v29_v17  ;;  %v661_v35 = vpack.c.bf16 %v48_v26, %v47_v25 }
  0x15   :  { %652 = vmatpush3.bf16.msra.mxu0 %v651_v3  ;;  %v161_v27 = vrot.slane %v15_v22, %v961_v13  ;;  %v154_v28 = vcombine.high %v15_v22, %v15_v22  ;;  %v80_v30 = vld [vmem:[%s1228_s1 + $0x1f8] sm:$0xff]  ;;  %v691_v34 = vpack.c.bf16 %v62_v24, %v61_v21  ;;  %v31_v36 = vld [vmem:[%s1228_s1 + $0x70] sm:$0xff]  ;;  %v97_v41 = vld [vmem:[%s1228_s1 + $0x280] sm:$0xff] }
  0x16   :  { %654 = vmatprep.subr.bf16.mxu0 %v653_v5  ;;  %v32_v37 = vld [vmem:[%s1228_s1 + $0x78] sm:$0xff]  ;;  %v63_v38 = vld [vmem:[%s1228_s1 + $0x170] sm:$0xff]  ;;  %v693_v39 = vpack.c.bf16 %v80_v30, %v79_v29  ;;  %v98_v42 = vld [vmem:[%s1228_s1 + $0x288] sm:$0xff] }
  0x17   :  { %684 = vmatpush3.bf16.msra.mxu1 %v683_v4  ;;  %v169_v32 = vcombine.high %v161_v27, %v161_v27  ;;  %v168_v33 = vrot.slane %v154_v28, %v961_v13  ;;  %v64_v40 = vld [vmem:[%s1228_s1 + $0x178] sm:$0xff]  ;;  %v129_v44 = vld [vmem:[%s1228_s1 + $0x380] sm:$0xff]  ;;  %v130_v45 = vld [vmem:[%s1228_s1 + $0x388] sm:$0xff]  ;;  %v663_v46 = vpack.c.bf16 %v32_v37, %v31_v36  ;;  %v697_v48 = vpack.c.bf16 %v98_v42, %v97_v41 }
  0x18   :  { %686 = vmatprep.subr.bf16.mxu1 %v685_v9  ;;  %v695_v47 = vpack.c.bf16 %v64_v40, %v63_v38  ;;  %v81_v49 = vld [vmem:[%s1228_s1 + $0x200] sm:$0xff]  ;;  %v82_v50 = vld [vmem:[%s1228_s1 + $0x208] sm:$0xff]  ;;  %v729_v52 = vpack.c.bf16 %v130_v45, %v129_v44  ;;  %v99_v54 = vld [vmem:[%s1228_s1 + $0x290] sm:$0xff] }
  0x19   :  { %656 = vmatpush3.bf16.msra.mxu0 %v655_v16  ;;  %260 = vmatprep.mubr.f32.mxu0 %v169_v32  ;;  %v170_v43 = vcombine.high %v168_v33, %v168_v33  ;;  %v113_v51 = vld [vmem:[%s1228_s1 + $0x300] sm:$0xff]  ;;  %v114_v53 = vld [vmem:[%s1228_s1 + $0x308] sm:$0xff]  ;;  %v100_v55 = vld [vmem:[%s1228_s1 + $0x298] sm:$0xff]  ;;  %v699_v58 = vpack.c.bf16 %v82_v50, %v81_v49 }
  0x1a   :  { %658 = vmatprep.subr.bf16.mxu0 %v657_v19  ;;  %v131_v56 = vld [vmem:[%s1228_s1 + $0x390] sm:$0xff]  ;;  %v132_v57 = vld [vmem:[%s1228_s1 + $0x398] sm:$0xff]  ;;  %v731_v59 = vpack.c.bf16 %v114_v53, %v113_v51  ;;  %v701_v60 = vpack.c.bf16 %v100_v55, %v99_v54  ;;  %v101_v2 = vld [vmem:[%s1228_s1 + $0x2a0] sm:$0xff] }
  0x1b   :  { %688 = vmatpush3.bf16.msra.mxu1 %v687_v18  ;;  %330 = vmatprep.mubr.f32.mxu1 %v170_v43  ;;  %v83_v61 = vld [vmem:[%s1228_s1 + $0x210] sm:$0xff]  ;;  %v84_v62 = vld [vmem:[%s1228_s1 + $0x218] sm:$0xff]  ;;  %v733_v0 = vpack.c.bf16 %v132_v57, %v131_v56  ;;  %v102_v3 = vld [vmem:[%s1228_s1 + $0x2a8] sm:$0xff] }
  0x1c   :  { %690 = vmatprep.subr.bf16.mxu1 %v689_v23  ;;  %v115_v63 = vld [vmem:[%s1228_s1 + $0x310] sm:$0xff]  ;;  %v116_v1 = vld [vmem:[%s1228_s1 + $0x318] sm:$0xff]  ;;  %v133_v4 = vld [vmem:[%s1228_s1 + $0x3a0] sm:$0xff]  ;;  %v703_v6 = vpack.c.bf16 %v84_v62, %v83_v61  ;;  %v705_v8 = vpack.c.bf16 %v102_v3, %v101_v2 }
  0x1d   :  { %660 = vmatpush3.bf16.msra.mxu0 %v659_v31  ;;  %v134_v5 = vld [vmem:[%s1228_s1 + $0x3a8] sm:$0xff]  ;;  %v735_v7 = vpack.c.bf16 %v116_v1, %v115_v63  ;;  %v85_v9 = vld [vmem:[%s1228_s1 + $0x220] sm:$0xff]  ;;  %v103_v15 = vld [vmem:[%s1228_s1 + $0x2b0] sm:$0xff] }
  0x1e   :  { %662 = vmatprep.subr.bf16.mxu0 %v661_v35  ;;  %v86_v10 = vld [vmem:[%s1228_s1 + $0x228] sm:$0xff]  ;;  %v117_v11 = vld [vmem:[%s1228_s1 + $0x320] sm:$0xff]  ;;  %v737_v12 = vpack.c.bf16 %v134_v5, %v133_v4  ;;  %v104_v16 = vld [vmem:[%s1228_s1 + $0x2b8] sm:$0xff] }
  0x1f   :  { %692 = vmatpush3.bf16.msra.mxu1 %v691_v34  ;;  %v118_v14 = vld [vmem:[%s1228_s1 + $0x328] sm:$0xff]  ;;  %v135_v17 = vld [vmem:[%s1228_s1 + $0x3b0] sm:$0xff]  ;;  %v136_v18 = vld [vmem:[%s1228_s1 + $0x3b8] sm:$0xff]  ;;  %v707_v19 = vpack.c.bf16 %v86_v10, %v85_v9  ;;  %v709_v22 = vpack.c.bf16 %v104_v16, %v103_v15 }
  0x20   :  { %694 = vmatprep.subr.bf16.mxu1 %v693_v39  ;;  %v87_v20 = vld [vmem:[%s1228_s1 + $0x230] sm:$0xff]  ;;  %v739_v21 = vpack.c.bf16 %v118_v14, %v117_v11  ;;  %v88_v23 = vld [vmem:[%s1228_s1 + $0x238] sm:$0xff]  ;;  %v741_v26 = vpack.c.bf16 %v136_v18, %v135_v17  ;;  %v106_v28 = vld [vmem:[%s1228_s1 + $0x2c8] sm:$0xff] }
  0x21   :  { %664 = vmatpush3.bf16.msra.mxu0 %v663_v46  ;;  %v119_v24 = vld [vmem:[%s1228_s1 + $0x330] sm:$0xff]  ;;  %v120_v25 = vld [vmem:[%s1228_s1 + $0x338] sm:$0xff]  ;;  %v137_v29 = vld [vmem:[%s1228_s1 + $0x3c0] sm:$0xff] }
  0x22   :  { %698 = vmatprep.subr.bf16.mxu0 %v697_v48  ;;  %v138_v30 = vld [vmem:[%s1228_s1 + $0x3c8] sm:$0xff] }
  0x23   :  { %696 = vmatpush3.bf16.msra.mxu1 %v695_v47  ;;  %v16_v31 = vld [vmem:[%s1227_s0 + $0x8] sm:$0xff] }
  0x24   :  { %730 = vmatprep.subr.bf16.mxu1 %v729_v52  ;;  %261 = vmatmul.mubr.f32.vlgmr.msra.gmra.mrb[0].mxu0 %v161_v27  ;;  %v105_v27 = vld [vmem:[%s1228_s1 + $0x2c0] sm:$0xff] }
  0x25   :  { %700 = vmatpush3.bf16.msra.mxu0 %v699_v58 }
  0x26   :  { %331 = vmatmul.mubr.f32.vlgmr.msra.gmra.mrb[0].mxu1 %v168_v33  ;;  %702 = vmatprep.subr.bf16.mxu0 %v701_v60 }
  0x27   :  { %732 = vmatpush3.bf16.msra.mxu1 %v731_v59 }
  0x28   :  { %734 = vmatprep.subr.bf16.mxu1 %v733_v0 }
  0x29   :  { %704 = vmatpush3.bf16.msra.mxu0 %v703_v6 }
  0x2a   :  { %706 = vmatprep.subr.bf16.mxu0 %v705_v8 }
  0x2b   :  { %736 = vmatpush3.bf16.msra.mxu1 %v735_v7 }
  0x2c   :  { %738 = vmatprep.subr.bf16.mxu1 %v737_v12 }
  0x2d   :  { %8 = vsyncpa [#allocation3], 0  ;;  %708 = vmatpush3.bf16.msra.mxu0 %v707_v19  ;;  %v711_v32 = vpack.c.bf16 %v88_v23, %v87_v20  ;;  %v1122_v33 = vrot.slane %v16_v31, %v961_v13  ;;  %v171_v34 = vcombine.high %v16_v31, %v16_v31  ;;  %v743_v35 = vpack.c.bf16 %v120_v25, %v119_v24  ;;  %v89_v37 = vld [vmem:[%s1228_s1 + $0x240] sm:$0xff]  ;;  %v90_v38 = vld [vmem:[%s1228_s1 + $0x248] sm:$0xff] }
  0x2e   :  { %710 = vmatprep.subr.bf16.mxu0 %v709_v22  ;;  %v713_v36 = vpack.c.bf16 %v106_v28, %v105_v27  ;;  %v121_v39 = vld [vmem:[%s1228_s1 + $0x340] sm:$0xff]  ;;  %v745_v40 = vpack.c.bf16 %v138_v30, %v137_v29  ;;  %v122_v41 = vld [vmem:[%s1228_s1 + $0x348] sm:$0xff]  ;;  %v107_v42 = vld [vmem:[%s1228_s1 + $0x2d0] sm:$0xff]  ;;  %v715_v48 = vpack.c.bf16 %v90_v38, %v89_v37  ;;  %vm476_vm0 = vcmask 74752  }
  0x2f   :  { %740 = vmatpush3.bf16.msra.mxu1 %v739_v21  ;;  %v108_v43 = vld [vmem:[%s1228_s1 + $0x2d8] sm:$0xff]  ;;  %v186_v44 = vcombine.high %v1122_v33, %v1122_v33  ;;  %v185_v45 = vrot.slane %v171_v34, %v961_v13  ;;  %v139_v46 = vld [vmem:[%s1228_s1 + $0x3d0] sm:$0xff]  ;;  %v747_v50 = vpack.c.bf16 %v122_v41, %v121_v39  ;;  %v109_v56 = vld [vmem:[%s1228_s1 + $0x2e0] sm:$0xff] }
  0x30   :  { %742 = vmatprep.subr.bf16.mxu1 %v741_v26  ;;  %v140_v47 = vld [vmem:[%s1228_s1 + $0x3d8] sm:$0xff]  ;;  %v717_v51 = vpack.c.bf16 %v108_v43, %v107_v42  ;;  %v91_v13 = vld [vmem:[%s1228_s1 + $0x250] sm:$0xff]  ;;  %v110_v57 = vld [vmem:[%s1228_s1 + $0x2e8] sm:$0xff] }
  0x31   :  { %712 = vmatpush3.bf16.msra.mxu0 %v711_v32  ;;  %400 = vmatprep.mubr.f32.mxu0 %v186_v44  ;;  %v187_v49 = vcombine.high %v185_v45, %v185_v45  ;;  %v92_v52 = vld [vmem:[%s1228_s1 + $0x258] sm:$0xff]  ;;  %v123_v53 = vld [vmem:[%s1228_s1 + $0x350] sm:$0xff]  ;;  %v749_v54 = vpack.c.bf16 %v140_v47, %v139_v46  ;;  %v141_v58 = vld [vmem:[%s1228_s1 + $0x3e0] sm:$0xff]  ;;  %v721_v62 = vpack.c.bf16 %v110_v57, %v109_v56 }
  0x32   :  { %714 = vmatprep.subr.bf16.mxu0 %v713_v36  ;;  %v124_v55 = vld [vmem:[%s1228_s1 + $0x358] sm:$0xff]  ;;  %v142_v59 = vld [vmem:[%s1228_s1 + $0x3e8] sm:$0xff]  ;;  %v719_v60 = vpack.c.bf16 %v92_v52, %v91_v13  ;;  %v93_v63 = vld [vmem:[%s1228_s1 + $0x260] sm:$0xff] }
  0x33   :  { %744 = vmatpush3.bf16.msra.mxu1 %v743_v35  ;;  %470 = vmatprep.mubr.f32.mxu1 %v187_v49  ;;  %v751_v61 = vpack.c.bf16 %v124_v55, %v123_v53  ;;  %v94_v0 = vld [vmem:[%s1228_s1 + $0x268] sm:$0xff]  ;;  %v125_v1 = vld [vmem:[%s1228_s1 + $0x360] sm:$0xff]  ;;  %v753_v2 = vpack.c.bf16 %v142_v59, %v141_v58  ;;  %v111_v4 = vld [vmem:[%s1228_s1 + $0x2f0] sm:$0xff] }
  0x34   :  { %746 = vmatprep.subr.bf16.mxu1 %v745_v40  ;;  %v126_v3 = vld [vmem:[%s1228_s1 + $0x368] sm:$0xff]  ;;  %v112_v5 = vld [vmem:[%s1228_s1 + $0x2f8] sm:$0xff]  ;;  %v143_v6 = vld [vmem:[%s1228_s1 + $0x3f0] sm:$0xff]  ;;  %v723_v8 = vpack.c.bf16 %v94_v0, %v93_v63 }
  0x35   :  { %716 = vmatpush3.bf16.msra.mxu0 %v715_v48  ;;  %v144_v7 = vld [vmem:[%s1228_s1 + $0x3f8] sm:$0xff]  ;;  %v755_v9 = vpack.c.bf16 %v126_v3, %v125_v1  ;;  %v725_v10 = vpack.c.bf16 %v112_v5, %v111_v4  ;;  %v95_v11 = vld [vmem:[%s1228_s1 + $0x270] sm:$0xff]  ;;  %v492_v20 = vld [vmem:[%s1229_s2] ss:$0 sm:$0xff] }
  0x36   :  { %718 = vmatprep.subr.bf16.mxu0 %v717_v51  ;;  %v96_v12 = vld [vmem:[%s1228_s1 + $0x278] sm:$0xff]  ;;  %v757_v14 = vpack.c.bf16 %v144_v7, %v143_v6  ;;  %v127_v15 = vld [vmem:[%s1228_s1 + $0x370] sm:$0xff] }
  0x37   :  { %748 = vmatpush3.bf16.msra.mxu1 %v747_v50  ;;  %v128_v16 = vld [vmem:[%s1228_s1 + $0x378] sm:$0xff]  ;;  %v727_v17 = vpack.c.bf16 %v96_v12, %v95_v11  ;;  %s790_s1 = smov [#allocation2]  }
  0x38   :  { %750 = vmatprep.subr.bf16.mxu1 %v749_v54  ;;  %v759_v18 = vpack.c.bf16 %v128_v16, %v127_v15  ;;  %s484_s29 = sshll.u32 %s790_s1, 4  ;;  %s485_s29 = int_to_ptr.vmem [resolvable:$true] %s484_s29 }
  0x39   :  { %720 = vmatpush3.bf16.msra.mxu0 %v719_v60  ;;  %s765_s2 = scalar_lea.vmem %s485_s29, 32  ;;  %p770_p1 = scmp.lt.s32.totalorder %s485_s29, %s485_s29 }
  0x3a   :  { %722 = vmatprep.subr.bf16.mxu0 %v721_v62  ;;  %p766_p0 = scmp.ne.s32.totalorder %s485_s29, %s765_s2  ;;  %p771_p2 = scmp.lt.s32.totalorder %s765_s2, %s765_s2 }
  0x3b   :  { %752 = vmatpush3.bf16.msra.mxu1 %v751_v61 }
  0x3c   :  { %754 = vmatprep.subr.bf16.mxu1 %v753_v2  ;;  %p772_p3 = por %p771_p2, %p770_p1 }
  0x3d   :  { %724 = vmatpush3.bf16.msra.mxu0 %v723_v8 }
  0x3e   :  { %726 = vmatprep.subr.bf16.mxu0 %v725_v10  ;;  %p773_p4 = pnand %p772_p3, %p766_p0 }
  0x3f   :  { %756 = vmatpush3.bf16.msra.mxu1 %v755_v9 }
  0x40   :  { %758 = vmatprep.subr.bf16.mxu1 %v757_v14 }
  0x41   :  { %728 = vmatpush3.bf16.msra.mxu0 %v727_v17 }
  0x43   :  { %760 = vmatpush3.bf16.msra.mxu1 %v759_v18 }
  0x44   :  { %401 = vmatmul.mubr.f32.vlgmr.msra.gmra.mrb[2].mxu0 %v1122_v33 }
  0x46   :  { %471 = vmatmul.mubr.f32.vlgmr.msra.gmra.mrb[2].mxu1 %v185_v45 }
  0xf7   :  { %v525_v19 = vpop.f32.mrb[0].mxu0 }
  0xf8   :  { %v526_v21 = vpop.f32.mrb[1].mxu0 }
  0xf9   :  { %v560_v22 = vpop.f32.mrb[0].mxu1  ;;  %v527_v23 = vadd.f32 %v526_v21, %v525_v19 }
  0xfa   :  { %v561_v24 = vpop.f32.mrb[1].mxu1 }
  0xfb   :  { %v562_v25 = vadd.f32 %v561_v24, %v560_v22  ;;  %v263_v26 = vadd.f32 %v527_v23, %v492_v20 }
  0xfd   :  { %v333_v27 = vadd.f32 %v562_v25, %v263_v26 }
 0x117   :  { %v595_v28 = vpop.f32.mrb[2].mxu0 }
 0x118   :  { %v596_v29 = vpop.f32.mrb[3].mxu0 }
 0x119   :  { %v630_v30 = vpop.f32.mrb[2].mxu1  ;;  %v597_v31 = vadd.f32 %v596_v29, %v595_v28 }
 0x11a   :  { %v631_v32 = vpop.f32.mrb[3].mxu1 }
 0x11b   :  { %v632_v34 = vadd.f32 %v631_v32, %v630_v30  ;;  %v403_v33 = vadd.f32 %v597_v31, %v333_v27 }
 0x11d   :  { %v473_v35 = vadd.f32 %v632_v34, %v403_v33 }
 0x11f   :  { %477 = vst.msk [vmem:[#allocation2] sm:$0x3] %vm476_vm0, %v473_v35 }
 0x120   :  { %776 = shalt.err (!%p773_p4)
}
 0x121   :  { %s777_s4 = scalar_lea.hbm %s1230_s3, 32 }
 0x122   :  { %p778_p5 = scmp.ne.s32.totalorder %s1230_s3, %s777_s4  ;;  %p781_p6 = scmp.lt.u32.totalorder %s777_s4, %s1230_s3 }
 0x124   :  { %p783_p7 = pnand %p781_p6, %p778_p5 }
 0x126   :  { %786 = shalt.err (!%p783_p7)
}
 0x127   :  { %487 = dma.vmem_to_hbm [thread:$0]  %s485_s29, 32, %s1230_s3, [#allocation3]  }
 0x128   :  { %787 = dma.done.wait [#allocation3], 32  }
 0x129   :  { %788 = vsyncadd [#allocation3], 4294967264 }
 0x12a   :  { %491 = vsyncpa [#allocation3], 1 }

// kernel: net_forward.6
= control target key start
LH: loop header
LB: loop body
LE: loop exit
PB: predicated region body
PF: predicated region fallthrough
CT: control target
= control target key end

     0   :  { %8 = vsyncpa [#allocation4], 0  ;;  %s10943_s0 = inlined_call_operand.vmem [shape: bf16[2,25088], index: 0, kind: input, shape index: {}]   ;;  %s10944_s1 = inlined_call_operand.hbm [shape: bf16[25088,1024], index: 1, kind: input, shape index: {}]   ;;  %s10945_s2 = inlined_call_operand.vmem [shape: f32[1,1024], index: 2, kind: input, shape index: {}]   ;;  %s10946_s3 = inlined_call_operand.vmem [shape: f32[2,1024], index: 3, kind: output, shape index: {}]  }
   0x1   :  { %10 = vsyncpa [#allocation4 + $0x1], 0  ;;  %s9724_s12 = smov 0   ;;  %s9726_s13 = smov 0  }
   0x2   :  { %s9728_s14 = smov 0   ;;  %s9730_s15 = smov 0  }
   0x3   :  { %s9732_s16 = smov 0   ;;  %s9734_s17 = smov 0  }
   0x4   :  { %s9736_s18 = smov 0   ;;  %s9738_s19 = smov 0  }
   0x5 LB: > { %s7154_s20 = sadd.s32 4294967295, %s9695_s19   ;;  %s25_s21 = sadd.s32 1, %s9687_s17  ;;  %s9695_s19 = sphi %s9738_s19, %s16_s19   ;;  %s9691_s18 = sphi %s9736_s18, %s10956_s18   ;;  %s9687_s17 = sphi %s9734_s17, %s10955_s17   ;;  %s9683_s16 = sphi %s9732_s16, %s10954_s16   ;;  %s9679_s15 = sphi %s9730_s15, %s10953_s15   ;;  %s9675_s14 = sphi %s9728_s14, %s10952_s14   ;;  %s9671_s13 = sphi %s9726_s13, %s10951_s13   ;;  %s9667_s12 = sphi %s9724_s12, %s10950_s12  }
   0x6   : > { %p26_p0 = scmp.ge.s32.totalorder %s25_s21, 7  ;;  %s28_s22 = sadd.s32 1, %s9691_s18 }
   0x7   : > { %s63_s23 = sadd.s32 1, %s9675_s14  ;;  %p70_p1 = scmp.ne.s32.totalorder %s9675_s14, %s9671_s13 }
   0x8   : > { %s10958_s21 = smov (%p26_p0, %s25_s21), 0  ;;  %s10960_s22 = smov (!%p26_p0, %s28_s22), %s9691_s18 }
   0x9   : > { %s58_s24 = ssub.s32 %s9687_s17, %s10958_s21  ;;  %p71_p2 = scmp.eq.s32.totalorder %s9695_s19, 0 }
   0xa   : > { %p30_p3 = scmp.ge.s32.totalorder %s10960_s22, 2  ;;  %p76_p4 = scmp.ne.s32.totalorder %s9671_s13, %s9667_s12 }
   0xb   : > { %p9775_p5 = por %p71_p2, %p70_p1  ;;  %p77_p6 = scmp.eq.s32.totalorder %s7154_s20, 0 }
   0xc   : > { %s10962_s22 = smov (%p30_p3, %s10960_s22), 0  ;;  %p8179_p8 = scmp.lt.s32.totalorder %s9695_s19, 14 }
   0xd   : > { %p9781_p7 = por %p77_p6, %p76_p4  ;;  %s59_s27 = ssub.s32 %s9691_s18, %s10962_s22 }
   0xe   : > { %s60_s28 = sor.u32 %s59_s27, %s58_s24  ;;  %s160_s29 = sand.u32 1, %s9675_s14  }
   0xf   : > { %p61_p9 = scmp.eq.s32.totalorder %s60_s28, 0  ;;  %s8171_s30 = smul.u32 7168, %s160_s29 }
  0x10   : > { %s7158_s4 = sshll.u32 %s9691_s18, 2  ;;  %s8066_s6 = smul.u32 3584, %s9687_s17 }
  0x11   : > { %s9791_s5 = scalar_select %p61_p9, %s9675_s14, %s63_s23  }
  0x12   : > { %s164_s7 = scalar_lea.vmem [#allocation3], %s8171_s30  ;;  %p9796_p10 = pnand %p8179_p8, %p9775_p5 }
  0x13   : > { %s174_s8 = sshll.u32 %s164_s7, 4  ;;  %s171_s10 = sadd.s32 %s8066_s6, %s7158_s4  ;;  %s9800_s8 = int_to_ptr.vmem [resolvable:$true] %s174_s8 }
  0x14   : > { %s7160_s11 = sshll.u32 %s171_s10, 6  ;;  %s9807_s23 = scalar_lea.sflag [#allocation4], %s160_s29 }
  0x15   : > { %s9805_s24 = scalar_lea.hbm %s10944_s1, %s7160_s11  ;;  %p9601_p12 = pneg %p9796_p10 }
  0x16   : > { %s9599_s25 = scalar_lea.hbm %s9805_s24, 114688  ;;  %s9604_s30 = scalar_lea.hbm %s10944_s1, 1605632 }
  0x17   : > { %p9600_p11 = scmp.ne.s32.totalorder %s9805_s24, %s9599_s25  ;;  %p9605_p1 = scmp.lt.u32.totalorder %s9805_s24, %s10944_s1 }
  0x18   : > { %p9606_p2 = scmp.lt.u32.totalorder %s9604_s30, %s9599_s25  ;;  %p9608_p4 = scmp.lt.u32.totalorder %s9599_s25, %s9805_s24 }
  0x19   : > { %p9602_p13 = pnand %p9601_p12, %p9600_p11 }
  0x1a   : > { %p9607_p3 = por %p9606_p2, %p9605_p1 }
  0x1b   : > { %p9603_p0 = pneg %p9602_p13 }
  0x1c   : > { %p9609_p5 = por %p9608_p4, %p9607_p3 }
  0x1e   : > { %p9610_p6 = pnand %p9609_p5, %p9603_p0 }
  0x20   : > { %9613 = shalt.err (!%p9610_p6)
}
  0x21   : > { %s9614_s29 = scalar_lea.vmem %s9800_s8, 114688  ;;  %s9697_s7 = smov [#allocation3]  }
  0x22   : > { %p9615_p8 = scmp.ne.s32.totalorder %s9800_s8, %s9614_s29  ;;  %s9619_s10 = sshll.u32 %s9697_s7, 4  ;;  %s9620_s10 = int_to_ptr.vmem [resolvable:$false] %s9619_s10 }
  0x23   : > { %s9621_s11 = scalar_lea.vmem %s9620_s10, 229376  ;;  %p9622_p13 = scmp.lt.s32.totalorder %s9800_s8, %s9620_s10 }
  0x24   : > { %p9617_p9 = pnand %p9615_p8, %p9601_p12  ;;  %p9623_p1 = scmp.lt.s32.totalorder %s9621_s11, %s9614_s29 }
  0x26   : > { %p9618_p11 = pneg %p9617_p9  ;;  %p9624_p2 = por %p9623_p1, %p9622_p13 }
  0x28   : > { %p9625_p3 = pnand %p9624_p2, %p9618_p11 }
  0x2a   : > { %9628 = shalt.err (!%p9625_p3)
}
  0x2b   : > { %s9698_s12 = smov 512   ;;  %s9699_s20 = smov 256  }
  0x2c   : > { %s9700_s25 = smov 16   ;;  %p7161_p12 = scmp.ge.s32.totalorder %s9695_s19, 1 }
  0x2d   : > { %8178 = dma.hbm_to_vmem [thread:$0]  (!%p9796_p10), %s9805_s24, 114688, %s9800_s8, %s9807_s23, %s9698_s12, %s9699_s20, %s9700_s25  }
  0x2e   : > { %p190_p0 = scmp.lt.s32.totalorder %s9695_s19, 15 }
  0x30   : > { %p191_p4 = pnand %p7161_p12, %p190_p0 }
  0x31   : > { %s196_s27 = sand.u32 (!%p191_p4), 1, %s9671_s13  }
  0x32   : > { %194 = sbr.rel (%p191_p4) target bundleno = 1199 (0x4af), region = 32  ;;  %s197_s30 = scalar_lea.sflag (!%p191_p4), [#allocation4], %s196_s27 }
  0x33   : > { %s8172_s28 = smul.u32 (!%p191_p4), 7168, %s196_s27 }
  0x35   : > { %s9838_s4 = scalar_lea.vmem (!%p191_p4), [#allocation3], %s8172_s28 }
  0x39   : > { %9662 = dma.done.wait (%p9781_p7), %s197_s30, 114688  }
  0x3a   : > { %9664 = vsyncadd (%p9781_p7), %s197_s30, 4294852608  ;;  %s231_s9 = smul.u32 28, %s9679_s15  ;;  %s7162_s8 = sshll.u32 %s9683_s16, 2 }
  0x3b   : > { %p239_p10 = scmp.lt.s32.totalorder %s7162_s8, 7  ;;  %p7165_p7 = scmp.ne.s32.totalorder %s9679_s15, 0 }
  0x3c   : > { %p232_p5 = scmp.lt.s32.totalorder %s231_s9, 195  ;;  %v9701_v0 = vmov (!%p7165_p7), 0.0  }
  0x3d   : > { %s10964_s8 = smov (!%p239_p10, %s7162_s8), 7  ;;  %252 = sbr.rel (%p7165_p7) target bundleno = 68 (0x44), region = 40 }
  0x3e   : > { %s10966_s9 = smov (!%p232_p5, %s231_s9), 195  ;;  %s241_s6 = scalar_lea.vmem %s10945_s2, %s10964_s8  ;;  %253 = vst [vmem:[#allocation2] sm:$0xff] (!%p7165_p7), %v9701_v0 }
  0x3f   : > { %s7164_s29 = sshll.u32 %s10964_s8, 1  ;;  %s9856_s26 = scalar_lea.vmem %s10943_s0, %s10966_s9 }
  0x40   : > { %s9861_s16 = scalar_lea.vmem %s10946_s3, %s7164_s29 }
  0x44 PF: > { %v8250_v1 = vld [vmem:[%s9838_s4 + $0x4] ss:$16 sps:$4 sm:$0xff]   ;;  %v8252_v2 = vld [vmem:[%s9838_s4 + $0xc] ss:$16 sps:$4 sm:$0xff]   ;;  %v8254_v3 = vld [vmem:[%s9838_s4] ss:$16 sps:$4 sm:$0xff]   ;;  %v1163_v39 = vlaneseq }
  0x45   : > { %5838 = vmatprep.subr.bf16.mxu0 %v8250_v1  ;;  %v8255_v4 = vld [vmem:[%s9838_s4 + $0x8] ss:$16 sps:$4 sm:$0xff]   ;;  %6412 = vmatprep.subr.bf16.mxu1 %v8252_v2  ;;  %v8256_v5 = vld [vmem:[%s9838_s4 + $0x24] ss:$16 sps:$4 sm:$0xff]   ;;  %v8258_v6 = vld [vmem:[%s9838_s4 + $0x2c] ss:$16 sps:$4 sm:$0xff]  }
  0x46   : > { %5839 = vmatpush1.bf16.msra.mxu0 %v8254_v3  ;;  %6413 = vmatpush1.bf16.msra.mxu1 %v8255_v4  ;;  %v8260_v7 = vld [vmem:[%s9838_s4 + $0x20] ss:$16 sps:$4 sm:$0xff]   ;;  %v8261_v8 = vld [vmem:[%s9838_s4 + $0x28] ss:$16 sps:$4 sm:$0xff]   ;;  %v8262_v9 = vld [vmem:[%s9838_s4 + $0x44] ss:$16 sps:$4 sm:$0xff]  }
  0x47   : > { %5840 = vmatprep.subr.bf16.mxu0 %v8256_v5  ;;  %6414 = vmatprep.subr.bf16.mxu1 %v8258_v6  ;;  %v8264_v10 = vld [vmem:[%s9838_s4 + $0x4c] ss:$16 sps:$4 sm:$0xff]   ;;  %v8266_v11 = vld [vmem:[%s9838_s4 + $0x40] ss:$16 sps:$4 sm:$0xff]   ;;  %v8267_v12 = vld [vmem:[%s9838_s4 + $0x48] ss:$16 sps:$4 sm:$0xff]  }
  0x48   : > { %v8268_v13 = vld [vmem:[%s9838_s4 + $0x64] ss:$16 sps:$4 sm:$0xff]   ;;  %v8270_v14 = vld [vmem:[%s9838_s4 + $0x6c] ss:$16 sps:$4 sm:$0xff]   ;;  %v8272_v15 = vld [vmem:[%s9838_s4 + $0x60] ss:$16 sps:$4 sm:$0xff]  }
  0x49   : > { %v8273_v16 = vld [vmem:[%s9838_s4 + $0x68] ss:$16 sps:$4 sm:$0xff]   ;;  %v8274_v17 = vld [vmem:[%s9838_s4 + $0x84] ss:$16 sps:$4 sm:$0xff]   ;;  %v8276_v18 = vld [vmem:[%s9838_s4 + $0x8c] ss:$16 sps:$4 sm:$0xff]  }
  0x4a   : > { %5841 = vmatpush1.bf16.msra.mxu0 %v8260_v7  ;;  %6415 = vmatpush1.bf16.msra.mxu1 %v8261_v8  ;;  %v8278_v19 = vld [vmem:[%s9838_s4 + $0x80] ss:$16 sps:$4 sm:$0xff]   ;;  %v8279_v20 = vld [vmem:[%s9838_s4 + $0x88] ss:$16 sps:$4 sm:$0xff]   ;;  %v8280_v21 = vld [vmem:[%s9838_s4 + $0xa4] ss:$16 sps:$4 sm:$0xff]  }
  0x4b   : > { %5842 = vmatprep.subr.bf16.mxu0 %v8262_v9  ;;  %6416 = vmatprep.subr.bf16.mxu1 %v8264_v10  ;;  %v8282_v22 = vld [vmem:[%s9838_s4 + $0xac] ss:$16 sps:$4 sm:$0xff]   ;;  %v8284_v23 = vld [vmem:[%s9838_s4 + $0xa0] ss:$16 sps:$4 sm:$0xff]   ;;  %v8285_v24 = vld [vmem:[%s9838_s4 + $0xa8] ss:$16 sps:$4 sm:$0xff]  }
  0x4c   : > { %v8286_v25 = vld [vmem:[%s9838_s4 + $0xc4] ss:$16 sps:$4 sm:$0xff]   ;;  %v8288_v26 = vld [vmem:[%s9838_s4 + $0xcc] ss:$16 sps:$4 sm:$0xff]   ;;  %v8290_v27 = vld [vmem:[%s9838_s4 + $0xc0] ss:$16 sps:$4 sm:$0xff]  }
  0x4d   : > { %v8291_v28 = vld [vmem:[%s9838_s4 + $0xc8] ss:$16 sps:$4 sm:$0xff]   ;;  %v8292_v29 = vld [vmem:[%s9838_s4 + $0xe4] ss:$16 sps:$4 sm:$0xff]   ;;  %v8294_v30 = vld [vmem:[%s9838_s4 + $0xec] ss:$16 sps:$4 sm:$0xff]  }
  0x4e   : > { %5843 = vmatpush1.bf16.msra.mxu0 %v8266_v11  ;;  %6417 = vmatpush1.bf16.msra.mxu1 %v8267_v12  ;;  %v8296_v31 = vld [vmem:[%s9838_s4 + $0xe0] ss:$16 sps:$4 sm:$0xff]   ;;  %v8297_v32 = vld [vmem:[%s9838_s4 + $0xe8] ss:$16 sps:$4 sm:$0xff]   ;;  %v8298_v33 = vld [vmem:[%s9838_s4 + $0x104] ss:$16 sps:$4 sm:$0xff]  }
  0x4f   : > { %5844 = vmatprep.subr.bf16.mxu0 %v8268_v13  ;;  %6418 = vmatprep.subr.bf16.mxu1 %v8270_v14  ;;  %v8300_v34 = vld [vmem:[%s9838_s4 + $0x10c] ss:$16 sps:$4 sm:$0xff]   ;;  %v8302_v35 = vld [vmem:[%s9838_s4 + $0x100] ss:$16 sps:$4 sm:$0xff]   ;;  %v8303_v36 = vld [vmem:[%s9838_s4 + $0x108] ss:$16 sps:$4 sm:$0xff]  }
  0x50   : > { %v9702_v37 = vmov 1966171168   ;;  %v8304_v40 = vld [vmem:[%s9838_s4 + $0x124] ss:$16 sps:$4 sm:$0xff]   ;;  %v8306_v41 = vld [vmem:[%s9838_s4 + $0x12c] ss:$16 sps:$4 sm:$0xff]  }
  0x51   : > { %v1161_v38 = vunpack.c.l.s4 %v9702_v37  ;;  %v8308_v42 = vld [vmem:[%s9838_s4 + $0x120] ss:$16 sps:$4 sm:$0xff]   ;;  %v9903_v44 = vshrl.u32 %v1163_v39, 7  ;;  %v8309_v45 = vld [vmem:[%s9838_s4 + $0x128] ss:$16 sps:$4 sm:$0xff]   ;;  %p8063_p6 = scmp.ne.s32.totalorder %s9679_s15, 6 }
  0x52   : > { %5845 = vmatpush1.bf16.msra.mxu0 %v8272_v15  ;;  %6419 = vmatpush1.bf16.msra.mxu1 %v8273_v16  ;;  %v8310_v46 = vld [vmem:[%s9838_s4 + $0x144] ss:$16 sps:$4 sm:$0xff]   ;;  %v8312_v47 = vld [vmem:[%s9838_s4 + $0x14c] ss:$16 sps:$4 sm:$0xff]   ;;  %v8314_v48 = vld [vmem:[%s9838_s4 + $0x140] ss:$16 sps:$4 sm:$0xff]  }
  0x53   : > { %5846 = vmatprep.subr.bf16.mxu0 %v8274_v17  ;;  %6420 = vmatprep.subr.bf16.mxu1 %v8276_v18  ;;  %v1162_v43 = vunpack.c.0.s8 %v1161_v38  ;;  %v8315_v49 = vld [vmem:[%s9838_s4 + $0x148] ss:$16 sps:$4 sm:$0xff]   ;;  %v8316_v51 = vld [vmem:[%s9838_s4 + $0x164] ss:$16 sps:$4 sm:$0xff]   ;;  %v8318_v52 = vld [vmem:[%s9838_s4 + $0x16c] ss:$16 sps:$4 sm:$0xff]  }
  0x54   : > { %v9916_v53 = vld [vmem:[%s9856_s26] sm:$0xff]  ;;  %v8320_v54 = vld [vmem:[%s9838_s4 + $0x160] ss:$16 sps:$4 sm:$0xff]   ;;  %v8322_v57 = vld [vmem:[%s9838_s4 + $0x184] ss:$16 sps:$4 sm:$0xff]  }
  0x55   : > { %v9911_v50 = vsub.s32 %v1162_v43, %v9903_v44  ;;  %v8321_v56 = vld [vmem:[%s9838_s4 + $0x168] ss:$16 sps:$4 sm:$0xff]   ;;  %v8324_v58 = vld [vmem:[%s9838_s4 + $0x18c] ss:$16 sps:$4 sm:$0xff]   ;;  %v8326_v60 = vld [vmem:[%s9838_s4 + $0x180] ss:$16 sps:$4 sm:$0xff]  }
  0x56   : > { %5847 = vmatpush1.bf16.msra.mxu0 %v8278_v19  ;;  %6421 = vmatpush1.bf16.msra.mxu1 %v8279_v20  ;;  %v8327_v62 = vld [vmem:[%s9838_s4 + $0x188] ss:$16 sps:$4 sm:$0xff]   ;;  %v8328_v63 = vld [vmem:[%s9838_s4 + $0x1a4] ss:$16 sps:$4 sm:$0xff]   ;;  %v8330_v0 = vld [vmem:[%s9838_s4 + $0x1ac] ss:$16 sps:$4 sm:$0xff]  }
  0x57   : > { %5848 = vmatprep.subr.bf16.mxu0 %v8280_v21  ;;  %6422 = vmatprep.subr.bf16.mxu1 %v8282_v22  ;;  %v1166_v55 = vrot.slane %v9916_v53, %v9911_v50  ;;  %v8332_v1 = vld [vmem:[%s9838_s4 + $0x1a0] ss:$16 sps:$4 sm:$0xff]   ;;  %v8333_v2 = vld [vmem:[%s9838_s4 + $0x1a8] ss:$16 sps:$4 sm:$0xff]   ;;  %v8334_v3 = vld [vmem:[%s9838_s4 + $0x1c4] ss:$16 sps:$4 sm:$0xff]  }
  0x58   : > { %v8336_v4 = vld [vmem:[%s9838_s4 + $0x1cc] ss:$16 sps:$4 sm:$0xff]   ;;  %v8338_v5 = vld [vmem:[%s9838_s4 + $0x1c0] ss:$16 sps:$4 sm:$0xff]   ;;  %v8339_v6 = vld [vmem:[%s9838_s4 + $0x1c8] ss:$16 sps:$4 sm:$0xff]  }
  0x59   : > { %v1174_v59 = vcombine.high %v1166_v55, %v1166_v55  ;;  %v8340_v7 = vld [vmem:[%s9838_s4 + $0x1e4] ss:$16 sps:$4 sm:$0xff]   ;;  %v8342_v8 = vld [vmem:[%s9838_s4 + $0x1ec] ss:$16 sps:$4 sm:$0xff]   ;;  %v8344_v9 = vld [vmem:[%s9838_s4 + $0x1e0] ss:$16 sps:$4 sm:$0xff]   ;;  %v9943_v14 = vrot.slane %v1166_v55, %v9911_v50 }
  0x5a   : > { %5849 = vmatpush1.bf16.msra.mxu0 %v8284_v23  ;;  %6423 = vmatpush1.bf16.msra.mxu1 %v8285_v24  ;;  %v8345_v10 = vld [vmem:[%s9838_s4 + $0x1e8] ss:$16 sps:$4 sm:$0xff]   ;;  %v8348_v11 = vld [vmem:[%s9838_s4 + $0x204] ss:$16 sps:$4 sm:$0xff]   ;;  %v8351_v12 = vld [vmem:[%s9838_s4 + $0x20c] ss:$16 sps:$4 sm:$0xff]  }
  0x5b   : > { %5850 = vmatprep.subr.bf16.mxu0 %v8286_v25  ;;  %6424 = vmatprep.subr.bf16.mxu1 %v8288_v26  ;;  %v1196_v61 = vrot.slane %v1174_v59, %v9911_v50  ;;  %v8346_v13 = vld [vmem:[%s9838_s4 + $0x200] ss:$16 sps:$4 sm:$0xff]   ;;  %v8349_v15 = vld [vmem:[%s9838_s4 + $0x208] ss:$16 sps:$4 sm:$0xff]   ;;  %v8354_v16 = vld [vmem:[%s9838_s4 + $0x224] ss:$16 sps:$4 sm:$0xff]  }
  0x5c   : > { %v8357_v17 = vld [vmem:[%s9838_s4 + $0x22c] ss:$16 sps:$4 sm:$0xff]   ;;  %v8352_v19 = vld [vmem:[%s9838_s4 + $0x220] ss:$16 sps:$4 sm:$0xff]   ;;  %v8355_v20 = vld [vmem:[%s9838_s4 + $0x228] ss:$16 sps:$4 sm:$0xff]  }
  0x5d   : > { %5870 = vmatprep.mubr.bf16.mxu0 %v1196_v61  ;;  %6444 = vmatprep.mubr.bf16.mxu1 %v1196_v61  ;;  %v1206_v18 = vcombine.high %v1196_v61, %v1196_v61  ;;  %v8360_v21 = vld [vmem:[%s9838_s4 + $0x244] ss:$16 sps:$4 sm:$0xff]   ;;  %v8363_v22 = vld [vmem:[%s9838_s4 + $0x24c] ss:$16 sps:$4 sm:$0xff]   ;;  %v8358_v23 = vld [vmem:[%s9838_s4 + $0x240] ss:$16 sps:$4 sm:$0xff]  }
  0x5e   : > { %5851 = vmatpush1.bf16.msra.mxu0 %v8290_v27  ;;  %6425 = vmatpush1.bf16.msra.mxu1 %v8291_v28  ;;  %v8361_v24 = vld [vmem:[%s9838_s4 + $0x248] ss:$16 sps:$4 sm:$0xff]   ;;  %v8366_v25 = vld [vmem:[%s9838_s4 + $0x264] ss:$16 sps:$4 sm:$0xff]   ;;  %v8369_v26 = vld [vmem:[%s9838_s4 + $0x26c] ss:$16 sps:$4 sm:$0xff]  }
  0x5f   : > { %5852 = vmatprep.subr.bf16.mxu0 %v8292_v29  ;;  %6426 = vmatprep.subr.bf16.mxu1 %v8294_v30  ;;  %v8364_v27 = vld [vmem:[%s9838_s4 + $0x260] ss:$16 sps:$4 sm:$0xff]   ;;  %v8367_v28 = vld [vmem:[%s9838_s4 + $0x268] ss:$16 sps:$4 sm:$0xff]   ;;  %v8372_v29 = vld [vmem:[%s9838_s4 + $0x284] ss:$16 sps:$4 sm:$0xff]  }
  0x60   : > { %v8375_v30 = vld [vmem:[%s9838_s4 + $0x28c] ss:$16 sps:$4 sm:$0xff]   ;;  %v8384_v37 = vld [vmem:[%s9838_s4 + $0x2c4] ss:$16 sps:$4 sm:$0xff]   ;;  %v8382_v39 = vld [vmem:[%s9838_s4 + $0x2c0] ss:$16 sps:$4 sm:$0xff]  }
  0x61   : > { %v8387_v38 = vld [vmem:[%s9838_s4 + $0x2cc] ss:$16 sps:$4 sm:$0xff]   ;;  %v8388_v43 = vld [vmem:[%s9838_s4 + $0x2e0] ss:$16 sps:$4 sm:$0xff]   ;;  %v8403_v55 = vld [vmem:[%s9838_s4 + $0x328] ss:$16 sps:$4 sm:$0xff]  }
  0x62   : > { %5853 = vmatpush1.bf16.msra.mxu0 %v8296_v31  ;;  %6427 = vmatpush1.bf16.msra.mxu1 %v8297_v32  ;;  %v8370_v31 = vld [vmem:[%s9838_s4 + $0x280] ss:$16 sps:$4 sm:$0xff]   ;;  %v8373_v32 = vld [vmem:[%s9838_s4 + $0x288] ss:$16 sps:$4 sm:$0xff]   ;;  %v8417_v61 = vld [vmem:[%s9838_s4 + $0x36c] ss:$16 sps:$4 sm:$0xff]  }
  0x63   : > { %5854 = vmatprep.subr.bf16.mxu0 %v8298_v33  ;;  %6428 = vmatprep.subr.bf16.mxu1 %v8300_v34  ;;  %v8378_v33 = vld [vmem:[%s9838_s4 + $0x2a4] ss:$16 sps:$4 sm:$0xff]   ;;  %v8381_v34 = vld [vmem:[%s9838_s4 + $0x2ac] ss:$16 sps:$4 sm:$0xff]   ;;  %v8409_v59 = vld [vmem:[%s9838_s4 + $0x348] ss:$16 sps:$4 sm:$0xff]  }
  0x66   : > { %5855 = vmatpush1.bf16.msra.mxu0 %v8302_v35  ;;  %6429 = vmatpush1.bf16.msra.mxu1 %v8303_v36  ;;  %v8376_v35 = vld [vmem:[%s9838_s4 + $0x2a0] ss:$16 sps:$4 sm:$0xff]   ;;  %v8379_v36 = vld [vmem:[%s9838_s4 + $0x2a8] ss:$16 sps:$4 sm:$0xff]  }
  0x67   : > { %5856 = vmatprep.subr.bf16.mxu0 %v8304_v40  ;;  %6430 = vmatprep.subr.bf16.mxu1 %v8306_v41  ;;  %v8385_v40 = vld [vmem:[%s9838_s4 + $0x2c8] ss:$16 sps:$4 sm:$0xff]   ;;  %v8390_v41 = vld [vmem:[%s9838_s4 + $0x2e4] ss:$16 sps:$4 sm:$0xff]  }
  0x6a   : > { %5857 = vmatpush1.bf16.msra.mxu0 %v8308_v42  ;;  %6431 = vmatpush1.bf16.msra.mxu1 %v8309_v45  ;;  %v8393_v42 = vld [vmem:[%s9838_s4 + $0x2ec] ss:$16 sps:$4 sm:$0xff]   ;;  %v8391_v45 = vld [vmem:[%s9838_s4 + $0x2e8] ss:$16 sps:$4 sm:$0xff]  }
  0x6b   : > { %5858 = vmatprep.subr.bf16.mxu0 %v8310_v46  ;;  %6432 = vmatprep.subr.bf16.mxu1 %v8312_v47  ;;  %v8396_v46 = vld [vmem:[%s9838_s4 + $0x304] ss:$16 sps:$4 sm:$0xff]   ;;  %v8399_v47 = vld [vmem:[%s9838_s4 + $0x30c] ss:$16 sps:$4 sm:$0xff]  }
  0x6e   : > { %5859 = vmatpush1.bf16.msra.mxu0 %v8314_v48  ;;  %6433 = vmatpush1.bf16.msra.mxu1 %v8315_v49  ;;  %v8394_v48 = vld [vmem:[%s9838_s4 + $0x300] ss:$16 sps:$4 sm:$0xff]   ;;  %v8397_v49 = vld [vmem:[%s9838_s4 + $0x308] ss:$16 sps:$4 sm:$0xff]  }
  0x6f   : > { %5860 = vmatprep.subr.bf16.mxu0 %v8316_v51  ;;  %6434 = vmatprep.subr.bf16.mxu1 %v8318_v52  ;;  %v8402_v51 = vld [vmem:[%s9838_s4 + $0x324] ss:$16 sps:$4 sm:$0xff]   ;;  %v8405_v52 = vld [vmem:[%s9838_s4 + $0x32c] ss:$16 sps:$4 sm:$0xff]  }
  0x72   : > { %5861 = vmatpush1.bf16.msra.mxu0 %v8320_v54  ;;  %6435 = vmatpush1.bf16.msra.mxu1 %v8321_v56  ;;  %v8400_v54 = vld [vmem:[%s9838_s4 + $0x320] ss:$16 sps:$4 sm:$0xff]   ;;  %v8408_v56 = vld [vmem:[%s9838_s4 + $0x344] ss:$16 sps:$4 sm:$0xff]  }
  0x73   : > { %5862 = vmatprep.subr.bf16.mxu0 %v8322_v57  ;;  %6436 = vmatprep.subr.bf16.mxu1 %v8324_v58  ;;  %v8411_v57 = vld [vmem:[%s9838_s4 + $0x34c] ss:$16 sps:$4 sm:$0xff]   ;;  %v8406_v58 = vld [vmem:[%s9838_s4 + $0x340] ss:$16 sps:$4 sm:$0xff]  }
  0x76   : > { %5863 = vmatpush1.bf16.msra.mxu0 %v8326_v60  ;;  %6437 = vmatpush1.bf16.msra.mxu1 %v8327_v62  ;;  %v8414_v60 = vld [vmem:[%s9838_s4 + $0x364] ss:$16 sps:$4 sm:$0xff]   ;;  %v8412_v62 = vld [vmem:[%s9838_s4 + $0x360] ss:$16 sps:$4 sm:$0xff]  }
  0x77   : > { %5864 = vmatprep.subr.bf16.mxu0 %v8328_v63  ;;  %6438 = vmatprep.subr.bf16.mxu1 %v8330_v0  ;;  %v8415_v63 = vld [vmem:[%s9838_s4 + $0x368] ss:$16 sps:$4 sm:$0xff]   ;;  %v8420_v0 = vld [vmem:[%s9838_s4 + $0x384] ss:$16 sps:$4 sm:$0xff]  }
  0x7a   : > { %5865 = vmatpush1.bf16.msra.mxu0 %v8332_v1  ;;  %6439 = vmatpush1.bf16.msra.mxu1 %v8333_v2  ;;  %v8423_v1 = vld [vmem:[%s9838_s4 + $0x38c] ss:$16 sps:$4 sm:$0xff]   ;;  %v8418_v2 = vld [vmem:[%s9838_s4 + $0x380] ss:$16 sps:$4 sm:$0xff]  }
  0x7b   : > { %5866 = vmatprep.subr.bf16.mxu0 %v8334_v3  ;;  %6440 = vmatprep.subr.bf16.mxu1 %v8336_v4  ;;  %v8421_v3 = vld [vmem:[%s9838_s4 + $0x388] ss:$16 sps:$4 sm:$0xff]   ;;  %v8426_v4 = vld [vmem:[%s9838_s4 + $0x3a4] ss:$16 sps:$4 sm:$0xff]  }
  0x7e   : > { %5867 = vmatpush1.bf16.msra.mxu0 %v8338_v5  ;;  %6441 = vmatpush1.bf16.msra.mxu1 %v8339_v6  ;;  %v8429_v5 = vld [vmem:[%s9838_s4 + $0x3ac] ss:$16 sps:$4 sm:$0xff]   ;;  %v8424_v6 = vld [vmem:[%s9838_s4 + $0x3a0] ss:$16 sps:$4 sm:$0xff]  }
  0x7f   : > { %5868 = vmatprep.subr.bf16.mxu0 %v8340_v7  ;;  %6442 = vmatprep.subr.bf16.mxu1 %v8342_v8  ;;  %v8427_v7 = vld [vmem:[%s9838_s4 + $0x3a8] ss:$16 sps:$4 sm:$0xff]   ;;  %v8432_v8 = vld [vmem:[%s9838_s4 + $0x3c4] ss:$16 sps:$4 sm:$0xff]  }
  0x82   : > { %5869 = vmatpush1.bf16.msra.mxu0 %v8344_v9  ;;  %6443 = vmatpush1.bf16.msra.mxu1 %v8345_v10  ;;  %v8435_v9 = vld [vmem:[%s9838_s4 + $0x3cc] ss:$16 sps:$4 sm:$0xff]   ;;  %v1159_v10 = vcombine.high %v9916_v53, %v9916_v53  ;;  %v8439_v53 = vld [vmem:[%s9838_s4 + $0x3e8] ss:$16 sps:$4 sm:$0xff]  }
  0x83   : > { %5879 = vmatprep.subr.bf16.mxu0 %v8348_v11  ;;  %6453 = vmatprep.subr.bf16.mxu1 %v8351_v12  ;;  %v8430_v11 = vld [vmem:[%s9838_s4 + $0x3c0] ss:$16 sps:$4 sm:$0xff]   ;;  %v8433_v12 = vld [vmem:[%s9838_s4 + $0x3c8] ss:$16 sps:$4 sm:$0xff]  }
  0x85   : > { %5871 = vmatmul.mubr.bf16.vlgmr.msra.gmra.mrb[0].mxu0 %v9943_v14  ;;  %6445 = vmatmul.mubr.bf16.vlgmr.msra.gmra.mrb[0].mxu1 %v9943_v14 }
  0x86   : > { %5880 = vmatpush1.bf16.msra.mxu0 %v8346_v13  ;;  %6454 = vmatpush1.bf16.msra.mxu1 %v8349_v15  ;;  %v8438_v13 = vld [vmem:[%s9838_s4 + $0x3e4] ss:$16 sps:$4 sm:$0xff]   ;;  %v8441_v15 = vld [vmem:[%s9838_s4 + $0x3ec] ss:$16 sps:$4 sm:$0xff]  }
  0x87   : > { %5881 = vmatprep.subr.bf16.mxu0 %v8354_v16  ;;  %6455 = vmatprep.subr.bf16.mxu1 %v8357_v17  ;;  %v10009_v16 = vrot.slane %v1159_v10, %v9911_v50  ;;  %v8436_v17 = vld [vmem:[%s9838_s4 + $0x3e0] ss:$16 sps:$4 sm:$0xff]   ;;  %v8517_v10 = vld [vmem:[%s9838_s4 + $0x588] ss:$16 sps:$4 sm:$0xff]  }
  0x88   : > { %5911 = vmatprep.mubr.bf16.mxu0 %v1206_v18  ;;  %6485 = vmatprep.mubr.bf16.mxu1 %v1206_v18  ;;  %v8444_v18 = vld [vmem:[%s9838_s4 + $0x404] ss:$16 sps:$4 sm:$0xff]  }
  0x8a   : > { %5882 = vmatpush1.bf16.msra.mxu0 %v8352_v19  ;;  %6456 = vmatpush1.bf16.msra.mxu1 %v8355_v20  ;;  %v8447_v19 = vld [vmem:[%s9838_s4 + $0x40c] ss:$16 sps:$4 sm:$0xff]   ;;  %v1175_v20 = vcombine.high %v10009_v16, %v10009_v16 }
  0x8b   : > { %5883 = vmatprep.subr.bf16.mxu0 %v8360_v21  ;;  %6457 = vmatprep.subr.bf16.mxu1 %v8363_v22  ;;  %v8442_v21 = vld [vmem:[%s9838_s4 + $0x400] ss:$16 sps:$4 sm:$0xff]   ;;  %v1204_v22 = vcombine.high %v9943_v14, %v9943_v14  ;;  %v8451_v14 = vld [vmem:[%s9838_s4 + $0x428] ss:$16 sps:$4 sm:$0xff]  }
  0x8e   : > { %5884 = vmatpush1.bf16.msra.mxu0 %v8358_v23  ;;  %6458 = vmatpush1.bf16.msra.mxu1 %v8361_v24  ;;  %v8445_v23 = vld [vmem:[%s9838_s4 + $0x408] ss:$16 sps:$4 sm:$0xff]   ;;  %v8450_v24 = vld [vmem:[%s9838_s4 + $0x424] ss:$16 sps:$4 sm:$0xff]  }
  0x8f   : > { %5885 = vmatprep.subr.bf16.mxu0 %v8366_v25  ;;  %6459 = vmatprep.subr.bf16.mxu1 %v8369_v26  ;;  %v8453_v25 = vld [vmem:[%s9838_s4 + $0x42c] ss:$16 sps:$4 sm:$0xff]   ;;  %v10024_v26 = vrot.slane %v1175_v20, %v9911_v50  ;;  %v8534_v20 = vld [vmem:[%s9838_s4 + $0x5e4] ss:$16 sps:$4 sm:$0xff]  }
  0x92   : > { %5886 = vmatpush1.bf16.msra.mxu0 %v8364_v27  ;;  %6460 = vmatpush1.bf16.msra.mxu1 %v8367_v28  ;;  %v8448_v27 = vld [vmem:[%s9838_s4 + $0x420] ss:$16 sps:$4 sm:$0xff]   ;;  %v8456_v28 = vld [vmem:[%s9838_s4 + $0x444] ss:$16 sps:$4 sm:$0xff]  }
  0x93   : > { %5887 = vmatprep.subr.bf16.mxu0 %v8372_v29  ;;  %6461 = vmatprep.subr.bf16.mxu1 %v8375_v30  ;;  %v8459_v29 = vld [vmem:[%s9838_s4 + $0x44c] ss:$16 sps:$4 sm:$0xff]   ;;  %v8454_v30 = vld [vmem:[%s9838_s4 + $0x440] ss:$16 sps:$4 sm:$0xff]  }
  0x96   : > { %5888 = vmatpush1.bf16.msra.mxu0 %v8370_v31  ;;  %6462 = vmatpush1.bf16.msra.mxu1 %v8373_v32  ;;  %v8457_v31 = vld [vmem:[%s9838_s4 + $0x448] ss:$16 sps:$4 sm:$0xff]   ;;  %v8462_v32 = vld [vmem:[%s9838_s4 + $0x464] ss:$16 sps:$4 sm:$0xff]  }
  0x97   : > { %5889 = vmatprep.subr.bf16.mxu0 %v8378_v33  ;;  %6463 = vmatprep.subr.bf16.mxu1 %v8381_v34  ;;  %v8465_v33 = vld [vmem:[%s9838_s4 + $0x46c] ss:$16 sps:$4 sm:$0xff]   ;;  %v8460_v34 = vld [vmem:[%s9838_s4 + $0x460] ss:$16 sps:$4 sm:$0xff]  }
  0x9a   : > { %5890 = vmatpush1.bf16.msra.mxu0 %v8376_v35  ;;  %6464 = vmatpush1.bf16.msra.mxu1 %v8379_v36  ;;  %v8463_v35 = vld [vmem:[%s9838_s4 + $0x468] ss:$16 sps:$4 sm:$0xff]   ;;  %v8468_v36 = vld [vmem:[%s9838_s4 + $0x484] ss:$16 sps:$4 sm:$0xff]  }
  0x9b   : > { %5891 = vmatprep.subr.bf16.mxu0 %v8384_v37  ;;  %6465 = vmatprep.subr.bf16.mxu1 %v8387_v38  ;;  %v8471_v37 = vld [vmem:[%s9838_s4 + $0x48c] ss:$16 sps:$4 sm:$0xff]   ;;  %v8466_v38 = vld [vmem:[%s9838_s4 + $0x480] ss:$16 sps:$4 sm:$0xff]  }
  0x9e   : > { %5892 = vmatpush1.bf16.msra.mxu0 %v8382_v39  ;;  %6466 = vmatpush1.bf16.msra.mxu1 %v8385_v40  ;;  %v8469_v39 = vld [vmem:[%s9838_s4 + $0x488] ss:$16 sps:$4 sm:$0xff]   ;;  %v8474_v40 = vld [vmem:[%s9838_s4 + $0x4a4] ss:$16 sps:$4 sm:$0xff]  }
  0x9f   : > { %5893 = vmatprep.subr.bf16.mxu0 %v8390_v41  ;;  %6467 = vmatprep.subr.bf16.mxu1 %v8393_v42  ;;  %v8477_v41 = vld [vmem:[%s9838_s4 + $0x4ac] ss:$16 sps:$4 sm:$0xff]   ;;  %v8472_v42 = vld [vmem:[%s9838_s4 + $0x4a0] ss:$16 sps:$4 sm:$0xff]  }
  0xa2   : > { %5894 = vmatpush1.bf16.msra.mxu0 %v8388_v43  ;;  %6468 = vmatpush1.bf16.msra.mxu1 %v8391_v45  ;;  %v8475_v43 = vld [vmem:[%s9838_s4 + $0x4a8] ss:$16 sps:$4 sm:$0xff]   ;;  %v8480_v45 = vld [vmem:[%s9838_s4 + $0x4c4] ss:$16 sps:$4 sm:$0xff]  }
  0xa3   : > { %5895 = vmatprep.subr.bf16.mxu0 %v8396_v46  ;;  %6469 = vmatprep.subr.bf16.mxu1 %v8399_v47  ;;  %v8483_v46 = vld [vmem:[%s9838_s4 + $0x4cc] ss:$16 sps:$4 sm:$0xff]   ;;  %v8478_v47 = vld [vmem:[%s9838_s4 + $0x4c0] ss:$16 sps:$4 sm:$0xff]  }
  0xa6   : > { %5896 = vmatpush1.bf16.msra.mxu0 %v8394_v48  ;;  %6470 = vmatpush1.bf16.msra.mxu1 %v8397_v49  ;;  %v8481_v48 = vld [vmem:[%s9838_s4 + $0x4c8] ss:$16 sps:$4 sm:$0xff]   ;;  %v8486_v49 = vld [vmem:[%s9838_s4 + $0x4e4] ss:$16 sps:$4 sm:$0xff]  }
  0xa7   : > { %5897 = vmatprep.subr.bf16.mxu0 %v8402_v51  ;;  %6471 = vmatprep.subr.bf16.mxu1 %v8405_v52  ;;  %v8489_v51 = vld [vmem:[%s9838_s4 + $0x4ec] ss:$16 sps:$4 sm:$0xff]   ;;  %v8484_v52 = vld [vmem:[%s9838_s4 + $0x4e0] ss:$16 sps:$4 sm:$0xff]  }
  0xaa   : > { %5898 = vmatpush1.bf16.msra.mxu0 %v8400_v54  ;;  %6472 = vmatpush1.bf16.msra.mxu1 %v8403_v55  ;;  %v8487_v54 = vld [vmem:[%s9838_s4 + $0x4e8] ss:$16 sps:$4 sm:$0xff]   ;;  %v8492_v55 = vld [vmem:[%s9838_s4 + $0x504] ss:$16 sps:$4 sm:$0xff]  }
  0xab   : > { %5899 = vmatprep.subr.bf16.mxu0 %v8408_v56  ;;  %6473 = vmatprep.subr.bf16.mxu1 %v8411_v57  ;;  %v8495_v56 = vld [vmem:[%s9838_s4 + $0x50c] ss:$16 sps:$4 sm:$0xff]   ;;  %v8490_v57 = vld [vmem:[%s9838_s4 + $0x500] ss:$16 sps:$4 sm:$0xff]  }
  0xae   : > { %5900 = vmatpush1.bf16.msra.mxu0 %v8406_v58  ;;  %6474 = vmatpush1.bf16.msra.mxu1 %v8409_v59  ;;  %v8493_v58 = vld [vmem:[%s9838_s4 + $0x508] ss:$16 sps:$4 sm:$0xff]   ;;  %v8498_v59 = vld [vmem:[%s9838_s4 + $0x524] ss:$16 sps:$4 sm:$0xff]  }
  0xaf   : > { %5901 = vmatprep.subr.bf16.mxu0 %v8414_v60  ;;  %6475 = vmatprep.subr.bf16.mxu1 %v8417_v61  ;;  %v8501_v60 = vld [vmem:[%s9838_s4 + $0x52c] ss:$16 sps:$4 sm:$0xff]   ;;  %v8496_v61 = vld [vmem:[%s9838_s4 + $0x520] ss:$16 sps:$4 sm:$0xff]  }
  0xb2   : > { %5902 = vmatpush1.bf16.msra.mxu0 %v8412_v62  ;;  %6476 = vmatpush1.bf16.msra.mxu1 %v8415_v63  ;;  %v8499_v62 = vld [vmem:[%s9838_s4 + $0x528] ss:$16 sps:$4 sm:$0xff]   ;;  %v8504_v63 = vld [vmem:[%s9838_s4 + $0x544] ss:$16 sps:$4 sm:$0xff]  }
  0xb3   : > { %5903 = vmatprep.subr.bf16.mxu0 %v8420_v0  ;;  %6477 = vmatprep.subr.bf16.mxu1 %v8423_v1  ;;  %v8507_v0 = vld [vmem:[%s9838_s4 + $0x54c] ss:$16 sps:$4 sm:$0xff]   ;;  %v8502_v1 = vld [vmem:[%s9838_s4 + $0x540] ss:$16 sps:$4 sm:$0xff]  }
  0xb6   : > { %5904 = vmatpush1.bf16.msra.mxu0 %v8418_v2  ;;  %6478 = vmatpush1.bf16.msra.mxu1 %v8421_v3  ;;  %v8505_v2 = vld [vmem:[%s9838_s4 + $0x548] ss:$16 sps:$4 sm:$0xff]   ;;  %v8510_v3 = vld [vmem:[%s9838_s4 + $0x564] ss:$16 sps:$4 sm:$0xff]  }
  0xb7   : > { %5905 = vmatprep.subr.bf16.mxu0 %v8426_v4  ;;  %6479 = vmatprep.subr.bf16.mxu1 %v8429_v5  ;;  %v8513_v4 = vld [vmem:[%s9838_s4 + $0x56c] ss:$16 sps:$4 sm:$0xff]   ;;  %v8508_v5 = vld [vmem:[%s9838_s4 + $0x560] ss:$16 sps:$4 sm:$0xff]  }
  0xba   : > { %5906 = vmatpush1.bf16.msra.mxu0 %v8424_v6  ;;  %6480 = vmatpush1.bf16.msra.mxu1 %v8427_v7  ;;  %v8511_v6 = vld [vmem:[%s9838_s4 + $0x568] ss:$16 sps:$4 sm:$0xff]   ;;  %v8516_v7 = vld [vmem:[%s9838_s4 + $0x584] ss:$16 sps:$4 sm:$0xff]  }
  0xbb   : > { %5907 = vmatprep.subr.bf16.mxu0 %v8432_v8  ;;  %6481 = vmatprep.subr.bf16.mxu1 %v8435_v9  ;;  %v8519_v8 = vld [vmem:[%s9838_s4 + $0x58c] ss:$16 sps:$4 sm:$0xff]   ;;  %v8514_v9 = vld [vmem:[%s9838_s4 + $0x580] ss:$16 sps:$4 sm:$0xff]  }
  0xbe   : > { %5908 = vmatpush1.bf16.msra.mxu0 %v8430_v11  ;;  %6482 = vmatpush1.bf16.msra.mxu1 %v8433_v12  ;;  %v8522_v11 = vld [vmem:[%s9838_s4 + $0x5a4] ss:$16 sps:$4 sm:$0xff]   ;;  %v8525_v12 = vld [vmem:[%s9838_s4 + $0x5ac] ss:$16 sps:$4 sm:$0xff]  }
  0xbf   : > { %5909 = vmatprep.subr.bf16.mxu0 %v8438_v13  ;;  %6483 = vmatprep.subr.bf16.mxu1 %v8441_v15  ;;  %v8520_v13 = vld [vmem:[%s9838_s4 + $0x5a0] ss:$16 sps:$4 sm:$0xff]   ;;  %v8523_v15 = vld [vmem:[%s9838_s4 + $0x5a8] ss:$16 sps:$4 sm:$0xff]  }
  0xc2   : > { %5910 = vmatpush1.bf16.msra.mxu0 %v8436_v17  ;;  %6484 = vmatpush1.bf16.msra.mxu1 %v8439_v53  ;;  %v8528_v17 = vld [vmem:[%s9838_s4 + $0x5c4] ss:$16 sps:$4 sm:$0xff]   ;;  %v8531_v53 = vld [vmem:[%s9838_s4 + $0x5cc] ss:$16 sps:$4 sm:$0xff]  }
  0xc3   : > { %5920 = vmatprep.subr.bf16.mxu0 %v8444_v18  ;;  %6494 = vmatprep.subr.bf16.mxu1 %v8447_v19  ;;  %v8526_v18 = vld [vmem:[%s9838_s4 + $0x5c0] ss:$16 sps:$4 sm:$0xff]   ;;  %v8529_v19 = vld [vmem:[%s9838_s4 + $0x5c8] ss:$16 sps:$4 sm:$0xff]  }
  0xc5   : > { %5912 = vmatmul.mubr.bf16.vlgmr.msra.gmra.mrb[0].mxu0 %v1204_v22  ;;  %6486 = vmatmul.mubr.bf16.vlgmr.msra.gmra.mrb[0].mxu1 %v1204_v22  ;;  %v8532_v22 = vld [vmem:[%s9838_s4 + $0x5e0] ss:$16 sps:$4 sm:$0xff]  }
  0xc6   : > { %5921 = vmatpush1.bf16.msra.mxu0 %v8442_v21  ;;  %6495 = vmatpush1.bf16.msra.mxu1 %v8445_v23  ;;  %v8537_v21 = vld [vmem:[%s9838_s4 + $0x5ec] ss:$16 sps:$4 sm:$0xff]   ;;  %v8535_v23 = vld [vmem:[%s9838_s4 + $0x5e8] ss:$16 sps:$4 sm:$0xff]  }
  0xc7   : > { %5922 = vmatprep.subr.bf16.mxu0 %v8450_v24  ;;  %6496 = vmatprep.subr.bf16.mxu1 %v8453_v25  ;;  %v8541_v24 = vld [vmem:[%s9838_s4 + $0x604] ss:$16 sps:$4 sm:$0xff]   ;;  %v8544_v25 = vld [vmem:[%s9838_s4 + $0x60c] ss:$16 sps:$4 sm:$0xff]  }
  0xc8   : > { %5952 = vmatprep.mubr.bf16.mxu0 %v10024_v26  ;;  %6526 = vmatprep.mubr.bf16.mxu1 %v10024_v26 }
  0xca   : > { %5923 = vmatpush1.bf16.msra.mxu0 %v8448_v27  ;;  %6497 = vmatpush1.bf16.msra.mxu1 %v8451_v14  ;;  %v8539_v27 = vld [vmem:[%s9838_s4 + $0x600] ss:$16 sps:$4 sm:$0xff]   ;;  %v10091_v14 = vrot.slane %v10009_v16, %v9911_v50 }
  0xcb   : > { %5924 = vmatprep.subr.bf16.mxu0 %v8456_v28  ;;  %6498 = vmatprep.subr.bf16.mxu1 %v8459_v29  ;;  %v8542_v28 = vld [vmem:[%s9838_s4 + $0x608] ss:$16 sps:$4 sm:$0xff]   ;;  %v8547_v29 = vld [vmem:[%s9838_s4 + $0x624] ss:$16 sps:$4 sm:$0xff]   ;;  %v8545_v16 = vld [vmem:[%s9838_s4 + $0x620] ss:$16 sps:$4 sm:$0xff]  }
  0xce   : > { %5925 = vmatpush1.bf16.msra.mxu0 %v8454_v30  ;;  %6499 = vmatpush1.bf16.msra.mxu1 %v8457_v31  ;;  %v8550_v30 = vld [vmem:[%s9838_s4 + $0x62c] ss:$16 sps:$4 sm:$0xff]   ;;  %v1207_v31 = vcombine.high %v10024_v26, %v10024_v26  ;;  %v8551_v26 = vld [vmem:[%s9838_s4 + $0x640] ss:$16 sps:$4 sm:$0xff]  }
  0xcf   : > { %5926 = vmatprep.subr.bf16.mxu0 %v8462_v32  ;;  %6500 = vmatprep.subr.bf16.mxu1 %v8465_v33  ;;  %v8548_v32 = vld [vmem:[%s9838_s4 + $0x628] ss:$16 sps:$4 sm:$0xff]   ;;  %v8553_v33 = vld [vmem:[%s9838_s4 + $0x644] ss:$16 sps:$4 sm:$0xff]  }
  0xd2   : > { %5927 = vmatpush1.bf16.msra.mxu0 %v8460_v34  ;;  %6501 = vmatpush1.bf16.msra.mxu1 %v8463_v35  ;;  %v8556_v34 = vld [vmem:[%s9838_s4 + $0x64c] ss:$16 sps:$4 sm:$0xff]   ;;  %v8554_v35 = vld [vmem:[%s9838_s4 + $0x648] ss:$16 sps:$4 sm:$0xff]  }
  0xd3   : > { %5928 = vmatprep.subr.bf16.mxu0 %v8468_v36  ;;  %6502 = vmatprep.subr.bf16.mxu1 %v8471_v37  ;;  %v8559_v36 = vld [vmem:[%s9838_s4 + $0x664] ss:$16 sps:$4 sm:$0xff]   ;;  %v8562_v37 = vld [vmem:[%s9838_s4 + $0x66c] ss:$16 sps:$4 sm:$0xff]  }
  0xd6   : > { %5929 = vmatpush1.bf16.msra.mxu0 %v8466_v38  ;;  %6503 = vmatpush1.bf16.msra.mxu1 %v8469_v39  ;;  %v8557_v38 = vld [vmem:[%s9838_s4 + $0x660] ss:$16 sps:$4 sm:$0xff]   ;;  %v8560_v39 = vld [vmem:[%s9838_s4 + $0x668] ss:$16 sps:$4 sm:$0xff]  }
  0xd7   : > { %5930 = vmatprep.subr.bf16.mxu0 %v8474_v40  ;;  %6504 = vmatprep.subr.bf16.mxu1 %v8477_v41  ;;  %v8565_v40 = vld [vmem:[%s9838_s4 + $0x684] ss:$16 sps:$4 sm:$0xff]   ;;  %v8568_v41 = vld [vmem:[%s9838_s4 + $0x68c] ss:$16 sps:$4 sm:$0xff]  }
  0xda   : > { %5931 = vmatpush1.bf16.msra.mxu0 %v8472_v42  ;;  %6505 = vmatpush1.bf16.msra.mxu1 %v8475_v43  ;;  %v8563_v42 = vld [vmem:[%s9838_s4 + $0x680] ss:$16 sps:$4 sm:$0xff]   ;;  %v8566_v43 = vld [vmem:[%s9838_s4 + $0x688] ss:$16 sps:$4 sm:$0xff]  }
  0xdb   : > { %5932 = vmatprep.subr.bf16.mxu0 %v8480_v45  ;;  %6506 = vmatprep.subr.bf16.mxu1 %v8483_v46  ;;  %v8571_v45 = vld [vmem:[%s9838_s4 + $0x6a4] ss:$16 sps:$4 sm:$0xff]   ;;  %v8574_v46 = vld [vmem:[%s9838_s4 + $0x6ac] ss:$16 sps:$4 sm:$0xff]  }
  0xde   : > { %5933 = vmatpush1.bf16.msra.mxu0 %v8478_v47  ;;  %6507 = vmatpush1.bf16.msra.mxu1 %v8481_v48  ;;  %v8569_v47 = vld [vmem:[%s9838_s4 + $0x6a0] ss:$16 sps:$4 sm:$0xff]   ;;  %v8572_v48 = vld [vmem:[%s9838_s4 + $0x6a8] ss:$16 sps:$4 sm:$0xff]  }
  0xdf   : > { %5934 = vmatprep.subr.bf16.mxu0 %v8486_v49  ;;  %6508 = vmatprep.subr.bf16.mxu1 %v8489_v51  ;;  %v8577_v49 = vld [vmem:[%s9838_s4 + $0x6c4] ss:$16 sps:$4 sm:$0xff]   ;;  %v8580_v51 = vld [vmem:[%s9838_s4 + $0x6cc] ss:$16 sps:$4 sm:$0xff]  }
  0xe2   : > { %5935 = vmatpush1.bf16.msra.mxu0 %v8484_v52  ;;  %6509 = vmatpush1.bf16.msra.mxu1 %v8487_v54  ;;  %v8575_v52 = vld [vmem:[%s9838_s4 + $0x6c0] ss:$16 sps:$4 sm:$0xff]   ;;  %v8578_v54 = vld [vmem:[%s9838_s4 + $0x6c8] ss:$16 sps:$4 sm:$0xff]  }
  0xe3   : > { %5936 = vmatprep.subr.bf16.mxu0 %v8492_v55  ;;  %6510 = vmatprep.subr.bf16.mxu1 %v8495_v56  ;;  %v8583_v55 = vld [vmem:[%s9838_s4 + $0x6e4] ss:$16 sps:$4 sm:$0xff]   ;;  %v8586_v56 = vld [vmem:[%s9838_s4 + $0x6ec] ss:$16 sps:$4 sm:$0xff]  }
  0xe6   : > { %5937 = vmatpush1.bf16.msra.mxu0 %v8490_v57  ;;  %6511 = vmatpush1.bf16.msra.mxu1 %v8493_v58  ;;  %v8581_v57 = vld [vmem:[%s9838_s4 + $0x6e0] ss:$16 sps:$4 sm:$0xff]   ;;  %v8584_v58 = vld [vmem:[%s9838_s4 + $0x6e8] ss:$16 sps:$4 sm:$0xff]  }
  0xe7   : > { %5938 = vmatprep.subr.bf16.mxu0 %v8498_v59  ;;  %6512 = vmatprep.subr.bf16.mxu1 %v8501_v60  ;;  %v8589_v59 = vld [vmem:[%s9838_s4 + $0x704] ss:$16 sps:$4 sm:$0xff]   ;;  %v8592_v60 = vld [vmem:[%s9838_s4 + $0x70c] ss:$16 sps:$4 sm:$0xff]  }
  0xea   : > { %5939 = vmatpush1.bf16.msra.mxu0 %v8496_v61  ;;  %6513 = vmatpush1.bf16.msra.mxu1 %v8499_v62  ;;  %v8587_v61 = vld [vmem:[%s9838_s4 + $0x700] ss:$16 sps:$4 sm:$0xff]   ;;  %v8590_v62 = vld [vmem:[%s9838_s4 + $0x708] ss:$16 sps:$4 sm:$0xff]  }
  0xeb   : > { %5940 = vmatprep.subr.bf16.mxu0 %v8504_v63  ;;  %6514 = vmatprep.subr.bf16.mxu1 %v8507_v0  ;;  %v8595_v63 = vld [vmem:[%s9838_s4 + $0x724] ss:$16 sps:$4 sm:$0xff]   ;;  %v8598_v0 = vld [vmem:[%s9838_s4 + $0x72c] ss:$16 sps:$4 sm:$0xff]  }
  0xee   : > { %5941 = vmatpush1.bf16.msra.mxu0 %v8502_v1  ;;  %6515 = vmatpush1.bf16.msra.mxu1 %v8505_v2  ;;  %v8593_v1 = vld [vmem:[%s9838_s4 + $0x720] ss:$16 sps:$4 sm:$0xff]   ;;  %v8596_v2 = vld [vmem:[%s9838_s4 + $0x728] ss:$16 sps:$4 sm:$0xff]  }
  0xef   : > { %5942 = vmatprep.subr.bf16.mxu0 %v8510_v3  ;;  %6516 = vmatprep.subr.bf16.mxu1 %v8513_v4  ;;  %v8601_v3 = vld [vmem:[%s9838_s4 + $0x744] ss:$16 sps:$4 sm:$0xff]   ;;  %v8604_v4 = vld [vmem:[%s9838_s4 + $0x74c] ss:$16 sps:$4 sm:$0xff]  }
  0xf2   : > { %5943 = vmatpush1.bf16.msra.mxu0 %v8508_v5  ;;  %6517 = vmatpush1.bf16.msra.mxu1 %v8511_v6  ;;  %v8599_v5 = vld [vmem:[%s9838_s4 + $0x740] ss:$16 sps:$4 sm:$0xff]   ;;  %v8602_v6 = vld [vmem:[%s9838_s4 + $0x748] ss:$16 sps:$4 sm:$0xff]  }
  0xf3   : > { %5944 = vmatprep.subr.bf16.mxu0 %v8516_v7  ;;  %6518 = vmatprep.subr.bf16.mxu1 %v8519_v8  ;;  %v8607_v7 = vld [vmem:[%s9838_s4 + $0x764] ss:$16 sps:$4 sm:$0xff]   ;;  %v8610_v8 = vld [vmem:[%s9838_s4 + $0x76c] ss:$16 sps:$4 sm:$0xff]  }
  0xf6   : > { %5945 = vmatpush1.bf16.msra.mxu0 %v8514_v9  ;;  %6519 = vmatpush1.bf16.msra.mxu1 %v8517_v10  ;;  %v8605_v9 = vld [vmem:[%s9838_s4 + $0x760] ss:$16 sps:$4 sm:$0xff]   ;;  %v8608_v10 = vld [vmem:[%s9838_s4 + $0x768] ss:$16 sps:$4 sm:$0xff]  }
  0xf7   : > { %5946 = vmatprep.subr.bf16.mxu0 %v8522_v11  ;;  %6520 = vmatprep.subr.bf16.mxu1 %v8525_v12  ;;  %v8613_v11 = vld [vmem:[%s9838_s4 + $0x784] ss:$16 sps:$4 sm:$0xff]   ;;  %v8616_v12 = vld [vmem:[%s9838_s4 + $0x78c] ss:$16 sps:$4 sm:$0xff]  }
  0xfa   : > { %5947 = vmatpush1.bf16.msra.mxu0 %v8520_v13  ;;  %6521 = vmatpush1.bf16.msra.mxu1 %v8523_v15  ;;  %v8611_v13 = vld [vmem:[%s9838_s4 + $0x780] ss:$16 sps:$4 sm:$0xff]   ;;  %v8614_v15 = vld [vmem:[%s9838_s4 + $0x788] ss:$16 sps:$4 sm:$0xff]  }
  0xfb   : > { %5948 = vmatprep.subr.bf16.mxu0 %v8528_v17  ;;  %6522 = vmatprep.subr.bf16.mxu1 %v8531_v53  ;;  %v8619_v17 = vld [vmem:[%s9838_s4 + $0x7a4] ss:$16 sps:$4 sm:$0xff]   ;;  %v8622_v53 = vld [vmem:[%s9838_s4 + $0x7ac] ss:$16 sps:$4 sm:$0xff]  }
  0xfe   : > { %5949 = vmatpush1.bf16.msra.mxu0 %v8526_v18  ;;  %6523 = vmatpush1.bf16.msra.mxu1 %v8529_v19  ;;  %v8617_v18 = vld [vmem:[%s9838_s4 + $0x7a0] ss:$16 sps:$4 sm:$0xff]   ;;  %v8620_v19 = vld [vmem:[%s9838_s4 + $0x7a8] ss:$16 sps:$4 sm:$0xff]  }
  0xff   : > { %5950 = vmatprep.subr.bf16.mxu0 %v8534_v20  ;;  %6524 = vmatprep.subr.bf16.mxu1 %v8537_v21  ;;  %v8625_v20 = vld [vmem:[%s9838_s4 + $0x7c4] ss:$16 sps:$4 sm:$0xff]   ;;  %v8628_v21 = vld [vmem:[%s9838_s4 + $0x7cc] ss:$16 sps:$4 sm:$0xff]  }
 0x102   : > { %5951 = vmatpush1.bf16.msra.mxu0 %v8532_v22  ;;  %6525 = vmatpush1.bf16.msra.mxu1 %v8535_v23  ;;  %v10153_v22 = vld.sshfl [vmem:[%s9856_s26 + $0x8] sm:$0xff pattern:$0x75316420] }
 0x103   : > { %5961 = vmatprep.subr.bf16.mxu0 %v8541_v24  ;;  %6535 = vmatprep.subr.bf16.mxu1 %v8544_v25  ;;  %v8623_v23 = vld [vmem:[%s9838_s4 + $0x7c0] ss:$16 sps:$4 sm:$0xff]   ;;  %v8626_v24 = vld [vmem:[%s9838_s4 + $0x7c8] ss:$16 sps:$4 sm:$0xff]   ;;  %v8631_v25 = vld [vmem:[%s9838_s4 + $0x7e4] ss:$16 sps:$4 sm:$0xff]  }
 0x105   : > { %5953 = vmatmul.mubr.bf16.vlgmr.msra.gmra.mrb[0].mxu0 %v10091_v14  ;;  %6527 = vmatmul.mubr.bf16.vlgmr.msra.gmra.mrb[0].mxu1 %v10091_v14 }
 0x106   : > { %5962 = vmatpush1.bf16.msra.mxu0 %v8539_v27  ;;  %6536 = vmatpush1.bf16.msra.mxu1 %v8542_v28  ;;  %v8634_v27 = vld [vmem:[%s9838_s4 + $0x7ec] ss:$16 sps:$4 sm:$0xff]   ;;  %v8629_v28 = vld [vmem:[%s9838_s4 + $0x7e0] ss:$16 sps:$4 sm:$0xff]  }
 0x107   : > { %5963 = vmatprep.subr.bf16.mxu0 %v8547_v29  ;;  %6537 = vmatprep.subr.bf16.mxu1 %v8550_v30  ;;  %v8632_v29 = vld [vmem:[%s9838_s4 + $0x7e8] ss:$16 sps:$4 sm:$0xff]   ;;  %v8637_v30 = vld [vmem:[%s9838_s4 + $0x804] ss:$16 sps:$4 sm:$0xff]  }
 0x108   : > { %5993 = vmatprep.mubr.bf16.mxu0 %v1207_v31  ;;  %6567 = vmatprep.mubr.bf16.mxu1 %v1207_v31  ;;  %v8640_v31 = vld [vmem:[%s9838_s4 + $0x80c] ss:$16 sps:$4 sm:$0xff]  }
 0x10a   : > { %5964 = vmatpush1.bf16.msra.mxu0 %v8545_v16  ;;  %6538 = vmatpush1.bf16.msra.mxu1 %v8548_v32  ;;  %v1223_v16 = vcombine.high %v10153_v22, %v10153_v22  ;;  %v1205_v32 = vcombine.high %v10091_v14, %v10091_v14  ;;  %v8641_v14 = vld [vmem:[%s9838_s4 + $0x820] ss:$16 sps:$4 sm:$0xff]  }
 0x10b   : > { %5965 = vmatprep.subr.bf16.mxu0 %v8553_v33  ;;  %6539 = vmatprep.subr.bf16.mxu1 %v8556_v34  ;;  %v8635_v33 = vld [vmem:[%s9838_s4 + $0x800] ss:$16 sps:$4 sm:$0xff]   ;;  %v8638_v34 = vld [vmem:[%s9838_s4 + $0x808] ss:$16 sps:$4 sm:$0xff]  }
 0x10e   : > { %5966 = vmatpush1.bf16.msra.mxu0 %v8551_v26  ;;  %6540 = vmatpush1.bf16.msra.mxu1 %v8554_v35  ;;  %v8643_v26 = vld [vmem:[%s9838_s4 + $0x824] ss:$16 sps:$4 sm:$0xff]   ;;  %v8646_v35 = vld [vmem:[%s9838_s4 + $0x82c] ss:$16 sps:$4 sm:$0xff]  }
 0x10f   : > { %5967 = vmatprep.subr.bf16.mxu0 %v8559_v36  ;;  %6541 = vmatprep.subr.bf16.mxu1 %v8562_v37  ;;  %v10172_v36 = vrot.slane %v1223_v16, %v9911_v50  ;;  %v8644_v37 = vld [vmem:[%s9838_s4 + $0x828] ss:$16 sps:$4 sm:$0xff]   ;;  %v8727_v16 = vld [vmem:[%s9838_s4 + $0x9e4] ss:$16 sps:$4 sm:$0xff]  }
 0x112   : > { %5968 = vmatpush1.bf16.msra.mxu0 %v8557_v38  ;;  %6542 = vmatpush1.bf16.msra.mxu1 %v8560_v39  ;;  %v8649_v38 = vld [vmem:[%s9838_s4 + $0x844] ss:$16 sps:$4 sm:$0xff]   ;;  %v8652_v39 = vld [vmem:[%s9838_s4 + $0x84c] ss:$16 sps:$4 sm:$0xff]  }
 0x113   : > { %5969 = vmatprep.subr.bf16.mxu0 %v8565_v40  ;;  %6543 = vmatprep.subr.bf16.mxu1 %v8568_v41  ;;  %v8647_v40 = vld [vmem:[%s9838_s4 + $0x840] ss:$16 sps:$4 sm:$0xff]   ;;  %v8650_v41 = vld [vmem:[%s9838_s4 + $0x848] ss:$16 sps:$4 sm:$0xff]  }
 0x116   : > { %5970 = vmatpush1.bf16.msra.mxu0 %v8563_v42  ;;  %6544 = vmatpush1.bf16.msra.mxu1 %v8566_v43  ;;  %v8655_v42 = vld [vmem:[%s9838_s4 + $0x864] ss:$16 sps:$4 sm:$0xff]   ;;  %v8658_v43 = vld [vmem:[%s9838_s4 + $0x86c] ss:$16 sps:$4 sm:$0xff]  }
 0x117   : > { %5971 = vmatprep.subr.bf16.mxu0 %v8571_v45  ;;  %6545 = vmatprep.subr.bf16.mxu1 %v8574_v46  ;;  %v8653_v45 = vld [vmem:[%s9838_s4 + $0x860] ss:$16 sps:$4 sm:$0xff]   ;;  %v8656_v46 = vld [vmem:[%s9838_s4 + $0x868] ss:$16 sps:$4 sm:$0xff]  }
 0x11a   : > { %5972 = vmatpush1.bf16.msra.mxu0 %v8569_v47  ;;  %6546 = vmatpush1.bf16.msra.mxu1 %v8572_v48  ;;  %v8661_v47 = vld [vmem:[%s9838_s4 + $0x884] ss:$16 sps:$4 sm:$0xff]   ;;  %v8664_v48 = vld [vmem:[%s9838_s4 + $0x88c] ss:$16 sps:$4 sm:$0xff]  }
 0x11b   : > { %5973 = vmatprep.subr.bf16.mxu0 %v8577_v49  ;;  %6547 = vmatprep.subr.bf16.mxu1 %v8580_v51  ;;  %v8659_v49 = vld [vmem:[%s9838_s4 + $0x880] ss:$16 sps:$4 sm:$0xff]   ;;  %v8662_v51 = vld [vmem:[%s9838_s4 + $0x888] ss:$16 sps:$4 sm:$0xff]  }
 0x11e   : > { %5974 = vmatpush1.bf16.msra.mxu0 %v8575_v52  ;;  %6548 = vmatpush1.bf16.msra.mxu1 %v8578_v54  ;;  %v8667_v52 = vld [vmem:[%s9838_s4 + $0x8a4] ss:$16 sps:$4 sm:$0xff]   ;;  %v8670_v54 = vld [vmem:[%s9838_s4 + $0x8ac] ss:$16 sps:$4 sm:$0xff]  }
 0x11f   : > { %5975 = vmatprep.subr.bf16.mxu0 %v8583_v55  ;;  %6549 = vmatprep.subr.bf16.mxu1 %v8586_v56  ;;  %v8665_v55 = vld [vmem:[%s9838_s4 + $0x8a0] ss:$16 sps:$4 sm:$0xff]   ;;  %v8668_v56 = vld [vmem:[%s9838_s4 + $0x8a8] ss:$16 sps:$4 sm:$0xff]  }
 0x122   : > { %5976 = vmatpush1.bf16.msra.mxu0 %v8581_v57  ;;  %6550 = vmatpush1.bf16.msra.mxu1 %v8584_v58  ;;  %v8673_v57 = vld [vmem:[%s9838_s4 + $0x8c4] ss:$16 sps:$4 sm:$0xff]   ;;  %v8676_v58 = vld [vmem:[%s9838_s4 + $0x8cc] ss:$16 sps:$4 sm:$0xff]  }
 0x123   : > { %5977 = vmatprep.subr.bf16.mxu0 %v8589_v59  ;;  %6551 = vmatprep.subr.bf16.mxu1 %v8592_v60  ;;  %v8671_v59 = vld [vmem:[%s9838_s4 + $0x8c0] ss:$16 sps:$4 sm:$0xff]   ;;  %v8674_v60 = vld [vmem:[%s9838_s4 + $0x8c8] ss:$16 sps:$4 sm:$0xff]  }
 0x126   : > { %5978 = vmatpush1.bf16.msra.mxu0 %v8587_v61  ;;  %6552 = vmatpush1.bf16.msra.mxu1 %v8590_v62  ;;  %v8679_v61 = vld [vmem:[%s9838_s4 + $0x8e4] ss:$16 sps:$4 sm:$0xff]   ;;  %v8682_v62 = vld [vmem:[%s9838_s4 + $0x8ec] ss:$16 sps:$4 sm:$0xff]  }
 0x127   : > { %5979 = vmatprep.subr.bf16.mxu0 %v8595_v63  ;;  %6553 = vmatprep.subr.bf16.mxu1 %v8598_v0  ;;  %v8677_v63 = vld [vmem:[%s9838_s4 + $0x8e0] ss:$16 sps:$4 sm:$0xff]   ;;  %v8680_v0 = vld [vmem:[%s9838_s4 + $0x8e8] ss:$16 sps:$4 sm:$0xff]  }
 0x12a   : > { %5980 = vmatpush1.bf16.msra.mxu0 %v8593_v1  ;;  %6554 = vmatpush1.bf16.msra.mxu1 %v8596_v2  ;;  %v8685_v1 = vld [vmem:[%s9838_s4 + $0x904] ss:$16 sps:$4 sm:$0xff]   ;;  %v8688_v2 = vld [vmem:[%s9838_s4 + $0x90c] ss:$16 sps:$4 sm:$0xff]  }
 0x12b   : > { %5981 = vmatprep.subr.bf16.mxu0 %v8601_v3  ;;  %6555 = vmatprep.subr.bf16.mxu1 %v8604_v4  ;;  %v8683_v3 = vld [vmem:[%s9838_s4 + $0x900] ss:$16 sps:$4 sm:$0xff]   ;;  %v8686_v4 = vld [vmem:[%s9838_s4 + $0x908] ss:$16 sps:$4 sm:$0xff]  }
 0x12e   : > { %5982 = vmatpush1.bf16.msra.mxu0 %v8599_v5  ;;  %6556 = vmatpush1.bf16.msra.mxu1 %v8602_v6  ;;  %v8691_v5 = vld [vmem:[%s9838_s4 + $0x924] ss:$16 sps:$4 sm:$0xff]   ;;  %v8694_v6 = vld [vmem:[%s9838_s4 + $0x92c] ss:$16 sps:$4 sm:$0xff]  }
 0x12f   : > { %5983 = vmatprep.subr.bf16.mxu0 %v8607_v7  ;;  %6557 = vmatprep.subr.bf16.mxu1 %v8610_v8  ;;  %v8689_v7 = vld [vmem:[%s9838_s4 + $0x920] ss:$16 sps:$4 sm:$0xff]   ;;  %v8692_v8 = vld [vmem:[%s9838_s4 + $0x928] ss:$16 sps:$4 sm:$0xff]  }
 0x132   : > { %5984 = vmatpush1.bf16.msra.mxu0 %v8605_v9  ;;  %6558 = vmatpush1.bf16.msra.mxu1 %v8608_v10  ;;  %v8697_v9 = vld [vmem:[%s9838_s4 + $0x944] ss:$16 sps:$4 sm:$0xff]   ;;  %v8700_v10 = vld [vmem:[%s9838_s4 + $0x94c] ss:$16 sps:$4 sm:$0xff]  }
 0x133   : > { %5985 = vmatprep.subr.bf16.mxu0 %v8613_v11  ;;  %6559 = vmatprep.subr.bf16.mxu1 %v8616_v12  ;;  %v8695_v11 = vld [vmem:[%s9838_s4 + $0x940] ss:$16 sps:$4 sm:$0xff]   ;;  %v8698_v12 = vld [vmem:[%s9838_s4 + $0x948] ss:$16 sps:$4 sm:$0xff]  }
 0x136   : > { %5986 = vmatpush1.bf16.msra.mxu0 %v8611_v13  ;;  %6560 = vmatpush1.bf16.msra.mxu1 %v8614_v15  ;;  %v8703_v13 = vld [vmem:[%s9838_s4 + $0x964] ss:$16 sps:$4 sm:$0xff]   ;;  %v8706_v15 = vld [vmem:[%s9838_s4 + $0x96c] ss:$16 sps:$4 sm:$0xff]  }
 0x137   : > { %5987 = vmatprep.subr.bf16.mxu0 %v8619_v17  ;;  %6561 = vmatprep.subr.bf16.mxu1 %v8622_v53  ;;  %v8701_v17 = vld [vmem:[%s9838_s4 + $0x960] ss:$16 sps:$4 sm:$0xff]   ;;  %v8704_v53 = vld [vmem:[%s9838_s4 + $0x968] ss:$16 sps:$4 sm:$0xff]  }
 0x13a   : > { %5988 = vmatpush1.bf16.msra.mxu0 %v8617_v18  ;;  %6562 = vmatpush1.bf16.msra.mxu1 %v8620_v19  ;;  %v8709_v18 = vld [vmem:[%s9838_s4 + $0x984] ss:$16 sps:$4 sm:$0xff]   ;;  %v8712_v19 = vld [vmem:[%s9838_s4 + $0x98c] ss:$16 sps:$4 sm:$0xff]  }
 0x13b   : > { %5989 = vmatprep.subr.bf16.mxu0 %v8625_v20  ;;  %6563 = vmatprep.subr.bf16.mxu1 %v8628_v21  ;;  %v8707_v20 = vld [vmem:[%s9838_s4 + $0x980] ss:$16 sps:$4 sm:$0xff]   ;;  %v8710_v21 = vld [vmem:[%s9838_s4 + $0x988] ss:$16 sps:$4 sm:$0xff]  }
 0x13e   : > { %5990 = vmatpush1.bf16.msra.mxu0 %v8623_v23  ;;  %6564 = vmatpush1.bf16.msra.mxu1 %v8626_v24  ;;  %v8715_v23 = vld [vmem:[%s9838_s4 + $0x9a4] ss:$16 sps:$4 sm:$0xff]   ;;  %v8718_v24 = vld [vmem:[%s9838_s4 + $0x9ac] ss:$16 sps:$4 sm:$0xff]  }
 0x13f   : > { %5991 = vmatprep.subr.bf16.mxu0 %v8631_v25  ;;  %6565 = vmatprep.subr.bf16.mxu1 %v8634_v27  ;;  %v8713_v25 = vld [vmem:[%s9838_s4 + $0x9a0] ss:$16 sps:$4 sm:$0xff]   ;;  %v8716_v27 = vld [vmem:[%s9838_s4 + $0x9a8] ss:$16 sps:$4 sm:$0xff]  }
 0x142   : > { %5992 = vmatpush1.bf16.msra.mxu0 %v8629_v28  ;;  %6566 = vmatpush1.bf16.msra.mxu1 %v8632_v29  ;;  %v8721_v28 = vld [vmem:[%s9838_s4 + $0x9c4] ss:$16 sps:$4 sm:$0xff]   ;;  %v8724_v29 = vld [vmem:[%s9838_s4 + $0x9cc] ss:$16 sps:$4 sm:$0xff]  }
 0x143   : > { %6002 = vmatprep.subr.bf16.mxu0 %v8637_v30  ;;  %6576 = vmatprep.subr.bf16.mxu1 %v8640_v31  ;;  %v8719_v30 = vld [vmem:[%s9838_s4 + $0x9c0] ss:$16 sps:$4 sm:$0xff]   ;;  %v8722_v31 = vld [vmem:[%s9838_s4 + $0x9c8] ss:$16 sps:$4 sm:$0xff]  }
 0x145   : > { %5994 = vmatmul.mubr.bf16.vlgmr.msra.gmra.mrb[0].mxu0 %v1205_v32  ;;  %6568 = vmatmul.mubr.bf16.vlgmr.msra.gmra.mrb[0].mxu1 %v1205_v32  ;;  %v8730_v32 = vld [vmem:[%s9838_s4 + $0x9ec] ss:$16 sps:$4 sm:$0xff]  }
 0x146   : > { %6003 = vmatpush1.bf16.msra.mxu0 %v8635_v33  ;;  %6577 = vmatpush1.bf16.msra.mxu1 %v8638_v34  ;;  %v8725_v33 = vld [vmem:[%s9838_s4 + $0x9e0] ss:$16 sps:$4 sm:$0xff]   ;;  %v8728_v34 = vld [vmem:[%s9838_s4 + $0x9e8] ss:$16 sps:$4 sm:$0xff]  }
 0x147   : > { %6004 = vmatprep.subr.bf16.mxu0 %v8643_v26  ;;  %6578 = vmatprep.subr.bf16.mxu1 %v8646_v35  ;;  %v8733_v26 = vld [vmem:[%s9838_s4 + $0xa04] ss:$16 sps:$4 sm:$0xff]   ;;  %v8736_v35 = vld [vmem:[%s9838_s4 + $0xa0c] ss:$16 sps:$4 sm:$0xff]  }
 0x148   : > { %6034 = vmatprep.mubr.bf16.mxu0 %v10172_v36  ;;  %6608 = vmatprep.mubr.bf16.mxu1 %v10172_v36 }
 0x14a   : > { %6005 = vmatpush1.bf16.msra.mxu0 %v8641_v14  ;;  %6579 = vmatpush1.bf16.msra.mxu1 %v8644_v37  ;;  %v10238_v14 = vrot.slane %v10153_v22, %v9911_v50  ;;  %v8731_v37 = vld [vmem:[%s9838_s4 + $0xa00] ss:$16 sps:$4 sm:$0xff]  }
 0x14b   : > { %6006 = vmatprep.subr.bf16.mxu0 %v8649_v38  ;;  %6580 = vmatprep.subr.bf16.mxu1 %v8652_v39  ;;  %v8734_v38 = vld [vmem:[%s9838_s4 + $0xa08] ss:$16 sps:$4 sm:$0xff]   ;;  %v8739_v39 = vld [vmem:[%s9838_s4 + $0xa24] ss:$16 sps:$4 sm:$0xff]   ;;  %v8737_v22 = vld [vmem:[%s9838_s4 + $0xa20] ss:$16 sps:$4 sm:$0xff]  }
 0x14e   : > { %6007 = vmatpush1.bf16.msra.mxu0 %v8647_v40  ;;  %6581 = vmatpush1.bf16.msra.mxu1 %v8650_v41  ;;  %v8742_v40 = vld [vmem:[%s9838_s4 + $0xa2c] ss:$16 sps:$4 sm:$0xff]   ;;  %v1255_v41 = vcombine.high %v10172_v36, %v10172_v36  ;;  %v8743_v36 = vld [vmem:[%s9838_s4 + $0xa40] ss:$16 sps:$4 sm:$0xff]  }
 0x14f   : > { %6008 = vmatprep.subr.bf16.mxu0 %v8655_v42  ;;  %6582 = vmatprep.subr.bf16.mxu1 %v8658_v43  ;;  %v8740_v42 = vld [vmem:[%s9838_s4 + $0xa28] ss:$16 sps:$4 sm:$0xff]   ;;  %v8745_v43 = vld [vmem:[%s9838_s4 + $0xa44] ss:$16 sps:$4 sm:$0xff]  }
 0x152   : > { %6009 = vmatpush1.bf16.msra.mxu0 %v8653_v45  ;;  %6583 = vmatpush1.bf16.msra.mxu1 %v8656_v46  ;;  %v8748_v45 = vld [vmem:[%s9838_s4 + $0xa4c] ss:$16 sps:$4 sm:$0xff]   ;;  %v8746_v46 = vld [vmem:[%s9838_s4 + $0xa48] ss:$16 sps:$4 sm:$0xff]  }
 0x153   : > { %6010 = vmatprep.subr.bf16.mxu0 %v8661_v47  ;;  %6584 = vmatprep.subr.bf16.mxu1 %v8664_v48  ;;  %v8751_v47 = vld [vmem:[%s9838_s4 + $0xa64] ss:$16 sps:$4 sm:$0xff]   ;;  %v8754_v48 = vld [vmem:[%s9838_s4 + $0xa6c] ss:$16 sps:$4 sm:$0xff]  }
 0x156   : > { %6011 = vmatpush1.bf16.msra.mxu0 %v8659_v49  ;;  %6585 = vmatpush1.bf16.msra.mxu1 %v8662_v51  ;;  %v8749_v49 = vld [vmem:[%s9838_s4 + $0xa60] ss:$16 sps:$4 sm:$0xff]   ;;  %v8752_v51 = vld [vmem:[%s9838_s4 + $0xa68] ss:$16 sps:$4 sm:$0xff]  }
 0x157   : > { %6012 = vmatprep.subr.bf16.mxu0 %v8667_v52  ;;  %6586 = vmatprep.subr.bf16.mxu1 %v8670_v54  ;;  %v8757_v52 = vld [vmem:[%s9838_s4 + $0xa84] ss:$16 sps:$4 sm:$0xff]   ;;  %v8760_v54 = vld [vmem:[%s9838_s4 + $0xa8c] ss:$16 sps:$4 sm:$0xff]  }
 0x15a   : > { %6013 = vmatpush1.bf16.msra.mxu0 %v8665_v55  ;;  %6587 = vmatpush1.bf16.msra.mxu1 %v8668_v56  ;;  %v8755_v55 = vld [vmem:[%s9838_s4 + $0xa80] ss:$16 sps:$4 sm:$0xff]   ;;  %v8758_v56 = vld [vmem:[%s9838_s4 + $0xa88] ss:$16 sps:$4 sm:$0xff]  }
 0x15b   : > { %6014 = vmatprep.subr.bf16.mxu0 %v8673_v57  ;;  %6588 = vmatprep.subr.bf16.mxu1 %v8676_v58  ;;  %v8763_v57 = vld [vmem:[%s9838_s4 + $0xaa4] ss:$16 sps:$4 sm:$0xff]   ;;  %v8766_v58 = vld [vmem:[%s9838_s4 + $0xaac] ss:$16 sps:$4 sm:$0xff]  }
 0x15e   : > { %6015 = vmatpush1.bf16.msra.mxu0 %v8671_v59  ;;  %6589 = vmatpush1.bf16.msra.mxu1 %v8674_v60  ;;  %v8761_v59 = vld [vmem:[%s9838_s4 + $0xaa0] ss:$16 sps:$4 sm:$0xff]   ;;  %v8764_v60 = vld [vmem:[%s9838_s4 + $0xaa8] ss:$16 sps:$4 sm:$0xff]  }
 0x15f   : > { %6016 = vmatprep.subr.bf16.mxu0 %v8679_v61  ;;  %6590 = vmatprep.subr.bf16.mxu1 %v8682_v62  ;;  %v8769_v61 = vld [vmem:[%s9838_s4 + $0xac4] ss:$16 sps:$4 sm:$0xff]   ;;  %v8772_v62 = vld [vmem:[%s9838_s4 + $0xacc] ss:$16 sps:$4 sm:$0xff]  }
 0x162   : > { %6017 = vmatpush1.bf16.msra.mxu0 %v8677_v63  ;;  %6591 = vmatpush1.bf16.msra.mxu1 %v8680_v0  ;;  %v8767_v63 = vld [vmem:[%s9838_s4 + $0xac0] ss:$16 sps:$4 sm:$0xff]   ;;  %v8770_v0 = vld [vmem:[%s9838_s4 + $0xac8] ss:$16 sps:$4 sm:$0xff]  }
 0x163   : > { %6018 = vmatprep.subr.bf16.mxu0 %v8685_v1  ;;  %6592 = vmatprep.subr.bf16.mxu1 %v8688_v2  ;;  %v8775_v1 = vld [vmem:[%s9838_s4 + $0xae4] ss:$16 sps:$4 sm:$0xff]   ;;  %v8778_v2 = vld [vmem:[%s9838_s4 + $0xaec] ss:$16 sps:$4 sm:$0xff]  }
 0x166   : > { %6019 = vmatpush1.bf16.msra.mxu0 %v8683_v3  ;;  %6593 = vmatpush1.bf16.msra.mxu1 %v8686_v4  ;;  %v8773_v3 = vld [vmem:[%s9838_s4 + $0xae0] ss:$16 sps:$4 sm:$0xff]   ;;  %v8776_v4 = vld [vmem:[%s9838_s4 + $0xae8] ss:$16 sps:$4 sm:$0xff]  }
 0x167   : > { %6020 = vmatprep.subr.bf16.mxu0 %v8691_v5  ;;  %6594 = vmatprep.subr.bf16.mxu1 %v8694_v6  ;;  %v8781_v5 = vld [vmem:[%s9838_s4 + $0xb04] ss:$16 sps:$4 sm:$0xff]   ;;  %v8784_v6 = vld [vmem:[%s9838_s4 + $0xb0c] ss:$16 sps:$4 sm:$0xff]  }
 0x16a   : > { %6021 = vmatpush1.bf16.msra.mxu0 %v8689_v7  ;;  %6595 = vmatpush1.bf16.msra.mxu1 %v8692_v8  ;;  %v8779_v7 = vld [vmem:[%s9838_s4 + $0xb00] ss:$16 sps:$4 sm:$0xff]   ;;  %v8782_v8 = vld [vmem:[%s9838_s4 + $0xb08] ss:$16 sps:$4 sm:$0xff]  }
 0x16b   : > { %6022 = vmatprep.subr.bf16.mxu0 %v8697_v9  ;;  %6596 = vmatprep.subr.bf16.mxu1 %v8700_v10  ;;  %v8787_v9 = vld [vmem:[%s9838_s4 + $0xb24] ss:$16 sps:$4 sm:$0xff]   ;;  %v8790_v10 = vld [vmem:[%s9838_s4 + $0xb2c] ss:$16 sps:$4 sm:$0xff]  }
 0x16e   : > { %6023 = vmatpush1.bf16.msra.mxu0 %v8695_v11  ;;  %6597 = vmatpush1.bf16.msra.mxu1 %v8698_v12  ;;  %v8785_v11 = vld [vmem:[%s9838_s4 + $0xb20] ss:$16 sps:$4 sm:$0xff]   ;;  %v8788_v12 = vld [vmem:[%s9838_s4 + $0xb28] ss:$16 sps:$4 sm:$0xff]  }
 0x16f   : > { %6024 = vmatprep.subr.bf16.mxu0 %v8703_v13  ;;  %6598 = vmatprep.subr.bf16.mxu1 %v8706_v15  ;;  %v8793_v13 = vld [vmem:[%s9838_s4 + $0xb44] ss:$16 sps:$4 sm:$0xff]   ;;  %v8796_v15 = vld [vmem:[%s9838_s4 + $0xb4c] ss:$16 sps:$4 sm:$0xff]  }
 0x172   : > { %6025 = vmatpush1.bf16.msra.mxu0 %v8701_v17  ;;  %6599 = vmatpush1.bf16.msra.mxu1 %v8704_v53  ;;  %v8791_v17 = vld [vmem:[%s9838_s4 + $0xb40] ss:$16 sps:$4 sm:$0xff]   ;;  %v8794_v53 = vld [vmem:[%s9838_s4 + $0xb48] ss:$16 sps:$4 sm:$0xff]  }
 0x173   : > { %6026 = vmatprep.subr.bf16.mxu0 %v8709_v18  ;;  %6600 = vmatprep.subr.bf16.mxu1 %v8712_v19  ;;  %v8799_v18 = vld [vmem:[%s9838_s4 + $0xb64] ss:$16 sps:$4 sm:$0xff]   ;;  %v8802_v19 = vld [vmem:[%s9838_s4 + $0xb6c] ss:$16 sps:$4 sm:$0xff]  }
 0x176   : > { %6027 = vmatpush1.bf16.msra.mxu0 %v8707_v20  ;;  %6601 = vmatpush1.bf16.msra.mxu1 %v8710_v21  ;;  %v8797_v20 = vld [vmem:[%s9838_s4 + $0xb60] ss:$16 sps:$4 sm:$0xff]   ;;  %v8800_v21 = vld [vmem:[%s9838_s4 + $0xb68] ss:$16 sps:$4 sm:$0xff]  }
 0x177   : > { %6028 = vmatprep.subr.bf16.mxu0 %v8715_v23  ;;  %6602 = vmatprep.subr.bf16.mxu1 %v8718_v24  ;;  %v8805_v23 = vld [vmem:[%s9838_s4 + $0xb84] ss:$16 sps:$4 sm:$0xff]   ;;  %v8808_v24 = vld [vmem:[%s9838_s4 + $0xb8c] ss:$16 sps:$4 sm:$0xff]  }
 0x17a   : > { %6029 = vmatpush1.bf16.msra.mxu0 %v8713_v25  ;;  %6603 = vmatpush1.bf16.msra.mxu1 %v8716_v27  ;;  %v8803_v25 = vld [vmem:[%s9838_s4 + $0xb80] ss:$16 sps:$4 sm:$0xff]   ;;  %v8806_v27 = vld [vmem:[%s9838_s4 + $0xb88] ss:$16 sps:$4 sm:$0xff]  }
 0x17b   : > { %6030 = vmatprep.subr.bf16.mxu0 %v8721_v28  ;;  %6604 = vmatprep.subr.bf16.mxu1 %v8724_v29  ;;  %v8811_v28 = vld [vmem:[%s9838_s4 + $0xba4] ss:$16 sps:$4 sm:$0xff]   ;;  %v8814_v29 = vld [vmem:[%s9838_s4 + $0xbac] ss:$16 sps:$4 sm:$0xff]  }
 0x17e   : > { %6031 = vmatpush1.bf16.msra.mxu0 %v8719_v30  ;;  %6605 = vmatpush1.bf16.msra.mxu1 %v8722_v31  ;;  %v8809_v30 = vld [vmem:[%s9838_s4 + $0xba0] ss:$16 sps:$4 sm:$0xff]   ;;  %v8812_v31 = vld [vmem:[%s9838_s4 + $0xba8] ss:$16 sps:$4 sm:$0xff]  }
 0x17f   : > { %6032 = vmatprep.subr.bf16.mxu0 %v8727_v16  ;;  %6606 = vmatprep.subr.bf16.mxu1 %v8730_v32  ;;  %v8817_v16 = vld [vmem:[%s9838_s4 + $0xbc4] ss:$16 sps:$4 sm:$0xff]   ;;  %v8820_v32 = vld [vmem:[%s9838_s4 + $0xbcc] ss:$16 sps:$4 sm:$0xff]  }
 0x182   : > { %6033 = vmatpush1.bf16.msra.mxu0 %v8725_v33  ;;  %6607 = vmatpush1.bf16.msra.mxu1 %v8728_v34  ;;  %v9597_v33 = vld [vmem:[%s9856_s26 + $0x8] sm:$0xff] }
 0x183   : > { %6043 = vmatprep.subr.bf16.mxu0 %v8733_v26  ;;  %6617 = vmatprep.subr.bf16.mxu1 %v8736_v35  ;;  %v1208_v34 = vcombine.high %v9597_v33, %v9597_v33  ;;  %v8815_v26 = vld [vmem:[%s9838_s4 + $0xbc0] ss:$16 sps:$4 sm:$0xff]   ;;  %v8818_v35 = vld [vmem:[%s9838_s4 + $0xbc8] ss:$16 sps:$4 sm:$0xff]  }
 0x184   : > { %v8899_v33 = vld [vmem:[%s9838_s4 + $0xd80] ss:$16 sps:$4 sm:$0xff]  }
 0x185   : > { %6035 = vmatmul.mubr.bf16.vlgmr.msra.gmra.mrb[0].mxu0 %v10238_v14  ;;  %6609 = vmatmul.mubr.bf16.vlgmr.msra.gmra.mrb[0].mxu1 %v10238_v14 }
 0x186   : > { %6044 = vmatpush1.bf16.msra.mxu0 %v8731_v37  ;;  %6618 = vmatpush1.bf16.msra.mxu1 %v8734_v38  ;;  %v8823_v37 = vld [vmem:[%s9838_s4 + $0xbe4] ss:$16 sps:$4 sm:$0xff]   ;;  %v8826_v38 = vld [vmem:[%s9838_s4 + $0xbec] ss:$16 sps:$4 sm:$0xff]  }
 0x187   : > { %6045 = vmatprep.subr.bf16.mxu0 %v8739_v39  ;;  %6619 = vmatprep.subr.bf16.mxu1 %v8742_v40  ;;  %v10306_v39 = vrot.slane %v1208_v34, %v9911_v50  ;;  %v8821_v40 = vld [vmem:[%s9838_s4 + $0xbe0] ss:$16 sps:$4 sm:$0xff]   ;;  %v8902_v34 = vld [vmem:[%s9838_s4 + $0xd88] ss:$16 sps:$4 sm:$0xff]  }
 0x188   : > { %6075 = vmatprep.mubr.bf16.mxu0 %v1255_v41  ;;  %6649 = vmatprep.mubr.bf16.mxu1 %v1255_v41  ;;  %v8824_v41 = vld [vmem:[%s9838_s4 + $0xbe8] ss:$16 sps:$4 sm:$0xff]  }
 0x18a   : > { %6046 = vmatpush1.bf16.msra.mxu0 %v8737_v22  ;;  %6620 = vmatpush1.bf16.msra.mxu1 %v8740_v42  ;;  %v8829_v22 = vld [vmem:[%s9838_s4 + $0xc04] ss:$16 sps:$4 sm:$0xff]   ;;  %v8832_v42 = vld [vmem:[%s9838_s4 + $0xc0c] ss:$16 sps:$4 sm:$0xff]  }
 0x18b   : > { %6047 = vmatprep.subr.bf16.mxu0 %v8745_v43  ;;  %6621 = vmatprep.subr.bf16.mxu1 %v8748_v45  ;;  %v1224_v43 = vcombine.high %v10306_v39, %v10306_v39  ;;  %v1253_v45 = vcombine.high %v10238_v14, %v10238_v14  ;;  %v8833_v14 = vld [vmem:[%s9838_s4 + $0xc20] ss:$16 sps:$4 sm:$0xff]  }
 0x18e   : > { %6048 = vmatpush1.bf16.msra.mxu0 %v8743_v36  ;;  %6622 = vmatpush1.bf16.msra.mxu1 %v8746_v46  ;;  %v8827_v36 = vld [vmem:[%s9838_s4 + $0xc00] ss:$16 sps:$4 sm:$0xff]   ;;  %v8830_v46 = vld [vmem:[%s9838_s4 + $0xc08] ss:$16 sps:$4 sm:$0xff]  }
 0x18f   : > { %6049 = vmatprep.subr.bf16.mxu0 %v8751_v47  ;;  %6623 = vmatprep.subr.bf16.mxu1 %v8754_v48  ;;  %v8835_v47 = vld [vmem:[%s9838_s4 + $0xc24] ss:$16 sps:$4 sm:$0xff]   ;;  %v8838_v48 = vld [vmem:[%s9838_s4 + $0xc2c] ss:$16 sps:$4 sm:$0xff]  }
 0x192   : > { %6050 = vmatpush1.bf16.msra.mxu0 %v8749_v49  ;;  %6624 = vmatpush1.bf16.msra.mxu1 %v8752_v51  ;;  %v10321_v49 = vrot.slane %v1224_v43, %v9911_v50  ;;  %v8836_v51 = vld [vmem:[%s9838_s4 + $0xc28] ss:$16 sps:$4 sm:$0xff]   ;;  %v8919_v43 = vld [vmem:[%s9838_s4 + $0xde4] ss:$16 sps:$4 sm:$0xff]  }
 0x193   : > { %6051 = vmatprep.subr.bf16.mxu0 %v8757_v52  ;;  %6625 = vmatprep.subr.bf16.mxu1 %v8760_v54  ;;  %v8841_v52 = vld [vmem:[%s9838_s4 + $0xc44] ss:$16 sps:$4 sm:$0xff]   ;;  %v8844_v54 = vld [vmem:[%s9838_s4 + $0xc4c] ss:$16 sps:$4 sm:$0xff]  }
 0x196   : > { %6052 = vmatpush1.bf16.msra.mxu0 %v8755_v55  ;;  %6626 = vmatpush1.bf16.msra.mxu1 %v8758_v56  ;;  %v8839_v55 = vld [vmem:[%s9838_s4 + $0xc40] ss:$16 sps:$4 sm:$0xff]   ;;  %v8842_v56 = vld [vmem:[%s9838_s4 + $0xc48] ss:$16 sps:$4 sm:$0xff]  }
 0x197   : > { %6053 = vmatprep.subr.bf16.mxu0 %v8763_v57  ;;  %6627 = vmatprep.subr.bf16.mxu1 %v8766_v58  ;;  %v8847_v57 = vld [vmem:[%s9838_s4 + $0xc64] ss:$16 sps:$4 sm:$0xff]   ;;  %v8850_v58 = vld [vmem:[%s9838_s4 + $0xc6c] ss:$16 sps:$4 sm:$0xff]  }
 0x19a   : > { %6054 = vmatpush1.bf16.msra.mxu0 %v8761_v59  ;;  %6628 = vmatpush1.bf16.msra.mxu1 %v8764_v60  ;;  %v8845_v59 = vld [vmem:[%s9838_s4 + $0xc60] ss:$16 sps:$4 sm:$0xff]   ;;  %v8848_v60 = vld [vmem:[%s9838_s4 + $0xc68] ss:$16 sps:$4 sm:$0xff]  }
 0x19b   : > { %6055 = vmatprep.subr.bf16.mxu0 %v8769_v61  ;;  %6629 = vmatprep.subr.bf16.mxu1 %v8772_v62  ;;  %v8853_v61 = vld [vmem:[%s9838_s4 + $0xc84] ss:$16 sps:$4 sm:$0xff]   ;;  %v8856_v62 = vld [vmem:[%s9838_s4 + $0xc8c] ss:$16 sps:$4 sm:$0xff]  }
 0x19e   : > { %6056 = vmatpush1.bf16.msra.mxu0 %v8767_v63  ;;  %6630 = vmatpush1.bf16.msra.mxu1 %v8770_v0  ;;  %v8851_v63 = vld [vmem:[%s9838_s4 + $0xc80] ss:$16 sps:$4 sm:$0xff]   ;;  %v8854_v0 = vld [vmem:[%s9838_s4 + $0xc88] ss:$16 sps:$4 sm:$0xff]  }
 0x19f   : > { %6057 = vmatprep.subr.bf16.mxu0 %v8775_v1  ;;  %6631 = vmatprep.subr.bf16.mxu1 %v8778_v2  ;;  %v8859_v1 = vld [vmem:[%s9838_s4 + $0xca4] ss:$16 sps:$4 sm:$0xff]   ;;  %v8862_v2 = vld [vmem:[%s9838_s4 + $0xcac] ss:$16 sps:$4 sm:$0xff]  }
 0x1a2   : > { %6058 = vmatpush1.bf16.msra.mxu0 %v8773_v3  ;;  %6632 = vmatpush1.bf16.msra.mxu1 %v8776_v4  ;;  %v8857_v3 = vld [vmem:[%s9838_s4 + $0xca0] ss:$16 sps:$4 sm:$0xff]   ;;  %v8860_v4 = vld [vmem:[%s9838_s4 + $0xca8] ss:$16 sps:$4 sm:$0xff]  }
 0x1a3   : > { %6059 = vmatprep.subr.bf16.mxu0 %v8781_v5  ;;  %6633 = vmatprep.subr.bf16.mxu1 %v8784_v6  ;;  %v8865_v5 = vld [vmem:[%s9838_s4 + $0xcc4] ss:$16 sps:$4 sm:$0xff]   ;;  %v8868_v6 = vld [vmem:[%s9838_s4 + $0xccc] ss:$16 sps:$4 sm:$0xff]  }
 0x1a6   : > { %6060 = vmatpush1.bf16.msra.mxu0 %v8779_v7  ;;  %6634 = vmatpush1.bf16.msra.mxu1 %v8782_v8  ;;  %v8863_v7 = vld [vmem:[%s9838_s4 + $0xcc0] ss:$16 sps:$4 sm:$0xff]   ;;  %v8866_v8 = vld [vmem:[%s9838_s4 + $0xcc8] ss:$16 sps:$4 sm:$0xff]  }
 0x1a7   : > { %6061 = vmatprep.subr.bf16.mxu0 %v8787_v9  ;;  %6635 = vmatprep.subr.bf16.mxu1 %v8790_v10  ;;  %v8871_v9 = vld [vmem:[%s9838_s4 + $0xce4] ss:$16 sps:$4 sm:$0xff]   ;;  %v8874_v10 = vld [vmem:[%s9838_s4 + $0xcec] ss:$16 sps:$4 sm:$0xff]  }
 0x1aa   : > { %6062 = vmatpush1.bf16.msra.mxu0 %v8785_v11  ;;  %6636 = vmatpush1.bf16.msra.mxu1 %v8788_v12  ;;  %v8869_v11 = vld [vmem:[%s9838_s4 + $0xce0] ss:$16 sps:$4 sm:$0xff]   ;;  %v8872_v12 = vld [vmem:[%s9838_s4 + $0xce8] ss:$16 sps:$4 sm:$0xff]  }
 0x1ab   : > { %6063 = vmatprep.subr.bf16.mxu0 %v8793_v13  ;;  %6637 = vmatprep.subr.bf16.mxu1 %v8796_v15  ;;  %v8877_v13 = vld [vmem:[%s9838_s4 + $0xd04] ss:$16 sps:$4 sm:$0xff]   ;;  %v8880_v15 = vld [vmem:[%s9838_s4 + $0xd0c] ss:$16 sps:$4 sm:$0xff]  }
 0x1ae   : > { %6064 = vmatpush1.bf16.msra.mxu0 %v8791_v17  ;;  %6638 = vmatpush1.bf16.msra.mxu1 %v8794_v53  ;;  %v8875_v17 = vld [vmem:[%s9838_s4 + $0xd00] ss:$16 sps:$4 sm:$0xff]   ;;  %v8878_v53 = vld [vmem:[%s9838_s4 + $0xd08] ss:$16 sps:$4 sm:$0xff]  }
 0x1af   : > { %6065 = vmatprep.subr.bf16.mxu0 %v8799_v18  ;;  %6639 = vmatprep.subr.bf16.mxu1 %v8802_v19  ;;  %v8883_v18 = vld [vmem:[%s9838_s4 + $0xd24] ss:$16 sps:$4 sm:$0xff]   ;;  %v8886_v19 = vld [vmem:[%s9838_s4 + $0xd2c] ss:$16 sps:$4 sm:$0xff]  }
 0x1b2   : > { %6066 = vmatpush1.bf16.msra.mxu0 %v8797_v20  ;;  %6640 = vmatpush1.bf16.msra.mxu1 %v8800_v21  ;;  %v8881_v20 = vld [vmem:[%s9838_s4 + $0xd20] ss:$16 sps:$4 sm:$0xff]   ;;  %v8884_v21 = vld [vmem:[%s9838_s4 + $0xd28] ss:$16 sps:$4 sm:$0xff]  }
 0x1b3   : > { %6067 = vmatprep.subr.bf16.mxu0 %v8805_v23  ;;  %6641 = vmatprep.subr.bf16.mxu1 %v8808_v24  ;;  %v8889_v23 = vld [vmem:[%s9838_s4 + $0xd44] ss:$16 sps:$4 sm:$0xff]   ;;  %v8892_v24 = vld [vmem:[%s9838_s4 + $0xd4c] ss:$16 sps:$4 sm:$0xff]  }
 0x1b6   : > { %6068 = vmatpush1.bf16.msra.mxu0 %v8803_v25  ;;  %6642 = vmatpush1.bf16.msra.mxu1 %v8806_v27  ;;  %v8887_v25 = vld [vmem:[%s9838_s4 + $0xd40] ss:$16 sps:$4 sm:$0xff]   ;;  %v8890_v27 = vld [vmem:[%s9838_s4 + $0xd48] ss:$16 sps:$4 sm:$0xff]  }
 0x1b7   : > { %6069 = vmatprep.subr.bf16.mxu0 %v8811_v28  ;;  %6643 = vmatprep.subr.bf16.mxu1 %v8814_v29  ;;  %v8895_v28 = vld [vmem:[%s9838_s4 + $0xd64] ss:$16 sps:$4 sm:$0xff]   ;;  %v8898_v29 = vld [vmem:[%s9838_s4 + $0xd6c] ss:$16 sps:$4 sm:$0xff]  }
 0x1ba   : > { %6070 = vmatpush1.bf16.msra.mxu0 %v8809_v30  ;;  %6644 = vmatpush1.bf16.msra.mxu1 %v8812_v31  ;;  %v8893_v30 = vld [vmem:[%s9838_s4 + $0xd60] ss:$16 sps:$4 sm:$0xff]   ;;  %v8896_v31 = vld [vmem:[%s9838_s4 + $0xd68] ss:$16 sps:$4 sm:$0xff]  }
 0x1bb   : > { %6071 = vmatprep.subr.bf16.mxu0 %v8817_v16  ;;  %6645 = vmatprep.subr.bf16.mxu1 %v8820_v32  ;;  %v8901_v16 = vld [vmem:[%s9838_s4 + $0xd84] ss:$16 sps:$4 sm:$0xff]   ;;  %v8904_v32 = vld [vmem:[%s9838_s4 + $0xd8c] ss:$16 sps:$4 sm:$0xff]  }
 0x1be   : > { %6072 = vmatpush1.bf16.msra.mxu0 %v8815_v26  ;;  %6646 = vmatpush1.bf16.msra.mxu1 %v8818_v35  ;;  %v8907_v26 = vld [vmem:[%s9838_s4 + $0xda4] ss:$16 sps:$4 sm:$0xff]   ;;  %v8910_v35 = vld [vmem:[%s9838_s4 + $0xdac] ss:$16 sps:$4 sm:$0xff]  }
 0x1bf   : > { %6073 = vmatprep.subr.bf16.mxu0 %v8823_v37  ;;  %6647 = vmatprep.subr.bf16.mxu1 %v8826_v38  ;;  %v8905_v37 = vld [vmem:[%s9838_s4 + $0xda0] ss:$16 sps:$4 sm:$0xff]   ;;  %v8908_v38 = vld [vmem:[%s9838_s4 + $0xda8] ss:$16 sps:$4 sm:$0xff]  }
 0x1c2   : > { %6074 = vmatpush1.bf16.msra.mxu0 %v8821_v40  ;;  %6648 = vmatpush1.bf16.msra.mxu1 %v8824_v41  ;;  %v8913_v40 = vld [vmem:[%s9838_s4 + $0xdc4] ss:$16 sps:$4 sm:$0xff]   ;;  %v8916_v41 = vld [vmem:[%s9838_s4 + $0xdcc] ss:$16 sps:$4 sm:$0xff]  }
 0x1c3   : > { %6084 = vmatprep.subr.bf16.mxu0 %v8829_v22  ;;  %6658 = vmatprep.subr.bf16.mxu1 %v8832_v42  ;;  %v8911_v22 = vld [vmem:[%s9838_s4 + $0xdc0] ss:$16 sps:$4 sm:$0xff]   ;;  %v8914_v42 = vld [vmem:[%s9838_s4 + $0xdc8] ss:$16 sps:$4 sm:$0xff]  }
 0x1c5   : > { %6076 = vmatmul.mubr.bf16.vlgmr.msra.gmra.mrb[0].mxu0 %v1253_v45  ;;  %6650 = vmatmul.mubr.bf16.vlgmr.msra.gmra.mrb[0].mxu1 %v1253_v45  ;;  %v8922_v45 = vld [vmem:[%s9838_s4 + $0xdec] ss:$16 sps:$4 sm:$0xff]  }
 0x1c6   : > { %6085 = vmatpush1.bf16.msra.mxu0 %v8827_v36  ;;  %6659 = vmatpush1.bf16.msra.mxu1 %v8830_v46  ;;  %v8917_v36 = vld [vmem:[%s9838_s4 + $0xde0] ss:$16 sps:$4 sm:$0xff]   ;;  %v8920_v46 = vld [vmem:[%s9838_s4 + $0xde8] ss:$16 sps:$4 sm:$0xff]  }
 0x1c7   : > { %6086 = vmatprep.subr.bf16.mxu0 %v8835_v47  ;;  %6660 = vmatprep.subr.bf16.mxu1 %v8838_v48  ;;  %v8926_v47 = vld [vmem:[%s9838_s4 + $0xe04] ss:$16 sps:$4 sm:$0xff]   ;;  %v8929_v48 = vld [vmem:[%s9838_s4 + $0xe0c] ss:$16 sps:$4 sm:$0xff]  }
 0x1c8   : > { %6116 = vmatprep.mubr.bf16.mxu0 %v10321_v49  ;;  %6690 = vmatprep.mubr.bf16.mxu1 %v10321_v49 }
 0x1ca   : > { %6087 = vmatpush1.bf16.msra.mxu0 %v8833_v14  ;;  %6661 = vmatpush1.bf16.msra.mxu1 %v8836_v51  ;;  %v10387_v14 = vrot.slane %v10306_v39, %v9911_v50  ;;  %v8924_v51 = vld [vmem:[%s9838_s4 + $0xe00] ss:$16 sps:$4 sm:$0xff]  }
 0x1cb   : > { %6088 = vmatprep.subr.bf16.mxu0 %v8841_v52  ;;  %6662 = vmatprep.subr.bf16.mxu1 %v8844_v54  ;;  %v8927_v52 = vld [vmem:[%s9838_s4 + $0xe08] ss:$16 sps:$4 sm:$0xff]   ;;  %v8932_v54 = vld [vmem:[%s9838_s4 + $0xe24] ss:$16 sps:$4 sm:$0xff]   ;;  %v8930_v39 = vld [vmem:[%s9838_s4 + $0xe20] ss:$16 sps:$4 sm:$0xff]  }
 0x1ce   : > { %6089 = vmatpush1.bf16.msra.mxu0 %v8839_v55  ;;  %6663 = vmatpush1.bf16.msra.mxu1 %v8842_v56  ;;  %v8935_v55 = vld [vmem:[%s9838_s4 + $0xe2c] ss:$16 sps:$4 sm:$0xff]   ;;  %v1256_v56 = vcombine.high %v10321_v49, %v10321_v49  ;;  %v8936_v49 = vld [vmem:[%s9838_s4 + $0xe40] ss:$16 sps:$4 sm:$0xff]  }
 0x1cf   : > { %6090 = vmatprep.subr.bf16.mxu0 %v8847_v57  ;;  %6664 = vmatprep.subr.bf16.mxu1 %v8850_v58  ;;  %v8933_v57 = vld [vmem:[%s9838_s4 + $0xe28] ss:$16 sps:$4 sm:$0xff]   ;;  %v8938_v58 = vld [vmem:[%s9838_s4 + $0xe44] ss:$16 sps:$4 sm:$0xff]  }
 0x1d2   : > { %6091 = vmatpush1.bf16.msra.mxu0 %v8845_v59  ;;  %6665 = vmatpush1.bf16.msra.mxu1 %v8848_v60  ;;  %v8941_v59 = vld [vmem:[%s9838_s4 + $0xe4c] ss:$16 sps:$4 sm:$0xff]   ;;  %v8939_v60 = vld [vmem:[%s9838_s4 + $0xe48] ss:$16 sps:$4 sm:$0xff]  }
 0x1d3   : > { %6092 = vmatprep.subr.bf16.mxu0 %v8853_v61  ;;  %6666 = vmatprep.subr.bf16.mxu1 %v8856_v62  ;;  %v8944_v61 = vld [vmem:[%s9838_s4 + $0xe64] ss:$16 sps:$4 sm:$0xff]   ;;  %v8947_v62 = vld [vmem:[%s9838_s4 + $0xe6c] ss:$16 sps:$4 sm:$0xff]  }
 0x1d6   : > { %6093 = vmatpush1.bf16.msra.mxu0 %v8851_v63  ;;  %6667 = vmatpush1.bf16.msra.mxu1 %v8854_v0  ;;  %v8942_v63 = vld [vmem:[%s9838_s4 + $0xe60] ss:$16 sps:$4 sm:$0xff]   ;;  %v8945_v0 = vld [vmem:[%s9838_s4 + $0xe68] ss:$16 sps:$4 sm:$0xff]  }
 0x1d7   : > { %6094 = vmatprep.subr.bf16.mxu0 %v8859_v1  ;;  %6668 = vmatprep.subr.bf16.mxu1 %v8862_v2  ;;  %v8950_v1 = vld [vmem:[%s9838_s4 + $0xe84] ss:$16 sps:$4 sm:$0xff]   ;;  %v8953_v2 = vld [vmem:[%s9838_s4 + $0xe8c] ss:$16 sps:$4 sm:$0xff]  }
 0x1da   : > { %6095 = vmatpush1.bf16.msra.mxu0 %v8857_v3  ;;  %6669 = vmatpush1.bf16.msra.mxu1 %v8860_v4  ;;  %v8948_v3 = vld [vmem:[%s9838_s4 + $0xe80] ss:$16 sps:$4 sm:$0xff]   ;;  %v8951_v4 = vld [vmem:[%s9838_s4 + $0xe88] ss:$16 sps:$4 sm:$0xff]  }
 0x1db   : > { %6096 = vmatprep.subr.bf16.mxu0 %v8865_v5  ;;  %6670 = vmatprep.subr.bf16.mxu1 %v8868_v6  ;;  %v8956_v5 = vld [vmem:[%s9838_s4 + $0xea4] ss:$16 sps:$4 sm:$0xff]   ;;  %v8959_v6 = vld [vmem:[%s9838_s4 + $0xeac] ss:$16 sps:$4 sm:$0xff]  }
 0x1de   : > { %6097 = vmatpush1.bf16.msra.mxu0 %v8863_v7  ;;  %6671 = vmatpush1.bf16.msra.mxu1 %v8866_v8  ;;  %v8954_v7 = vld [vmem:[%s9838_s4 + $0xea0] ss:$16 sps:$4 sm:$0xff]   ;;  %v8957_v8 = vld [vmem:[%s9838_s4 + $0xea8] ss:$16 sps:$4 sm:$0xff]  }
 0x1df   : > { %6098 = vmatprep.subr.bf16.mxu0 %v8871_v9  ;;  %6672 = vmatprep.subr.bf16.mxu1 %v8874_v10  ;;  %v8962_v9 = vld [vmem:[%s9838_s4 + $0xec4] ss:$16 sps:$4 sm:$0xff]   ;;  %v8965_v10 = vld [vmem:[%s9838_s4 + $0xecc] ss:$16 sps:$4 sm:$0xff]  }
 0x1e2   : > { %6099 = vmatpush1.bf16.msra.mxu0 %v8869_v11  ;;  %6673 = vmatpush1.bf16.msra.mxu1 %v8872_v12  ;;  %v8960_v11 = vld [vmem:[%s9838_s4 + $0xec0] ss:$16 sps:$4 sm:$0xff]   ;;  %v8963_v12 = vld [vmem:[%s9838_s4 + $0xec8] ss:$16 sps:$4 sm:$0xff]  }
 0x1e3   : > { %6100 = vmatprep.subr.bf16.mxu0 %v8877_v13  ;;  %6674 = vmatprep.subr.bf16.mxu1 %v8880_v15  ;;  %v8968_v13 = vld [vmem:[%s9838_s4 + $0xee4] ss:$16 sps:$4 sm:$0xff]   ;;  %v8971_v15 = vld [vmem:[%s9838_s4 + $0xeec] ss:$16 sps:$4 sm:$0xff]  }
 0x1e6   : > { %6101 = vmatpush1.bf16.msra.mxu0 %v8875_v17  ;;  %6675 = vmatpush1.bf16.msra.mxu1 %v8878_v53  ;;  %v8966_v17 = vld [vmem:[%s9838_s4 + $0xee0] ss:$16 sps:$4 sm:$0xff]   ;;  %v8969_v53 = vld [vmem:[%s9838_s4 + $0xee8] ss:$16 sps:$4 sm:$0xff]  }
 0x1e7   : > { %6102 = vmatprep.subr.bf16.mxu0 %v8883_v18  ;;  %6676 = vmatprep.subr.bf16.mxu1 %v8886_v19  ;;  %v8974_v18 = vld [vmem:[%s9838_s4 + $0xf04] ss:$16 sps:$4 sm:$0xff]   ;;  %v8977_v19 = vld [vmem:[%s9838_s4 + $0xf0c] ss:$16 sps:$4 sm:$0xff]  }
 0x1ea   : > { %6103 = vmatpush1.bf16.msra.mxu0 %v8881_v20  ;;  %6677 = vmatpush1.bf16.msra.mxu1 %v8884_v21  ;;  %v8972_v20 = vld [vmem:[%s9838_s4 + $0xf00] ss:$16 sps:$4 sm:$0xff]   ;;  %v8975_v21 = vld [vmem:[%s9838_s4 + $0xf08] ss:$16 sps:$4 sm:$0xff]  }
 0x1eb   : > { %6104 = vmatprep.subr.bf16.mxu0 %v8889_v23  ;;  %6678 = vmatprep.subr.bf16.mxu1 %v8892_v24  ;;  %v8980_v23 = vld [vmem:[%s9838_s4 + $0xf24] ss:$16 sps:$4 sm:$0xff]   ;;  %v8983_v24 = vld [vmem:[%s9838_s4 + $0xf2c] ss:$16 sps:$4 sm:$0xff]  }
 0x1ee   : > { %6105 = vmatpush1.bf16.msra.mxu0 %v8887_v25  ;;  %6679 = vmatpush1.bf16.msra.mxu1 %v8890_v27  ;;  %v8978_v25 = vld [vmem:[%s9838_s4 + $0xf20] ss:$16 sps:$4 sm:$0xff]   ;;  %v8981_v27 = vld [vmem:[%s9838_s4 + $0xf28] ss:$16 sps:$4 sm:$0xff]  }
 0x1ef   : > { %6106 = vmatprep.subr.bf16.mxu0 %v8895_v28  ;;  %6680 = vmatprep.subr.bf16.mxu1 %v8898_v29  ;;  %v8986_v28 = vld [vmem:[%s9838_s4 + $0xf44] ss:$16 sps:$4 sm:$0xff]   ;;  %v8989_v29 = vld [vmem:[%s9838_s4 + $0xf4c] ss:$16 sps:$4 sm:$0xff]  }
 0x1f2   : > { %6107 = vmatpush1.bf16.msra.mxu0 %v8893_v30  ;;  %6681 = vmatpush1.bf16.msra.mxu1 %v8896_v31  ;;  %v8984_v30 = vld [vmem:[%s9838_s4 + $0xf40] ss:$16 sps:$4 sm:$0xff]   ;;  %v8987_v31 = vld [vmem:[%s9838_s4 + $0xf48] ss:$16 sps:$4 sm:$0xff]  }
 0x1f3   : > { %6108 = vmatprep.subr.bf16.mxu0 %v8901_v16  ;;  %6682 = vmatprep.subr.bf16.mxu1 %v8904_v32  ;;  %v8992_v16 = vld [vmem:[%s9838_s4 + $0xf64] ss:$16 sps:$4 sm:$0xff]   ;;  %v8995_v32 = vld [vmem:[%s9838_s4 + $0xf6c] ss:$16 sps:$4 sm:$0xff]  }
 0x1f6   : > { %6109 = vmatpush1.bf16.msra.mxu0 %v8899_v33  ;;  %6683 = vmatpush1.bf16.msra.mxu1 %v8902_v34  ;;  %v8990_v33 = vld [vmem:[%s9838_s4 + $0xf60] ss:$16 sps:$4 sm:$0xff]   ;;  %v8993_v34 = vld [vmem:[%s9838_s4 + $0xf68] ss:$16 sps:$4 sm:$0xff]  }
 0x1f7   : > { %6110 = vmatprep.subr.bf16.mxu0 %v8907_v26  ;;  %6684 = vmatprep.subr.bf16.mxu1 %v8910_v35  ;;  %v8998_v26 = vld [vmem:[%s9838_s4 + $0xf84] ss:$16 sps:$4 sm:$0xff]   ;;  %v9001_v35 = vld [vmem:[%s9838_s4 + $0xf8c] ss:$16 sps:$4 sm:$0xff]  }
 0x1fa   : > { %6111 = vmatpush1.bf16.msra.mxu0 %v8905_v37  ;;  %6685 = vmatpush1.bf16.msra.mxu1 %v8908_v38  ;;  %v8996_v37 = vld [vmem:[%s9838_s4 + $0xf80] ss:$16 sps:$4 sm:$0xff]   ;;  %v8999_v38 = vld [vmem:[%s9838_s4 + $0xf88] ss:$16 sps:$4 sm:$0xff]  }
 0x1fb   : > { %6112 = vmatprep.subr.bf16.mxu0 %v8913_v40  ;;  %6686 = vmatprep.subr.bf16.mxu1 %v8916_v41  ;;  %v9004_v40 = vld [vmem:[%s9838_s4 + $0xfa4] ss:$16 sps:$4 sm:$0xff]   ;;  %v9007_v41 = vld [vmem:[%s9838_s4 + $0xfac] ss:$16 sps:$4 sm:$0xff]  }
 0x1fe   : > { %6113 = vmatpush1.bf16.msra.mxu0 %v8911_v22  ;;  %6687 = vmatpush1.bf16.msra.mxu1 %v8914_v42  ;;  %v9002_v22 = vld [vmem:[%s9838_s4 + $0xfa0] ss:$16 sps:$4 sm:$0xff]   ;;  %v9005_v42 = vld [vmem:[%s9838_s4 + $0xfa8] ss:$16 sps:$4 sm:$0xff]  }
 0x1ff   : > { %6114 = vmatprep.subr.bf16.mxu0 %v8919_v43  ;;  %6688 = vmatprep.subr.bf16.mxu1 %v8922_v45  ;;  %v9010_v43 = vld [vmem:[%s9838_s4 + $0xfc4] ss:$16 sps:$4 sm:$0xff]   ;;  %v9013_v45 = vld [vmem:[%s9838_s4 + $0xfcc] ss:$16 sps:$4 sm:$0xff]  }
 0x202   : > { %6115 = vmatpush1.bf16.msra.mxu0 %v8917_v36  ;;  %6689 = vmatpush1.bf16.msra.mxu1 %v8920_v46  ;;  %v10450_v36 = vld [vmem:[%s9856_s26 + $0x10] sm:$0xff]  ;;  %v9008_v46 = vld [vmem:[%s9838_s4 + $0xfc0] ss:$16 sps:$4 sm:$0xff]  }
 0x203   : > { %6125 = vmatprep.subr.bf16.mxu0 %v8926_v47  ;;  %6699 = vmatprep.subr.bf16.mxu1 %v8929_v48  ;;  %v9011_v47 = vld [vmem:[%s9838_s4 + $0xfc8] ss:$16 sps:$4 sm:$0xff]   ;;  %v9016_v48 = vld [vmem:[%s9838_s4 + $0xfe4] ss:$16 sps:$4 sm:$0xff]  }
 0x205   : > { %6117 = vmatmul.mubr.bf16.vlgmr.msra.gmra.mrb[0].mxu0 %v10387_v14  ;;  %6691 = vmatmul.mubr.bf16.vlgmr.msra.gmra.mrb[0].mxu1 %v10387_v14 }
 0x206   : > { %6126 = vmatpush1.bf16.msra.mxu0 %v8924_v51  ;;  %6700 = vmatpush1.bf16.msra.mxu1 %v8927_v52  ;;  %v9019_v51 = vld [vmem:[%s9838_s4 + $0xfec] ss:$16 sps:$4 sm:$0xff]   ;;  %v10458_v52 = vrot.slane %v10450_v36, %v9911_v50 }
 0x207   : > { %6127 = vmatprep.subr.bf16.mxu0 %v8932_v54  ;;  %6701 = vmatprep.subr.bf16.mxu1 %v8935_v55  ;;  %v9014_v54 = vld [vmem:[%s9838_s4 + $0xfe0] ss:$16 sps:$4 sm:$0xff]   ;;  %v9017_v55 = vld [vmem:[%s9838_s4 + $0xfe8] ss:$16 sps:$4 sm:$0xff]  }
 0x208   : > { %6157 = vmatprep.mubr.bf16.mxu0 %v1256_v56  ;;  %6731 = vmatprep.mubr.bf16.mxu1 %v1256_v56  ;;  %v9022_v56 = vld [vmem:[%s9838_s4 + $0x1004] ss:$16 sps:$4 sm:$0xff]  }
 0x20a   : > { %6128 = vmatpush1.bf16.msra.mxu0 %v8930_v39  ;;  %6702 = vmatpush1.bf16.msra.mxu1 %v8933_v57  ;;  %v9025_v39 = vld [vmem:[%s9838_s4 + $0x100c] ss:$16 sps:$4 sm:$0xff]   ;;  %v1272_v57 = vcombine.high %v10458_v52, %v10458_v52 }
 0x20b   : > { %6129 = vmatprep.subr.bf16.mxu0 %v8938_v58  ;;  %6703 = vmatprep.subr.bf16.mxu1 %v8941_v59  ;;  %v1254_v58 = vcombine.high %v10387_v14, %v10387_v14  ;;  %v9020_v59 = vld [vmem:[%s9838_s4 + $0x1000] ss:$16 sps:$4 sm:$0xff]  }
 0x20c   : > { %v9026_v14 = vld [vmem:[%s9838_s4 + $0x1020] ss:$16 sps:$4 sm:$0xff]  }
 0x20e   : > { %6130 = vmatpush1.bf16.msra.mxu0 %v8936_v49  ;;  %6704 = vmatpush1.bf16.msra.mxu1 %v8939_v60  ;;  %v9023_v49 = vld [vmem:[%s9838_s4 + $0x1008] ss:$16 sps:$4 sm:$0xff]   ;;  %v9028_v60 = vld [vmem:[%s9838_s4 + $0x1024] ss:$16 sps:$4 sm:$0xff]  }
 0x20f   : > { %6131 = vmatprep.subr.bf16.mxu0 %v8944_v61  ;;  %6705 = vmatprep.subr.bf16.mxu1 %v8947_v62  ;;  %v9031_v61 = vld [vmem:[%s9838_s4 + $0x102c] ss:$16 sps:$4 sm:$0xff]   ;;  %v10473_v62 = vrot.slane %v1272_v57, %v9911_v50  ;;  %v9107_v57 = vld [vmem:[%s9838_s4 + $0x11c8] ss:$16 sps:$4 sm:$0xff]  }
 0x212   : > { %6132 = vmatpush1.bf16.msra.mxu0 %v8942_v63  ;;  %6706 = vmatpush1.bf16.msra.mxu1 %v8945_v0  ;;  %v9029_v63 = vld [vmem:[%s9838_s4 + $0x1028] ss:$16 sps:$4 sm:$0xff]   ;;  %v9034_v0 = vld [vmem:[%s9838_s4 + $0x1044] ss:$16 sps:$4 sm:$0xff]  }
 0x213   : > { %6133 = vmatprep.subr.bf16.mxu0 %v8950_v1  ;;  %6707 = vmatprep.subr.bf16.mxu1 %v8953_v2  ;;  %v9037_v1 = vld [vmem:[%s9838_s4 + $0x104c] ss:$16 sps:$4 sm:$0xff]   ;;  %v9032_v2 = vld [vmem:[%s9838_s4 + $0x1040] ss:$16 sps:$4 sm:$0xff]  }
 0x216   : > { %6134 = vmatpush1.bf16.msra.mxu0 %v8948_v3  ;;  %6708 = vmatpush1.bf16.msra.mxu1 %v8951_v4  ;;  %v9035_v3 = vld [vmem:[%s9838_s4 + $0x1048] ss:$16 sps:$4 sm:$0xff]   ;;  %v9040_v4 = vld [vmem:[%s9838_s4 + $0x1064] ss:$16 sps:$4 sm:$0xff]  }
 0x217   : > { %6135 = vmatprep.subr.bf16.mxu0 %v8956_v5  ;;  %6709 = vmatprep.subr.bf16.mxu1 %v8959_v6  ;;  %v9043_v5 = vld [vmem:[%s9838_s4 + $0x106c] ss:$16 sps:$4 sm:$0xff]   ;;  %v9038_v6 = vld [vmem:[%s9838_s4 + $0x1060] ss:$16 sps:$4 sm:$0xff]  }
 0x21a   : > { %6136 = vmatpush1.bf16.msra.mxu0 %v8954_v7  ;;  %6710 = vmatpush1.bf16.msra.mxu1 %v8957_v8  ;;  %v9041_v7 = vld [vmem:[%s9838_s4 + $0x1068] ss:$16 sps:$4 sm:$0xff]   ;;  %v9046_v8 = vld [vmem:[%s9838_s4 + $0x1084] ss:$16 sps:$4 sm:$0xff]  }
 0x21b   : > { %6137 = vmatprep.subr.bf16.mxu0 %v8962_v9  ;;  %6711 = vmatprep.subr.bf16.mxu1 %v8965_v10  ;;  %v9049_v9 = vld [vmem:[%s9838_s4 + $0x108c] ss:$16 sps:$4 sm:$0xff]   ;;  %v9044_v10 = vld [vmem:[%s9838_s4 + $0x1080] ss:$16 sps:$4 sm:$0xff]  }
 0x21e   : > { %6138 = vmatpush1.bf16.msra.mxu0 %v8960_v11  ;;  %6712 = vmatpush1.bf16.msra.mxu1 %v8963_v12  ;;  %v9047_v11 = vld [vmem:[%s9838_s4 + $0x1088] ss:$16 sps:$4 sm:$0xff]   ;;  %v9052_v12 = vld [vmem:[%s9838_s4 + $0x10a4] ss:$16 sps:$4 sm:$0xff]  }
 0x21f   : > { %6139 = vmatprep.subr.bf16.mxu0 %v8968_v13  ;;  %6713 = vmatprep.subr.bf16.mxu1 %v8971_v15  ;;  %v9055_v13 = vld [vmem:[%s9838_s4 + $0x10ac] ss:$16 sps:$4 sm:$0xff]   ;;  %v9050_v15 = vld [vmem:[%s9838_s4 + $0x10a0] ss:$16 sps:$4 sm:$0xff]  }
 0x222   : > { %6140 = vmatpush1.bf16.msra.mxu0 %v8966_v17  ;;  %6714 = vmatpush1.bf16.msra.mxu1 %v8969_v53  ;;  %v9053_v17 = vld [vmem:[%s9838_s4 + $0x10a8] ss:$16 sps:$4 sm:$0xff]   ;;  %v9058_v53 = vld [vmem:[%s9838_s4 + $0x10c4] ss:$16 sps:$4 sm:$0xff]  }
 0x223   : > { %6141 = vmatprep.subr.bf16.mxu0 %v8974_v18  ;;  %6715 = vmatprep.subr.bf16.mxu1 %v8977_v19  ;;  %v9061_v18 = vld [vmem:[%s9838_s4 + $0x10cc] ss:$16 sps:$4 sm:$0xff]   ;;  %v9056_v19 = vld [vmem:[%s9838_s4 + $0x10c0] ss:$16 sps:$4 sm:$0xff]  }
 0x226   : > { %6142 = vmatpush1.bf16.msra.mxu0 %v8972_v20  ;;  %6716 = vmatpush1.bf16.msra.mxu1 %v8975_v21  ;;  %v9059_v20 = vld [vmem:[%s9838_s4 + $0x10c8] ss:$16 sps:$4 sm:$0xff]   ;;  %v9064_v21 = vld [vmem:[%s9838_s4 + $0x10e4] ss:$16 sps:$4 sm:$0xff]  }
 0x227   : > { %6143 = vmatprep.subr.bf16.mxu0 %v8980_v23  ;;  %6717 = vmatprep.subr.bf16.mxu1 %v8983_v24  ;;  %v9067_v23 = vld [vmem:[%s9838_s4 + $0x10ec] ss:$16 sps:$4 sm:$0xff]   ;;  %v9062_v24 = vld [vmem:[%s9838_s4 + $0x10e0] ss:$16 sps:$4 sm:$0xff]  }
 0x22a   : > { %6144 = vmatpush1.bf16.msra.mxu0 %v8978_v25  ;;  %6718 = vmatpush1.bf16.msra.mxu1 %v8981_v27  ;;  %v9065_v25 = vld [vmem:[%s9838_s4 + $0x10e8] ss:$16 sps:$4 sm:$0xff]   ;;  %v9070_v27 = vld [vmem:[%s9838_s4 + $0x1104] ss:$16 sps:$4 sm:$0xff]  }
 0x22b   : > { %6145 = vmatprep.subr.bf16.mxu0 %v8986_v28  ;;  %6719 = vmatprep.subr.bf16.mxu1 %v8989_v29  ;;  %v9073_v28 = vld [vmem:[%s9838_s4 + $0x110c] ss:$16 sps:$4 sm:$0xff]   ;;  %v9068_v29 = vld [vmem:[%s9838_s4 + $0x1100] ss:$16 sps:$4 sm:$0xff]  }
 0x22e   : > { %6146 = vmatpush1.bf16.msra.mxu0 %v8984_v30  ;;  %6720 = vmatpush1.bf16.msra.mxu1 %v8987_v31  ;;  %v9071_v30 = vld [vmem:[%s9838_s4 + $0x1108] ss:$16 sps:$4 sm:$0xff]   ;;  %v9076_v31 = vld [vmem:[%s9838_s4 + $0x1124] ss:$16 sps:$4 sm:$0xff]  }
 0x22f   : > { %6147 = vmatprep.subr.bf16.mxu0 %v8992_v16  ;;  %6721 = vmatprep.subr.bf16.mxu1 %v8995_v32  ;;  %v9079_v16 = vld [vmem:[%s9838_s4 + $0x112c] ss:$16 sps:$4 sm:$0xff]   ;;  %v9074_v32 = vld [vmem:[%s9838_s4 + $0x1120] ss:$16 sps:$4 sm:$0xff]  }
 0x232   : > { %6148 = vmatpush1.bf16.msra.mxu0 %v8990_v33  ;;  %6722 = vmatpush1.bf16.msra.mxu1 %v8993_v34  ;;  %v9077_v33 = vld [vmem:[%s9838_s4 + $0x1128] ss:$16 sps:$4 sm:$0xff]   ;;  %v9082_v34 = vld [vmem:[%s9838_s4 + $0x1144] ss:$16 sps:$4 sm:$0xff]  }
 0x233   : > { %6149 = vmatprep.subr.bf16.mxu0 %v8998_v26  ;;  %6723 = vmatprep.subr.bf16.mxu1 %v9001_v35  ;;  %v9085_v26 = vld [vmem:[%s9838_s4 + $0x114c] ss:$16 sps:$4 sm:$0xff]   ;;  %v9080_v35 = vld [vmem:[%s9838_s4 + $0x1140] ss:$16 sps:$4 sm:$0xff]  }
 0x236   : > { %6150 = vmatpush1.bf16.msra.mxu0 %v8996_v37  ;;  %6724 = vmatpush1.bf16.msra.mxu1 %v8999_v38  ;;  %v9083_v37 = vld [vmem:[%s9838_s4 + $0x1148] ss:$16 sps:$4 sm:$0xff]   ;;  %v9088_v38 = vld [vmem:[%s9838_s4 + $0x1164] ss:$16 sps:$4 sm:$0xff]  }
 0x237   : > { %6151 = vmatprep.subr.bf16.mxu0 %v9004_v40  ;;  %6725 = vmatprep.subr.bf16.mxu1 %v9007_v41  ;;  %v9091_v40 = vld [vmem:[%s9838_s4 + $0x116c] ss:$16 sps:$4 sm:$0xff]   ;;  %v9086_v41 = vld [vmem:[%s9838_s4 + $0x1160] ss:$16 sps:$4 sm:$0xff]  }
 0x23a   : > { %6152 = vmatpush1.bf16.msra.mxu0 %v9002_v22  ;;  %6726 = vmatpush1.bf16.msra.mxu1 %v9005_v42  ;;  %v9089_v22 = vld [vmem:[%s9838_s4 + $0x1168] ss:$16 sps:$4 sm:$0xff]   ;;  %v9094_v42 = vld [vmem:[%s9838_s4 + $0x1184] ss:$16 sps:$4 sm:$0xff]  }
 0x23b   : > { %6153 = vmatprep.subr.bf16.mxu0 %v9010_v43  ;;  %6727 = vmatprep.subr.bf16.mxu1 %v9013_v45  ;;  %v9097_v43 = vld [vmem:[%s9838_s4 + $0x118c] ss:$16 sps:$4 sm:$0xff]   ;;  %v9092_v45 = vld [vmem:[%s9838_s4 + $0x1180] ss:$16 sps:$4 sm:$0xff]  }
 0x23e   : > { %6154 = vmatpush1.bf16.msra.mxu0 %v9008_v46  ;;  %6728 = vmatpush1.bf16.msra.mxu1 %v9011_v47  ;;  %v9095_v46 = vld [vmem:[%s9838_s4 + $0x1188] ss:$16 sps:$4 sm:$0xff]   ;;  %v9100_v47 = vld [vmem:[%s9838_s4 + $0x11a4] ss:$16 sps:$4 sm:$0xff]  }
 0x23f   : > { %6155 = vmatprep.subr.bf16.mxu0 %v9016_v48  ;;  %6729 = vmatprep.subr.bf16.mxu1 %v9019_v51  ;;  %v9103_v48 = vld [vmem:[%s9838_s4 + $0x11ac] ss:$16 sps:$4 sm:$0xff]   ;;  %v9098_v51 = vld [vmem:[%s9838_s4 + $0x11a0] ss:$16 sps:$4 sm:$0xff]  }
 0x242   : > { %6156 = vmatpush1.bf16.msra.mxu0 %v9014_v54  ;;  %6730 = vmatpush1.bf16.msra.mxu1 %v9017_v55  ;;  %v9101_v54 = vld [vmem:[%s9838_s4 + $0x11a8] ss:$16 sps:$4 sm:$0xff]   ;;  %v9106_v55 = vld [vmem:[%s9838_s4 + $0x11c4] ss:$16 sps:$4 sm:$0xff]  }
 0x243   : > { %6166 = vmatprep.subr.bf16.mxu0 %v9022_v56  ;;  %6740 = vmatprep.subr.bf16.mxu1 %v9025_v39  ;;  %v9109_v56 = vld [vmem:[%s9838_s4 + $0x11cc] ss:$16 sps:$4 sm:$0xff]   ;;  %v9104_v39 = vld [vmem:[%s9838_s4 + $0x11c0] ss:$16 sps:$4 sm:$0xff]  }
 0x245   : > { %6158 = vmatmul.mubr.bf16.vlgmr.msra.gmra.mrb[0].mxu0 %v1254_v58  ;;  %6732 = vmatmul.mubr.bf16.vlgmr.msra.gmra.mrb[0].mxu1 %v1254_v58  ;;  %v9112_v58 = vld [vmem:[%s9838_s4 + $0x11e4] ss:$16 sps:$4 sm:$0xff]  }
 0x246   : > { %6167 = vmatpush1.bf16.msra.mxu0 %v9020_v59  ;;  %6741 = vmatpush1.bf16.msra.mxu1 %v9023_v49  ;;  %v9115_v59 = vld [vmem:[%s9838_s4 + $0x11ec] ss:$16 sps:$4 sm:$0xff]   ;;  %v9110_v49 = vld [vmem:[%s9838_s4 + $0x11e0] ss:$16 sps:$4 sm:$0xff]  }
 0x247   : > { %6168 = vmatprep.subr.bf16.mxu0 %v9028_v60  ;;  %6742 = vmatprep.subr.bf16.mxu1 %v9031_v61  ;;  %v9113_v60 = vld [vmem:[%s9838_s4 + $0x11e8] ss:$16 sps:$4 sm:$0xff]   ;;  %v9118_v61 = vld [vmem:[%s9838_s4 + $0x1204] ss:$16 sps:$4 sm:$0xff]  }
 0x248   : > { %6198 = vmatprep.mubr.bf16.mxu0 %v10473_v62  ;;  %6772 = vmatprep.mubr.bf16.mxu1 %v10473_v62 }
 0x24a   : > { %6169 = vmatpush1.bf16.msra.mxu0 %v9026_v14  ;;  %6743 = vmatpush1.bf16.msra.mxu1 %v9029_v63  ;;  %v9121_v14 = vld [vmem:[%s9838_s4 + $0x120c] ss:$16 sps:$4 sm:$0xff]   ;;  %v10539_v63 = vrot.slane %v10458_v52, %v9911_v50  ;;  %v9122_v52 = vld [vmem:[%s9838_s4 + $0x1220] ss:$16 sps:$4 sm:$0xff]  }
 0x24b   : > { %6170 = vmatprep.subr.bf16.mxu0 %v9034_v0  ;;  %6744 = vmatprep.subr.bf16.mxu1 %v9037_v1  ;;  %v9116_v0 = vld [vmem:[%s9838_s4 + $0x1200] ss:$16 sps:$4 sm:$0xff]   ;;  %v9119_v1 = vld [vmem:[%s9838_s4 + $0x1208] ss:$16 sps:$4 sm:$0xff]  }
 0x24e   : > { %6171 = vmatpush1.bf16.msra.mxu0 %v9032_v2  ;;  %6745 = vmatpush1.bf16.msra.mxu1 %v9035_v3  ;;  %v9124_v2 = vld [vmem:[%s9838_s4 + $0x1224] ss:$16 sps:$4 sm:$0xff]   ;;  %v9127_v3 = vld [vmem:[%s9838_s4 + $0x122c] ss:$16 sps:$4 sm:$0xff]  }
 0x24f   : > { %6172 = vmatprep.subr.bf16.mxu0 %v9040_v4  ;;  %6746 = vmatprep.subr.bf16.mxu1 %v9043_v5  ;;  %v1304_v4 = vcombine.high %v10473_v62, %v10473_v62  ;;  %v9125_v5 = vld [vmem:[%s9838_s4 + $0x1228] ss:$16 sps:$4 sm:$0xff]   ;;  %v9128_v62 = vld [vmem:[%s9838_s4 + $0x1240] ss:$16 sps:$4 sm:$0xff]  }
 0x252   : > { %6173 = vmatpush1.bf16.msra.mxu0 %v9038_v6  ;;  %6747 = vmatpush1.bf16.msra.mxu1 %v9041_v7  ;;  %v9130_v6 = vld [vmem:[%s9838_s4 + $0x1244] ss:$16 sps:$4 sm:$0xff]   ;;  %v9133_v7 = vld [vmem:[%s9838_s4 + $0x124c] ss:$16 sps:$4 sm:$0xff]  }
 0x253   : > { %6174 = vmatprep.subr.bf16.mxu0 %v9046_v8  ;;  %6748 = vmatprep.subr.bf16.mxu1 %v9049_v9  ;;  %v9131_v8 = vld [vmem:[%s9838_s4 + $0x1248] ss:$16 sps:$4 sm:$0xff]   ;;  %v9136_v9 = vld [vmem:[%s9838_s4 + $0x1264] ss:$16 sps:$4 sm:$0xff]  }
 0x256   : > { %6175 = vmatpush1.bf16.msra.mxu0 %v9044_v10  ;;  %6749 = vmatpush1.bf16.msra.mxu1 %v9047_v11  ;;  %v9139_v10 = vld [vmem:[%s9838_s4 + $0x126c] ss:$16 sps:$4 sm:$0xff]   ;;  %v9134_v11 = vld [vmem:[%s9838_s4 + $0x1260] ss:$16 sps:$4 sm:$0xff]  }
 0x257   : > { %6176 = vmatprep.subr.bf16.mxu0 %v9052_v12  ;;  %6750 = vmatprep.subr.bf16.mxu1 %v9055_v13  ;;  %v9137_v12 = vld [vmem:[%s9838_s4 + $0x1268] ss:$16 sps:$4 sm:$0xff]   ;;  %v9142_v13 = vld [vmem:[%s9838_s4 + $0x1284] ss:$16 sps:$4 sm:$0xff]  }
 0x25a   : > { %6177 = vmatpush1.bf16.msra.mxu0 %v9050_v15  ;;  %6751 = vmatpush1.bf16.msra.mxu1 %v9053_v17  ;;  %v9145_v15 = vld [vmem:[%s9838_s4 + $0x128c] ss:$16 sps:$4 sm:$0xff]   ;;  %v9140_v17 = vld [vmem:[%s9838_s4 + $0x1280] ss:$16 sps:$4 sm:$0xff]  }
 0x25b   : > { %6178 = vmatprep.subr.bf16.mxu0 %v9058_v53  ;;  %6752 = vmatprep.subr.bf16.mxu1 %v9061_v18  ;;  %v9143_v53 = vld [vmem:[%s9838_s4 + $0x1288] ss:$16 sps:$4 sm:$0xff]   ;;  %v9148_v18 = vld [vmem:[%s9838_s4 + $0x12a4] ss:$16 sps:$4 sm:$0xff]  }
 0x25e   : > { %6179 = vmatpush1.bf16.msra.mxu0 %v9056_v19  ;;  %6753 = vmatpush1.bf16.msra.mxu1 %v9059_v20  ;;  %v9151_v19 = vld [vmem:[%s9838_s4 + $0x12ac] ss:$16 sps:$4 sm:$0xff]   ;;  %v9146_v20 = vld [vmem:[%s9838_s4 + $0x12a0] ss:$16 sps:$4 sm:$0xff]  }
 0x25f   : > { %6180 = vmatprep.subr.bf16.mxu0 %v9064_v21  ;;  %6754 = vmatprep.subr.bf16.mxu1 %v9067_v23  ;;  %v9149_v21 = vld [vmem:[%s9838_s4 + $0x12a8] ss:$16 sps:$4 sm:$0xff]   ;;  %v9154_v23 = vld [vmem:[%s9838_s4 + $0x12c4] ss:$16 sps:$4 sm:$0xff]  }
 0x262   : > { %6181 = vmatpush1.bf16.msra.mxu0 %v9062_v24  ;;  %6755 = vmatpush1.bf16.msra.mxu1 %v9065_v25  ;;  %v9157_v24 = vld [vmem:[%s9838_s4 + $0x12cc] ss:$16 sps:$4 sm:$0xff]   ;;  %v9152_v25 = vld [vmem:[%s9838_s4 + $0x12c0] ss:$16 sps:$4 sm:$0xff]  }
 0x263   : > { %6182 = vmatprep.subr.bf16.mxu0 %v9070_v27  ;;  %6756 = vmatprep.subr.bf16.mxu1 %v9073_v28  ;;  %v9155_v27 = vld [vmem:[%s9838_s4 + $0x12c8] ss:$16 sps:$4 sm:$0xff]   ;;  %v9160_v28 = vld [vmem:[%s9838_s4 + $0x12e4] ss:$16 sps:$4 sm:$0xff]  }
 0x266   : > { %6183 = vmatpush1.bf16.msra.mxu0 %v9068_v29  ;;  %6757 = vmatpush1.bf16.msra.mxu1 %v9071_v30  ;;  %v9163_v29 = vld [vmem:[%s9838_s4 + $0x12ec] ss:$16 sps:$4 sm:$0xff]   ;;  %v9158_v30 = vld [vmem:[%s9838_s4 + $0x12e0] ss:$16 sps:$4 sm:$0xff]  }
 0x267   : > { %6184 = vmatprep.subr.bf16.mxu0 %v9076_v31  ;;  %6758 = vmatprep.subr.bf16.mxu1 %v9079_v16  ;;  %v9161_v31 = vld [vmem:[%s9838_s4 + $0x12e8] ss:$16 sps:$4 sm:$0xff]   ;;  %v9166_v16 = vld [vmem:[%s9838_s4 + $0x1304] ss:$16 sps:$4 sm:$0xff]  }
 0x26a   : > { %6185 = vmatpush1.bf16.msra.mxu0 %v9074_v32  ;;  %6759 = vmatpush1.bf16.msra.mxu1 %v9077_v33  ;;  %v9169_v32 = vld [vmem:[%s9838_s4 + $0x130c] ss:$16 sps:$4 sm:$0xff]   ;;  %v9164_v33 = vld [vmem:[%s9838_s4 + $0x1300] ss:$16 sps:$4 sm:$0xff]  }
 0x26b   : > { %6186 = vmatprep.subr.bf16.mxu0 %v9082_v34  ;;  %6760 = vmatprep.subr.bf16.mxu1 %v9085_v26  ;;  %v9167_v34 = vld [vmem:[%s9838_s4 + $0x1308] ss:$16 sps:$4 sm:$0xff]   ;;  %v9172_v26 = vld [vmem:[%s9838_s4 + $0x1324] ss:$16 sps:$4 sm:$0xff]  }
 0x26e   : > { %6187 = vmatpush1.bf16.msra.mxu0 %v9080_v35  ;;  %6761 = vmatpush1.bf16.msra.mxu1 %v9083_v37  ;;  %v9175_v35 = vld [vmem:[%s9838_s4 + $0x132c] ss:$16 sps:$4 sm:$0xff]   ;;  %v9170_v37 = vld [vmem:[%s9838_s4 + $0x1320] ss:$16 sps:$4 sm:$0xff]  }
 0x26f   : > { %6188 = vmatprep.subr.bf16.mxu0 %v9088_v38  ;;  %6762 = vmatprep.subr.bf16.mxu1 %v9091_v40  ;;  %v9173_v38 = vld [vmem:[%s9838_s4 + $0x1328] ss:$16 sps:$4 sm:$0xff]   ;;  %v9178_v40 = vld [vmem:[%s9838_s4 + $0x1344] ss:$16 sps:$4 sm:$0xff]  }
 0x272   : > { %6189 = vmatpush1.bf16.msra.mxu0 %v9086_v41  ;;  %6763 = vmatpush1.bf16.msra.mxu1 %v9089_v22  ;;  %v9181_v41 = vld [vmem:[%s9838_s4 + $0x134c] ss:$16 sps:$4 sm:$0xff]   ;;  %v9176_v22 = vld [vmem:[%s9838_s4 + $0x1340] ss:$16 sps:$4 sm:$0xff]  }
 0x273   : > { %6190 = vmatprep.subr.bf16.mxu0 %v9094_v42  ;;  %6764 = vmatprep.subr.bf16.mxu1 %v9097_v43  ;;  %v9179_v42 = vld [vmem:[%s9838_s4 + $0x1348] ss:$16 sps:$4 sm:$0xff]   ;;  %v9184_v43 = vld [vmem:[%s9838_s4 + $0x1364] ss:$16 sps:$4 sm:$0xff]  }
 0x276   : > { %6191 = vmatpush1.bf16.msra.mxu0 %v9092_v45  ;;  %6765 = vmatpush1.bf16.msra.mxu1 %v9095_v46  ;;  %v9187_v45 = vld [vmem:[%s9838_s4 + $0x136c] ss:$16 sps:$4 sm:$0xff]   ;;  %v9182_v46 = vld [vmem:[%s9838_s4 + $0x1360] ss:$16 sps:$4 sm:$0xff]  }
 0x277   : > { %6192 = vmatprep.subr.bf16.mxu0 %v9100_v47  ;;  %6766 = vmatprep.subr.bf16.mxu1 %v9103_v48  ;;  %v9185_v47 = vld [vmem:[%s9838_s4 + $0x1368] ss:$16 sps:$4 sm:$0xff]   ;;  %v9190_v48 = vld [vmem:[%s9838_s4 + $0x1384] ss:$16 sps:$4 sm:$0xff]  }
 0x27a   : > { %6193 = vmatpush1.bf16.msra.mxu0 %v9098_v51  ;;  %6767 = vmatpush1.bf16.msra.mxu1 %v9101_v54  ;;  %v9193_v51 = vld [vmem:[%s9838_s4 + $0x138c] ss:$16 sps:$4 sm:$0xff]   ;;  %v9188_v54 = vld [vmem:[%s9838_s4 + $0x1380] ss:$16 sps:$4 sm:$0xff]  }
 0x27b   : > { %6194 = vmatprep.subr.bf16.mxu0 %v9106_v55  ;;  %6768 = vmatprep.subr.bf16.mxu1 %v9109_v56  ;;  %v9191_v55 = vld [vmem:[%s9838_s4 + $0x1388] ss:$16 sps:$4 sm:$0xff]   ;;  %v9196_v56 = vld [vmem:[%s9838_s4 + $0x13a4] ss:$16 sps:$4 sm:$0xff]  }
 0x27e   : > { %6195 = vmatpush1.bf16.msra.mxu0 %v9104_v39  ;;  %6769 = vmatpush1.bf16.msra.mxu1 %v9107_v57  ;;  %v9199_v39 = vld [vmem:[%s9838_s4 + $0x13ac] ss:$16 sps:$4 sm:$0xff]   ;;  %v9194_v57 = vld [vmem:[%s9838_s4 + $0x13a0] ss:$16 sps:$4 sm:$0xff]  }
 0x27f   : > { %6196 = vmatprep.subr.bf16.mxu0 %v9112_v58  ;;  %6770 = vmatprep.subr.bf16.mxu1 %v9115_v59  ;;  %v9197_v58 = vld [vmem:[%s9838_s4 + $0x13a8] ss:$16 sps:$4 sm:$0xff]   ;;  %v9202_v59 = vld [vmem:[%s9838_s4 + $0x13c4] ss:$16 sps:$4 sm:$0xff]  }
 0x282   : > { %6197 = vmatpush1.bf16.msra.mxu0 %v9110_v49  ;;  %6771 = vmatpush1.bf16.msra.mxu1 %v9113_v60  ;;  %v9205_v49 = vld [vmem:[%s9838_s4 + $0x13cc] ss:$16 sps:$4 sm:$0xff]   ;;  %v1257_v60 = vcombine.high %v10450_v36, %v10450_v36  ;;  %v9206_v36 = vld [vmem:[%s9838_s4 + $0x13e0] ss:$16 sps:$4 sm:$0xff]  }
 0x283   : > { %6207 = vmatprep.subr.bf16.mxu0 %v9118_v61  ;;  %6781 = vmatprep.subr.bf16.mxu1 %v9121_v14  ;;  %v9200_v61 = vld [vmem:[%s9838_s4 + $0x13c0] ss:$16 sps:$4 sm:$0xff]   ;;  %v9203_v14 = vld [vmem:[%s9838_s4 + $0x13c8] ss:$16 sps:$4 sm:$0xff]  }
 0x285   : > { %6199 = vmatmul.mubr.bf16.vlgmr.msra.gmra.mrb[0].mxu0 %v10539_v63  ;;  %6773 = vmatmul.mubr.bf16.vlgmr.msra.gmra.mrb[0].mxu1 %v10539_v63 }
 0x286   : > { %6208 = vmatpush1.bf16.msra.mxu0 %v9116_v0  ;;  %6782 = vmatpush1.bf16.msra.mxu1 %v9119_v1  ;;  %v9208_v0 = vld [vmem:[%s9838_s4 + $0x13e4] ss:$16 sps:$4 sm:$0xff]   ;;  %v9211_v1 = vld [vmem:[%s9838_s4 + $0x13ec] ss:$16 sps:$4 sm:$0xff]  }
 0x287   : > { %6209 = vmatprep.subr.bf16.mxu0 %v9124_v2  ;;  %6783 = vmatprep.subr.bf16.mxu1 %v9127_v3  ;;  %v10608_v2 = vrot.slane %v1257_v60, %v9911_v50  ;;  %v9209_v3 = vld [vmem:[%s9838_s4 + $0x13e8] ss:$16 sps:$4 sm:$0xff]  }
 0x288   : > { %6239 = vmatprep.mubr.bf16.mxu0 %v1304_v4  ;;  %6813 = vmatprep.mubr.bf16.mxu1 %v1304_v4  ;;  %v9214_v4 = vld [vmem:[%s9838_s4 + $0x1404] ss:$16 sps:$4 sm:$0xff]   ;;  %v9287_v60 = vld [vmem:[%s9838_s4 + $0x1588] ss:$16 sps:$4 sm:$0xff]  }
 0x28a   : > { %6210 = vmatpush1.bf16.msra.mxu0 %v9122_v52  ;;  %6784 = vmatpush1.bf16.msra.mxu1 %v9125_v5  ;;  %v9217_v52 = vld [vmem:[%s9838_s4 + $0x140c] ss:$16 sps:$4 sm:$0xff]   ;;  %v1273_v5 = vcombine.high %v10608_v2, %v10608_v2 }
 0x28b   : > { %6211 = vmatprep.subr.bf16.mxu0 %v9130_v6  ;;  %6785 = vmatprep.subr.bf16.mxu1 %v9133_v7  ;;  %v1302_v6 = vcombine.high %v10539_v63, %v10539_v63  ;;  %v9212_v7 = vld [vmem:[%s9838_s4 + $0x1400] ss:$16 sps:$4 sm:$0xff]  }
 0x28c   : > { %v9218_v63 = vld [vmem:[%s9838_s4 + $0x1420] ss:$16 sps:$4 sm:$0xff]  }
 0x28e   : > { %6212 = vmatpush1.bf16.msra.mxu0 %v9128_v62  ;;  %6786 = vmatpush1.bf16.msra.mxu1 %v9131_v8  ;;  %v9215_v62 = vld [vmem:[%s9838_s4 + $0x1408] ss:$16 sps:$4 sm:$0xff]   ;;  %v9220_v8 = vld [vmem:[%s9838_s4 + $0x1424] ss:$16 sps:$4 sm:$0xff]  }
 0x28f   : > { %6213 = vmatprep.subr.bf16.mxu0 %v9136_v9  ;;  %6787 = vmatprep.subr.bf16.mxu1 %v9139_v10  ;;  %v9223_v9 = vld [vmem:[%s9838_s4 + $0x142c] ss:$16 sps:$4 sm:$0xff]   ;;  %v10623_v10 = vrot.slane %v1273_v5, %v9911_v50  ;;  %v9304_v5 = vld [vmem:[%s9838_s4 + $0x15e4] ss:$16 sps:$4 sm:$0xff]  }
 0x292   : > { %6214 = vmatpush1.bf16.msra.mxu0 %v9134_v11  ;;  %6788 = vmatpush1.bf16.msra.mxu1 %v9137_v12  ;;  %v9221_v11 = vld [vmem:[%s9838_s4 + $0x1428] ss:$16 sps:$4 sm:$0xff]   ;;  %v9226_v12 = vld [vmem:[%s9838_s4 + $0x1444] ss:$16 sps:$4 sm:$0xff]  }
 0x293   : > { %6215 = vmatprep.subr.bf16.mxu0 %v9142_v13  ;;  %6789 = vmatprep.subr.bf16.mxu1 %v9145_v15  ;;  %v9229_v13 = vld [vmem:[%s9838_s4 + $0x144c] ss:$16 sps:$4 sm:$0xff]   ;;  %v9224_v15 = vld [vmem:[%s9838_s4 + $0x1440] ss:$16 sps:$4 sm:$0xff]  }
 0x296   : > { %6216 = vmatpush1.bf16.msra.mxu0 %v9140_v17  ;;  %6790 = vmatpush1.bf16.msra.mxu1 %v9143_v53  ;;  %v9227_v17 = vld [vmem:[%s9838_s4 + $0x1448] ss:$16 sps:$4 sm:$0xff]   ;;  %v9232_v53 = vld [vmem:[%s9838_s4 + $0x1464] ss:$16 sps:$4 sm:$0xff]  }
 0x297   : > { %6217 = vmatprep.subr.bf16.mxu0 %v9148_v18  ;;  %6791 = vmatprep.subr.bf16.mxu1 %v9151_v19  ;;  %v9235_v18 = vld [vmem:[%s9838_s4 + $0x146c] ss:$16 sps:$4 sm:$0xff]   ;;  %v9230_v19 = vld [vmem:[%s9838_s4 + $0x1460] ss:$16 sps:$4 sm:$0xff]  }
 0x29a   : > { %6218 = vmatpush1.bf16.msra.mxu0 %v9146_v20  ;;  %6792 = vmatpush1.bf16.msra.mxu1 %v9149_v21  ;;  %v9233_v20 = vld [vmem:[%s9838_s4 + $0x1468] ss:$16 sps:$4 sm:$0xff]   ;;  %v9238_v21 = vld [vmem:[%s9838_s4 + $0x1484] ss:$16 sps:$4 sm:$0xff]  }
 0x29b   : > { %6219 = vmatprep.subr.bf16.mxu0 %v9154_v23  ;;  %6793 = vmatprep.subr.bf16.mxu1 %v9157_v24  ;;  %v9241_v23 = vld [vmem:[%s9838_s4 + $0x148c] ss:$16 sps:$4 sm:$0xff]   ;;  %v9236_v24 = vld [vmem:[%s9838_s4 + $0x1480] ss:$16 sps:$4 sm:$0xff]  }
 0x29e   : > { %6220 = vmatpush1.bf16.msra.mxu0 %v9152_v25  ;;  %6794 = vmatpush1.bf16.msra.mxu1 %v9155_v27  ;;  %v9239_v25 = vld [vmem:[%s9838_s4 + $0x1488] ss:$16 sps:$4 sm:$0xff]   ;;  %v9244_v27 = vld [vmem:[%s9838_s4 + $0x14a4] ss:$16 sps:$4 sm:$0xff]  }
 0x29f   : > { %6221 = vmatprep.subr.bf16.mxu0 %v9160_v28  ;;  %6795 = vmatprep.subr.bf16.mxu1 %v9163_v29  ;;  %v9247_v28 = vld [vmem:[%s9838_s4 + $0x14ac] ss:$16 sps:$4 sm:$0xff]   ;;  %v9242_v29 = vld [vmem:[%s9838_s4 + $0x14a0] ss:$16 sps:$4 sm:$0xff]  }
 0x2a2   : > { %6222 = vmatpush1.bf16.msra.mxu0 %v9158_v30  ;;  %6796 = vmatpush1.bf16.msra.mxu1 %v9161_v31  ;;  %v9245_v30 = vld [vmem:[%s9838_s4 + $0x14a8] ss:$16 sps:$4 sm:$0xff]   ;;  %v9250_v31 = vld [vmem:[%s9838_s4 + $0x14c4] ss:$16 sps:$4 sm:$0xff]  }
 0x2a3   : > { %6223 = vmatprep.subr.bf16.mxu0 %v9166_v16  ;;  %6797 = vmatprep.subr.bf16.mxu1 %v9169_v32  ;;  %v9253_v16 = vld [vmem:[%s9838_s4 + $0x14cc] ss:$16 sps:$4 sm:$0xff]   ;;  %v9248_v32 = vld [vmem:[%s9838_s4 + $0x14c0] ss:$16 sps:$4 sm:$0xff]  }
 0x2a6   : > { %6224 = vmatpush1.bf16.msra.mxu0 %v9164_v33  ;;  %6798 = vmatpush1.bf16.msra.mxu1 %v9167_v34  ;;  %v9251_v33 = vld [vmem:[%s9838_s4 + $0x14c8] ss:$16 sps:$4 sm:$0xff]   ;;  %v9256_v34 = vld [vmem:[%s9838_s4 + $0x14e4] ss:$16 sps:$4 sm:$0xff]  }
 0x2a7   : > { %6225 = vmatprep.subr.bf16.mxu0 %v9172_v26  ;;  %6799 = vmatprep.subr.bf16.mxu1 %v9175_v35  ;;  %v9259_v26 = vld [vmem:[%s9838_s4 + $0x14ec] ss:$16 sps:$4 sm:$0xff]   ;;  %v9254_v35 = vld [vmem:[%s9838_s4 + $0x14e0] ss:$16 sps:$4 sm:$0xff]  }
 0x2aa   : > { %6226 = vmatpush1.bf16.msra.mxu0 %v9170_v37  ;;  %6800 = vmatpush1.bf16.msra.mxu1 %v9173_v38  ;;  %v9257_v37 = vld [vmem:[%s9838_s4 + $0x14e8] ss:$16 sps:$4 sm:$0xff]   ;;  %v9262_v38 = vld [vmem:[%s9838_s4 + $0x1504] ss:$16 sps:$4 sm:$0xff]  }
 0x2ab   : > { %6227 = vmatprep.subr.bf16.mxu0 %v9178_v40  ;;  %6801 = vmatprep.subr.bf16.mxu1 %v9181_v41  ;;  %v9265_v40 = vld [vmem:[%s9838_s4 + $0x150c] ss:$16 sps:$4 sm:$0xff]   ;;  %v9260_v41 = vld [vmem:[%s9838_s4 + $0x1500] ss:$16 sps:$4 sm:$0xff]  }
 0x2ae   : > { %6228 = vmatpush1.bf16.msra.mxu0 %v9176_v22  ;;  %6802 = vmatpush1.bf16.msra.mxu1 %v9179_v42  ;;  %v9263_v22 = vld [vmem:[%s9838_s4 + $0x1508] ss:$16 sps:$4 sm:$0xff]   ;;  %v9268_v42 = vld [vmem:[%s9838_s4 + $0x1524] ss:$16 sps:$4 sm:$0xff]  }
 0x2af   : > { %6229 = vmatprep.subr.bf16.mxu0 %v9184_v43  ;;  %6803 = vmatprep.subr.bf16.mxu1 %v9187_v45  ;;  %v9271_v43 = vld [vmem:[%s9838_s4 + $0x152c] ss:$16 sps:$4 sm:$0xff]   ;;  %v9266_v45 = vld [vmem:[%s9838_s4 + $0x1520] ss:$16 sps:$4 sm:$0xff]  }
 0x2b2   : > { %6230 = vmatpush1.bf16.msra.mxu0 %v9182_v46  ;;  %6804 = vmatpush1.bf16.msra.mxu1 %v9185_v47  ;;  %v9269_v46 = vld [vmem:[%s9838_s4 + $0x1528] ss:$16 sps:$4 sm:$0xff]   ;;  %v9274_v47 = vld [vmem:[%s9838_s4 + $0x1544] ss:$16 sps:$4 sm:$0xff]  }
 0x2b3   : > { %6231 = vmatprep.subr.bf16.mxu0 %v9190_v48  ;;  %6805 = vmatprep.subr.bf16.mxu1 %v9193_v51  ;;  %v9277_v48 = vld [vmem:[%s9838_s4 + $0x154c] ss:$16 sps:$4 sm:$0xff]   ;;  %v9272_v51 = vld [vmem:[%s9838_s4 + $0x1540] ss:$16 sps:$4 sm:$0xff]  }
 0x2b6   : > { %6232 = vmatpush1.bf16.msra.mxu0 %v9188_v54  ;;  %6806 = vmatpush1.bf16.msra.mxu1 %v9191_v55  ;;  %v9275_v54 = vld [vmem:[%s9838_s4 + $0x1548] ss:$16 sps:$4 sm:$0xff]   ;;  %v9280_v55 = vld [vmem:[%s9838_s4 + $0x1564] ss:$16 sps:$4 sm:$0xff]  }
 0x2b7   : > { %6233 = vmatprep.subr.bf16.mxu0 %v9196_v56  ;;  %6807 = vmatprep.subr.bf16.mxu1 %v9199_v39  ;;  %v9283_v56 = vld [vmem:[%s9838_s4 + $0x156c] ss:$16 sps:$4 sm:$0xff]   ;;  %v9278_v39 = vld [vmem:[%s9838_s4 + $0x1560] ss:$16 sps:$4 sm:$0xff]  }
 0x2ba   : > { %6234 = vmatpush1.bf16.msra.mxu0 %v9194_v57  ;;  %6808 = vmatpush1.bf16.msra.mxu1 %v9197_v58  ;;  %v9281_v57 = vld [vmem:[%s9838_s4 + $0x1568] ss:$16 sps:$4 sm:$0xff]   ;;  %v9286_v58 = vld [vmem:[%s9838_s4 + $0x1584] ss:$16 sps:$4 sm:$0xff]  }
 0x2bb   : > { %6235 = vmatprep.subr.bf16.mxu0 %v9202_v59  ;;  %6809 = vmatprep.subr.bf16.mxu1 %v9205_v49  ;;  %v9289_v59 = vld [vmem:[%s9838_s4 + $0x158c] ss:$16 sps:$4 sm:$0xff]   ;;  %v9284_v49 = vld [vmem:[%s9838_s4 + $0x1580] ss:$16 sps:$4 sm:$0xff]  }
 0x2be   : > { %6236 = vmatpush1.bf16.msra.mxu0 %v9200_v61  ;;  %6810 = vmatpush1.bf16.msra.mxu1 %v9203_v14  ;;  %v9292_v61 = vld [vmem:[%s9838_s4 + $0x15a4] ss:$16 sps:$4 sm:$0xff]   ;;  %v9295_v14 = vld [vmem:[%s9838_s4 + $0x15ac] ss:$16 sps:$4 sm:$0xff]  }
 0x2bf   : > { %6237 = vmatprep.subr.bf16.mxu0 %v9208_v0  ;;  %6811 = vmatprep.subr.bf16.mxu1 %v9211_v1  ;;  %v9290_v0 = vld [vmem:[%s9838_s4 + $0x15a0] ss:$16 sps:$4 sm:$0xff]   ;;  %v9293_v1 = vld [vmem:[%s9838_s4 + $0x15a8] ss:$16 sps:$4 sm:$0xff]  }
 0x2c2   : > { %6238 = vmatpush1.bf16.msra.mxu0 %v9206_v36  ;;  %6812 = vmatpush1.bf16.msra.mxu1 %v9209_v3  ;;  %v9298_v36 = vld [vmem:[%s9838_s4 + $0x15c4] ss:$16 sps:$4 sm:$0xff]   ;;  %v9301_v3 = vld [vmem:[%s9838_s4 + $0x15cc] ss:$16 sps:$4 sm:$0xff]  }
 0x2c3   : > { %6248 = vmatprep.subr.bf16.mxu0 %v9214_v4  ;;  %6822 = vmatprep.subr.bf16.mxu1 %v9217_v52  ;;  %v9296_v4 = vld [vmem:[%s9838_s4 + $0x15c0] ss:$16 sps:$4 sm:$0xff]   ;;  %v9299_v52 = vld [vmem:[%s9838_s4 + $0x15c8] ss:$16 sps:$4 sm:$0xff]  }
 0x2c5   : > { %6240 = vmatmul.mubr.bf16.vlgmr.msra.gmra.mrb[0].mxu0 %v1302_v6  ;;  %6814 = vmatmul.mubr.bf16.vlgmr.msra.gmra.mrb[0].mxu1 %v1302_v6  ;;  %v9307_v6 = vld [vmem:[%s9838_s4 + $0x15ec] ss:$16 sps:$4 sm:$0xff]  }
 0x2c6   : > { %6249 = vmatpush1.bf16.msra.mxu0 %v9212_v7  ;;  %6823 = vmatpush1.bf16.msra.mxu1 %v9215_v62  ;;  %v9302_v7 = vld [vmem:[%s9838_s4 + $0x15e0] ss:$16 sps:$4 sm:$0xff]   ;;  %v9305_v62 = vld [vmem:[%s9838_s4 + $0x15e8] ss:$16 sps:$4 sm:$0xff]  }
 0x2c7   : > { %6250 = vmatprep.subr.bf16.mxu0 %v9220_v8  ;;  %6824 = vmatprep.subr.bf16.mxu1 %v9223_v9  ;;  %v9311_v8 = vld [vmem:[%s9838_s4 + $0x1604] ss:$16 sps:$4 sm:$0xff]   ;;  %v9314_v9 = vld [vmem:[%s9838_s4 + $0x160c] ss:$16 sps:$4 sm:$0xff]  }
 0x2c8   : > { %6280 = vmatprep.mubr.bf16.mxu0 %v10623_v10  ;;  %6854 = vmatprep.mubr.bf16.mxu1 %v10623_v10 }
 0x2ca   : > { %6251 = vmatpush1.bf16.msra.mxu0 %v9218_v63  ;;  %6825 = vmatpush1.bf16.msra.mxu1 %v9221_v11  ;;  %v10689_v63 = vrot.slane %v10608_v2, %v9911_v50  ;;  %v9309_v11 = vld [vmem:[%s9838_s4 + $0x1600] ss:$16 sps:$4 sm:$0xff]  }
 0x2cb   : > { %6252 = vmatprep.subr.bf16.mxu0 %v9226_v12  ;;  %6826 = vmatprep.subr.bf16.mxu1 %v9229_v13  ;;  %v9312_v12 = vld [vmem:[%s9838_s4 + $0x1608] ss:$16 sps:$4 sm:$0xff]   ;;  %v9317_v13 = vld [vmem:[%s9838_s4 + $0x1624] ss:$16 sps:$4 sm:$0xff]   ;;  %v9315_v2 = vld [vmem:[%s9838_s4 + $0x1620] ss:$16 sps:$4 sm:$0xff]  }
 0x2ce   : > { %6253 = vmatpush1.bf16.msra.mxu0 %v9224_v15  ;;  %6827 = vmatpush1.bf16.msra.mxu1 %v9227_v17  ;;  %v9320_v15 = vld [vmem:[%s9838_s4 + $0x162c] ss:$16 sps:$4 sm:$0xff]   ;;  %v1305_v17 = vcombine.high %v10623_v10, %v10623_v10  ;;  %v9321_v10 = vld [vmem:[%s9838_s4 + $0x1640] ss:$16 sps:$4 sm:$0xff]  }
 0x2cf   : > { %6254 = vmatprep.subr.bf16.mxu0 %v9232_v53  ;;  %6828 = vmatprep.subr.bf16.mxu1 %v9235_v18  ;;  %v9318_v53 = vld [vmem:[%s9838_s4 + $0x1628] ss:$16 sps:$4 sm:$0xff]   ;;  %v9323_v18 = vld [vmem:[%s9838_s4 + $0x1644] ss:$16 sps:$4 sm:$0xff]  }
 0x2d2   : > { %6255 = vmatpush1.bf16.msra.mxu0 %v9230_v19  ;;  %6829 = vmatpush1.bf16.msra.mxu1 %v9233_v20  ;;  %v9326_v19 = vld [vmem:[%s9838_s4 + $0x164c] ss:$16 sps:$4 sm:$0xff]   ;;  %v9324_v20 = vld [vmem:[%s9838_s4 + $0x1648] ss:$16 sps:$4 sm:$0xff]  }
 0x2d3   : > { %6256 = vmatprep.subr.bf16.mxu0 %v9238_v21  ;;  %6830 = vmatprep.subr.bf16.mxu1 %v9241_v23  ;;  %v9329_v21 = vld [vmem:[%s9838_s4 + $0x1664] ss:$16 sps:$4 sm:$0xff]   ;;  %v9332_v23 = vld [vmem:[%s9838_s4 + $0x166c] ss:$16 sps:$4 sm:$0xff]  }
 0x2d6   : > { %6257 = vmatpush1.bf16.msra.mxu0 %v9236_v24  ;;  %6831 = vmatpush1.bf16.msra.mxu1 %v9239_v25  ;;  %v9327_v24 = vld [vmem:[%s9838_s4 + $0x1660] ss:$16 sps:$4 sm:$0xff]   ;;  %v9330_v25 = vld [vmem:[%s9838_s4 + $0x1668] ss:$16 sps:$4 sm:$0xff]  }
 0x2d7   : > { %6258 = vmatprep.subr.bf16.mxu0 %v9244_v27  ;;  %6832 = vmatprep.subr.bf16.mxu1 %v9247_v28  ;;  %v9335_v27 = vld [vmem:[%s9838_s4 + $0x1684] ss:$16 sps:$4 sm:$0xff]   ;;  %v9338_v28 = vld [vmem:[%s9838_s4 + $0x168c] ss:$16 sps:$4 sm:$0xff]  }
 0x2da   : > { %6259 = vmatpush1.bf16.msra.mxu0 %v9242_v29  ;;  %6833 = vmatpush1.bf16.msra.mxu1 %v9245_v30  ;;  %v9333_v29 = vld [vmem:[%s9838_s4 + $0x1680] ss:$16 sps:$4 sm:$0xff]   ;;  %v9336_v30 = vld [vmem:[%s9838_s4 + $0x1688] ss:$16 sps:$4 sm:$0xff]  }
 0x2db   : > { %6260 = vmatprep.subr.bf16.mxu0 %v9250_v31  ;;  %6834 = vmatprep.subr.bf16.mxu1 %v9253_v16  ;;  %v9341_v31 = vld [vmem:[%s9838_s4 + $0x16a4] ss:$16 sps:$4 sm:$0xff]   ;;  %v9344_v16 = vld [vmem:[%s9838_s4 + $0x16ac] ss:$16 sps:$4 sm:$0xff]  }
 0x2de   : > { %6261 = vmatpush1.bf16.msra.mxu0 %v9248_v32  ;;  %6835 = vmatpush1.bf16.msra.mxu1 %v9251_v33  ;;  %v9339_v32 = vld [vmem:[%s9838_s4 + $0x16a0] ss:$16 sps:$4 sm:$0xff]   ;;  %v9342_v33 = vld [vmem:[%s9838_s4 + $0x16a8] ss:$16 sps:$4 sm:$0xff]  }
 0x2df   : > { %6262 = vmatprep.subr.bf16.mxu0 %v9256_v34  ;;  %6836 = vmatprep.subr.bf16.mxu1 %v9259_v26  ;;  %v9347_v34 = vld [vmem:[%s9838_s4 + $0x16c4] ss:$16 sps:$4 sm:$0xff]   ;;  %v9350_v26 = vld [vmem:[%s9838_s4 + $0x16cc] ss:$16 sps:$4 sm:$0xff]  }
 0x2e2   : > { %6263 = vmatpush1.bf16.msra.mxu0 %v9254_v35  ;;  %6837 = vmatpush1.bf16.msra.mxu1 %v9257_v37  ;;  %v9345_v35 = vld [vmem:[%s9838_s4 + $0x16c0] ss:$16 sps:$4 sm:$0xff]   ;;  %v9348_v37 = vld [vmem:[%s9838_s4 + $0x16c8] ss:$16 sps:$4 sm:$0xff]  }
 0x2e3   : > { %6264 = vmatprep.subr.bf16.mxu0 %v9262_v38  ;;  %6838 = vmatprep.subr.bf16.mxu1 %v9265_v40  ;;  %v9353_v38 = vld [vmem:[%s9838_s4 + $0x16e4] ss:$16 sps:$4 sm:$0xff]   ;;  %v9356_v40 = vld [vmem:[%s9838_s4 + $0x16ec] ss:$16 sps:$4 sm:$0xff]  }
 0x2e6   : > { %6265 = vmatpush1.bf16.msra.mxu0 %v9260_v41  ;;  %6839 = vmatpush1.bf16.msra.mxu1 %v9263_v22  ;;  %v9351_v41 = vld [vmem:[%s9838_s4 + $0x16e0] ss:$16 sps:$4 sm:$0xff]   ;;  %v9354_v22 = vld [vmem:[%s9838_s4 + $0x16e8] ss:$16 sps:$4 sm:$0xff]  }
 0x2e7   : > { %6266 = vmatprep.subr.bf16.mxu0 %v9268_v42  ;;  %6840 = vmatprep.subr.bf16.mxu1 %v9271_v43  ;;  %v9359_v42 = vld [vmem:[%s9838_s4 + $0x1704] ss:$16 sps:$4 sm:$0xff]   ;;  %v9362_v43 = vld [vmem:[%s9838_s4 + $0x170c] ss:$16 sps:$4 sm:$0xff]  }
 0x2ea   : > { %6267 = vmatpush1.bf16.msra.mxu0 %v9266_v45  ;;  %6841 = vmatpush1.bf16.msra.mxu1 %v9269_v46  ;;  %v9357_v45 = vld [vmem:[%s9838_s4 + $0x1700] ss:$16 sps:$4 sm:$0xff]   ;;  %v9360_v46 = vld [vmem:[%s9838_s4 + $0x1708] ss:$16 sps:$4 sm:$0xff]  }
 0x2eb   : > { %6268 = vmatprep.subr.bf16.mxu0 %v9274_v47  ;;  %6842 = vmatprep.subr.bf16.mxu1 %v9277_v48  ;;  %v9365_v47 = vld [vmem:[%s9838_s4 + $0x1724] ss:$16 sps:$4 sm:$0xff]   ;;  %v9368_v48 = vld [vmem:[%s9838_s4 + $0x172c] ss:$16 sps:$4 sm:$0xff]  }
 0x2ee   : > { %6269 = vmatpush1.bf16.msra.mxu0 %v9272_v51  ;;  %6843 = vmatpush1.bf16.msra.mxu1 %v9275_v54  ;;  %v9363_v51 = vld [vmem:[%s9838_s4 + $0x1720] ss:$16 sps:$4 sm:$0xff]   ;;  %v9366_v54 = vld [vmem:[%s9838_s4 + $0x1728] ss:$16 sps:$4 sm:$0xff]  }
 0x2ef   : > { %6270 = vmatprep.subr.bf16.mxu0 %v9280_v55  ;;  %6844 = vmatprep.subr.bf16.mxu1 %v9283_v56  ;;  %v9371_v55 = vld [vmem:[%s9838_s4 + $0x1744] ss:$16 sps:$4 sm:$0xff]   ;;  %v9374_v56 = vld [vmem:[%s9838_s4 + $0x174c] ss:$16 sps:$4 sm:$0xff]  }
 0x2f2   : > { %6271 = vmatpush1.bf16.msra.mxu0 %v9278_v39  ;;  %6845 = vmatpush1.bf16.msra.mxu1 %v9281_v57  ;;  %v9369_v39 = vld [vmem:[%s9838_s4 + $0x1740] ss:$16 sps:$4 sm:$0xff]   ;;  %v9372_v57 = vld [vmem:[%s9838_s4 + $0x1748] ss:$16 sps:$4 sm:$0xff]  }
 0x2f3   : > { %6272 = vmatprep.subr.bf16.mxu0 %v9286_v58  ;;  %6846 = vmatprep.subr.bf16.mxu1 %v9289_v59  ;;  %v9377_v58 = vld [vmem:[%s9838_s4 + $0x1764] ss:$16 sps:$4 sm:$0xff]   ;;  %v9380_v59 = vld [vmem:[%s9838_s4 + $0x176c] ss:$16 sps:$4 sm:$0xff]  }
 0x2f6   : > { %6273 = vmatpush1.bf16.msra.mxu0 %v9284_v49  ;;  %6847 = vmatpush1.bf16.msra.mxu1 %v9287_v60  ;;  %v9375_v49 = vld [vmem:[%s9838_s4 + $0x1760] ss:$16 sps:$4 sm:$0xff]   ;;  %v9378_v60 = vld [vmem:[%s9838_s4 + $0x1768] ss:$16 sps:$4 sm:$0xff]  }
 0x2f7   : > { %6274 = vmatprep.subr.bf16.mxu0 %v9292_v61  ;;  %6848 = vmatprep.subr.bf16.mxu1 %v9295_v14  ;;  %v9383_v61 = vld [vmem:[%s9838_s4 + $0x1784] ss:$16 sps:$4 sm:$0xff]   ;;  %v9386_v14 = vld [vmem:[%s9838_s4 + $0x178c] ss:$16 sps:$4 sm:$0xff]  }
 0x2fa   : > { %6275 = vmatpush1.bf16.msra.mxu0 %v9290_v0  ;;  %6849 = vmatpush1.bf16.msra.mxu1 %v9293_v1  ;;  %v9381_v0 = vld [vmem:[%s9838_s4 + $0x1780] ss:$16 sps:$4 sm:$0xff]   ;;  %v9384_v1 = vld [vmem:[%s9838_s4 + $0x1788] ss:$16 sps:$4 sm:$0xff]  }
 0x2fb   : > { %6276 = vmatprep.subr.bf16.mxu0 %v9298_v36  ;;  %6850 = vmatprep.subr.bf16.mxu1 %v9301_v3  ;;  %v9389_v36 = vld [vmem:[%s9838_s4 + $0x17a4] ss:$16 sps:$4 sm:$0xff]   ;;  %v9392_v3 = vld [vmem:[%s9838_s4 + $0x17ac] ss:$16 sps:$4 sm:$0xff]  }
 0x2fe   : > { %6277 = vmatpush1.bf16.msra.mxu0 %v9296_v4  ;;  %6851 = vmatpush1.bf16.msra.mxu1 %v9299_v52  ;;  %v9387_v4 = vld [vmem:[%s9838_s4 + $0x17a0] ss:$16 sps:$4 sm:$0xff]   ;;  %v9390_v52 = vld [vmem:[%s9838_s4 + $0x17a8] ss:$16 sps:$4 sm:$0xff]  }
 0x2ff   : > { %6278 = vmatprep.subr.bf16.mxu0 %v9304_v5  ;;  %6852 = vmatprep.subr.bf16.mxu1 %v9307_v6  ;;  %v9395_v5 = vld [vmem:[%s9838_s4 + $0x17c4] ss:$16 sps:$4 sm:$0xff]   ;;  %v9398_v6 = vld [vmem:[%s9838_s4 + $0x17cc] ss:$16 sps:$4 sm:$0xff]  }
 0x302   : > { %6279 = vmatpush1.bf16.msra.mxu0 %v9302_v7  ;;  %6853 = vmatpush1.bf16.msra.mxu1 %v9305_v62  ;;  %v9393_v7 = vld [vmem:[%s9838_s4 + $0x17c0] ss:$16 sps:$4 sm:$0xff]   ;;  %v9396_v62 = vld [vmem:[%s9838_s4 + $0x17c8] ss:$16 sps:$4 sm:$0xff]  }
 0x303   : > { %6289 = vmatprep.subr.bf16.mxu0 %v9311_v8  ;;  %6863 = vmatprep.subr.bf16.mxu1 %v9314_v9  ;;  %v9401_v8 = vld [vmem:[%s9838_s4 + $0x17e4] ss:$16 sps:$4 sm:$0xff]   ;;  %v9404_v9 = vld [vmem:[%s9838_s4 + $0x17ec] ss:$16 sps:$4 sm:$0xff]  }
 0x305   : > { %6281 = vmatmul.mubr.bf16.vlgmr.msra.gmra.mrb[0].mxu0 %v10689_v63  ;;  %6855 = vmatmul.mubr.bf16.vlgmr.msra.gmra.mrb[0].mxu1 %v10689_v63 }
 0x306   : > { %6290 = vmatpush1.bf16.msra.mxu0 %v9309_v11  ;;  %6864 = vmatpush1.bf16.msra.mxu1 %v9312_v12  ;;  %v10756_v11 = vld.sshfl [vmem:[%s9856_s26 + $0x18] sm:$0x33 pattern:$0x75316420] }
 0x307   : > { %6291 = vmatprep.subr.bf16.mxu0 %v9317_v13  ;;  %6865 = vmatprep.subr.bf16.mxu1 %v9320_v15  ;;  %v9399_v12 = vld [vmem:[%s9838_s4 + $0x17e0] ss:$16 sps:$4 sm:$0xff]   ;;  %v9402_v13 = vld [vmem:[%s9838_s4 + $0x17e8] ss:$16 sps:$4 sm:$0xff]   ;;  %v9407_v15 = vld [vmem:[%s9838_s4 + $0x1804] ss:$16 sps:$4 sm:$0xff]  }
 0x308   : > { %6321 = vmatprep.mubr.bf16.mxu0 %v1305_v17  ;;  %6895 = vmatprep.mubr.bf16.mxu1 %v1305_v17  ;;  %v9410_v17 = vld [vmem:[%s9838_s4 + $0x180c] ss:$16 sps:$4 sm:$0xff]  }
 0x30a   : > { %6292 = vmatpush1.bf16.msra.mxu0 %v9315_v2  ;;  %6866 = vmatpush1.bf16.msra.mxu1 %v9318_v53  ;;  %v1313_v2 = vcombine.high %v10756_v11, %v10756_v11  ;;  %v1303_v53 = vcombine.high %v10689_v63, %v10689_v63  ;;  %v9411_v63 = vld [vmem:[%s9838_s4 + $0x1820] ss:$16 sps:$4 sm:$0xff]  }
 0x30b   : > { %6293 = vmatprep.subr.bf16.mxu0 %v9323_v18  ;;  %6867 = vmatprep.subr.bf16.mxu1 %v9326_v19  ;;  %v9405_v18 = vld [vmem:[%s9838_s4 + $0x1800] ss:$16 sps:$4 sm:$0xff]   ;;  %v9408_v19 = vld [vmem:[%s9838_s4 + $0x1808] ss:$16 sps:$4 sm:$0xff]  }
 0x30e   : > { %6294 = vmatpush1.bf16.msra.mxu0 %v9321_v10  ;;  %6868 = vmatpush1.bf16.msra.mxu1 %v9324_v20  ;;  %v9413_v10 = vld [vmem:[%s9838_s4 + $0x1824] ss:$16 sps:$4 sm:$0xff]   ;;  %v9416_v20 = vld [vmem:[%s9838_s4 + $0x182c] ss:$16 sps:$4 sm:$0xff]  }
 0x30f   : > { %6295 = vmatprep.subr.bf16.mxu0 %v9329_v21  ;;  %6869 = vmatprep.subr.bf16.mxu1 %v9332_v23  ;;  %v10771_v21 = vrot.slane %v1313_v2, %v9911_v50  ;;  %v9414_v23 = vld [vmem:[%s9838_s4 + $0x1828] ss:$16 sps:$4 sm:$0xff]   ;;  %v9497_v2 = vld [vmem:[%s9838_s4 + $0x19e4] ss:$16 sps:$4 sm:$0xff]  }
 0x312   : > { %6296 = vmatpush1.bf16.msra.mxu0 %v9327_v24  ;;  %6870 = vmatpush1.bf16.msra.mxu1 %v9330_v25  ;;  %v9419_v24 = vld [vmem:[%s9838_s4 + $0x1844] ss:$16 sps:$4 sm:$0xff]   ;;  %v9422_v25 = vld [vmem:[%s9838_s4 + $0x184c] ss:$16 sps:$4 sm:$0xff]  }
 0x313   : > { %6297 = vmatprep.subr.bf16.mxu0 %v9335_v27  ;;  %6871 = vmatprep.subr.bf16.mxu1 %v9338_v28  ;;  %v9417_v27 = vld [vmem:[%s9838_s4 + $0x1840] ss:$16 sps:$4 sm:$0xff]   ;;  %v9420_v28 = vld [vmem:[%s9838_s4 + $0x1848] ss:$16 sps:$4 sm:$0xff]  }
 0x316   : > { %6298 = vmatpush1.bf16.msra.mxu0 %v9333_v29  ;;  %6872 = vmatpush1.bf16.msra.mxu1 %v9336_v30  ;;  %v9425_v29 = vld [vmem:[%s9838_s4 + $0x1864] ss:$16 sps:$4 sm:$0xff]   ;;  %v9428_v30 = vld [vmem:[%s9838_s4 + $0x186c] ss:$16 sps:$4 sm:$0xff]  }
 0x317   : > { %6299 = vmatprep.subr.bf16.mxu0 %v9341_v31  ;;  %6873 = vmatprep.subr.bf16.mxu1 %v9344_v16  ;;  %v9423_v31 = vld [vmem:[%s9838_s4 + $0x1860] ss:$16 sps:$4 sm:$0xff]   ;;  %v9426_v16 = vld [vmem:[%s9838_s4 + $0x1868] ss:$16 sps:$4 sm:$0xff]  }
 0x31a   : > { %6300 = vmatpush1.bf16.msra.mxu0 %v9339_v32  ;;  %6874 = vmatpush1.bf16.msra.mxu1 %v9342_v33  ;;  %v9431_v32 = vld [vmem:[%s9838_s4 + $0x1884] ss:$16 sps:$4 sm:$0xff]   ;;  %v9434_v33 = vld [vmem:[%s9838_s4 + $0x188c] ss:$16 sps:$4 sm:$0xff]  }
 0x31b   : > { %6301 = vmatprep.subr.bf16.mxu0 %v9347_v34  ;;  %6875 = vmatprep.subr.bf16.mxu1 %v9350_v26  ;;  %v9429_v34 = vld [vmem:[%s9838_s4 + $0x1880] ss:$16 sps:$4 sm:$0xff]   ;;  %v9432_v26 = vld [vmem:[%s9838_s4 + $0x1888] ss:$16 sps:$4 sm:$0xff]  }
 0x31e   : > { %6302 = vmatpush1.bf16.msra.mxu0 %v9345_v35  ;;  %6876 = vmatpush1.bf16.msra.mxu1 %v9348_v37  ;;  %v9437_v35 = vld [vmem:[%s9838_s4 + $0x18a4] ss:$16 sps:$4 sm:$0xff]   ;;  %v9440_v37 = vld [vmem:[%s9838_s4 + $0x18ac] ss:$16 sps:$4 sm:$0xff]  }
 0x31f   : > { %6303 = vmatprep.subr.bf16.mxu0 %v9353_v38  ;;  %6877 = vmatprep.subr.bf16.mxu1 %v9356_v40  ;;  %v9435_v38 = vld [vmem:[%s9838_s4 + $0x18a0] ss:$16 sps:$4 sm:$0xff]   ;;  %v9438_v40 = vld [vmem:[%s9838_s4 + $0x18a8] ss:$16 sps:$4 sm:$0xff]  }
 0x322   : > { %6304 = vmatpush1.bf16.msra.mxu0 %v9351_v41  ;;  %6878 = vmatpush1.bf16.msra.mxu1 %v9354_v22  ;;  %v9443_v41 = vld [vmem:[%s9838_s4 + $0x18c4] ss:$16 sps:$4 sm:$0xff]   ;;  %v9446_v22 = vld [vmem:[%s9838_s4 + $0x18cc] ss:$16 sps:$4 sm:$0xff]  }
 0x323   : > { %6305 = vmatprep.subr.bf16.mxu0 %v9359_v42  ;;  %6879 = vmatprep.subr.bf16.mxu1 %v9362_v43  ;;  %v9441_v42 = vld [vmem:[%s9838_s4 + $0x18c0] ss:$16 sps:$4 sm:$0xff]   ;;  %v9444_v43 = vld [vmem:[%s9838_s4 + $0x18c8] ss:$16 sps:$4 sm:$0xff]  }
 0x326   : > { %6306 = vmatpush1.bf16.msra.mxu0 %v9357_v45  ;;  %6880 = vmatpush1.bf16.msra.mxu1 %v9360_v46  ;;  %v9449_v45 = vld [vmem:[%s9838_s4 + $0x18e4] ss:$16 sps:$4 sm:$0xff]   ;;  %v9452_v46 = vld [vmem:[%s9838_s4 + $0x18ec] ss:$16 sps:$4 sm:$0xff]  }
 0x327   : > { %6307 = vmatprep.subr.bf16.mxu0 %v9365_v47  ;;  %6881 = vmatprep.subr.bf16.mxu1 %v9368_v48  ;;  %v9447_v47 = vld [vmem:[%s9838_s4 + $0x18e0] ss:$16 sps:$4 sm:$0xff]   ;;  %v9450_v48 = vld [vmem:[%s9838_s4 + $0x18e8] ss:$16 sps:$4 sm:$0xff]  }
 0x32a   : > { %6308 = vmatpush1.bf16.msra.mxu0 %v9363_v51  ;;  %6882 = vmatpush1.bf16.msra.mxu1 %v9366_v54  ;;  %v9455_v51 = vld [vmem:[%s9838_s4 + $0x1904] ss:$16 sps:$4 sm:$0xff]   ;;  %v9458_v54 = vld [vmem:[%s9838_s4 + $0x190c] ss:$16 sps:$4 sm:$0xff]  }
 0x32b   : > { %6309 = vmatprep.subr.bf16.mxu0 %v9371_v55  ;;  %6883 = vmatprep.subr.bf16.mxu1 %v9374_v56  ;;  %v9453_v55 = vld [vmem:[%s9838_s4 + $0x1900] ss:$16 sps:$4 sm:$0xff]   ;;  %v9456_v56 = vld [vmem:[%s9838_s4 + $0x1908] ss:$16 sps:$4 sm:$0xff]  }
 0x32e   : > { %6310 = vmatpush1.bf16.msra.mxu0 %v9369_v39  ;;  %6884 = vmatpush1.bf16.msra.mxu1 %v9372_v57  ;;  %v9461_v39 = vld [vmem:[%s9838_s4 + $0x1924] ss:$16 sps:$4 sm:$0xff]   ;;  %v9464_v57 = vld [vmem:[%s9838_s4 + $0x192c] ss:$16 sps:$4 sm:$0xff]  }
 0x32f   : > { %6311 = vmatprep.subr.bf16.mxu0 %v9377_v58  ;;  %6885 = vmatprep.subr.bf16.mxu1 %v9380_v59  ;;  %v9459_v58 = vld [vmem:[%s9838_s4 + $0x1920] ss:$16 sps:$4 sm:$0xff]   ;;  %v9462_v59 = vld [vmem:[%s9838_s4 + $0x1928] ss:$16 sps:$4 sm:$0xff]  }
 0x332   : > { %6312 = vmatpush1.bf16.msra.mxu0 %v9375_v49  ;;  %6886 = vmatpush1.bf16.msra.mxu1 %v9378_v60  ;;  %v9467_v49 = vld [vmem:[%s9838_s4 + $0x1944] ss:$16 sps:$4 sm:$0xff]   ;;  %v9470_v60 = vld [vmem:[%s9838_s4 + $0x194c] ss:$16 sps:$4 sm:$0xff]  }
 0x333   : > { %6313 = vmatprep.subr.bf16.mxu0 %v9383_v61  ;;  %6887 = vmatprep.subr.bf16.mxu1 %v9386_v14  ;;  %v9465_v61 = vld [vmem:[%s9838_s4 + $0x1940] ss:$16 sps:$4 sm:$0xff]   ;;  %v9468_v14 = vld [vmem:[%s9838_s4 + $0x1948] ss:$16 sps:$4 sm:$0xff]  }
 0x336   : > { %6314 = vmatpush1.bf16.msra.mxu0 %v9381_v0  ;;  %6888 = vmatpush1.bf16.msra.mxu1 %v9384_v1  ;;  %v9473_v0 = vld [vmem:[%s9838_s4 + $0x1964] ss:$16 sps:$4 sm:$0xff]   ;;  %v9476_v1 = vld [vmem:[%s9838_s4 + $0x196c] ss:$16 sps:$4 sm:$0xff]  }
 0x337   : > { %6315 = vmatprep.subr.bf16.mxu0 %v9389_v36  ;;  %6889 = vmatprep.subr.bf16.mxu1 %v9392_v3  ;;  %v9471_v36 = vld [vmem:[%s9838_s4 + $0x1960] ss:$16 sps:$4 sm:$0xff]   ;;  %v9474_v3 = vld [vmem:[%s9838_s4 + $0x1968] ss:$16 sps:$4 sm:$0xff]  }
 0x33a   : > { %6316 = vmatpush1.bf16.msra.mxu0 %v9387_v4  ;;  %6890 = vmatpush1.bf16.msra.mxu1 %v9390_v52  ;;  %v9479_v4 = vld [vmem:[%s9838_s4 + $0x1984] ss:$16 sps:$4 sm:$0xff]   ;;  %v9482_v52 = vld [vmem:[%s9838_s4 + $0x198c] ss:$16 sps:$4 sm:$0xff]  }
 0x33b   : > { %6317 = vmatprep.subr.bf16.mxu0 %v9395_v5  ;;  %6891 = vmatprep.subr.bf16.mxu1 %v9398_v6  ;;  %v9477_v5 = vld [vmem:[%s9838_s4 + $0x1980] ss:$16 sps:$4 sm:$0xff]   ;;  %v9480_v6 = vld [vmem:[%s9838_s4 + $0x1988] ss:$16 sps:$4 sm:$0xff]  }
 0x33e   : > { %6318 = vmatpush1.bf16.msra.mxu0 %v9393_v7  ;;  %6892 = vmatpush1.bf16.msra.mxu1 %v9396_v62  ;;  %v9485_v7 = vld [vmem:[%s9838_s4 + $0x19a4] ss:$16 sps:$4 sm:$0xff]   ;;  %v9488_v62 = vld [vmem:[%s9838_s4 + $0x19ac] ss:$16 sps:$4 sm:$0xff]  }
 0x33f   : > { %6319 = vmatprep.subr.bf16.mxu0 %v9401_v8  ;;  %6893 = vmatprep.subr.bf16.mxu1 %v9404_v9  ;;  %v9483_v8 = vld [vmem:[%s9838_s4 + $0x19a0] ss:$16 sps:$4 sm:$0xff]   ;;  %v9486_v9 = vld [vmem:[%s9838_s4 + $0x19a8] ss:$16 sps:$4 sm:$0xff]  }
 0x342   : > { %6320 = vmatpush1.bf16.msra.mxu0 %v9399_v12  ;;  %6894 = vmatpush1.bf16.msra.mxu1 %v9402_v13  ;;  %v9491_v12 = vld [vmem:[%s9838_s4 + $0x19c4] ss:$16 sps:$4 sm:$0xff]   ;;  %v9494_v13 = vld [vmem:[%s9838_s4 + $0x19cc] ss:$16 sps:$4 sm:$0xff]  }
 0x343   : > { %6330 = vmatprep.subr.bf16.mxu0 %v9407_v15  ;;  %6904 = vmatprep.subr.bf16.mxu1 %v9410_v17  ;;  %v9489_v15 = vld [vmem:[%s9838_s4 + $0x19c0] ss:$16 sps:$4 sm:$0xff]   ;;  %v9492_v17 = vld [vmem:[%s9838_s4 + $0x19c8] ss:$16 sps:$4 sm:$0xff]  }
 0x345   : > { %6322 = vmatmul.mubr.bf16.vlgmr.msra.gmra.mrb[0].mxu0 %v1303_v53  ;;  %6896 = vmatmul.mubr.bf16.vlgmr.msra.gmra.mrb[0].mxu1 %v1303_v53  ;;  %v9500_v53 = vld [vmem:[%s9838_s4 + $0x19ec] ss:$16 sps:$4 sm:$0xff]  }
 0x346   : > { %6331 = vmatpush1.bf16.msra.mxu0 %v9405_v18  ;;  %6905 = vmatpush1.bf16.msra.mxu1 %v9408_v19  ;;  %v9495_v18 = vld [vmem:[%s9838_s4 + $0x19e0] ss:$16 sps:$4 sm:$0xff]   ;;  %v9498_v19 = vld [vmem:[%s9838_s4 + $0x19e8] ss:$16 sps:$4 sm:$0xff]  }
 0x347   : > { %6332 = vmatprep.subr.bf16.mxu0 %v9413_v10  ;;  %6906 = vmatprep.subr.bf16.mxu1 %v9416_v20  ;;  %v9503_v10 = vld [vmem:[%s9838_s4 + $0x1a04] ss:$16 sps:$4 sm:$0xff]   ;;  %v9506_v20 = vld [vmem:[%s9838_s4 + $0x1a0c] ss:$16 sps:$4 sm:$0xff]  }
 0x348   : > { %6362 = vmatprep.mubr.bf16.mxu0 %v10771_v21  ;;  %6936 = vmatprep.mubr.bf16.mxu1 %v10771_v21 }
 0x34a   : > { %6333 = vmatpush1.bf16.msra.mxu0 %v9411_v63  ;;  %6907 = vmatpush1.bf16.msra.mxu1 %v9414_v23  ;;  %v10837_v63 = vrot.slane %v10756_v11, %v9911_v50  ;;  %v9501_v23 = vld [vmem:[%s9838_s4 + $0x1a00] ss:$16 sps:$4 sm:$0xff]   ;;  %v9510_v11 = vld [vmem:[%s9838_s4 + $0x1a28] ss:$16 sps:$4 sm:$0xff]  }
 0x34b   : > { %6334 = vmatprep.subr.bf16.mxu0 %v9419_v24  ;;  %6908 = vmatprep.subr.bf16.mxu1 %v9422_v25  ;;  %v9504_v24 = vld [vmem:[%s9838_s4 + $0x1a08] ss:$16 sps:$4 sm:$0xff]   ;;  %v9509_v25 = vld [vmem:[%s9838_s4 + $0x1a24] ss:$16 sps:$4 sm:$0xff]   ;;  %v9507_v50 = vld [vmem:[%s9838_s4 + $0x1a20] ss:$16 sps:$4 sm:$0xff]  }
 0x34e   : > { %6335 = vmatpush1.bf16.msra.mxu0 %v9417_v27  ;;  %6909 = vmatpush1.bf16.msra.mxu1 %v9420_v28  ;;  %v9512_v27 = vld [vmem:[%s9838_s4 + $0x1a2c] ss:$16 sps:$4 sm:$0xff]   ;;  %v1329_v28 = vcombine.high %v10771_v21, %v10771_v21  ;;  %v9513_v21 = vld [vmem:[%s9838_s4 + $0x1a40] ss:$16 sps:$4 sm:$0xff]  }
 0x34f   : > { %6336 = vmatprep.subr.bf16.mxu0 %v9425_v29  ;;  %6910 = vmatprep.subr.bf16.mxu1 %v9428_v30  ;;  %v9515_v29 = vld [vmem:[%s9838_s4 + $0x1a44] ss:$16 sps:$4 sm:$0xff]   ;;  %v9518_v30 = vld [vmem:[%s9838_s4 + $0x1a4c] ss:$16 sps:$4 sm:$0xff]  }
 0x352   : > { %6337 = vmatpush1.bf16.msra.mxu0 %v9423_v31  ;;  %6911 = vmatpush1.bf16.msra.mxu1 %v9426_v16  ;;  %v9516_v31 = vld [vmem:[%s9838_s4 + $0x1a48] ss:$16 sps:$4 sm:$0xff]   ;;  %v9521_v16 = vld [vmem:[%s9838_s4 + $0x1a64] ss:$16 sps:$4 sm:$0xff]  }
 0x353   : > { %6338 = vmatprep.subr.bf16.mxu0 %v9431_v32  ;;  %6912 = vmatprep.subr.bf16.mxu1 %v9434_v33  ;;  %v9524_v32 = vld [vmem:[%s9838_s4 + $0x1a6c] ss:$16 sps:$4 sm:$0xff]   ;;  %v9519_v33 = vld [vmem:[%s9838_s4 + $0x1a60] ss:$16 sps:$4 sm:$0xff]  }
 0x356   : > { %6339 = vmatpush1.bf16.msra.mxu0 %v9429_v34  ;;  %6913 = vmatpush1.bf16.msra.mxu1 %v9432_v26  ;;  %v9522_v34 = vld [vmem:[%s9838_s4 + $0x1a68] ss:$16 sps:$4 sm:$0xff]   ;;  %v9527_v26 = vld [vmem:[%s9838_s4 + $0x1a84] ss:$16 sps:$4 sm:$0xff]  }
 0x357   : > { %6340 = vmatprep.subr.bf16.mxu0 %v9437_v35  ;;  %6914 = vmatprep.subr.bf16.mxu1 %v9440_v37  ;;  %v9530_v35 = vld [vmem:[%s9838_s4 + $0x1a8c] ss:$16 sps:$4 sm:$0xff]   ;;  %v9525_v37 = vld [vmem:[%s9838_s4 + $0x1a80] ss:$16 sps:$4 sm:$0xff]  }
 0x35a   : > { %6341 = vmatpush1.bf16.msra.mxu0 %v9435_v38  ;;  %6915 = vmatpush1.bf16.msra.mxu1 %v9438_v40  ;;  %v9528_v38 = vld [vmem:[%s9838_s4 + $0x1a88] ss:$16 sps:$4 sm:$0xff]   ;;  %v9533_v40 = vld [vmem:[%s9838_s4 + $0x1aa4] ss:$16 sps:$4 sm:$0xff]  }
 0x35b   : > { %6342 = vmatprep.subr.bf16.mxu0 %v9443_v41  ;;  %6916 = vmatprep.subr.bf16.mxu1 %v9446_v22  ;;  %v9536_v41 = vld [vmem:[%s9838_s4 + $0x1aac] ss:$16 sps:$4 sm:$0xff]   ;;  %v9531_v22 = vld [vmem:[%s9838_s4 + $0x1aa0] ss:$16 sps:$4 sm:$0xff]  }
 0x35e   : > { %6343 = vmatpush1.bf16.msra.mxu0 %v9441_v42  ;;  %6917 = vmatpush1.bf16.msra.mxu1 %v9444_v43  ;;  %v9534_v42 = vld [vmem:[%s9838_s4 + $0x1aa8] ss:$16 sps:$4 sm:$0xff]   ;;  %v9539_v43 = vld [vmem:[%s9838_s4 + $0x1ac4] ss:$16 sps:$4 sm:$0xff]  }
 0x35f   : > { %6344 = vmatprep.subr.bf16.mxu0 %v9449_v45  ;;  %6918 = vmatprep.subr.bf16.mxu1 %v9452_v46  ;;  %v9542_v45 = vld [vmem:[%s9838_s4 + $0x1acc] ss:$16 sps:$4 sm:$0xff]   ;;  %v9537_v46 = vld [vmem:[%s9838_s4 + $0x1ac0] ss:$16 sps:$4 sm:$0xff]  }
 0x362   : > { %6345 = vmatpush1.bf16.msra.mxu0 %v9447_v47  ;;  %6919 = vmatpush1.bf16.msra.mxu1 %v9450_v48  ;;  %v9540_v47 = vld [vmem:[%s9838_s4 + $0x1ac8] ss:$16 sps:$4 sm:$0xff]   ;;  %v9545_v48 = vld [vmem:[%s9838_s4 + $0x1ae4] ss:$16 sps:$4 sm:$0xff]  }
 0x363   : > { %6346 = vmatprep.subr.bf16.mxu0 %v9455_v51  ;;  %6920 = vmatprep.subr.bf16.mxu1 %v9458_v54  ;;  %v9548_v51 = vld [vmem:[%s9838_s4 + $0x1aec] ss:$16 sps:$4 sm:$0xff]   ;;  %v9543_v54 = vld [vmem:[%s9838_s4 + $0x1ae0] ss:$16 sps:$4 sm:$0xff]  }
 0x366   : > { %6347 = vmatpush1.bf16.msra.mxu0 %v9453_v55  ;;  %6921 = vmatpush1.bf16.msra.mxu1 %v9456_v56  ;;  %v9546_v55 = vld [vmem:[%s9838_s4 + $0x1ae8] ss:$16 sps:$4 sm:$0xff]   ;;  %v9551_v56 = vld [vmem:[%s9838_s4 + $0x1b04] ss:$16 sps:$4 sm:$0xff]  }
 0x367   : > { %6348 = vmatprep.subr.bf16.mxu0 %v9461_v39  ;;  %6922 = vmatprep.subr.bf16.mxu1 %v9464_v57  ;;  %v9554_v39 = vld [vmem:[%s9838_s4 + $0x1b0c] ss:$16 sps:$4 sm:$0xff]   ;;  %v9549_v57 = vld [vmem:[%s9838_s4 + $0x1b00] ss:$16 sps:$4 sm:$0xff]  }
 0x36a   : > { %6349 = vmatpush1.bf16.msra.mxu0 %v9459_v58  ;;  %6923 = vmatpush1.bf16.msra.mxu1 %v9462_v59  ;;  %v9552_v58 = vld [vmem:[%s9838_s4 + $0x1b08] ss:$16 sps:$4 sm:$0xff]   ;;  %v9557_v59 = vld [vmem:[%s9838_s4 + $0x1b24] ss:$16 sps:$4 sm:$0xff]  }
 0x36b   : > { %6350 = vmatprep.subr.bf16.mxu0 %v9467_v49  ;;  %6924 = vmatprep.subr.bf16.mxu1 %v9470_v60  ;;  %v9560_v49 = vld [vmem:[%s9838_s4 + $0x1b2c] ss:$16 sps:$4 sm:$0xff]   ;;  %v9555_v60 = vld [vmem:[%s9838_s4 + $0x1b20] ss:$16 sps:$4 sm:$0xff]  }
 0x36e   : > { %6351 = vmatpush1.bf16.msra.mxu0 %v9465_v61  ;;  %6925 = vmatpush1.bf16.msra.mxu1 %v9468_v14  ;;  %v9558_v61 = vld [vmem:[%s9838_s4 + $0x1b28] ss:$16 sps:$4 sm:$0xff]   ;;  %v9563_v14 = vld [vmem:[%s9838_s4 + $0x1b44] ss:$16 sps:$4 sm:$0xff]  }
 0x36f   : > { %6352 = vmatprep.subr.bf16.mxu0 %v9473_v0  ;;  %6926 = vmatprep.subr.bf16.mxu1 %v9476_v1  ;;  %v9566_v0 = vld [vmem:[%s9838_s4 + $0x1b4c] ss:$16 sps:$4 sm:$0xff]   ;;  %v9561_v1 = vld [vmem:[%s9838_s4 + $0x1b40] ss:$16 sps:$4 sm:$0xff]  }
 0x372   : > { %6353 = vmatpush1.bf16.msra.mxu0 %v9471_v36  ;;  %6927 = vmatpush1.bf16.msra.mxu1 %v9474_v3  ;;  %v9564_v36 = vld [vmem:[%s9838_s4 + $0x1b48] ss:$16 sps:$4 sm:$0xff]   ;;  %v9569_v3 = vld [vmem:[%s9838_s4 + $0x1b64] ss:$16 sps:$4 sm:$0xff]  }
 0x373   : > { %6354 = vmatprep.subr.bf16.mxu0 %v9479_v4  ;;  %6928 = vmatprep.subr.bf16.mxu1 %v9482_v52  ;;  %v9572_v4 = vld [vmem:[%s9838_s4 + $0x1b6c] ss:$16 sps:$4 sm:$0xff]   ;;  %v9567_v52 = vld [vmem:[%s9838_s4 + $0x1b60] ss:$16 sps:$4 sm:$0xff]  }
 0x376   : > { %6355 = vmatpush1.bf16.msra.mxu0 %v9477_v5  ;;  %6929 = vmatpush1.bf16.msra.mxu1 %v9480_v6  ;;  %v9570_v5 = vld [vmem:[%s9838_s4 + $0x1b68] ss:$16 sps:$4 sm:$0xff]   ;;  %v9575_v6 = vld [vmem:[%s9838_s4 + $0x1b84] ss:$16 sps:$4 sm:$0xff]  }
 0x377   : > { %6356 = vmatprep.subr.bf16.mxu0 %v9485_v7  ;;  %6930 = vmatprep.subr.bf16.mxu1 %v9488_v62  ;;  %v9578_v7 = vld [vmem:[%s9838_s4 + $0x1b8c] ss:$16 sps:$4 sm:$0xff]   ;;  %v9573_v62 = vld [vmem:[%s9838_s4 + $0x1b80] ss:$16 sps:$4 sm:$0xff]  }
 0x37a   : > { %6357 = vmatpush1.bf16.msra.mxu0 %v9483_v8  ;;  %6931 = vmatpush1.bf16.msra.mxu1 %v9486_v9  ;;  %v9576_v8 = vld [vmem:[%s9838_s4 + $0x1b88] ss:$16 sps:$4 sm:$0xff]   ;;  %v9581_v9 = vld [vmem:[%s9838_s4 + $0x1ba4] ss:$16 sps:$4 sm:$0xff]  }
 0x37b   : > { %6358 = vmatprep.subr.bf16.mxu0 %v9491_v12  ;;  %6932 = vmatprep.subr.bf16.mxu1 %v9494_v13  ;;  %v9584_v12 = vld [vmem:[%s9838_s4 + $0x1bac] ss:$16 sps:$4 sm:$0xff]   ;;  %v9579_v13 = vld [vmem:[%s9838_s4 + $0x1ba0] ss:$16 sps:$4 sm:$0xff]  }
 0x37e   : > { %6359 = vmatpush1.bf16.msra.mxu0 %v9489_v15  ;;  %6933 = vmatpush1.bf16.msra.mxu1 %v9492_v17  ;;  %v9582_v15 = vld [vmem:[%s9838_s4 + $0x1ba8] ss:$16 sps:$4 sm:$0xff]   ;;  %v9587_v17 = vld [vmem:[%s9838_s4 + $0x1bc4] ss:$16 sps:$4 sm:$0xff]  }
 0x37f   : > { %6360 = vmatprep.subr.bf16.mxu0 %v9497_v2  ;;  %6934 = vmatprep.subr.bf16.mxu1 %v9500_v53  ;;  %v9590_v2 = vld [vmem:[%s9838_s4 + $0x1bcc] ss:$16 sps:$4 sm:$0xff]   ;;  %v9585_v53 = vld [vmem:[%s9838_s4 + $0x1bc0] ss:$16 sps:$4 sm:$0xff]  }
 0x382   : > { %6361 = vmatpush1.bf16.msra.mxu0 %v9495_v18  ;;  %6935 = vmatpush1.bf16.msra.mxu1 %v9498_v19  ;;  %v9588_v18 = vld [vmem:[%s9838_s4 + $0x1bc8] ss:$16 sps:$4 sm:$0xff]   ;;  %v9593_v19 = vld [vmem:[%s9838_s4 + $0x1be4] ss:$16 sps:$4 sm:$0xff]  }
 0x383   : > { %6371 = vmatprep.subr.bf16.mxu0 %v9503_v10  ;;  %6945 = vmatprep.subr.bf16.mxu1 %v9506_v20  ;;  %v9596_v10 = vld [vmem:[%s9838_s4 + $0x1bec] ss:$16 sps:$4 sm:$0xff]   ;;  %v9591_v20 = vld [vmem:[%s9838_s4 + $0x1be0] ss:$16 sps:$4 sm:$0xff]  }
 0x385   : > { %6363 = vmatmul.mubr.bf16.vlgmr.msra.gmra.mrb[0].mxu0 %v10837_v63  ;;  %6937 = vmatmul.mubr.bf16.vlgmr.msra.gmra.mrb[0].mxu1 %v10837_v63 }
 0x386   : > { %6372 = vmatpush1.bf16.msra.mxu0 %v9501_v23  ;;  %6946 = vmatpush1.bf16.msra.mxu1 %v9504_v24  ;;  %v9594_v23 = vld [vmem:[%s9838_s4 + $0x1be8] ss:$16 sps:$4 sm:$0xff]   ;;  %v1328_v24 = vcombine.high %v10837_v63, %v10837_v63 }
 0x387   : > { %6373 = vmatprep.subr.bf16.mxu0 %v9509_v25  ;;  %6947 = vmatprep.subr.bf16.mxu1 %v9512_v27  ;;  %v9703_v25 = vmov 1983009808  }
 0x388   : > { %6403 = vmatprep.mubr.bf16.mxu0 %v1329_v28  ;;  %6977 = vmatprep.mubr.bf16.mxu1 %v1329_v28  ;;  %v6993_v27 = vunpack.c.l.s4 %v9703_v25 }
 0x38a   : > { %6374 = vmatpush1.bf16.msra.mxu0 %v9507_v50  ;;  %6948 = vmatpush1.bf16.msra.mxu1 %v9510_v11  ;;  %v6994_v28 = vunpack.c.0.s8 %v6993_v27 }
 0x38b   : > { %6375 = vmatprep.subr.bf16.mxu0 %v9515_v29  ;;  %6949 = vmatprep.subr.bf16.mxu1 %v9518_v30 }
 0x38c   : > { %v6997_v29 = vsub.s32 %v6994_v28, %v9903_v44 }
 0x38e   : > { %6376 = vmatpush1.bf16.msra.mxu0 %v9513_v21  ;;  %6950 = vmatpush1.bf16.msra.mxu1 %v9516_v31 }
 0x38f   : > { %6377 = vmatprep.subr.bf16.mxu0 %v9521_v16  ;;  %6951 = vmatprep.subr.bf16.mxu1 %v9524_v32 }
 0x392   : > { %6378 = vmatpush1.bf16.msra.mxu0 %v9519_v33  ;;  %6952 = vmatpush1.bf16.msra.mxu1 %v9522_v34 }
 0x393   : > { %6379 = vmatprep.subr.bf16.mxu0 %v9527_v26  ;;  %6953 = vmatprep.subr.bf16.mxu1 %v9530_v35 }
 0x396   : > { %6380 = vmatpush1.bf16.msra.mxu0 %v9525_v37  ;;  %6954 = vmatpush1.bf16.msra.mxu1 %v9528_v38  ;;  %v254_v37 = vld [vmem:[#allocation2] sm:$0xff] }
 0x397   : > { %6381 = vmatprep.subr.bf16.mxu0 %v9533_v40  ;;  %6955 = vmatprep.subr.bf16.mxu1 %v9536_v41  ;;  %v7015_v41 = vld [vmem:[%s241_s6] sm:$0xf] (!%p8063_p6) }
 0x39a   : > { %6382 = vmatpush1.bf16.msra.mxu0 %v9531_v22  ;;  %6956 = vmatpush1.bf16.msra.mxu1 %v9534_v42  ;;  %v7019_v22 = vsub.s32 (!%p8063_p6), 0, %v9903_v44  ;;  %v7023_v42 = vsub.s32 (!%p8063_p6), 1, %v9903_v44 }
 0x39b   : > { %6383 = vmatprep.subr.bf16.mxu0 %v9539_v43  ;;  %6957 = vmatprep.subr.bf16.mxu1 %v9542_v45  ;;  %v7027_v43 = vsub.s32 (!%p8063_p6), 2, %v9903_v44  ;;  %v7031_v45 = vsub.s32 (!%p8063_p6), 3, %v9903_v44 }
 0x39e   : > { %6384 = vmatpush1.bf16.msra.mxu0 %v9537_v46  ;;  %6958 = vmatpush1.bf16.msra.mxu1 %v9540_v47  ;;  %v7020_v46 = vrot.slane (!%p8063_p6), %v7015_v41, %v7019_v22  ;;  %v7024_v47 = vrot.slane (!%p8063_p6), %v7015_v41, %v7023_v42 }
 0x39f   : > { %6385 = vmatprep.subr.bf16.mxu0 %v9545_v48  ;;  %6959 = vmatprep.subr.bf16.mxu1 %v9548_v51  ;;  %v7028_v48 = vrot.slane (!%p8063_p6), %v7015_v41, %v7027_v43  ;;  %v7032_v51 = vrot.slane (!%p8063_p6), %v7015_v41, %v7031_v45 }
 0x3a2   : > { %6386 = vmatpush1.bf16.msra.mxu0 %v9543_v54  ;;  %6960 = vmatpush1.bf16.msra.mxu1 %v9546_v55  ;;  %v7033_v54 = vcombine.low (!%p8063_p6), %v7020_v46, %v7024_v47  ;;  %v7034_v55 = vcombine.low (!%p8063_p6), %v7028_v48, %v7032_v51 }
 0x3a3   : > { %6387 = vmatprep.subr.bf16.mxu0 %v9551_v56  ;;  %6961 = vmatprep.subr.bf16.mxu1 %v9554_v39 }
 0x3a4   : > { %v7041_v56 = vrot.slane (!%p8063_p6), %v7033_v54, %v6997_v29  ;;  %v7048_v39 = vrot.slane (!%p8063_p6), %v7034_v55, %v6997_v29 }
 0x3a6   : > { %6388 = vmatpush1.bf16.msra.mxu0 %v9549_v57  ;;  %6962 = vmatpush1.bf16.msra.mxu1 %v9552_v58  ;;  %v7049_v58 = vcombine.low (!%p8063_p6), %v7041_v56, %v7048_v39 }
 0x3a7   : > { %6389 = vmatprep.subr.bf16.mxu0 %v9557_v59  ;;  %6963 = vmatprep.subr.bf16.mxu1 %v9560_v49 }
 0x3aa   : > { %6390 = vmatpush1.bf16.msra.mxu0 %v9555_v60  ;;  %6964 = vmatpush1.bf16.msra.mxu1 %v9558_v61 }
 0x3ab   : > { %6391 = vmatprep.subr.bf16.mxu0 %v9563_v14  ;;  %6965 = vmatprep.subr.bf16.mxu1 %v9566_v0 }
 0x3ae   : > { %6392 = vmatpush1.bf16.msra.mxu0 %v9561_v1  ;;  %6966 = vmatpush1.bf16.msra.mxu1 %v9564_v36 }
 0x3af   : > { %6393 = vmatprep.subr.bf16.mxu0 %v9569_v3  ;;  %6967 = vmatprep.subr.bf16.mxu1 %v9572_v4 }
 0x3b2   : > { %6394 = vmatpush1.bf16.msra.mxu0 %v9567_v52  ;;  %6968 = vmatpush1.bf16.msra.mxu1 %v9570_v5 }
 0x3b3   : > { %6395 = vmatprep.subr.bf16.mxu0 %v9575_v6  ;;  %6969 = vmatprep.subr.bf16.mxu1 %v9578_v7 }
 0x3b6   : > { %6396 = vmatpush1.bf16.msra.mxu0 %v9573_v62  ;;  %6970 = vmatpush1.bf16.msra.mxu1 %v9576_v8 }
 0x3b7   : > { %6397 = vmatprep.subr.bf16.mxu0 %v9581_v9  ;;  %6971 = vmatprep.subr.bf16.mxu1 %v9584_v12 }
 0x3ba   : > { %6398 = vmatpush1.bf16.msra.mxu0 %v9579_v13  ;;  %6972 = vmatpush1.bf16.msra.mxu1 %v9582_v15 }
 0x3bb   : > { %6399 = vmatprep.subr.bf16.mxu0 %v9587_v17  ;;  %6973 = vmatprep.subr.bf16.mxu1 %v9590_v2 }
 0x3be   : > { %6400 = vmatpush1.bf16.msra.mxu0 %v9585_v53  ;;  %6974 = vmatpush1.bf16.msra.mxu1 %v9588_v18 }
 0x3bf   : > { %6401 = vmatprep.subr.bf16.mxu0 %v9593_v19  ;;  %6975 = vmatprep.subr.bf16.mxu1 %v9596_v10 }
 0x3c2   : > { %6402 = vmatpush1.bf16.msra.mxu0 %v9591_v20  ;;  %6976 = vmatpush1.bf16.msra.mxu1 %v9594_v23 }
 0x3c5   : > { %6404 = vmatmul.mubr.bf16.vlgmr.msra.gmra.mrb[0].mxu0 %v1328_v24  ;;  %6978 = vmatmul.mubr.bf16.vlgmr.msra.gmra.mrb[0].mxu1 %v1328_v24 }
 0x498   : > { %v6405_v50 = vpop.f32.mrb[0].mxu0  ;;  %v6979_v11 = vpop.f32.mrb[0].mxu1 }
 0x499   : > { %v6407_v30 = vpop.f32.mrb[1].mxu0  ;;  %v6981_v21 = vpop.f32.mrb[1].mxu1 }
 0x49a   : > { %v6990_v31 = vcombine.low %v6405_v50, %v6407_v30  ;;  %v6991_v16 = vcombine.low %v6979_v11, %v6981_v21  ;;  %v6409_v32 = vpop.f32.mrb[2].mxu0  ;;  %v6983_v33 = vpop.f32.mrb[2].mxu1 }
 0x49b   : > { %v6410_v34 = vpop.f32.mrb[3].mxu0  ;;  %v6984_v26 = vpop.f32.mrb[3].mxu1 }
 0x49c   : > { %v6998_v63 = vrot.slane %v6990_v31, %v6997_v29  ;;  %v7005_v35 = vrot.slane %v6991_v16, %v6997_v29  ;;  %7013 = sbr.rel (%p8063_p6) target bundleno = 1199 (0x4af), region = 44 }
 0x49e   : > { %v7006_v38 = vcombine.low %v6998_v63, %v7005_v35 }
 0x4a0   : > { %v7008_v40 = vadd.f32 %v7006_v38, %v254_v37 }
 0x4a2   : > { %7009 = vst [vmem:[#allocation2] sm:$0xff] %v7008_v40 }
 0x4a9   : > { %v7014_v57 = vld [vmem:[#allocation2] sm:$0xff] }
 0x4aa   : > { %v7051_v59 = vadd.f32 %v7049_v58, %v7014_v57 }
 0x4ac   : > { %v7052_v49 = vmax.f32 %v7051_v59, 0.0 }
 0x4ae   : > { %7053 = vst [vmem:[%s9861_s16] sm:$0xff] %v7052_v49 }
 0x4af PF: > { %s16_s19 = sadd.s32 1, %s9695_s19   ;;  %s10950_s12 = smov %s9671_s13 }
 0x4b0   : > { %p13_p8 = scmp.ge.s32.totalorder %s16_s19, 16   ;;  %s10951_s13 = smov %s9675_s14 }
 0x4b1   : > { %s10952_s14 = smov %s9791_s5  ;;  %s10953_s15 = smov %s9687_s17 }
 0x4b2   : > { %s10954_s16 = smov %s9691_s18  ;;  %s10955_s17 = smov %s10958_s21 }
 0x4b3   : > { %s10956_s18 = smov %s10962_s22  ;;  %15 = sbr.rel (!%p13_p8) target bundleno = 5 (0x5), region = 86 }
 0x4ba   :  { %7076 = vsyncpa [#allocation4], 1 }
 0x4bb   :  { %7078 = vsyncpa [#allocation4 + $0x1], 1 }

</bundles_post_ra>
